<compile_context>
chip_gen: v7x
topology: tpu7x:2x2x1
jax: 0.10.0
libtpu: 0.0.40
codegen_flags: <defaults>
</compile_context>

<pallas_src>
import functools

import jax
import jax.numpy as jnp
from jax import lax
from jax.experimental import pallas as pl
from jax.experimental.pallas import tpu as pltpu

_BN_EPS = 1e-5
_LANE = 128


def _round_up(v, m):
    return ((v + m - 1) // m) * m


# ---------------------------------------------------------------------------
# Fused kernel: conv1(3x3)+bn1+relu + conv2(3x3, stride 1)+bn2 + shortcut + relu
# One batch image per grid step.
# ---------------------------------------------------------------------------
def _block_kernel(x_ref, w1_ref, s1_ref, b1_ref, w2_ref, s2_ref, b2_ref,
                  pw_ref, o_ref, *scratch, taps, res_tap, oh, ow, cin, cout,
                  cp, staged):
    m = oh * ow

    if staged:
        # stride=1: unpadded NHWC image block; stage it into a halo'd VMEM
        # scratch.  Only the 1-pixel border is zeroed (interior is fully
        # overwritten every step).
        xs_ref, act_ref = scratch
        zr = jnp.zeros((1, ow + 2, cin), xs_ref.dtype)
        xs_ref[0:1, :, :] = zr
        xs_ref[oh + 1:oh + 2, :, :] = zr
        zc = jnp.zeros((oh + 2, 1, cin), xs_ref.dtype)
        xs_ref[:, 0:1, :] = zc
        xs_ref[:, ow + 1:ow + 2, :] = zc
        xs_ref[1:1 + oh, 1:1 + ow, :] = x_ref[...]

        def tap(t):
            r0, c0 = taps[t]
            return xs_ref[r0:r0 + oh, c0:c0 + ow, :]
    else:
        # stride=2: pre-padded space-to-depth input, taps are contiguous slices.
        (act_ref,) = scratch

        def tap(t):
            p, r0, c0 = taps[t]
            return x_ref[p, r0:r0 + oh, c0:c0 + ow, :]

    # ---- conv1 + bn1 + relu: single K = 9*cin matmul (in-kernel im2col) ----
    patches = jnp.concatenate([tap(t) for t in range(9)], axis=-1)
    acc1 = jnp.dot(patches.reshape(m, 9 * cin), w1_ref[...],
                   preferred_element_type=jnp.float32)          # (m, cp) f32
    a1 = jnp.maximum(acc1 * s1_ref[...] + b1_ref[...], 0.0)

    # ---- stage activation (bf16) with zero halo; border-only zeroing -------
    zr = jnp.zeros((1, ow + 2, cp), act_ref.dtype)
    act_ref[0:1, :, :] = zr
    act_ref[oh + 1:oh + 2, :, :] = zr
    zc = jnp.zeros((oh + 2, 1, cp), act_ref.dtype)
    act_ref[:, 0:1, :] = zc
    act_ref[:, ow + 1:ow + 2, :] = zc
    act_ref[1:1 + oh, 1:1 + ow, :] = a1.reshape(oh, ow, cp).astype(act_ref.dtype)

    # ---- conv2 + bn2: three K = 3*cp matmuls (kw taps fused along K) -------
    acc2 = None
    for kh in range(3):
        p2 = jnp.concatenate(
            [act_ref[kh:kh + oh, kw:kw + ow, :] for kw in range(3)], axis=-1)
        d = jnp.dot(p2.reshape(m, 3 * cp), w2_ref[kh],
                    preferred_element_type=jnp.float32)
        acc2 = d if acc2 is None else acc2 + d

    # ---- shortcut straight from the resident x block, channel placement via
    #      an exact one-hot bf16 matmul; bn2 epilogue + add + relu -----------
    if res_tap is None:
        res = x_ref[...]                                  # identity shortcut
    else:
        p, r0, c0 = res_tap
        res = x_ref[p, r0:r0 + oh, c0:c0 + ow, :]         # x[::2, ::2] plane
    res_pl = jnp.dot(res.reshape(m, cin), pw_ref[...],
                     preferred_element_type=jnp.float32)
    y = acc2 * s2_ref[...] + b2_ref[...] + res_pl
    y = jnp.maximum(y, 0.0)[:, :cout]                     # narrow writeback
    o_ref[...] = y.reshape(oh, ow, cout).astype(o_ref.dtype)


# ---------------------------------------------------------------------------
# Parameter preparation (BN folding, weight layout)
# ---------------------------------------------------------------------------
def _fold_bn(bn, cp):
    s = bn["gamma"] / jnp.sqrt(bn["var"] + _BN_EPS)
    b = bn["beta"] - bn["mean"] * s
    pad = cp - s.shape[0]
    s = jnp.pad(s, (0, pad)).reshape(1, cp).astype(jnp.float32)
    b = jnp.pad(b, (0, pad)).reshape(1, cp).astype(jnp.float32)
    return s, b


def _prep_w1(w_oihw, cp):
    cout, cin = w_oihw.shape[0], w_oihw.shape[1]
    # (O,I,kh,kw) -> (kh,kw,I,O) -> (9*cin, O), pad O -> cp, bf16.
    w = jnp.transpose(w_oihw, (2, 3, 1, 0)).reshape(9 * cin, cout)
    w = jnp.pad(w, ((0, 0), (0, cp - cout)))
    return w.astype(jnp.bfloat16)


def _prep_w2(w_oihw, cp):
    cout = w_oihw.shape[0]
    # (O,I,kh,kw) -> (kh,kw,I,O), pad I,O -> cp, -> (3, 3*cp, cp), bf16.
    w = jnp.transpose(w_oihw, (2, 3, 1, 0))
    w = jnp.pad(w, ((0, 0), (0, 0), (0, cp - cout), (0, cp - cout)))
    return w.reshape(3, 3 * cp, cp).astype(jnp.bfloat16)


# ---------------------------------------------------------------------------
# BasicConvBlock forward (option 'A' shortcut), NCHW external interface
# ---------------------------------------------------------------------------
@functools.partial(jax.jit, static_argnames=("stride", "option"))
def basic_conv_block_forward(x, params, stride=1, option="A"):
    N, cin, H, W = x.shape
    cout = params["conv1_w"].shape[0]
    cp = _round_up(cout, _LANE)
    oh = (H - 1) // stride + 1               # 3x3, pad=1
    ow = (W - 1) // stride + 1

    x_nhwc = jnp.transpose(x, (0, 2, 3, 1))

    if stride == 1:
        if cin != cout:
            # PyTorch's option-'A' LambdaLayer subsamples spatially even at
            # stride=1, which cannot be added to the full-res main branch.
            raise NotImplementedError(
                "stride=1 with in_channels != out_channels is not addable")
        pre = 0
        x_in = x_nhwc.astype(jnp.bfloat16)                # (N,H,W,cin), no HBM pad
        taps = tuple((kh, kw) for kh in range(3) for kw in range(3))
        res_tap = None
        staged = True
        x_spec = pl.BlockSpec((None, H, W, cin), lambda n: (n, 0, 0, 0))
        scratch = [pltpu.VMEM((H + 2, W + 2, cin), jnp.bfloat16),
                   pltpu.VMEM((oh + 2, ow + 2, cp), jnp.bfloat16)]
    elif stride == 2:
        if option != "A":
            # TODO(synk): option='B' projection shortcut produces 2*out_c
            # channels in the original module and cannot be summed with the
            # out_c main branch; not implemented.
            raise NotImplementedError("option 'B' projection shortcut")
        pre = cout // 4
        assert cin + 2 * pre == cout, "option-'A' channel pad must reach out_c"
        # Space-to-depth of the spatially padded image so every stride-2 tap
        # (and the x[::2, ::2] shortcut = parity plane (1,1)) is a contiguous
        # slice inside the kernel.
        xp = jnp.pad(x_nhwc, ((0, 0), (1, 1), (1, 1), (0, 0)))
        hp, wp = H + 2, W + 2
        hp2, wp2 = _round_up(hp, 2), _round_up(wp, 2)
        xq = jnp.pad(xp, ((0, 0), (0, hp2 - hp), (0, wp2 - wp), (0, 0)))
        xq = xq.reshape(N, hp2 // 2, 2, wp2 // 2, 2, cin)
        xq = jnp.transpose(xq, (0, 2, 4, 1, 3, 5))        # (N, ph, pw, h, w, C)
        x_in = xq.reshape(N, 4, hp2 // 2, wp2 // 2, cin).astype(jnp.bfloat16)
        taps = tuple(((kh % 2) * 2 + (kw % 2), kh // 2, kw // 2)
                     for kh in range(3) for kw in range(3))
        res_tap = (3, 0, 0)
        staged = False
        hq, wq = hp2 // 2, wp2 // 2
        x_spec = pl.BlockSpec((None, 4, hq, wq, cin), lambda n: (n, 0, 0, 0, 0))
        scratch = [pltpu.VMEM((oh + 2, ow + 2, cp), jnp.bfloat16)]
    else:
        raise NotImplementedError("only stride 1 or 2 supported")

    w1 = _prep_w1(params["conv1_w"], cp)                  # (9*cin, cp)
    w2 = _prep_w2(params["conv2_w"], cp)                  # (3, 3*cp, cp)
    s1, b1 = _fold_bn(params["bn1"], cp)
    s2, b2 = _fold_bn(params["bn2"], cp)
    # One-hot channel-placement matrix for the shortcut (exact in bf16).
    place = jnp.zeros((cin, cp), jnp.float32)
    place = place.at[jnp.arange(cin), pre + jnp.arange(cin)].set(1.0)
    place = place.astype(jnp.bfloat16)

    kernel = functools.partial(
        _block_kernel, taps=taps, res_tap=res_tap, oh=oh, ow=ow,
        cin=cin, cout=cout, cp=cp, staged=staged)

    m = oh * ow
    flops = N * (2 * m * 9 * cin * cp + 2 * m * 9 * cp * cp + 2 * m * cin * cp)
    bytes_accessed = int(
        x_in.size * 2 + N * oh * ow * cout * 2
        + (w1.size + w2.size + place.size) * 2
        + (s1.size + b1.size + s2.size + b2.size) * 4)
    cost = pl.CostEstimate(flops=int(flops), transcendentals=0,
                           bytes_accessed=bytes_accessed)

    out = pl.pallas_call(
        kernel,
        grid=(N,),
        in_specs=[
            x_spec,
            pl.BlockSpec((9 * cin, cp), lambda n: (0, 0)),
            pl.BlockSpec((1, cp), lambda n: (0, 0)),
            pl.BlockSpec((1, cp), lambda n: (0, 0)),
            pl.BlockSpec((3, 3 * cp, cp), lambda n: (0, 0, 0)),
            pl.BlockSpec((1, cp), lambda n: (0, 0)),
            pl.BlockSpec((1, cp), lambda n: (0, 0)),
            pl.BlockSpec((cin, cp), lambda n: (0, 0)),
        ],
        out_specs=pl.BlockSpec((None, oh, ow, cout), lambda n: (n, 0, 0, 0)),
        out_shape=jax.ShapeDtypeStruct((N, oh, ow, cout), jnp.bfloat16),
        scratch_shapes=scratch,
        compiler_params=pltpu.CompilerParams(
            dimension_semantics=("parallel",)),
        cost_estimate=cost,
    )(x_in, w1, s1, b1, w2, s2, b2, place)

    # Single fused transpose + cast pass back to the NCHW f32 interface.
    return jnp.transpose(out, (0, 3, 1, 2)).astype(jnp.float32)


# ---------------------------------------------------------------------------
# Deterministic parameter init (shapes from the PyTorch __init__)
# ---------------------------------------------------------------------------
def init_params(key, in_c, out_c):
    ks = jax.random.split(key, 4)

    def bn_params(k, c):
        ka, kb, kc, kd = jax.random.split(k, 4)
        return dict(
            gamma=1.0 + 0.1 * jax.random.normal(ka, (c,), jnp.float32),
            beta=0.1 * jax.random.normal(kb, (c,), jnp.float32),
            mean=0.05 * jax.random.normal(kc, (c,), jnp.float32),
            var=1.0 + 0.5 * jax.random.uniform(kd, (c,), jnp.float32),
        )

    return dict(
        conv1_w=0.1 * jax.random.normal(ks[0], (out_c, in_c, 3, 3), jnp.float32),
        conv2_w=0.1 * jax.random.normal(ks[1], (out_c, out_c, 3, 3), jnp.float32),
        bn1=bn_params(ks[2], out_c),
        bn2=bn_params(ks[3], out_c),
    )


# ---------------------------------------------------------------------------
# Pure-JAX reference (mirrors the PyTorch forward, eval-mode BN, fp32)
# ---------------------------------------------------------------------------
def reference_forward(x, params, stride):
    def bn(y, p):
        s = p["gamma"] / jnp.sqrt(p["var"] + _BN_EPS)
        b = p["beta"] - p["mean"] * s
        return y * s[None, :, None, None] + b[None, :, None, None]

    def conv(y, w, st):
        return lax.conv_general_dilated(
            y, w, (st, st), ((1, 1), (1, 1)),
            dimension_numbers=("NCHW", "OIHW", "NCHW"))

    out = jax.nn.relu(bn(conv(x, params["conv1_w"], stride), params["bn1"]))
    out = bn(conv(out, params["conv2_w"], 1), params["bn2"])
    in_c = x.shape[1]
    out_c = params["conv1_w"].shape[0]
    if stride == 1 and in_c == out_c:
        sc = x
    else:
        p = out_c // 4
        sc = jnp.pad(x[:, :, ::2, ::2], ((0, 0), (p, p), (0, 0), (0, 0)))
    return jax.nn.relu(out + sc)


if __name__ == "__main__":
    key = jax.random.PRNGKey(0)
    kx, kp1, kp2 = jax.random.split(key, 3)

    x = jax.random.normal(kx, (2, 4, 16, 16), jnp.float32)

    # Case 1: identity shortcut (stride=1, in_channels == out_channels)
    p1 = init_params(kp1, 4, 4)
    y1 = basic_conv_block_forward(x, p1, stride=1)
    jax.block_until_ready(y1)
    r1 = reference_forward(x, p1, 1)
    assert y1.shape == r1.shape == (2, 4, 16, 16)
    assert jnp.allclose(y1, r1, atol=5e-2, rtol=5e-2), \
        float(jnp.max(jnp.abs(y1 - r1)))

    # Case 2: option-'A' downsampling shortcut (stride=2, out = 2 * in)
    p2 = init_params(kp2, 4, 8)
    y2 = basic_conv_block_forward(x, p2, stride=2, option="A")
    jax.block_until_ready(y2)
    r2 = reference_forward(x, p2, 2)
    assert y2.shape == r2.shape == (2, 8, 8, 8)
    assert jnp.allclose(y2, r2, atol=5e-2, rtol=5e-2), \
        float(jnp.max(jnp.abs(y2 - r2)))

    print("KERNEL_OK")
</pallas_src>

<mosaic_0001>
module attributes {stable_mosaic.version = 11 : i64} {
  func.func @_block_kernel(%arg0: i32, %arg1: memref<1x16x16x4xbf16, #tpu.memory_space<vmem>>, %arg2: memref<36x128xbf16, #tpu.memory_space<vmem>>, %arg3: memref<1x128xf32, #tpu.memory_space<vmem>>, %arg4: memref<1x128xf32, #tpu.memory_space<vmem>>, %arg5: memref<3x384x128xbf16, #tpu.memory_space<vmem>>, %arg6: memref<1x128xf32, #tpu.memory_space<vmem>>, %arg7: memref<1x128xf32, #tpu.memory_space<vmem>>, %arg8: memref<4x128xbf16, #tpu.memory_space<vmem>>, %arg9: memref<1x16x16x4xbf16, #tpu.memory_space<vmem>>, %arg10: memref<18x18x4xbf16, #tpu.memory_space<vmem>>, %arg11: memref<18x18x128xbf16, #tpu.memory_space<vmem>>) attributes {dimension_semantics = [#tpu.dimension_semantics<parallel>], iteration_bounds = array<i64: 2>, scalar_prefetch = 0 : i64, scratch_operands = 2 : i64, tpu.core_type = #tpu.core_type<tc>, window_params = [{transform_indices = @transform_0, window_bounds = array<i64: 1, 16, 16, 4>}, {pipeline_mode = #tpu.pipeline_mode<synchronous>, transform_indices = @transform_1, window_bounds = array<i64: 36, 128>}, {pipeline_mode = #tpu.pipeline_mode<synchronous>, transform_indices = @transform_2, window_bounds = array<i64: 1, 128>}, {pipeline_mode = #tpu.pipeline_mode<synchronous>, transform_indices = @transform_3, window_bounds = array<i64: 1, 128>}, {pipeline_mode = #tpu.pipeline_mode<synchronous>, transform_indices = @transform_4, window_bounds = array<i64: 3, 384, 128>}, {pipeline_mode = #tpu.pipeline_mode<synchronous>, transform_indices = @transform_5, window_bounds = array<i64: 1, 128>}, {pipeline_mode = #tpu.pipeline_mode<synchronous>, transform_indices = @transform_6, window_bounds = array<i64: 1, 128>}, {pipeline_mode = #tpu.pipeline_mode<synchronous>, transform_indices = @transform_7, window_bounds = array<i64: 4, 128>}, {transform_indices = @transform_8, window_bounds = array<i64: 1, 16, 16, 4>}]} {
    %cst = arith.constant 0.000000e+00 : bf16
    %0 = vector.broadcast %cst : bf16 to vector<1x18x4xbf16>
    %c0 = arith.constant 0 : index
    %c0_0 = arith.constant 0 : index
    %c0_1 = arith.constant 0 : index
    %1 = vector.load %arg10[%c0, %c0_0, %c0_1] : memref<18x18x4xbf16, #tpu.memory_space<vmem>>, vector<1x18x4xbf16>
    tpu.vector_store %arg10[%c0, %c0_0, %c0_1], %0 {strides = array<i32>} : memref<18x18x4xbf16, #tpu.memory_space<vmem>>, vector<1x18x4xbf16>,
    %c17 = arith.constant 17 : index
    %c0_2 = arith.constant 0 : index
    %c0_3 = arith.constant 0 : index
    %2 = vector.load %arg10[%c17, %c0_2, %c0_3] : memref<18x18x4xbf16, #tpu.memory_space<vmem>>, vector<1x18x4xbf16>
    tpu.vector_store %arg10[%c17, %c0_2, %c0_3], %0 {strides = array<i32>} : memref<18x18x4xbf16, #tpu.memory_space<vmem>>, vector<1x18x4xbf16>,
    %cst_4 = arith.constant 0.000000e+00 : bf16
    %3 = vector.broadcast %cst_4 : bf16 to vector<18x1x4xbf16>
    %c0_5 = arith.constant 0 : index
    %c0_6 = arith.constant 0 : index
    %c0_7 = arith.constant 0 : index
    %4 = vector.load %arg10[%c0_5, %c0_6, %c0_7] : memref<18x18x4xbf16, #tpu.memory_space<vmem>>, vector<18x1x4xbf16>
    tpu.vector_store %arg10[%c0_5, %c0_6, %c0_7], %3 {strides = array<i32>} : memref<18x18x4xbf16, #tpu.memory_space<vmem>>, vector<18x1x4xbf16>,
    %c0_8 = arith.constant 0 : index
    %c17_9 = arith.constant 17 : index
    %c0_10 = arith.constant 0 : index
    %5 = vector.load %arg10[%c0_8, %c17_9, %c0_10] : memref<18x18x4xbf16, #tpu.memory_space<vmem>>, vector<18x1x4xbf16>
    tpu.vector_store %arg10[%c0_8, %c17_9, %c0_10], %3 {strides = array<i32>} : memref<18x18x4xbf16, #tpu.memory_space<vmem>>, vector<18x1x4xbf16>,
    %c0_11 = arith.constant 0 : index
    %c0_12 = arith.constant 0 : index
    %c0_13 = arith.constant 0 : index
    %c0_14 = arith.constant 0 : index
    %6 = vector.load %arg1[%c0_11, %c0_12, %c0_13, %c0_14] : memref<1x16x16x4xbf16, #tpu.memory_space<vmem>>, vector<1x16x16x4xbf16>
    %7 = vector.shape_cast %6 : vector<1x16x16x4xbf16> to vector<16x16x4xbf16>
    %c1 = arith.constant 1 : index
    %c1_15 = arith.constant 1 : index
    %c0_16 = arith.constant 0 : index
    %8 = vector.load %arg10[%c1, %c1_15, %c0_16] : memref<18x18x4xbf16, #tpu.memory_space<vmem>>, vector<16x16x4xbf16>
    tpu.vector_store %arg10[%c1, %c1_15, %c0_16], %7 {strides = array<i32>} : memref<18x18x4xbf16, #tpu.memory_space<vmem>>, vector<16x16x4xbf16>,
    %c0_17 = arith.constant 0 : index
    %c0_18 = arith.constant 0 : index
    %c0_19 = arith.constant 0 : index
    %9 = vector.load %arg10[%c0_17, %c0_18, %c0_19] : memref<18x18x4xbf16, #tpu.memory_space<vmem>>, vector<16x16x4xbf16>
    %c0_20 = arith.constant 0 : index
    %c1_21 = arith.constant 1 : index
    %c0_22 = arith.constant 0 : index
    %10 = vector.load %arg10[%c0_20, %c1_21, %c0_22] : memref<18x18x4xbf16, #tpu.memory_space<vmem>>, vector<16x16x4xbf16>
    %c0_23 = arith.constant 0 : index
    %c2 = arith.constant 2 : index
    %c0_24 = arith.constant 0 : index
    %11 = vector.load %arg10[%c0_23, %c2, %c0_24] : memref<18x18x4xbf16, #tpu.memory_space<vmem>>, vector<16x16x4xbf16>
    %c1_25 = arith.constant 1 : index
    %c0_26 = arith.constant 0 : index
    %c0_27 = arith.constant 0 : index
    %12 = vector.load %arg10[%c1_25, %c0_26, %c0_27] : memref<18x18x4xbf16, #tpu.memory_space<vmem>>, vector<16x16x4xbf16>
    %c1_28 = arith.constant 1 : index
    %c1_29 = arith.constant 1 : index
    %c0_30 = arith.constant 0 : index
    %13 = vector.load %arg10[%c1_28, %c1_29, %c0_30] : memref<18x18x4xbf16, #tpu.memory_space<vmem>>, vector<16x16x4xbf16>
    %c1_31 = arith.constant 1 : index
    %c2_32 = arith.constant 2 : index
    %c0_33 = arith.constant 0 : index
    %14 = vector.load %arg10[%c1_31, %c2_32, %c0_33] : memref<18x18x4xbf16, #tpu.memory_space<vmem>>, vector<16x16x4xbf16>
    %c2_34 = arith.constant 2 : index
    %c0_35 = arith.constant 0 : index
    %c0_36 = arith.constant 0 : index
    %15 = vector.load %arg10[%c2_34, %c0_35, %c0_36] : memref<18x18x4xbf16, #tpu.memory_space<vmem>>, vector<16x16x4xbf16>
    %c2_37 = arith.constant 2 : index
    %c1_38 = arith.constant 1 : index
    %c0_39 = arith.constant 0 : index
    %16 = vector.load %arg10[%c2_37, %c1_38, %c0_39] : memref<18x18x4xbf16, #tpu.memory_space<vmem>>, vector<16x16x4xbf16>
    %c2_40 = arith.constant 2 : index
    %c2_41 = arith.constant 2 : index
    %c0_42 = arith.constant 0 : index
    %17 = vector.load %arg10[%c2_40, %c2_41, %c0_42] : memref<18x18x4xbf16, #tpu.memory_space<vmem>>, vector<16x16x4xbf16>
    %18 = tpu.concatenate %9, %10, %11, %12, %13, %14, %15, %16, %17 in 2 : vector<16x16x4xbf16>, vector<16x16x4xbf16>, vector<16x16x4xbf16>, vector<16x16x4xbf16>, vector<16x16x4xbf16>, vector<16x16x4xbf16>, vector<16x16x4xbf16>, vector<16x16x4xbf16>, vector<16x16x4xbf16> -> vector<16x16x36xbf16>
    %19 = vector.shape_cast %18 : vector<16x16x36xbf16> to vector<256x36xbf16>
    %c0_43 = arith.constant 0 : index
    %c0_44 = arith.constant 0 : index
    %20 = vector.load %arg2[%c0_43, %c0_44] : memref<36x128xbf16, #tpu.memory_space<vmem>>, vector<36x128xbf16>
    %cst_45 = arith.constant dense<0.000000e+00> : vector<256x128xf32>
    %21 = tpu.matmul %19, %20, %cst_45 {dimension_numbers = #tpu.dot_dimension_numbers<[1], [0], [0], [1], [0, 0, 1, 1], [], []>} : vector<256x36xbf16>, vector<36x128xbf16>, vector<256x128xf32> -> vector<256x128xf32>
    %c0_46 = arith.constant 0 : index
    %c0_47 = arith.constant 0 : index
    %22 = vector.load %arg3[%c0_46, %c0_47] : memref<1x128xf32, #tpu.memory_space<vmem>>, vector<1x128xf32>
    %23 = vector.broadcast %22 : vector<1x128xf32> to vector<256x128xf32>
    %24 = arith.mulf %21, %23 : vector<256x128xf32>
    %c0_48 = arith.constant 0 : index
    %c0_49 = arith.constant 0 : index
    %25 = vector.load %arg4[%c0_48, %c0_49] : memref<1x128xf32, #tpu.memory_space<vmem>>, vector<1x128xf32>
    %26 = vector.broadcast %25 : vector<1x128xf32> to vector<256x128xf32>
    %27 = arith.addf %24, %26 : vector<256x128xf32>
    %cst_50 = arith.constant 0.000000e+00 : f32
    %28 = vector.broadcast %cst_50 : f32 to vector<256x128xf32>
    %29 = arith.maximumf %27, %28 : vector<256x128xf32>
    %cst_51 = arith.constant 0.000000e+00 : bf16
    %30 = vector.broadcast %cst_51 : bf16 to vector<1x18x128xbf16>
    %c0_52 = arith.constant 0 : index
    %c0_53 = arith.constant 0 : index
    %c0_54 = arith.constant 0 : index
    %31 = vector.load %arg11[%c0_52, %c0_53, %c0_54] : memref<18x18x128xbf16, #tpu.memory_space<vmem>>, vector<1x18x128xbf16>
    tpu.vector_store %arg11[%c0_52, %c0_53, %c0_54], %30 {strides = array<i32>} : memref<18x18x128xbf16, #tpu.memory_space<vmem>>, vector<1x18x128xbf16>,
    %c17_55 = arith.constant 17 : index
    %c0_56 = arith.constant 0 : index
    %c0_57 = arith.constant 0 : index
    %32 = vector.load %arg11[%c17_55, %c0_56, %c0_57] : memref<18x18x128xbf16, #tpu.memory_space<vmem>>, vector<1x18x128xbf16>
    tpu.vector_store %arg11[%c17_55, %c0_56, %c0_57], %30 {strides = array<i32>} : memref<18x18x128xbf16, #tpu.memory_space<vmem>>, vector<1x18x128xbf16>,
    %cst_58 = arith.constant 0.000000e+00 : bf16
    %33 = vector.broadcast %cst_58 : bf16 to vector<18x1x128xbf16>
    %c0_59 = arith.constant 0 : index
    %c0_60 = arith.constant 0 : index
    %c0_61 = arith.constant 0 : index
    %34 = vector.load %arg11[%c0_59, %c0_60, %c0_61] : memref<18x18x128xbf16, #tpu.memory_space<vmem>>, vector<18x1x128xbf16>
    tpu.vector_store %arg11[%c0_59, %c0_60, %c0_61], %33 {strides = array<i32>} : memref<18x18x128xbf16, #tpu.memory_space<vmem>>, vector<18x1x128xbf16>,
    %c0_62 = arith.constant 0 : index
    %c17_63 = arith.constant 17 : index
    %c0_64 = arith.constant 0 : index
    %35 = vector.load %arg11[%c0_62, %c17_63, %c0_64] : memref<18x18x128xbf16, #tpu.memory_space<vmem>>, vector<18x1x128xbf16>
    tpu.vector_store %arg11[%c0_62, %c17_63, %c0_64], %33 {strides = array<i32>} : memref<18x18x128xbf16, #tpu.memory_space<vmem>>, vector<18x1x128xbf16>,
    %36 = vector.shape_cast %29 : vector<256x128xf32> to vector<16x16x128xf32>
    %37 = arith.truncf %36 : vector<16x16x128xf32> to vector<16x16x128xbf16>
    %c1_65 = arith.constant 1 : index
    %c1_66 = arith.constant 1 : index
    %c0_67 = arith.constant 0 : index
    %38 = vector.load %arg11[%c1_65, %c1_66, %c0_67] : memref<18x18x128xbf16, #tpu.memory_space<vmem>>, vector<16x16x128xbf16>
    tpu.vector_store %arg11[%c1_65, %c1_66, %c0_67], %37 {strides = array<i32>} : memref<18x18x128xbf16, #tpu.memory_space<vmem>>, vector<16x16x128xbf16>,
    %c0_68 = arith.constant 0 : index
    %c0_69 = arith.constant 0 : index
    %c0_70 = arith.constant 0 : index
    %39 = vector.load %arg11[%c0_68, %c0_69, %c0_70] : memref<18x18x128xbf16, #tpu.memory_space<vmem>>, vector<16x16x128xbf16>
    %c0_71 = arith.constant 0 : index
    %c1_72 = arith.constant 1 : index
    %c0_73 = arith.constant 0 : index
    %40 = vector.load %arg11[%c0_71, %c1_72, %c0_73] : memref<18x18x128xbf16, #tpu.memory_space<vmem>>, vector<16x16x128xbf16>
    %c0_74 = arith.constant 0 : index
    %c2_75 = arith.constant 2 : index
    %c0_76 = arith.constant 0 : index
    %41 = vector.load %arg11[%c0_74, %c2_75, %c0_76] : memref<18x18x128xbf16, #tpu.memory_space<vmem>>, vector<16x16x128xbf16>
    %42 = tpu.concatenate %39, %40, %41 in 2 : vector<16x16x128xbf16>, vector<16x16x128xbf16>, vector<16x16x128xbf16> -> vector<16x16x384xbf16>
    %43 = vector.shape_cast %42 : vector<16x16x384xbf16> to vector<256x384xbf16>
    %c0_77 = arith.constant 0 : index
    %c0_78 = arith.constant 0 : index
    %c0_79 = arith.constant 0 : index
    %44 = vector.load %arg5[%c0_77, %c0_78, %c0_79] : memref<3x384x128xbf16, #tpu.memory_space<vmem>>, vector<1x384x128xbf16>
    %45 = vector.shape_cast %44 : vector<1x384x128xbf16> to vector<384x128xbf16>
    %cst_80 = arith.constant dense<0.000000e+00> : vector<256x128xf32>
    %46 = tpu.matmul %43, %45, %cst_80 {dimension_numbers = #tpu.dot_dimension_numbers<[1], [0], [0], [1], [0, 0, 1, 1], [], []>} : vector<256x384xbf16>, vector<384x128xbf16>, vector<256x128xf32> -> vector<256x128xf32>
    %c1_81 = arith.constant 1 : index
    %c0_82 = arith.constant 0 : index
    %c0_83 = arith.constant 0 : index
    %47 = vector.load %arg11[%c1_81, %c0_82, %c0_83] : memref<18x18x128xbf16, #tpu.memory_space<vmem>>, vector<16x16x128xbf16>
    %c1_84 = arith.constant 1 : index
    %c1_85 = arith.constant 1 : index
    %c0_86 = arith.constant 0 : index
    %48 = vector.load %arg11[%c1_84, %c1_85, %c0_86] : memref<18x18x128xbf16, #tpu.memory_space<vmem>>, vector<16x16x128xbf16>
    %c1_87 = arith.constant 1 : index
    %c2_88 = arith.constant 2 : index
    %c0_89 = arith.constant 0 : index
    %49 = vector.load %arg11[%c1_87, %c2_88, %c0_89] : memref<18x18x128xbf16, #tpu.memory_space<vmem>>, vector<16x16x128xbf16>
    %50 = tpu.concatenate %47, %48, %49 in 2 : vector<16x16x128xbf16>, vector<16x16x128xbf16>, vector<16x16x128xbf16> -> vector<16x16x384xbf16>
    %51 = vector.shape_cast %50 : vector<16x16x384xbf16> to vector<256x384xbf16>
    %c1_90 = arith.constant 1 : index
    %c0_91 = arith.constant 0 : index
    %c0_92 = arith.constant 0 : index
    %52 = vector.load %arg5[%c1_90, %c0_91, %c0_92] : memref<3x384x128xbf16, #tpu.memory_space<vmem>>, vector<1x384x128xbf16>
    %53 = vector.shape_cast %52 : vector<1x384x128xbf16> to vector<384x128xbf16>
    %cst_93 = arith.constant dense<0.000000e+00> : vector<256x128xf32>
    %54 = tpu.matmul %51, %53, %cst_93 {dimension_numbers = #tpu.dot_dimension_numbers<[1], [0], [0], [1], [0, 0, 1, 1], [], []>} : vector<256x384xbf16>, vector<384x128xbf16>, vector<256x128xf32> -> vector<256x128xf32>
    %55 = arith.addf %46, %54 : vector<256x128xf32>
    %c2_94 = arith.constant 2 : index
    %c0_95 = arith.constant 0 : index
    %c0_96 = arith.constant 0 : index
    %56 = vector.load %arg11[%c2_94, %c0_95, %c0_96] : memref<18x18x128xbf16, #tpu.memory_space<vmem>>, vector<16x16x128xbf16>
    %c2_97 = arith.constant 2 : index
    %c1_98 = arith.constant 1 : index
    %c0_99 = arith.constant 0 : index
    %57 = vector.load %arg11[%c2_97, %c1_98, %c0_99] : memref<18x18x128xbf16, #tpu.memory_space<vmem>>, vector<16x16x128xbf16>
    %c2_100 = arith.constant 2 : index
    %c2_101 = arith.constant 2 : index
    %c0_102 = arith.constant 0 : index
    %58 = vector.load %arg11[%c2_100, %c2_101, %c0_102] : memref<18x18x128xbf16, #tpu.memory_space<vmem>>, vector<16x16x128xbf16>
    %59 = tpu.concatenate %56, %57, %58 in 2 : vector<16x16x128xbf16>, vector<16x16x128xbf16>, vector<16x16x128xbf16> -> vector<16x16x384xbf16>
    %60 = vector.shape_cast %59 : vector<16x16x384xbf16> to vector<256x384xbf16>
    %c2_103 = arith.constant 2 : index
    %c0_104 = arith.constant 0 : index
    %c0_105 = arith.constant 0 : index
    %61 = vector.load %arg5[%c2_103, %c0_104, %c0_105] : memref<3x384x128xbf16, #tpu.memory_space<vmem>>, vector<1x384x128xbf16>
    %62 = vector.shape_cast %61 : vector<1x384x128xbf16> to vector<384x128xbf16>
    %cst_106 = arith.constant dense<0.000000e+00> : vector<256x128xf32>
    %63 = tpu.matmul %60, %62, %cst_106 {dimension_numbers = #tpu.dot_dimension_numbers<[1], [0], [0], [1], [0, 0, 1, 1], [], []>} : vector<256x384xbf16>, vector<384x128xbf16>, vector<256x128xf32> -> vector<256x128xf32>
    %64 = arith.addf %55, %63 : vector<256x128xf32>
    %c0_107 = arith.constant 0 : index
    %c0_108 = arith.constant 0 : index
    %c0_109 = arith.constant 0 : index
    %c0_110 = arith.constant 0 : index
    %65 = vector.load %arg1[%c0_107, %c0_108, %c0_109, %c0_110] : memref<1x16x16x4xbf16, #tpu.memory_space<vmem>>, vector<1x16x16x4xbf16>
    %66 = vector.shape_cast %65 : vector<1x16x16x4xbf16> to vector<16x16x4xbf16>
    %67 = vector.shape_cast %66 : vector<16x16x4xbf16> to vector<256x4xbf16>
    %c0_111 = arith.constant 0 : index
    %c0_112 = arith.constant 0 : index
    %68 = vector.load %arg8[%c0_111, %c0_112] : memref<4x128xbf16, #tpu.memory_space<vmem>>, vector<4x128xbf16>
    %cst_113 = arith.constant dense<0.000000e+00> : vector<256x128xf32>
    %69 = tpu.matmul %67, %68, %cst_113 {dimension_numbers = #tpu.dot_dimension_numbers<[1], [0], [0], [1], [0, 0, 1, 1], [], []>} : vector<256x4xbf16>, vector<4x128xbf16>, vector<256x128xf32> -> vector<256x128xf32>
    %c0_114 = arith.constant 0 : index
    %c0_115 = arith.constant 0 : index
    %70 = vector.load %arg6[%c0_114, %c0_115] : memref<1x128xf32, #tpu.memory_space<vmem>>, vector<1x128xf32>
    %71 = vector.broadcast %70 : vector<1x128xf32> to vector<256x128xf32>
    %72 = arith.mulf %64, %71 : vector<256x128xf32>
    %c0_116 = arith.constant 0 : index
    %c0_117 = arith.constant 0 : index
    %73 = vector.load %arg7[%c0_116, %c0_117] : memref<1x128xf32, #tpu.memory_space<vmem>>, vector<1x128xf32>
    %74 = vector.broadcast %73 : vector<1x128xf32> to vector<256x128xf32>
    %75 = arith.addf %72, %74 : vector<256x128xf32>
    %76 = arith.addf %75, %69 : vector<256x128xf32>
    %cst_118 = arith.constant 0.000000e+00 : f32
    %77 = vector.broadcast %cst_118 : f32 to vector<256x128xf32>
    %78 = arith.maximumf %76, %77 : vector<256x128xf32>
    %79 = vector.extract_strided_slice %78 {offsets = [0, 0], sizes = [256, 4], strides = [1, 1]} : vector<256x128xf32> to vector<256x4xf32>
    %80 = vector.shape_cast %79 : vector<256x4xf32> to vector<16x16x4xf32>
    %81 = arith.truncf %80 : vector<16x16x4xf32> to vector<16x16x4xbf16>
    %c0_119 = arith.constant 0 : index
    %c0_120 = arith.constant 0 : index
    %c0_121 = arith.constant 0 : index
    %c0_122 = arith.constant 0 : index
    %82 = vector.load %arg9[%c0_119, %c0_120, %c0_121, %c0_122] : memref<1x16x16x4xbf16, #tpu.memory_space<vmem>>, vector<1x16x16x4xbf16>
    %83 = vector.shape_cast %82 : vector<1x16x16x4xbf16> to vector<16x16x4xbf16>
    %84 = vector.shape_cast %81 : vector<16x16x4xbf16> to vector<1x16x16x4xbf16>
    tpu.vector_store %arg9[%c0_119, %c0_120, %c0_121, %c0_122], %84 {strides = array<i32>} : memref<1x16x16x4xbf16, #tpu.memory_space<vmem>>, vector<1x16x16x4xbf16>,
    return
  }
  func.func @transform_0(%arg0: i32) -> (i32, i32, i32, i32) {
    %c0_i32 = arith.constant 0 : i32
    %c0_i32_0 = arith.constant 0 : i32
    %c0_i32_1 = arith.constant 0 : i32
    %c0_i32_2 = arith.constant 0 : i32
    return %arg0, %c0_i32, %c0_i32_0, %c0_i32_1 : i32, i32, i32, i32
  }
  func.func @transform_1(%arg0: i32) -> (i32, i32) {
    %c0_i32 = arith.constant 0 : i32
    %c0_i32_0 = arith.constant 0 : i32
    %c0_i32_1 = arith.constant 0 : i32
    return %c0_i32, %c0_i32_0 : i32, i32
  }
  func.func @transform_2(%arg0: i32) -> (i32, i32) {
    %c0_i32 = arith.constant 0 : i32
    %c0_i32_0 = arith.constant 0 : i32
    %c0_i32_1 = arith.constant 0 : i32
    return %c0_i32, %c0_i32_0 : i32, i32
  }
  func.func @transform_3(%arg0: i32) -> (i32, i32) {
    %c0_i32 = arith.constant 0 : i32
    %c0_i32_0 = arith.constant 0 : i32
    %c0_i32_1 = arith.constant 0 : i32
    return %c0_i32, %c0_i32_0 : i32, i32
  }
  func.func @transform_4(%arg0: i32) -> (i32, i32, i32) {
    %c0_i32 = arith.constant 0 : i32
    %c0_i32_0 = arith.constant 0 : i32
    %c0_i32_1 = arith.constant 0 : i32
    %c0_i32_2 = arith.constant 0 : i32
    return %c0_i32, %c0_i32_0, %c0_i32_1 : i32, i32, i32
  }
  func.func @transform_5(%arg0: i32) -> (i32, i32) {
    %c0_i32 = arith.constant 0 : i32
    %c0_i32_0 = arith.constant 0 : i32
    %c0_i32_1 = arith.constant 0 : i32
    return %c0_i32, %c0_i32_0 : i32, i32
  }
  func.func @transform_6(%arg0: i32) -> (i32, i32) {
    %c0_i32 = arith.constant 0 : i32
    %c0_i32_0 = arith.constant 0 : i32
    %c0_i32_1 = arith.constant 0 : i32
    return %c0_i32, %c0_i32_0 : i32, i32
  }
  func.func @transform_7(%arg0: i32) -> (i32, i32) {
    %c0_i32 = arith.constant 0 : i32
    %c0_i32_0 = arith.constant 0 : i32
    %c0_i32_1 = arith.constant 0 : i32
    return %c0_i32, %c0_i32_0 : i32, i32
  }
  func.func @transform_8(%arg0: i32) -> (i32, i32, i32, i32) {
    %c0_i32 = arith.constant 0 : i32
    %c0_i32_0 = arith.constant 0 : i32
    %c0_i32_1 = arith.constant 0 : i32
    %c0_i32_2 = arith.constant 0 : i32
    return %arg0, %c0_i32, %c0_i32_0, %c0_i32_1 : i32, i32, i32, i32
  }
}

</mosaic_0001>

<bundles_post_ra>
// kernel: basic_conv_block_forward.1
= control target key start
LH: loop header
LB: loop body
LE: loop exit
PB: predicated region body
PF: predicated region fallthrough
CT: control target
= control target key end

     0   :  { %s9662_s27 = smov 0   ;;  %s12540_s0 = inlined_call_operand.vmem [shape: bf16[2,16,16,4], index: 0, kind: input, shape index: {}]   ;;  %s12541_s1 = inlined_call_operand.vmem [shape: bf16[36,128], index: 1, kind: input, shape index: {}]   ;;  %s12542_s2 = inlined_call_operand.vmem [shape: f32[1,128], index: 2, kind: input, shape index: {}]   ;;  %s12543_s3 = inlined_call_operand.vmem [shape: f32[1,128], index: 3, kind: input, shape index: {}]   ;;  %s12544_s4 = inlined_call_operand.vmem [shape: bf16[3,384,128], index: 4, kind: input, shape index: {}]   ;;  %s12545_s5 = inlined_call_operand.vmem [shape: f32[1,128], index: 5, kind: input, shape index: {}]   ;;  %s12546_s6 = inlined_call_operand.vmem [shape: f32[1,128], index: 6, kind: input, shape index: {}]   ;;  %s12547_s7 = inlined_call_operand.vmem [shape: bf16[4,128], index: 7, kind: input, shape index: {}]   ;;  %s12548_s8 = inlined_call_operand.vmem [shape: bf16[2,16,16,4], index: 8, kind: output, shape index: {}]  }
   0x1 LB: > { %s7681_s28 = sadd.s32 4294967295, %s9606_s27   ;;  %p7685_p0 = scmp.ge.s32.totalorder %s9606_s27, 1  ;;  %s9606_s27 = sphi %s9662_s27, %s18_s27  }
   0x2   : > { %p262_p1 = scmp.lt.s32.totalorder %s9606_s27, 3 }
   0x4   : > { %p263_p2 = pnand %p7685_p0, %p262_p1 }
   0x6   : > { %266 = sbr.rel (%p263_p2) target bundleno = 1142 (0x476), region = 52 }
   0xd   : > { %vm12552_vm0 = vcmask 27648   ;;  %vm310_vm1 = vcmask 24576   ;;  %vm12551_vm2 = vsmask.f32 256  ;;  %v9608_v0 = vmov 0   ;;  %p296_p3 = scmp.lt.s32.totalorder %s7681_s28, 1 }
   0xe   : > { %308 = vst.msk [vmem:[#allocation2] sm:$0xf] %vm12552_vm0, %v9608_v0  ;;  %309 = vst.msk [vmem:[#allocation2 + $0x4] sm:$0xf] %vm12552_vm0, %v9608_v0  ;;  %vm12550_vm4 = vsmask.f32 7938 }
   0xf   : > { %311 = vst.msk [vmem:[#allocation2 + $0x8] sm:$0x1] %vm310_vm1, %v9608_v0  ;;  %vm9675_vm3 = vmand %vm310_vm1, %vm12551_vm2  ;;  %v322_v2 = vld [vmem:[#allocation2 + $0xc] sm:$0x1]  ;;  %s12677_s28 = smov (!%p296_p3, %s7681_s28), 1  ;;  %vm1492_vm9 = vcmask 1046528  }
  0x10   : > { %313 = vst.msk [vmem:[#allocation2 + $0xcc] sm:$0xf] %vm12552_vm0, %v9608_v0  ;;  %314 = vst.msk [vmem:[#allocation2 + $0xd0] sm:$0xf] %vm12552_vm0, %v9608_v0  ;;  %v323_v3 = vsel %vm9675_vm3, 0, %v322_v2  ;;  %s8267_s29 = sshll.u32 %s12677_s28, 7 }
  0x11   : > { %315 = vst.msk [vmem:[#allocation2 + $0xd4] sm:$0x1] %vm310_vm1, %v9608_v0  ;;  %3189 = vst [vmem:[#allocation3] sm:$0xf] %v9608_v0  ;;  %v325_v4 = vld [vmem:[#allocation2 + $0x18] sm:$0x1]  ;;  %s9702_s10 = scalar_lea.vmem %s12540_s0, %s8267_s29  ;;  %s12360_s25 = scalar_lea.vmem %s12548_s8, %s8267_s29 }
  0x12   : > { %3190 = vst [vmem:[#allocation3 + $0x4] sm:$0xf] %v9608_v0  ;;  %3191 = vst [vmem:[#allocation3 + $0x8] sm:$0x1] %v9608_v0  ;;  %v328_v5 = vld [vmem:[#allocation2 + $0x24] sm:$0x1] }
  0x13   : > { %3193 = vst [vmem:[#allocation3 + $0xcc] sm:$0xf] %v9608_v0  ;;  %3194 = vst [vmem:[#allocation3 + $0xd0] sm:$0xf] %v9608_v0  ;;  %v326_v6 = vsel %vm9675_vm3, 0, %v325_v4  ;;  %v329_v7 = vsel %vm9675_vm3, 0, %v328_v5 }
  0x14   : > { %3195 = vst [vmem:[#allocation3 + $0xd4] sm:$0x1] %v9608_v0  ;;  %324 = vst [vmem:[#allocation2 + $0xc] sm:$0x1] %v323_v3  ;;  %v378_v9 = vld [vmem:[#allocation2 + $0x14] sm:$0x1] }
  0x15   : > { %vm9692_vm5 = vmand %vm310_vm1, %vm12550_vm4  ;;  %327 = vst [vmem:[#allocation2 + $0x18] sm:$0x1] %v326_v6  ;;  %v381_v10 = vld [vmem:[#allocation2 + $0x20] sm:$0x1]  ;;  %vm461_vm6 = vsmask.f32 4368 }
  0x16   : > { %330 = vst [vmem:[#allocation2 + $0x24] sm:$0x1] %v329_v7  ;;  %v379_v11 = vsel %vm9692_vm5, 0, %v378_v9  ;;  %v382_v12 = vsel %vm9692_vm5, 0, %v381_v10  ;;  %v429_v13 = vld [vmem:[%s9702_s10] sm:$0xf]  ;;  %vm9721_vm7 = vmand %vm12552_vm0, %vm12550_vm4 }
  0x17   : > { %v430_v14 = vld [vmem:[%s9702_s10 + $0x4] sm:$0xf]  ;;  %v431_v15 = vld [vmem:[%s9702_s10 + $0x8] sm:$0xf]  ;;  %380 = vst [vmem:[#allocation2 + $0x14] sm:$0x1] %v379_v11  ;;  %vm9729_vm8 = vmor %vm12551_vm2, %vm461_vm6 }
  0x18   : > { %383 = vst [vmem:[#allocation2 + $0x20] sm:$0x1] %v382_v12  ;;  %v384_v16 = vld [vmem:[#allocation2 + $0x2c] sm:$0x1]  ;;  %v375_v17 = vld [vmem:[#allocation2 + $0x8] sm:$0x1] }
  0x19   : > { %v9711_v18 = vld [vmem:[#allocation2 + $0x4] sm:$0xf]  ;;  %v946_v19 = vld [vmem:[#allocation2] sm:$0xe]  ;;  %v376_v20 = vsel %vm9692_vm5, 0, %v375_v17  ;;  %v464_v23 = vshrl.u32 %v429_v13, 16 }
  0x1a   : > { %v7722_v21 = vcombine.low %v946_v19, %v9711_v18  ;;  %v319_v22 = vld [vmem:[#allocation2] sm:$0x1]  ;;  %v467_v24 = vshll.u32 %v429_v13, 16  ;;  %377 = vst [vmem:[#allocation2 + $0x8] sm:$0x1] %v376_v20  ;;  %v472_v26 = vshrl.u32 %v430_v14, 16 }
  0x1b   : > { %v320_v25 = vsel %vm9675_vm3, 0, %v319_v22  ;;  %v475_v27 = vshll.u32 %v430_v14, 16  ;;  %v432_v28 = vld [vmem:[%s9702_s10 + $0xc] sm:$0xf]  ;;  %v481_v29 = vshrl.u32 %v431_v15, 16  ;;  %v466_v31 = vrot.slane %v464_v23, 7 }
  0x1c   : > { %v1493_v30 = vrot.slane %v7722_v21, 1  ;;  %321 = vst [vmem:[#allocation2] sm:$0x1] %v320_v25  ;;  %v786_v32 = vld [vmem:[#allocation2 + $0xc] sm:$0xf]  ;;  %v484_v33 = vshll.u32 %v431_v15, 16 }
  0x1d   : > { %v489_v34 = vshrl.u32 %v432_v28, 16  ;;  %v474_v36 = vrot.slane %v472_v26, 7  ;;  %v483_v37 = vrot.slane %v481_v29, 7  ;;  %v492_v38 = vshll.u32 %v432_v28, 16  ;;  %v793_v39 = vld [vmem:[#allocation2 + $0x18] sm:$0xf] }
  0x1e   : > { %v385_v40 = vsel %vm9692_vm5, 0, %v384_v16  ;;  %v469_v42 = vor.u32 %v467_v24, %v466_v31  ;;  %v470_v43 = vrot.slane %v466_v31, 4  ;;  %v433_v45 = vld [vmem:[%s9702_s10 + $0x10] sm:$0xf]  ;;  %v434_v46 = vld [vmem:[%s9702_s10 + $0x14] sm:$0xf] }
  0x1f   : > { %v491_v44 = vrot.slane %v489_v34, 7  ;;  %386 = vst [vmem:[#allocation2 + $0x2c] sm:$0x1] %v385_v40  ;;  %v477_v47 = vor.u32 %v475_v27, %v474_v36  ;;  %v479_v48 = vrot.slane %v474_v36, 4  ;;  %v486_v49 = vor.u32 %v484_v33, %v483_v37  ;;  %v790_v51 = vld [vmem:[#allocation2 + $0x14] sm:$0x1] }
  0x20   : > { %v487_v50 = vrot.slane %v483_v37, 4  ;;  %v787_v52 = vsel %vm9721_vm7, %v469_v42, %v786_v32  ;;  %v498_v55 = vshrl.u32 %v433_v45, 16  ;;  %v797_v56 = vld [vmem:[#allocation2 + $0x20] sm:$0x1]  ;;  %v331_v57 = vld [vmem:[#allocation2 + $0x30] sm:$0x1] }
  0x21   : > { %v494_v53 = vor.u32 %v492_v38, %v491_v44  ;;  %v496_v54 = vrot.slane %v491_v44, 4  ;;  %v478_v58 = vsel %vm9729_vm8, %v470_v43, %v477_v47  ;;  %788 = vst [vmem:[#allocation2 + $0xc] sm:$0xf] %v787_v52  ;;  %v794_v59 = vsel %vm9721_vm7, %v486_v49, %v793_v39  ;;  %v800_v62 = vld [vmem:[#allocation2 + $0x24] sm:$0xf]  ;;  %s9609_s11 = smov 8  }
  0x22   : > { %v501_v60 = vshll.u32 %v433_v45, 16  ;;  %v506_v61 = vshrl.u32 %v434_v46, 16  ;;  %v9179_v63 = vld [vmem:[#allocation2 + $0x8] ss:$0 sps:$4 sm:$0x11]   ;;  %v500_v2 = vrot.slane %v498_v55, 7  ;;  %v791_v3 = vsel %vm9675_vm3, %v479_v48, %v790_v51 }
  0x23   : > { %789 = vst.msk [vmem:[#allocation2 + $0x10] sm:$0xf] %vm12552_vm0, %v478_v58  ;;  %v495_v0 = vsel %vm9729_vm8, %v487_v50, %v494_v53  ;;  %795 = vst [vmem:[#allocation2 + $0x18] sm:$0xf] %v794_v59  ;;  %v798_v4 = vsel %vm9675_vm3, %v496_v54, %v797_v56  ;;  %v898_v5 = vld [vmem:[#allocation2] sm:$0xf] }
  0x24   : > { %796 = vst.msk [vmem:[#allocation2 + $0x1c] sm:$0xf] %vm12552_vm0, %v495_v0  ;;  %v508_v6 = vrot.slane %v506_v61, 7  ;;  %v509_v7 = vshll.u32 %v434_v46, 16  ;;  %792 = vst [vmem:[#allocation2 + $0x14] sm:$0x1] %v791_v3  ;;  %v9752_v11 = vcombine.low %v898_v5, %v9711_v18  ;;  %v503_v12 = vor.u32 %v501_v60, %v500_v2 }
  0x25   : > { %799 = vst [vmem:[#allocation2 + $0x20] sm:$0x1] %v798_v4  ;;  %v332_v9 = vsel %vm9675_vm3, 0, %v331_v57  ;;  %v1494_v10 = vrot.slane %v9179_v63, 1  ;;  %v504_v13 = vrot.slane %v500_v2, 4  ;;  %v1228_v24 = vshll.u32 %v9179_v63, 16 }
  0x26   : > { %333 = vst [vmem:[#allocation2 + $0x30] sm:$0x1] %v332_v9  ;;  %v511_v14 = vor.u32 %v509_v7, %v508_v6  ;;  %v513_v15 = vrot.slane %v508_v6, 4  ;;  %v804_v16 = vld [vmem:[#allocation2 + $0x2c] sm:$0x1]  ;;  %v801_v19 = vsel %vm9721_vm7, %v503_v12, %v800_v62  ;;  %v1223_v20 = vshll.u32 %v9752_v11, 16 }
  0x27   : > { %v1495_v17 = vsel %vm1492_vm9, %v1493_v30, %v1494_v10  ;;  %802 = vst [vmem:[#allocation2 + $0x24] sm:$0xf] %v801_v19  ;;  %vm1219_vm10 = vsmask.f32 7424  ;;  %v1221_v27 = vshrl.u32 %v9752_v11, 16  ;;  %s9610_s12 = smov 12  }
  0x28   : > { %1541 = vrot.lane.b32.xlu1 %v1495_v17, %s9609_s11  ;;  %v512_v18 = vsel %vm9729_vm8, %v504_v13, %v511_v14  ;;  %v805_v21 = vsel %vm9675_vm3, %v513_v15, %v804_v16  ;;  %v962_v22 = vld [vmem:[#allocation2 + $0xc] sm:$0xf]  ;;  %v1225_v28 = vrot.slane %v1223_v20, 1  ;;  %v9766_v29 = vld [vmem:[%s9702_s10 + $0x18] sm:$0xf]  ;;  %v1230_v40 = vrot.slane %v1228_v24, 1 }
  0x29   : > { %v1010_v23 = vld [vmem:[#allocation2 + $0xc] sm:$0xe]  ;;  %803 = vst.msk [vmem:[#allocation2 + $0x28] sm:$0xf] %vm12552_vm0, %v512_v18  ;;  %806 = vst [vmem:[#allocation2 + $0x2c] sm:$0x1] %v805_v21 }
  0x2a   : > { %v963_v25 = vld [vmem:[#allocation2 + $0x10] sm:$0xf]  ;;  %v964_v26 = vld [vmem:[#allocation2 + $0x18] sm:$0xf]  ;;  %v947_v42 = vld [vmem:[#allocation2 + $0xc] sm:$0xe]  ;;  %v1226_v45 = vor.u32 %v1225_v28, %v1221_v27 }
  0x2b   : > { %v9768_v30 = vcombine.low %v962_v22, %v963_v25  ;;  %v965_v31 = vld [vmem:[#allocation2 + $0x1c] sm:$0xf]  ;;  %v1027_v32 = vld [vmem:[#allocation2 + $0x18] sm:$0xf]  ;;  %v901_v37 = vld [vmem:[#allocation2 + $0x10] sm:$0xf]  ;;  %v7770_v38 = vcombine.low %v1010_v23, %v963_v25 }
  0x2c   : > { %v1028_v33 = vld [vmem:[#allocation2 + $0x1c] sm:$0xf]  ;;  %v1011_v34 = vld [vmem:[#allocation2 + $0x18] sm:$0xe]  ;;  %v7739_v36 = vcombine.low %v964_v26, %v965_v31  ;;  %v7723_v46 = vcombine.low %v947_v42, %v901_v37  ;;  %v900_v47 = vld [vmem:[#allocation2 + $0xc] sm:$0xf]  ;;  %v1231_v61 = vsel %vm1219_vm10, %v1226_v45, %v1230_v40 }
  0x2d   : > { %1653 = vrot.lane.b32.xlu0 %v9768_v30, %s9610_s12  ;;  %v9772_v39 = vcombine.low %v1027_v32, %v1028_v33  ;;  %v9774_v43 = vld [vmem:[#allocation2 + $0x14] ss:$0 sps:$4 sm:$0x11]   ;;  %v1075_v44 = vld [vmem:[#allocation2 + $0x18] sm:$0xe]  ;;  %v7771_v48 = vcombine.low %v1011_v34, %v965_v31  ;;  %v515_v52 = vshrl.u32 %v9766_v29, 16  ;;  %v9786_v58 = vcombine.low %v900_v47, %v901_v37 }
  0x2e   : > { %1655 = vrot.lane.b32.xlu1 %v7739_v36, %s9610_s12  ;;  %v1748_v49 = vshll.u32 %v7739_v36, 16  ;;  %v1029_v50 = vld [vmem:[#allocation2 + $0x24] sm:$0xf]  ;;  %v1497_v51 = vrot.slane %v9774_v43, 1  ;;  %v1496_v54 = vrot.slane %v7723_v46, 1  ;;  %v7818_v56 = vcombine.low %v1075_v44, %v1028_v33  ;;  %s9611_s13 = smov 24  }
  0x2f   : > { %v9781_v55 = vld [vmem:[#allocation2 + $0x14] ss:$0 sps:$4 sm:$0x11]   ;;  %v2005_v59 = vrot.slane %v7770_v38, 1  ;;  %v1736_v0 = vshll.u32 %v9768_v30, 16  ;;  %v2008_v3 = vrot.slane %v7771_v48, 1 }
  0x30   : > { %v9779_v53 = vld [vmem:[#allocation2 + $0x28] sm:$0xf]  ;;  %v9193_v60 = vld [vmem:[#allocation2 + $0x20] ss:$0 sps:$4 sm:$0x11]   ;;  %v2006_v62 = vrot.slane %v9781_v55, 1  ;;  %v1498_v5 = vsel %vm1492_vm9, %v1496_v54, %v1497_v51 }
  0x31   : > { %2165 = vrot.lane.b32.xlu0 %v9772_v39, %s9611_s13  ;;  %v7787_v57 = vcombine.low %v1029_v50, %v9779_v53  ;;  %v9790_v63 = vld [vmem:[#allocation2 + $0x20] ss:$0 sps:$4 sm:$0x11]   ;;  %v1746_v4 = vshrl.u32 %v7739_v36, 16  ;;  %v2009_v6 = vrot.slane %v9193_v60, 1  ;;  %v1750_v7 = vrot.slane %v1748_v49, 1 }
  0x32   : > { %v1753_v9 = vshll.u32 %v9193_v60, 16  ;;  %v9795_v10 = vld [vmem:[#allocation2 + $0x2c] ss:$0 sps:$4 sm:$0x11]   ;;  %s9612_s14 = smov 4   ;;  %v2517_v12 = vrot.slane %v7818_v56, 1  ;;  %v2007_v17 = vsel %vm1492_vm9, %v2005_v59, %v2006_v62 }
  0x33   : > { %v2260_v2 = vshll.u32 %v7787_v57, 16  ;;  %2167 = vrot.lane.b32.xlu1 %v7787_v57, %s9611_s13  ;;  %v2518_v13 = vrot.slane %v9790_v63, 1  ;;  %v1233_v14 = vshrl.u32 %v9786_v58, 16  ;;  %v1235_v15 = vshll.u32 %v9786_v58, 16  ;;  %v902_v16 = vld [vmem:[#allocation2 + $0x18] sm:$0xf] }
  0x34   : > { %v1751_v19 = vor.u32 %v1750_v7, %v1746_v4  ;;  %v1755_v20 = vrot.slane %v1753_v9, 1  ;;  %v1240_v18 = vshll.u32 %v9774_v43, 16  ;;  %v9803_v21 = vld [vmem:[#allocation2 + $0x1c] sm:$0xf]  ;;  %v2258_v23 = vshrl.u32 %v7787_v57, 16  ;;  %s9613_s15 = smov 20  }
  0x35   : > { %1412 = vrot.lane.b32.xlu0 %v1231_v61, %s9612_s14  ;;  %v1237_v22 = vrot.slane %v1235_v15, 1  ;;  %v2262_v24 = vrot.slane %v2260_v2, 1  ;;  %v2265_v25 = vshll.u32 %v9795_v10, 16  ;;  %v2010_v26 = vsel %vm1492_vm9, %v2008_v3, %v2009_v6  ;;  %v9810_v32 = vld [vmem:[#allocation2 + $0x20] ss:$0 sps:$4 sm:$0x11]  }
  0x36   : > { %v1734_v27 = vshrl.u32 %v9768_v30, 16  ;;  %v1738_v28 = vrot.slane %v1736_v0, 1  ;;  %v1741_v31 = vshll.u32 %v9781_v55, 16  ;;  %v2248_v33 = vshll.u32 %v9772_v39, 16  ;;  %v9258_v30 = vld [vmem:[%s12541_s1] sm:$0xff]   ;;  %v9262_v56 = vld [vmem:[%s12541_s1 + $0x8] sm:$0xff]  }
  0x37   : > { %1543 = vrot.lane.b32.xlu1 %v1498_v5, %s9609_s11  ;;  %v9815_v34 = vcombine.low %v902_v16, %v9803_v21  ;;  %v9817_v36 = vrot.slane %v515_v52, 7  ;;  %v518_v37 = vshll.u32 %v9766_v29, 16  ;;  %v9823_v38 = vld [vmem:[#allocation2 + $0x24] sm:$0xe]  ;;  %v2519_v40 = vsel %vm1492_vm9, %v2517_v12, %v2518_v13  ;;  %v9827_v46 = vld [vmem:[#allocation2 + $0x28] sm:$0xf]  ;;  %8777 = vmatprep.subr.bf16.mxu0 %v9258_v30 }
  0x38   : > { %v1756_v42 = vsel %vm1219_vm10, %v1751_v19, %v1755_v20  ;;  %v1238_v43 = vor.u32 %v1237_v22, %v1233_v14  ;;  %v1242_v44 = vrot.slane %v1240_v18, 1  ;;  %v904_v45 = vld [vmem:[#allocation2 + $0x24] sm:$0xf]  ;;  %v2263_v47 = vor.u32 %v2262_v24, %v2258_v23  ;;  %v9831_v50 = vld [vmem:[#allocation2 + $0x2c] ss:$0 sps:$4 sm:$0x11]   ;;  %8778 = vmatpush3.bf16.msra.mxu0 %v9258_v30  ;;  %8993 = vmatprep.subr.bf16.mxu1 %v9258_v30 }
  0x39   : > { %2053 = vrot.lane.b32.xlu0 %v2007_v17, %s9613_s15  ;;  %v2267_v48 = vrot.slane %v2265_v25, 1  ;;  %v1739_v29 = vor.u32 %v1738_v28, %v1734_v27  ;;  %v1247_v49 = vshll.u32 %v9815_v34, 16  ;;  %v1743_v51 = vrot.slane %v1741_v31, 1  ;;  %s9614_s20 = smov 32   ;;  %v436_v62 = vld [vmem:[%s9702_s10 + $0x1c] sm:$0xf]  ;;  %8996 = vmatpush3.bf16.msra.mxu1 %v9258_v30 }
  0x3a   : > { %v1245_v52 = vshrl.u32 %v9815_v34, 16  ;;  %v1252_v54 = vshll.u32 %v9810_v32, 16  ;;  %v2246_v55 = vshrl.u32 %v9772_v39, 16  ;;  %v2250_v59 = vrot.slane %v2248_v33, 1  ;;  %v949_v0 = vld [vmem:[#allocation2 + $0x24] sm:$0xe]  ;;  %8779 = vmatprep.subr.bf16.mxu0 %v9262_v56  ;;  %8994 = vmatprep.subr.bf16.mxu1 %v9262_v56 }
  0x3b   : > { %2055 = vrot.lane.b32.xlu1 %v2010_v26, %s9613_s15  ;;  %v1249_v57 = vrot.slane %v1247_v49, 1  ;;  %v2253_v60 = vshll.u32 %v9790_v63, 16  ;;  %v9842_v61 = vcombine.low %v904_v45, %v9827_v46  ;;  %v1243_v39 = vsel %vm1219_vm10, %v1238_v43, %v1242_v44  ;;  %v948_v2 = vld [vmem:[#allocation2 + $0x18] sm:$0xe]  ;;  %v807_v4 = vld [vmem:[#allocation2 + $0x30] sm:$0xf] }
  0x3c   : > { %v520_v3 = vor.u32 %v518_v37, %v9817_v36  ;;  %v7819_v5 = vcombine.low %v9823_v38, %v9779_v53  ;;  %s9615_s21 = smov 16   ;;  %v1264_v7 = vshll.u32 %v9831_v50, 16  ;;  %v2268_v9 = vsel %vm1219_vm10, %v2263_v47, %v2267_v48  ;;  %v966_v15 = vld [vmem:[#allocation2 + $0x24] sm:$0xf]  ;;  %v9855_v16 = vld [vmem:[#allocation2 + $0x28] sm:$0xf]  ;;  %8780 = vmatpush3.bf16.msra.mxu0 %v9262_v56 }
  0x3d   : > { %2565 = vrot.lane.b32.xlu0 %v2519_v40, %s9614_s20  ;;  %v1257_v63 = vshrl.u32 %v9842_v61, 16  ;;  %v1259_v6 = vshll.u32 %v9842_v61, 16  ;;  %v1744_v12 = vsel %vm1219_vm10, %v1739_v29, %v1743_v51  ;;  %v1250_v13 = vor.u32 %v1249_v57, %v1245_v52  ;;  %v387_v18 = vld [vmem:[#allocation2 + $0x38] sm:$0x1]  ;;  %8997 = vmatpush3.bf16.msra.mxu1 %v9262_v56  ;;  %v334_v26 = vld [vmem:[#allocation2 + $0x3c] sm:$0x1] }
  0x3e   : > { %v1254_v14 = vrot.slane %v1252_v54, 1  ;;  %v2251_v53 = vor.u32 %v2250_v59, %v2246_v55  ;;  %v2255_v17 = vrot.slane %v2253_v60, 1  ;;  %v7725_v20 = vcombine.low %v949_v0, %v9827_v46  ;;  %s9616_s22 = smov 28   ;;  %v437_v33 = vld [vmem:[%s9702_s10 + $0x20] sm:$0xf] }
  0x3f   : > { %1927 = vrot.lane.b32.xlu1 %v1756_v42, %s9615_s21  ;;  %v1261_v19 = vrot.slane %v1259_v6, 1  ;;  %v7724_v22 = vcombine.low %v948_v2, %v9803_v21  ;;  %v523_v23 = vshrl.u32 %v436_v62, 16  ;;  %v526_v24 = vshll.u32 %v436_v62, 16  ;;  %v438_v37 = vld [vmem:[%s9702_s10 + $0x24] sm:$0xf] }
  0x40   : > { %v808_v25 = vsel %vm9721_vm7, %v520_v3, %v807_v4  ;;  %v1266_v28 = vrot.slane %v1264_v7, 1  ;;  %v9864_v31 = vcombine.low %v966_v15, %v9855_v16  ;;  %v1255_v30 = vsel %vm1219_vm10, %v1250_v13, %v1254_v14  ;;  %v390_v42 = vld [vmem:[#allocation2 + $0x44] sm:$0x1]  ;;  %v337_v47 = vld [vmem:[#allocation2 + $0x48] sm:$0x1] }
  0x41   : > { %1414 = vrot.lane.b32.xlu0 %v1243_v39, %s9612_s14  ;;  %v1262_v27 = vor.u32 %v1261_v19, %v1257_v63  ;;  %809 = vst [vmem:[#allocation2 + $0x30] sm:$0xf] %v808_v25  ;;  %v521_v21 = vrot.slane %v9817_v36, 4  ;;  %v525_v38 = vrot.slane %v523_v23, 7  ;;  %v388_v40 = vsel %vm9692_vm5, 0, %v387_v18 }
  0x42   : > { %v2256_v43 = vsel %vm1219_vm10, %v2251_v53, %v2255_v17  ;;  %v2520_v44 = vrot.slane %v7819_v5, 1  ;;  %v2521_v45 = vrot.slane %v9795_v10, 1  ;;  %v1502_v46 = vrot.slane %v7725_v20, 1  ;;  %389 = vst [vmem:[#allocation2 + $0x38] sm:$0x1] %v388_v40 }
  0x43   : > { %2439 = vrot.lane.b32.xlu1 %v2268_v9, %s9616_s22  ;;  %v1503_v48 = vrot.slane %v9831_v50, 1  ;;  %v1499_v29 = vrot.slane %v7724_v22, 1  ;;  %v1500_v36 = vrot.slane %v9810_v32, 1  ;;  %v528_v49 = vor.u32 %v526_v24, %v525_v38  ;;  %v9877_v51 = vld [vmem:[#allocation2 + $0x2c] ss:$0 sps:$4 sm:$0x11]  }
  0x44   : > { %v1267_v52 = vsel %vm1219_vm10, %v1262_v27, %v1266_v28  ;;  %v1760_v54 = vshll.u32 %v9864_v31, 16  ;;  %v335_v10 = vsel %vm9675_vm3, 0, %v334_v26  ;;  %v532_v55 = vshrl.u32 %v437_v33, 16  ;;  %v439_v56 = vld [vmem:[%s9702_s10 + $0x28] sm:$0xf] }
  0x45   : > { %1925 = vrot.lane.b32.xlu0 %v1744_v12, %s9615_s21  ;;  %v529_v50 = vsel %vm9729_vm8, %v521_v21, %v528_v49  ;;  %336 = vst [vmem:[#allocation2 + $0x3c] sm:$0x1] %v335_v10  ;;  %v535_v32 = vshll.u32 %v437_v33, 16  ;;  %v540_v57 = vshrl.u32 %v438_v37, 16  ;;  %v543_v59 = vshll.u32 %v438_v37, 16 }
  0x46   : > { %v530_v60 = vrot.slane %v525_v38, 4  ;;  %810 = vst.msk [vmem:[#allocation2 + $0x34] sm:$0xf] %vm12552_vm0, %v529_v50  ;;  %v534_v62 = vrot.slane %v532_v55, 7  ;;  %v391_v39 = vsel %vm9692_vm5, 0, %v390_v42  ;;  %v338_v0 = vsel %vm9675_vm3, 0, %v337_v47 }
  0x47   : > { %1416 = vrot.lane.b32.xlu1 %v1255_v30, %s9612_s14  ;;  %v2522_v2 = vsel %vm1492_vm9, %v2520_v44, %v2521_v45  ;;  %v1504_v3 = vsel %vm1492_vm9, %v1502_v46, %v1503_v48  ;;  %v542_v4 = vrot.slane %v540_v57, 7  ;;  %392 = vst [vmem:[#allocation2 + $0x44] sm:$0x1] %v391_v39  ;;  %339 = vst [vmem:[#allocation2 + $0x48] sm:$0x1] %v338_v0  ;;  %v549_v63 = vshrl.u32 %v439_v56, 16 }
  0x48   : > { %v440_v5 = vld [vmem:[%s9702_s10 + $0x2c] sm:$0xf]  ;;  %v393_v6 = vld [vmem:[#allocation2 + $0x50] sm:$0x1]  ;;  %v1501_v7 = vsel %vm1492_vm9, %v1499_v29, %v1500_v36  ;;  %v1758_v9 = vshrl.u32 %v9864_v31, 16  ;;  %v1765_v12 = vshll.u32 %v9877_v51, 16  ;;  %v537_v17 = vor.u32 %v535_v32, %v534_v62 }
  0x49   : > { %2437 = vrot.lane.b32.xlu0 %v2256_v43, %s9616_s22  ;;  %v538_v13 = vrot.slane %v534_v62, 4  ;;  %v340_v14 = vld [vmem:[#allocation2 + $0x54] sm:$0x1]  ;;  %v811_v15 = vld [vmem:[#allocation2 + $0x38] sm:$0x1]  ;;  %v1762_v53 = vrot.slane %v1760_v54, 1  ;;  %v545_v19 = vor.u32 %v543_v59, %v542_v4 }
  0x4a   : > { %v552_v20 = vshll.u32 %v439_v56, 16  ;;  %v968_v18 = vld [vmem:[#allocation2 + $0x30] sm:$0xf]  ;;  %v812_v22 = vsel %vm9675_vm3, %v530_v60, %v811_v15  ;;  %v551_v23 = vrot.slane %v549_v63, 7  ;;  %v557_v24 = vshrl.u32 %v440_v5, 16 }
  0x4b   : > { %1418 = vrot.lane.b32.xlu1 %v1267_v52, %s9612_s14  ;;  %v394_v25 = vsel %vm9692_vm5, 0, %v393_v6  ;;  %813 = vst [vmem:[#allocation2 + $0x38] sm:$0x1] %v812_v22  ;;  %v546_v26 = vsel %vm9729_vm8, %v538_v13, %v545_v19  ;;  %v547_v27 = vrot.slane %v542_v4, 4  ;;  %v1031_v28 = vld [vmem:[#allocation2 + $0x30] sm:$0xf]  ;;  %v1763_v52 = vor.u32 %v1762_v53, %v1758_v9 }
  0x4c   : > { %v560_v33 = vshll.u32 %v440_v5, 16  ;;  %395 = vst [vmem:[#allocation2 + $0x50] sm:$0x1] %v394_v25  ;;  %v341_v37 = vsel %vm9675_vm3, 0, %v340_v14  ;;  %v1012_v30 = vld [vmem:[#allocation2 + $0x24] sm:$0xe]  ;;  %v554_v29 = vor.u32 %v552_v20, %v551_v23 }
  0x4d   : > { %2567 = vrot.lane.b32.xlu0 %v2522_v2, %s9614_s20  ;;  %v814_v21 = vld [vmem:[#allocation2 + $0x3c] sm:$0xf]  ;;  %817 = vst.msk [vmem:[#allocation2 + $0x40] sm:$0xf] %vm12552_vm0, %v546_v26  ;;  %v9911_v38 = vrot.slane %v557_v24, 7  ;;  %v1767_v42 = vrot.slane %v1765_v12, 1  ;;  %v7772_v49 = vcombine.low %v1012_v30, %v9855_v16 }
  0x4e   : > { %342 = vst [vmem:[#allocation2 + $0x54] sm:$0x1] %v341_v37  ;;  %v969_v40 = vld [vmem:[#allocation2 + $0x34] sm:$0xf]  ;;  %v815_v43 = vsel %vm9721_vm7, %v537_v17, %v814_v21  ;;  %v1013_v45 = vld [vmem:[#allocation2 + $0x30] sm:$0xe] }
  0x4f   : > { %1547 = vrot.lane.b32.xlu1 %v1504_v3, %s9609_s11  ;;  %v9915_v44 = vld [vmem:[#allocation2 + $0x34] sm:$0xf]  ;;  %v7741_v46 = vcombine.low %v968_v18, %v969_v40  ;;  %816 = vst [vmem:[#allocation2 + $0x3c] sm:$0xf] %v815_v43  ;;  %v818_v48 = vld [vmem:[#allocation2 + $0x44] sm:$0x1]  ;;  %v562_v10 = vor.u32 %v560_v33, %v9911_v38  ;;  %v7773_v57 = vcombine.low %v1013_v45, %v969_v40 }
  0x50   : > { %v9919_v47 = vcombine.low %v1031_v28, %v9915_v44  ;;  %v555_v36 = vrot.slane %v551_v23, 4  ;;  %v819_v54 = vsel %vm9675_vm3, %v547_v27, %v818_v48  ;;  %v821_v55 = vld [vmem:[#allocation2 + $0x48] sm:$0xf]  ;;  %v906_v32 = vld [vmem:[#allocation2 + $0x30] sm:$0xf]  ;;  %v1768_v2 = vsel %vm1219_vm10, %v1763_v52, %v1767_v42 }
  0x51   : > { %1545 = vrot.lane.b32.xlu0 %v1501_v7, %s9609_s11  ;;  %v1772_v56 = vshll.u32 %v7741_v46, 16  ;;  %v1770_v50 = vshrl.u32 %v7741_v46, 16  ;;  %820 = vst [vmem:[#allocation2 + $0x44] sm:$0x1] %v819_v54  ;;  %v9927_v60 = vld [vmem:[#allocation2 + $0x34] sm:$0xf]  ;;  %v822_v0 = vsel %vm9721_vm7, %v554_v29, %v821_v55 }
  0x52   : > { %v2272_v59 = vshll.u32 %v9919_v47, 16  ;;  %v9206_v16 = vld [vmem:[#allocation2 + $0x38] ss:$0 sps:$4 sm:$0x11]   ;;  %v563_v39 = vsel %vm9729_vm8, %v555_v36, %v562_v10  ;;  %v2011_v3 = vrot.slane %v7772_v49, 1  ;;  %v2012_v4 = vrot.slane %v9877_v51, 1 }
  0x53   : > { %1659 = vrot.lane.b32.xlu1 %v7741_v46, %s9610_s12  ;;  %v1774_v62 = vrot.slane %v1772_v56, 1  ;;  %823 = vst [vmem:[#allocation2 + $0x48] sm:$0xf] %v822_v0  ;;  %824 = vst.msk [vmem:[#allocation2 + $0x4c] sm:$0xf] %vm12552_vm0, %v563_v39  ;;  %v2014_v9 = vrot.slane %v7773_v57, 1  ;;  %v9943_v14 = vcombine.low %v906_v32, %v9927_v60 }
  0x54   : > { %v9937_v5 = vld [vmem:[#allocation2 + $0x40] sm:$0xf]  ;;  %v1077_v6 = vld [vmem:[#allocation2 + $0x30] sm:$0xe]  ;;  %v2015_v12 = vrot.slane %v9206_v16, 1  ;;  %v2270_v53 = vshrl.u32 %v9919_v47, 16  ;;  %v2013_v20 = vsel %vm1492_vm9, %v2011_v3, %v2012_v4 }
  0x55   : > { %1657 = vrot.lane.b32.xlu0 %v9864_v31, %s9610_s12  ;;  %v1775_v63 = vor.u32 %v1774_v62, %v1770_v50  ;;  %v1777_v31 = vshll.u32 %v9206_v16, 16  ;;  %v9940_v7 = vld [vmem:[#allocation2 + $0x38] ss:$0 sps:$4 sm:$0x11]   ;;  %v2274_v17 = vrot.slane %v2272_v59, 1  ;;  %v7820_v27 = vcombine.low %v1077_v6, %v9915_v44 }
  0x56   : > { %v1033_v13 = vld [vmem:[#allocation2 + $0x3c] sm:$0xf]  ;;  %v2277_v22 = vshll.u32 %v9940_v7, 16  ;;  %v9953_v25 = vld [vmem:[#allocation2 + $0x40] sm:$0xf]  ;;  %v2016_v26 = vsel %vm1492_vm9, %v2014_v9, %v2015_v12  ;;  %v1271_v33 = vshll.u32 %v9943_v14, 16 }
  0x57   : > { %v1779_v15 = vrot.slane %v1777_v31, 1  ;;  %v7789_v51 = vcombine.low %v1033_v13, %v9937_v5  ;;  %v908_v19 = vld [vmem:[#allocation2 + $0x3c] sm:$0xf]  ;;  %v9958_v28 = vld [vmem:[#allocation2 + $0x38] ss:$0 sps:$4 sm:$0x11]   ;;  %v2275_v42 = vor.u32 %v2274_v17, %v2270_v53 }
  0x58   : > { %v9949_v18 = vld [vmem:[#allocation2 + $0x44] ss:$0 sps:$4 sm:$0x11]   ;;  %v9964_v40 = vcombine.low %v908_v19, %v9953_v25  ;;  %v2279_v43 = vrot.slane %v2277_v22, 1  ;;  %v950_v45 = vld [vmem:[#allocation2 + $0x30] sm:$0xe] }
  0x59   : > { %1929 = vrot.lane.b32.xlu0 %v1768_v2, %s9615_s21  ;;  %v1780_v23 = vsel %vm1219_vm10, %v1775_v63, %v1779_v15  ;;  %v2284_v24 = vshll.u32 %v7789_v51, 16  ;;  %v2282_v37 = vshrl.u32 %v7789_v51, 16  ;;  %v2289_v21 = vshll.u32 %v9949_v18, 16  ;;  %v441_v46 = vld [vmem:[%s9702_s10 + $0x30] sm:$0xf] }
  0x5a   : > { %1931 = vrot.lane.b32.xlu1 %v1780_v23, %s9615_s21  ;;  %v1078_v48 = vld [vmem:[#allocation2 + $0x3c] sm:$0xe]  ;;  %v1269_v44 = vshrl.u32 %v9943_v14, 16  ;;  %v9968_v29 = vld [vmem:[#allocation2 + $0x44] ss:$0 sps:$4 sm:$0x11]   ;;  %v2280_v59 = vsel %vm1219_vm10, %v2275_v42, %v2279_v43  ;;  %v7726_v16 = vcombine.low %v950_v45, %v9927_v60 }
  0x5b   : > { %v2286_v30 = vrot.slane %v2284_v24, 1  ;;  %v1273_v36 = vrot.slane %v1271_v33, 1  ;;  %v1276_v49 = vshll.u32 %v9958_v28, 16  ;;  %v2523_v52 = vrot.slane %v7820_v27, 1  ;;  %v442_v10 = vld [vmem:[%s9702_s10 + $0x34] sm:$0xf] }
  0x5c   : > { %v2524_v54 = vrot.slane %v9940_v7, 1  ;;  %v2291_v56 = vrot.slane %v2289_v21, 1  ;;  %v1283_v50 = vshll.u32 %v9964_v40, 16  ;;  %v564_v32 = vrot.slane %v9911_v38, 4  ;;  %v970_v62 = vld [vmem:[#allocation2 + $0x3c] sm:$0xf] }
  0x5d   : > { %2057 = vrot.lane.b32.xlu0 %v2013_v20, %s9613_s15  ;;  %v2287_v55 = vor.u32 %v2286_v30, %v2282_v37  ;;  %v7821_v57 = vcombine.low %v1078_v48, %v9937_v5  ;;  %v9981_v39 = vld [vmem:[#allocation2 + $0x40] sm:$0xf]  ;;  %v825_v0 = vld [vmem:[#allocation2 + $0x50] sm:$0x1]  ;;  %v1288_v2 = vshll.u32 %v9968_v29, 16  ;;  %v566_v3 = vshrl.u32 %v441_v46, 16 }
  0x5e   : > { %2059 = vrot.lane.b32.xlu1 %v2016_v26, %s9613_s15  ;;  %v1274_v4 = vor.u32 %v1273_v36, %v1269_v44  ;;  %v1278_v63 = vrot.slane %v1276_v49, 1  ;;  %v951_v31 = vld [vmem:[#allocation2 + $0x3c] sm:$0xe]  ;;  %v826_v38 = vsel %vm9675_vm3, %v564_v32, %v825_v0  ;;  %v569_v5 = vshll.u32 %v441_v46, 16  ;;  %v972_v9 = vld [vmem:[#allocation2 + $0x48] sm:$0xf] }
  0x5f   : > { %v2292_v6 = vsel %vm1219_vm10, %v2287_v55, %v2291_v56  ;;  %v1281_v60 = vshrl.u32 %v9964_v40, 16  ;;  %v1285_v7 = vrot.slane %v1283_v50, 1  ;;  %v9990_v12 = vld [vmem:[#allocation2 + $0x4c] sm:$0xf]  ;;  %v9993_v13 = vcombine.low %v970_v62, %v9981_v39  ;;  %827 = vst [vmem:[#allocation2 + $0x50] sm:$0x1] %v826_v38 }
  0x60   : > { %v2525_v15 = vsel %vm1492_vm9, %v2523_v52, %v2524_v54  ;;  %v2527_v53 = vrot.slane %v9949_v18, 1  ;;  %v1505_v17 = vrot.slane %v7726_v16, 1  ;;  %v396_v19 = vld [vmem:[#allocation2 + $0x5c] sm:$0x1]  ;;  %v1290_v20 = vrot.slane %v1288_v2, 1 }
  0x61   : > { %2169 = vrot.lane.b32.xlu0 %v9919_v47, %s9611_s13  ;;  %v574_v47 = vshrl.u32 %v442_v10, 16  ;;  %v7727_v22 = vcombine.low %v951_v31, %v9953_v25  ;;  %v1014_v23 = vld [vmem:[#allocation2 + $0x3c] sm:$0xe]  ;;  %v568_v24 = vrot.slane %v566_v3, 7  ;;  %v1279_v27 = vsel %vm1219_vm10, %v1274_v4, %v1278_v63  ;;  %v828_v21 = vld [vmem:[#allocation2 + $0x54] sm:$0xf] }
  0x62   : > { %2171 = vrot.lane.b32.xlu1 %v7789_v51, %s9611_s13  ;;  %v2526_v51 = vrot.slane %v7821_v57, 1  ;;  %v10001_v33 = vcombine.low %v972_v9, %v9990_v12  ;;  %v10003_v37 = vld [vmem:[#allocation2 + $0x44] ss:$0 sps:$4 sm:$0x11]   ;;  %v577_v30 = vshll.u32 %v442_v10, 16  ;;  %v1286_v18 = vor.u32 %v1285_v7, %v1281_v60 }
  0x63   : > { %v576_v26 = vrot.slane %v574_v47, 7  ;;  %v1784_v42 = vshll.u32 %v9993_v13, 16  ;;  %v571_v25 = vor.u32 %v569_v5, %v568_v24  ;;  %v572_v43 = vrot.slane %v568_v24, 4  ;;  %v1035_v54 = vld [vmem:[#allocation2 + $0x48] sm:$0xf] }
  0x64   : > { %v2528_v45 = vsel %vm1492_vm9, %v2526_v51, %v2527_v53  ;;  %v1506_v46 = vrot.slane %v9958_v28, 1  ;;  %v397_v44 = vsel %vm9692_vm5, 0, %v396_v19  ;;  %v1508_v36 = vrot.slane %v7727_v22, 1  ;;  %v10014_v10 = vld [vmem:[#allocation2 + $0x4c] sm:$0xf] }
  0x65   : > { %2441 = vrot.lane.b32.xlu0 %v2280_v59, %s9616_s22  ;;  %v579_v48 = vor.u32 %v577_v30, %v576_v26  ;;  %v1509_v49 = vrot.slane %v9968_v29, 1  ;;  %v829_v52 = vsel %vm9721_vm7, %v571_v25, %v828_v21  ;;  %398 = vst [vmem:[#allocation2 + $0x5c] sm:$0x1] %v397_v44  ;;  %v1796_v55 = vshll.u32 %v10001_v33, 16  ;;  %v343_v0 = vld [vmem:[#allocation2 + $0x60] sm:$0x1] }
  0x66   : > { %2443 = vrot.lane.b32.xlu1 %v2292_v6, %s9616_s22  ;;  %v7774_v28 = vcombine.low %v1014_v23, %v9981_v39  ;;  %v10019_v56 = vld [vmem:[#allocation2 + $0x50] ss:$0 sps:$4 sm:$0x11]   ;;  %830 = vst [vmem:[#allocation2 + $0x54] sm:$0xf] %v829_v52  ;;  %v1291_v29 = vsel %vm1219_vm10, %v1286_v18, %v1290_v20  ;;  %v1782_v32 = vshrl.u32 %v9993_v13, 16  ;;  %v1507_v16 = vsel %vm1492_vm9, %v1505_v17, %v1506_v46 }
  0x67   : > { %v580_v50 = vsel %vm9729_vm8, %v572_v43, %v579_v48  ;;  %v1786_v57 = vrot.slane %v1784_v42, 1  ;;  %v1789_v59 = vshll.u32 %v10003_v37, 16  ;;  %v581_v62 = vrot.slane %v576_v26, 4  ;;  %v443_v2 = vld [vmem:[%s9702_s10 + $0x38] sm:$0xf] }
  0x68   : > { %831 = vst.msk [vmem:[#allocation2 + $0x58] sm:$0xf] %vm12552_vm0, %v580_v50  ;;  %v10030_v39 = vcombine.low %v1035_v54, %v10014_v10  ;;  %v1015_v3 = vld [vmem:[#allocation2 + $0x48] sm:$0xe]  ;;  %v1794_v47 = vshrl.u32 %v10001_v33, 16  ;;  %v1798_v4 = vrot.slane %v1796_v55, 1  ;;  %v1510_v31 = vsel %vm1492_vm9, %v1508_v36, %v1509_v49 }
  0x69   : > { %2569 = vrot.lane.b32.xlu0 %v2525_v15, %s9614_s20  ;;  %v1801_v63 = vshll.u32 %v10019_v56, 16  ;;  %v1787_v38 = vor.u32 %v1786_v57, %v1782_v32  ;;  %v1791_v5 = vrot.slane %v1789_v59, 1  ;;  %v2017_v6 = vrot.slane %v7774_v28, 1  ;;  %v1079_v60 = vld [vmem:[#allocation2 + $0x48] sm:$0xe] }
  0x6a   : > { %1420 = vrot.lane.b32.xlu1 %v1279_v27, %s9612_s14  ;;  %v444_v7 = vld [vmem:[%s9702_s10 + $0x3c] sm:$0xf]  ;;  %v910_v15 = vld [vmem:[#allocation2 + $0x48] sm:$0xf]  ;;  %v344_v51 = vsel %vm9675_vm3, 0, %v343_v0  ;;  %v583_v53 = vshrl.u32 %v443_v2, 16  ;;  %v7775_v17 = vcombine.low %v1015_v3, %v9990_v12  ;;  %v1799_v26 = vor.u32 %v1798_v4, %v1794_v47 }
  0x6b   : > { %v2018_v19 = vrot.slane %v10003_v37, 1  ;;  %v2296_v22 = vshll.u32 %v10030_v39, 16  ;;  %v10046_v24 = vld [vmem:[#allocation2 + $0x4c] sm:$0xf]  ;;  %345 = vst [vmem:[#allocation2 + $0x60] sm:$0x1] %v344_v51  ;;  %v1792_v12 = vsel %vm1219_vm10, %v1787_v38, %v1791_v5  ;;  %v7822_v18 = vcombine.low %v1079_v60, %v10014_v10 }
  0x6c   : > { %v832_v9 = vld [vmem:[#allocation2 + $0x5c] sm:$0x1]  ;;  %v1803_v27 = vrot.slane %v1801_v63, 1  ;;  %v10051_v21 = vld [vmem:[#allocation2 + $0x50] ss:$0 sps:$4 sm:$0x11]   ;;  %v10061_v42 = vcombine.low %v910_v15, %v10046_v24 }
  0x6d   : > { %2571 = vrot.lane.b32.xlu0 %v2528_v45, %s9614_s20  ;;  %v1037_v20 = vld [vmem:[#allocation2 + $0x54] sm:$0xf]  ;;  %v833_v23 = vsel %vm9675_vm3, %v581_v62, %v832_v9  ;;  %v585_v25 = vrot.slane %v583_v53, 7  ;;  %v586_v43 = vshll.u32 %v443_v2, 16  ;;  %v591_v45 = vshrl.u32 %v444_v7, 16 }
  0x6e   : > { %1422 = vrot.lane.b32.xlu1 %v1291_v29, %s9612_s14  ;;  %834 = vst [vmem:[#allocation2 + $0x5c] sm:$0x1] %v833_v23  ;;  %v399_v46 = vld [vmem:[#allocation2 + $0x68] sm:$0x1]  ;;  %v2020_v48 = vrot.slane %v7775_v17, 1  ;;  %v2021_v44 = vrot.slane %v10019_v56, 1  ;;  %v1804_v52 = vsel %vm1219_vm10, %v1799_v26, %v1803_v27  ;;  %v2019_v54 = vsel %vm1492_vm9, %v2017_v6, %v2018_v19 }
  0x6f   : > { %v10049_v30 = vld [vmem:[#allocation2 + $0x58] sm:$0xf]  ;;  %v2294_v36 = vshrl.u32 %v10030_v39, 16  ;;  %v346_v49 = vld [vmem:[#allocation2 + $0x6c] sm:$0x1]  ;;  %v2301_v10 = vshll.u32 %v10051_v21, 16  ;;  %v588_v50 = vor.u32 %v586_v43, %v585_v25 }
  0x70   : > { %v10057_v37 = vcombine.low %v1037_v20, %v10049_v30  ;;  %v10070_v55 = vld [vmem:[#allocation2 + $0x50] ss:$0 sps:$4 sm:$0x11]   ;;  %v912_v28 = vld [vmem:[#allocation2 + $0x54] sm:$0xf]  ;;  %v589_v32 = vrot.slane %v585_v25, 4  ;;  %v2022_v38 = vsel %vm1492_vm9, %v2020_v48, %v2021_v44 }
  0x71   : > { %1549 = vrot.lane.b32.xlu0 %v1507_v16, %s9609_s11  ;;  %v10074_v29 = vld [vmem:[#allocation2 + $0x58] sm:$0xf]  ;;  %v593_v57 = vrot.slane %v591_v45, 7  ;;  %v1295_v59 = vshll.u32 %v10061_v42, 16  ;;  %v2529_v16 = vrot.slane %v7822_v18, 1  ;;  %v400_v0 = vsel %vm9692_vm5, 0, %v399_v46 }
  0x72   : > { %1551 = vrot.lane.b32.xlu1 %v1510_v31, %s9609_s11  ;;  %v2308_v56 = vshll.u32 %v10057_v37, 16  ;;  %v835_v62 = vld [vmem:[#allocation2 + $0x60] sm:$0xf]  ;;  %v347_v2 = vsel %vm9675_vm3, 0, %v346_v49  ;;  %v2530_v63 = vrot.slane %v10051_v21, 1  ;;  %v2303_v5 = vrot.slane %v2301_v10, 1 }
  0x73   : > { %v445_v3 = vld [vmem:[%s9702_s10 + $0x40] sm:$0xf]  ;;  %401 = vst [vmem:[#allocation2 + $0x68] sm:$0x1] %v400_v0  ;;  %348 = vst [vmem:[#allocation2 + $0x6c] sm:$0x1] %v347_v2  ;;  %v10088_v6 = vcombine.low %v912_v28, %v10074_v29 }
  0x74   : > { %v952_v60 = vld [vmem:[#allocation2 + $0x48] sm:$0xe]  ;;  %v2306_v9 = vshrl.u32 %v10057_v37, 16  ;;  %v2310_v15 = vrot.slane %v2308_v56, 1  ;;  %v1300_v17 = vshll.u32 %v10070_v55, 16  ;;  %v1297_v23 = vrot.slane %v1295_v59, 1 }
  0x75   : > { %1661 = vrot.lane.b32.xlu0 %v9993_v13, %s9610_s12  ;;  %v2298_v13 = vrot.slane %v2296_v22, 1  ;;  %v10082_v47 = vld [vmem:[#allocation2 + $0x5c] ss:$0 sps:$4 sm:$0x11]   ;;  %v446_v19 = vld [vmem:[%s9702_s10 + $0x44] sm:$0xf]  ;;  %v7728_v43 = vcombine.low %v952_v60, %v10046_v24 }
  0x76   : > { %1663 = vrot.lane.b32.xlu1 %v10001_v33, %s9610_s12  ;;  %v594_v33 = vshll.u32 %v444_v7, 16  ;;  %v836_v7 = vsel %vm9721_vm7, %v588_v50, %v835_v62  ;;  %v2313_v51 = vshll.u32 %v10082_v47, 16  ;;  %v1080_v20 = vld [vmem:[#allocation2 + $0x54] sm:$0xe]  ;;  %v1293_v22 = vshrl.u32 %v10061_v42, 16 }
  0x77   : > { %v2299_v4 = vor.u32 %v2298_v13, %v2294_v36  ;;  %837 = vst [vmem:[#allocation2 + $0x60] sm:$0xf] %v836_v7  ;;  %v598_v26 = vrot.slane %v593_v57, 4  ;;  %v600_v27 = vshrl.u32 %v445_v3, 16  ;;  %v1307_v18 = vshll.u32 %v10088_v6, 16 }
  0x78   : > { %v596_v31 = vor.u32 %v594_v33, %v593_v57  ;;  %v953_v25 = vld [vmem:[#allocation2 + $0x54] sm:$0xe]  ;;  %v402_v45 = vld [vmem:[#allocation2 + $0x74] sm:$0x1]  ;;  %v2311_v46 = vor.u32 %v2310_v15, %v2306_v9  ;;  %v2315_v48 = vrot.slane %v2313_v51, 1  ;;  %v603_v13 = vshll.u32 %v445_v3, 16 }
  0x79   : > { %1933 = vrot.lane.b32.xlu0 %v1792_v12, %s9615_s21  ;;  %v2304_v21 = vsel %vm1219_vm10, %v2299_v4, %v2303_v5  ;;  %v2531_v12 = vsel %vm1492_vm9, %v2529_v16, %v2530_v63  ;;  %v10108_v44 = vld [vmem:[#allocation2 + $0x5c] ss:$0 sps:$4 sm:$0x11]   ;;  %v602_v36 = vrot.slane %v600_v27, 7  ;;  %v7823_v49 = vcombine.low %v1080_v20, %v10049_v30  ;;  %v974_v24 = vld [vmem:[#allocation2 + $0x54] sm:$0xf] }
  0x7a   : > { %1935 = vrot.lane.b32.xlu1 %v1804_v52, %s9615_s21  ;;  %v597_v53 = vsel %vm9729_vm8, %v589_v32, %v596_v31  ;;  %v1302_v52 = vrot.slane %v1300_v17, 1  ;;  %v608_v10 = vshrl.u32 %v446_v19, 16  ;;  %v611_v28 = vshll.u32 %v446_v19, 16  ;;  %v10112_v32 = vld [vmem:[#allocation2 + $0x58] sm:$0xf] }
  0x7b   : > { %838 = vst.msk [vmem:[#allocation2 + $0x64] sm:$0xf] %vm12552_vm0, %v597_v53  ;;  %v1298_v50 = vor.u32 %v1297_v23, %v1293_v22  ;;  %v7729_v56 = vcombine.low %v953_v25, %v10074_v29  ;;  %v605_v57 = vor.u32 %v603_v13, %v602_v36  ;;  %v842_v33 = vld [vmem:[#allocation2 + $0x6c] sm:$0xf]  ;;  %v1305_v30 = vshrl.u32 %v10088_v6, 16 }
  0x7c   : > { %v606_v59 = vrot.slane %v602_v36, 4  ;;  %v610_v16 = vrot.slane %v608_v10, 7  ;;  %v403_v62 = vsel %vm9692_vm5, 0, %v402_v45  ;;  %v2316_v29 = vsel %vm1219_vm10, %v2311_v46, %v2315_v48 }
  0x7d   : > { %2061 = vrot.lane.b32.xlu0 %v2019_v54, %s9613_s15  ;;  %v839_v54 = vld [vmem:[#allocation2 + $0x68] sm:$0x1]  ;;  %v1309_v0 = vrot.slane %v1307_v18, 1  ;;  %v1312_v2 = vshll.u32 %v10108_v44, 16  ;;  %v843_v3 = vsel %vm9721_vm7, %v605_v57, %v842_v33  ;;  %404 = vst [vmem:[#allocation2 + $0x74] sm:$0x1] %v403_v62  ;;  %v10130_v5 = vcombine.low %v974_v24, %v10112_v32 }
  0x7e   : > { %2063 = vrot.lane.b32.xlu1 %v2022_v38, %s9613_s15  ;;  %v2532_v4 = vrot.slane %v7823_v49, 1  ;;  %v2533_v63 = vrot.slane %v10082_v47, 1  ;;  %v976_v31 = vld [vmem:[#allocation2 + $0x60] sm:$0xf]  ;;  %v613_v60 = vor.u32 %v611_v28, %v610_v16  ;;  %844 = vst [vmem:[#allocation2 + $0x6c] sm:$0xf] %v843_v3  ;;  %v1303_v51 = vsel %vm1219_vm10, %v1298_v50, %v1302_v52 }
  0x7f   : > { %v1511_v7 = vrot.slane %v7728_v43, 1  ;;  %v1039_v9 = vld [vmem:[#allocation2 + $0x60] sm:$0xf]  ;;  %v1514_v53 = vrot.slane %v7729_v56, 1  ;;  %v1512_v17 = vrot.slane %v10070_v55, 1  ;;  %v1310_v20 = vor.u32 %v1309_v0, %v1305_v30 }
  0x80   : > { %v1016_v47 = vld [vmem:[#allocation2 + $0x54] sm:$0xe]  ;;  %v614_v19 = vsel %vm9729_vm8, %v606_v59, %v613_v60  ;;  %v1314_v22 = vrot.slane %v1312_v2, 1  ;;  %v615_v27 = vrot.slane %v610_v16, 4  ;;  %v1808_v55 = vshll.u32 %v10130_v5, 16 }
  0x81   : > { %2173 = vrot.lane.b32.xlu0 %v10030_v39, %s9611_s13  ;;  %v840_v39 = vsel %vm9675_vm3, %v598_v26, %v839_v54  ;;  %v10143_v26 = vld [vmem:[#allocation2 + $0x5c] ss:$0 sps:$4 sm:$0x11]   ;;  %845 = vst.msk [vmem:[#allocation2 + $0x70] sm:$0xf] %vm12552_vm0, %v614_v19  ;;  %v1515_v25 = vrot.slane %v10108_v44, 1  ;;  %v7776_v45 = vcombine.low %v1016_v47, %v10112_v32  ;;  %v1513_v10 = vsel %vm1492_vm9, %v1511_v7, %v1512_v17 }
  0x82   : > { %2175 = vrot.lane.b32.xlu1 %v10057_v37, %s9611_s13  ;;  %841 = vst [vmem:[#allocation2 + $0x68] sm:$0x1] %v840_v39  ;;  %v349_v37 = vld [vmem:[#allocation2 + $0x78] sm:$0x1]  ;;  %v10127_v38 = vld [vmem:[#allocation2 + $0x64] sm:$0xf]  ;;  %v1315_v36 = vsel %vm1219_vm10, %v1310_v20, %v1314_v22 }
  0x83   : > { %v10132_v15 = vld [vmem:[#allocation2 + $0x64] sm:$0xf]  ;;  %v10141_v23 = vcombine.low %v976_v31, %v10127_v38  ;;  %v1017_v43 = vld [vmem:[#allocation2 + $0x60] sm:$0xe]  ;;  %v1813_v49 = vshll.u32 %v10143_v26, 16  ;;  %v1806_v28 = vshrl.u32 %v10130_v5, 16  ;;  %v1516_v39 = vsel %vm1492_vm9, %v1514_v53, %v1515_v25 }
  0x84   : > { %v10149_v18 = vcombine.low %v1039_v9, %v10132_v15  ;;  %v846_v48 = vld [vmem:[#allocation2 + $0x74] sm:$0x1]  ;;  %v914_v44 = vld [vmem:[#allocation2 + $0x60] sm:$0xf]  ;;  %v915_v54 = vld [vmem:[#allocation2 + $0x64] sm:$0xf]  ;;  %v7777_v57 = vcombine.low %v1017_v43, %v10127_v38 }
  0x85   : > { %2445 = vrot.lane.b32.xlu0 %v2304_v21, %s9616_s22  ;;  %v2534_v21 = vsel %vm1492_vm9, %v2532_v4, %v2533_v63  ;;  %v1820_v13 = vshll.u32 %v10141_v23, 16  ;;  %v847_v52 = vsel %vm9675_vm3, %v615_v27, %v846_v48  ;;  %v1810_v50 = vrot.slane %v1808_v55, 1  ;;  %v1081_v32 = vld [vmem:[#allocation2 + $0x60] sm:$0xe]  ;;  %v1041_v3 = vld [vmem:[#allocation2 + $0x6c] sm:$0xf] }
  0x86   : > { %2447 = vrot.lane.b32.xlu1 %v2316_v29, %s9616_s22  ;;  %v2320_v56 = vshll.u32 %v10149_v18, 16  ;;  %848 = vst [vmem:[#allocation2 + $0x74] sm:$0x1] %v847_v52  ;;  %v2023_v24 = vrot.slane %v7776_v45, 1  ;;  %v10168_v30 = vcombine.low %v914_v44, %v915_v54  ;;  %v1818_v59 = vshrl.u32 %v10141_v23, 16 }
  0x87   : > { %v1822_v16 = vrot.slane %v1820_v13, 1  ;;  %v1815_v62 = vrot.slane %v1813_v49, 1  ;;  %v2024_v29 = vrot.slane %v10143_v26, 1  ;;  %v954_v0 = vld [vmem:[#allocation2 + $0x60] sm:$0xe]  ;;  %v1811_v2 = vor.u32 %v1810_v50, %v1806_v28 }
  0x88   : > { %v7824_v4 = vcombine.low %v1081_v32, %v10132_v15  ;;  %v2318_v63 = vshrl.u32 %v10149_v18, 16  ;;  %v2322_v31 = vrot.slane %v2320_v56, 1  ;;  %v2026_v9 = vrot.slane %v7777_v57, 1  ;;  %v447_v17 = vld [vmem:[%s9702_s10 + $0x48] sm:$0xf] }
  0x89   : > { %2573 = vrot.lane.b32.xlu0 %v2531_v12, %s9614_s20  ;;  %v350_v12 = vsel %vm9675_vm3, 0, %v349_v37  ;;  %v9242_v46 = vld [vmem:[#allocation2 + $0x68] ss:$0 sps:$4 sm:$0x11]   ;;  %v10173_v37 = vld [vmem:[#allocation2 + $0x70] sm:$0xf]  ;;  %v1823_v47 = vor.u32 %v1822_v16, %v1818_v59  ;;  %v1816_v22 = vsel %vm1219_vm10, %v1811_v2, %v1815_v62  ;;  %v7730_v27 = vcombine.low %v954_v0, %v915_v54 }
  0x8a   : > { %351 = vst [vmem:[#allocation2 + $0x78] sm:$0x1] %v350_v12  ;;  %1424 = vrot.lane.b32.xlu1 %v1303_v51, %s9612_s14  ;;  %v1825_v33 = vshll.u32 %v9242_v46, 16  ;;  %v9249_v38 = vld [vmem:[#allocation2 + $0x68] ss:$0 sps:$4 sm:$0x11]   ;;  %v10185_v15 = vcombine.low %v1041_v3, %v10173_v37  ;;  %v2025_v55 = vsel %vm1492_vm9, %v2023_v24, %v2024_v29  ;;  %v2323_v25 = vor.u32 %v2322_v31, %v2318_v63 }
  0x8b   : > { %v10177_v60 = vld [vmem:[#allocation2 + $0x68] ss:$0 sps:$4 sm:$0x11]   ;;  %v2027_v51 = vrot.slane %v9242_v46, 1  ;;  %v1319_v53 = vshll.u32 %v10168_v30, 16  ;;  %v2535_v26 = vrot.slane %v7824_v4, 1 }
  0x8c   : > { %v1827_v7 = vrot.slane %v1825_v33, 1  ;;  %v916_v19 = vld [vmem:[#allocation2 + $0x6c] sm:$0xf]  ;;  %v10187_v20 = vld [vmem:[#allocation2 + $0x70] sm:$0xf]  ;;  %v2325_v43 = vshll.u32 %v9249_v38, 16 }
  0x8d   : > { %2575 = vrot.lane.b32.xlu0 %v2534_v21, %s9614_s20  ;;  %v448_v21 = vld [vmem:[%s9702_s10 + $0x4c] sm:$0xf]  ;;  %v1324_v45 = vshll.u32 %v10177_v60, 16  ;;  %v1317_v46 = vshrl.u32 %v10168_v30, 16  ;;  %v1321_v48 = vrot.slane %v1319_v53, 1  ;;  %v2332_v49 = vshll.u32 %v10185_v15, 16 }
  0x8e   : > { %1426 = vrot.lane.b32.xlu1 %v1315_v36, %s9612_s14  ;;  %v1082_v12 = vld [vmem:[#allocation2 + $0x6c] sm:$0xe]  ;;  %v10198_v36 = vcombine.low %v916_v19, %v10187_v20  ;;  %v1828_v13 = vsel %vm1219_vm10, %v1823_v47, %v1827_v7  ;;  %v10203_v52 = vld [vmem:[#allocation2 + $0x74] ss:$0 sps:$4 sm:$0x11]   ;;  %v617_v44 = vshrl.u32 %v447_v17, 16 }
  0x8f   : > { %v620_v54 = vshll.u32 %v447_v17, 16  ;;  %v2536_v28 = vrot.slane %v9249_v38, 1  ;;  %v10208_v50 = vrot.slane %v7730_v27, 1  ;;  %v625_v56 = vshrl.u32 %v448_v21, 16  ;;  %v405_v59 = vld [vmem:[#allocation2 + $0x80] sm:$0x1] }
  0x90   : > { %v9264_v24 = vld [vmem:[%s12541_s1 + $0x10] ss:$0 sps:$4 sm:$0x33]   ;;  %v2327_v32 = vrot.slane %v2325_v43, 1  ;;  %v619_v57 = vrot.slane %v617_v44, 7  ;;  %v628_v33 = vshll.u32 %v448_v21, 16  ;;  %v1322_v62 = vor.u32 %v1321_v48, %v1317_v46 }
  0x91   : > { %1553 = vrot.lane.b32.xlu0 %v1513_v10, %s9609_s11  ;;  %v2330_v16 = vshrl.u32 %v10185_v15, 16  ;;  %v1331_v29 = vshll.u32 %v10198_v36, 16  ;;  %v10216_v0 = vrot.slane %v625_v56, 7  ;;  %v849_v2 = vld [vmem:[#allocation2 + $0x78] sm:$0xf]  ;;  %v2334_v3 = vrot.slane %v2332_v49, 1 }
  0x92   : > { %1555 = vrot.lane.b32.xlu1 %v1516_v39, %s9609_s11  ;;  %v1326_v39 = vrot.slane %v1324_v45, 1  ;;  %v955_v4 = vld [vmem:[#allocation2 + $0x6c] sm:$0xe]  ;;  %v622_v63 = vor.u32 %v620_v54, %v619_v57  ;;  %v623_v31 = vrot.slane %v619_v57, 4  ;;  %v352_v38 = vld [vmem:[#allocation2 + $0x84] sm:$0x1] }
  0x93   : > { %v10221_v7 = vld [vmem:[%s9702_s10 + $0x50] sm:$0xf]  ;;  %v630_v53 = vor.u32 %v628_v33, %v10216_v0  ;;  %v978_v17 = vld [vmem:[#allocation2 + $0x6c] sm:$0xf]  ;;  %v406_v19 = vsel %vm9692_vm5, 0, %v405_v59  ;;  %vm12549_vm11 = vcmask 1041408  }
  0x94   : > { %v10229_v47 = vld [vmem:[#allocation2 + $0x70] sm:$0xf]  ;;  %v408_v27 = vld [vmem:[#allocation2 + $0x8c] sm:$0x1]  ;;  %407 = vst [vmem:[#allocation2 + $0x80] sm:$0x1] %v406_v19  ;;  %v10249_v48 = vsel %vm1219_vm10, %v1322_v62, %v1326_v39  ;;  %9159 = vmatprep.subr.msk.bf16.mxu0 %vm12549_vm11, %v9264_v24  ;;  %9160 = vmatprep.subr.msk.bf16.mxu1 %vm12549_vm11, %v9264_v24 }
  0x95   : > { %1665 = vrot.lane.b32.xlu0 %v10130_v5, %s9610_s12  ;;  %v2028_v5 = vsel %vm1492_vm9, %v2026_v9, %v2027_v51  ;;  %v10224_v9 = vsel %vm1492_vm9, %v2535_v26, %v2536_v28  ;;  %v1329_v26 = vshrl.u32 %v10198_v36, 16  ;;  %v355_v43 = vld [vmem:[#allocation2 + $0x90] sm:$0x1]  ;;  %v10243_v45 = vld [vmem:[%s9702_s10 + $0x58] sm:$0xf]  ;;  %v631_v49 = vsel %vm9729_vm8, %v623_v31, %v630_v53 }
  0x96   : > { %1667 = vrot.lane.b32.xlu1 %v10141_v23, %s9610_s12  ;;  %v7825_v23 = vcombine.low %v1082_v12, %v10173_v37  ;;  %v2337_v37 = vshll.u32 %v10203_v52, 16  ;;  %v850_v12 = vsel %vm9721_vm7, %v622_v63, %v849_v2  ;;  %v2916_v44 = vsel %vm12549_vm11, %v9264_v24, 0  ;;  %v411_v54 = vld [vmem:[#allocation2 + $0x98] sm:$0x1]  ;;  %852 = vst.msk [vmem:[#allocation2 + $0x7c] sm:$0xf] %vm12552_vm0, %v631_v49 }
  0x97   : > { %851 = vst [vmem:[#allocation2 + $0x78] sm:$0xf] %v850_v12  ;;  %v1333_v28 = vrot.slane %v1331_v29, 1  ;;  %v10262_v56 = vcombine.low %v978_v17, %v10229_v47  ;;  %8782 = vmatpush3.bf16.msra.mxu0 %v2916_v44  ;;  %v2539_v39 = vrot.slane %v10203_v52, 1  ;;  %v632_v57 = vrot.slane %v10216_v0, 4  ;;  %8998 = vmatpush3.bf16.msra.mxu1 %v2916_v44 }
  0x98   : > { %v10226_v51 = vrot.slane %v7825_v23, 1  ;;  %v2339_v23 = vrot.slane %v2337_v37, 1  ;;  %v353_v33 = vsel %vm9675_vm3, 0, %v352_v38  ;;  %v409_v52 = vsel %vm9692_vm5, 0, %v408_v27 }
  0x99   : > { %1937 = vrot.lane.b32.xlu0 %v1816_v22, %s9615_s21  ;;  %v10234_v22 = vld [vmem:[%s9702_s10 + $0x54] sm:$0xf]  ;;  %354 = vst [vmem:[#allocation2 + $0x84] sm:$0x1] %v353_v33  ;;  %vm2597_vm12 = vcmask 31744   ;;  %v356_v24 = vsel %vm9675_vm3, 0, %v355_v43 }
  0x9a   : > { %v10205_v10 = vpop.permute.xlu1 %1541  ;;  %1939 = vrot.lane.b32.xlu1 %v1828_v13, %s9615_s21  ;;  %v10251_v13 = vld [vmem:[#allocation2 + $0x74] ss:$0 sps:$4 sm:$0x11]   ;;  %v642_v62 = vshrl.u32 %v10234_v22, 16  ;;  %v645_v29 = vshll.u32 %v10234_v22, 16  ;;  %v654_v53 = vshll.u32 %v10243_v45, 16 }
  0x9b   : > { %410 = vst [vmem:[#allocation2 + $0x8c] sm:$0x1] %v409_v52  ;;  %v1336_v63 = vshll.u32 %v10251_v13, 16  ;;  %357 = vst [vmem:[#allocation2 + $0x90] sm:$0x1] %v356_v24  ;;  %vm2630_vm13 = vcmask 64512  }
  0x9c   : > { %v644_v31 = vrot.slane %v642_v62, 7  ;;  %v853_v38 = vld [vmem:[#allocation2 + $0x80] sm:$0x1]  ;;  %v1521_v44 = vrot.slane %v10251_v13, 1  ;;  %v2540_v13 = vsel %vm1492_vm9, %v10226_v51, %v2539_v39  ;;  %vm2663_vm14 = vcmask 97280  }
  0x9d   : > { %2065 = vrot.lane.b32.xlu0 %v2025_v55, %s9613_s15  ;;  %v2328_v55 = vsel %vm1219_vm10, %v2323_v25, %v2327_v32  ;;  %v7731_v25 = vcombine.low %v955_v4, %v10187_v20  ;;  %v10265_v20 = vld [vmem:[%s9702_s10 + $0x5c] sm:$0xf]  ;;  %v854_v12 = vsel %vm9675_vm3, %v632_v57, %v853_v38  ;;  %v1338_v57 = vrot.slane %v1336_v63, 1 }
  0x9e   : > { %2067 = vrot.lane.b32.xlu1 %v2028_v5, %s9613_s15  ;;  %v2335_v5 = vor.u32 %v2334_v3, %v2330_v16  ;;  %v358_v32 = vld [vmem:[#allocation2 + $0x9c] sm:$0x1]  ;;  %v637_v16 = vshll.u32 %v10221_v7, 16  ;;  %v651_v3 = vshrl.u32 %v10243_v45, 16  ;;  %v659_v17 = vshrl.u32 %v10265_v20, 16 }
  0x9f   : > { %v10236_v21 = vpop.permute.xlu0 %1653  ;;  %v1520_v0 = vrot.slane %v7731_v25, 1  ;;  %v359_v19 = vsel %vm9675_vm3, 0, %v358_v32  ;;  %v980_v27 = vld [vmem:[#allocation2 + $0x78] sm:$0xf]  ;;  %v647_v25 = vor.u32 %v645_v29, %v644_v31  ;;  %v1334_v45 = vor.u32 %v1333_v28, %v1329_v26  ;;  %855 = vst [vmem:[#allocation2 + $0x80] sm:$0x1] %v854_v12 }
  0xa0   : > { %v10246_v46 = vpop.permute.xlu1 %1655  ;;  %v2340_v37 = vsel %vm1219_vm10, %v2335_v5, %v2339_v23  ;;  %v10300_v49 = vrot.slane %v651_v3, 7  ;;  %360 = vst [vmem:[#allocation2 + $0x9c] sm:$0x1] %v359_v19  ;;  %v10307_v5 = vld [vmem:[#allocation2 + $0x7c] sm:$0xf]  ;;  %v649_v23 = vrot.slane %v644_v31, 4 }
  0xa1   : > { %2177 = vrot.lane.b32.xlu0 %v10149_v18, %s9611_s13  ;;  %v634_v18 = vshrl.u32 %v10221_v7, 16  ;;  %v10314_v33 = vcombine.low %v980_v27, %v10307_v5  ;;  %v10317_v26 = vld [vmem:[#allocation2 + $0x74] ss:$0 sps:$4 sm:$0x11]   ;;  %v1830_v28 = vshrl.u32 %v10262_v56, 16  ;;  %v662_v62 = vshll.u32 %v10265_v20, 16 }
  0xa2   : > { %2179 = vrot.lane.b32.xlu1 %v10185_v15, %s9611_s13  ;;  %v412_v15 = vsel %vm9692_vm5, 0, %v411_v54  ;;  %v1518_v54 = vrot.slane %v10177_v60, 1  ;;  %v10328_v52 = vld [vmem:[#allocation2 + $0x78] sm:$0xe]  ;;  %v860_v3 = vld [vmem:[#allocation2 + $0x8c] sm:$0x1]  ;;  %v656_v51 = vor.u32 %v654_v53, %v10300_v49  ;;  %v1522_v39 = vsel %vm1492_vm9, %v1520_v0, %v1521_v44 }
  0xa3   : > { %v10273_v59 = vpop.permute.xlu0 %2165  ;;  %v636_v2 = vrot.slane %v634_v18, 7  ;;  %413 = vst [vmem:[#allocation2 + $0x98] sm:$0x1] %v412_v15  ;;  %v1832_v18 = vshll.u32 %v10262_v56, 16  ;;  %v1043_v24 = vld [vmem:[#allocation2 + $0x78] sm:$0xf]  ;;  %v861_v63 = vsel %vm9675_vm3, %v649_v23, %v860_v3  ;;  %v1339_v38 = vsel %vm1219_vm10, %v1334_v45, %v1338_v57 }
  0xa4   : > { %vm2696_vm15 = vcmask 130048   ;;  %v918_v31 = vld [vmem:[#allocation2 + $0x78] sm:$0xf]  ;;  %v863_v15 = vld [vmem:[#allocation2 + $0x90] sm:$0xf]  ;;  %v1837_v19 = vshll.u32 %v10317_v26, 16 }
  0xa5   : > { %2449 = vrot.lane.b32.xlu0 %v2328_v55, %s9616_s22  ;;  %v10287_v4 = vpop.permute.xlu1 %2167  ;;  %v640_v7 = vrot.slane %v636_v2, 4  ;;  %v10296_v55 = vld [vmem:[#allocation2 + $0x6c] sm:$0xe]  ;;  %v639_v43 = vor.u32 %v637_v16, %v636_v2  ;;  %v856_v16 = vld [vmem:[#allocation2 + $0x84] sm:$0xf]  ;;  %v1834_v0 = vrot.slane %v1832_v18, 1  ;;  %v864_v44 = vsel %vm9721_vm7, %v656_v51, %v863_v15 }
  0xa6   : > { %2451 = vrot.lane.b32.xlu1 %v2340_v37, %s9616_s22  ;;  %v7778_v20 = vcombine.low %v10296_v55, %v10229_v47  ;;  %v10338_v37 = vld [vmem:[#allocation2 + $0x7c] sm:$0xf]  ;;  %v1844_v47 = vshll.u32 %v10314_v33, 16  ;;  %862 = vst [vmem:[#allocation2 + $0x8c] sm:$0x1] %v861_v63  ;;  %v657_v27 = vrot.slane %v10300_v49, 4  ;;  %v7779_v49 = vcombine.low %v10328_v52, %v10307_v5 }
  0xa7   : > { %v1413_v22 = vpop.permute.xlu0 %1412  ;;  %v648_v60 = vsel %vm9729_vm8, %v640_v7, %v647_v25  ;;  %v857_v2 = vsel %vm9721_vm7, %v639_v43, %v856_v16  ;;  %v10349_v53 = vld [vmem:[#allocation2 + $0x7c] sm:$0xf]  ;;  %vm2729_vm1 = vcmask 162816   ;;  %v10360_v45 = vcombine.low %v1043_v24, %v10338_v37  ;;  %865 = vst [vmem:[#allocation2 + $0x90] sm:$0xf] %v864_v44 }
  0xa8   : > { %859 = vst.msk [vmem:[#allocation2 + $0x88] sm:$0xf] %vm12552_vm0, %v648_v60  ;;  %858 = vst [vmem:[#allocation2 + $0x84] sm:$0xf] %v857_v2  ;;  %v2599_v43 = vsel %vm2597_vm12, %v9752_v11, %v1413_v22  ;;  %v10368_v23 = vcombine.low %v918_v31, %v10349_v53  ;;  %vm2762_vm6 = vcmask 195584   ;;  %v1842_v18 = vshrl.u32 %v10314_v33, 16 }
  0xa9   : > { %2577 = vrot.lane.b32.xlu0 %v10224_v9, %s9614_s20  ;;  %v10311_v32 = vpop.permute.xlu1 %1543  ;;  %v661_v9 = vrot.slane %v659_v17, 7  ;;  %v1846_v60 = vrot.slane %v1844_v47, 1  ;;  %v1839_v16 = vrot.slane %v1837_v19, 1  ;;  %v2632_v2 = vsel %vm2630_vm13, %v2599_v43, %v10205_v10  ;;  %v956_v31 = vld [vmem:[#allocation2 + $0x78] sm:$0xe] }
  0xaa   : > { %1428 = vrot.lane.b32.xlu1 %v10249_v48, %s9612_s14  ;;  %v1519_v48 = vsel %vm1492_vm9, %v10208_v50, %v1518_v54  ;;  %v867_v17 = vld [vmem:[#allocation2 + $0x98] sm:$0x1]  ;;  %v10357_v50 = vld [vmem:[#allocation2 + $0x80] ss:$0 sps:$4 sm:$0x11]   ;;  %vm2795_vm11 = vcmask 228352  }
  0xab   : > { %v10326_v29 = vpop.permute.xlu0 %2053  ;;  %v664_v55 = vor.u32 %v662_v62, %v661_v9  ;;  %v666_v12 = vrot.slane %v661_v9, 4  ;;  %v1083_v54 = vld [vmem:[#allocation2 + $0x78] sm:$0xe]  ;;  %v1849_v5 = vshll.u32 %v10357_v50, 16  ;;  %v2029_v9 = vrot.slane %v7778_v20, 1 }
  0xac   : > { %v2030_v62 = vrot.slane %v10317_v26, 1  ;;  %vm2828_vm4 = vcmask 261120   ;;  %vm2881_vm2 = vcmask 293888   ;;  %v2344_v51 = vshll.u32 %v10360_v45, 16 }
  0xad   : > { %2579 = vrot.lane.b32.xlu0 %v2540_v13, %s9614_s20  ;;  %v10344_v7 = vpop.permute.xlu1 %2055  ;;  %v665_v11 = vsel %vm9729_vm8, %v657_v27, %v664_v55  ;;  %v868_v22 = vsel %vm9675_vm3, %v666_v12, %v867_v17  ;;  %v1835_v13 = vor.u32 %v1834_v0, %v1830_v28  ;;  %v2032_v20 = vrot.slane %v7779_v49, 1  ;;  %v10401_v0 = vld [vmem:[#allocation2 + $0x80] ss:$0 sps:$4 sm:$0x11]  }
  0xae   : > { %1430 = vrot.lane.b32.xlu1 %v1339_v38, %s9612_s14  ;;  %866 = vst.msk [vmem:[#allocation2 + $0x94] sm:$0xf] %vm12552_vm0, %v665_v11  ;;  %869 = vst [vmem:[#allocation2 + $0x98] sm:$0x1] %v868_v22  ;;  %v7826_v26 = vcombine.low %v1083_v54, %v10338_v37  ;;  %v1343_v63 = vshll.u32 %v10368_v23, 16  ;;  %v1847_v38 = vor.u32 %v1846_v60, %v1842_v18  ;;  %v2346_v19 = vrot.slane %v2344_v51, 1 }
  0xaf   : > { %v10355_v25 = vpop.permute.xlu0 %2565  ;;  %v10379_v52 = vld [vmem:[#allocation2 + $0x88] sm:$0xf]  ;;  %v1045_v3 = vld [vmem:[#allocation2 + $0x84] sm:$0xf]  ;;  %v2665_v37 = vsel %vm2663_vm14, %v2632_v2, %v10236_v21  ;;  %v1840_v47 = vsel %vm1219_vm10, %v1835_v13, %v1839_v16  ;;  %v1341_v27 = vshrl.u32 %v10368_v23, 16  ;;  %v7732_v55 = vcombine.low %v956_v31, %v10349_v53 }
  0xb0   : > { %v10411_v12 = vld [vmem:[#allocation2 + $0x8c] ss:$0 sps:$4 sm:$0x11]   ;;  %v10413_v43 = vrot.slane %v1343_v63, 1  ;;  %v10415_v44 = vrot.slane %v7826_v26, 1  ;;  %v2542_v2 = vrot.slane %v10401_v0, 1 }
  0xb1   : > { %1557 = vrot.lane.b32.xlu0 %v1519_v48, %s9609_s11  ;;  %v1928_v57 = vpop.permute.xlu1 %1927  ;;  %v1851_v48 = vrot.slane %v1849_v5, 1  ;;  %v920_v11 = vld [vmem:[#allocation2 + $0x84] sm:$0xf]  ;;  %v10426_v22 = vld [vmem:[#allocation2 + $0x88] sm:$0xf]  ;;  %v2361_v31 = vshll.u32 %v10411_v12, 16 }
  0xb2   : > { %1559 = vrot.lane.b32.xlu1 %v1522_v39, %s9609_s11  ;;  %v10394_v39 = vcombine.low %v1045_v3, %v10379_v52  ;;  %v10435_v60 = vld [vmem:[#allocation2 + $0x80] ss:$0 sps:$4 sm:$0x11]   ;;  %v1084_v13 = vld [vmem:[#allocation2 + $0x84] sm:$0xe] }
  0xb3   : > { %v1415_v24 = vpop.permute.xlu0 %1414  ;;  %v1852_v53 = vsel %vm1219_vm10, %v1847_v38, %v1851_v48  ;;  %v10448_v51 = vld [vmem:[#allocation2 + $0x8c] ss:$0 sps:$4 sm:$0x11]   ;;  %v1348_v38 = vshll.u32 %v10435_v60, 16  ;;  %v957_v48 = vld [vmem:[#allocation2 + $0x84] sm:$0xe] }
  0xb4   : > { %v2601_v28 = vsel %vm2597_vm12, %v9786_v58, %v1415_v24  ;;  %v10438_v24 = vrot.slane %v7732_v55, 1  ;;  %v2363_v55 = vrot.slane %v2361_v31, 1 }
  0xb5   : > { %v2634_v10 = vsel %vm2630_vm13, %v2601_v28, %v10311_v32  ;;  %1669 = vrot.lane.b32.xlu0 %v10262_v56, %s9610_s12  ;;  %v2440_v15 = vpop.permute.xlu1 %2439  ;;  %v2342_v32 = vshrl.u32 %v10360_v45, 16 }
  0xb6   : > { %v2667_v58 = vsel %vm2663_vm14, %v2634_v10, %v10246_v46  ;;  %1671 = vrot.lane.b32.xlu1 %v10314_v33, %s9610_s12  ;;  %v2033_v46 = vrot.slane %v10357_v50, 1  ;;  %v2356_v50 = vshll.u32 %v10394_v39, 16 }
  0xb7   : > { %v2700_v56 = vsel %vm2696_vm15, %v2667_v58, %v1928_v57  ;;  %v1926_v17 = vpop.permute.xlu0 %1925  ;;  %v10429_v57 = vld [vmem:[%s9702_s10 + $0x60] sm:$0xf]  ;;  %v2347_v16 = vor.u32 %v2346_v19, %v2342_v32  ;;  %v10468_v19 = vld [vmem:[#allocation2 + $0x88] sm:$0xf] }
  0xb8   : > { %v2698_v21 = vsel %vm2696_vm15, %v2665_v37, %v1926_v17  ;;  %v2733_v49 = vsel %vm2729_vm1, %v2700_v56, %v10344_v7  ;;  %v2031_v7 = vsel %vm1492_vm9, %v2029_v9, %v2030_v62  ;;  %v2034_v9 = vsel %vm1492_vm9, %v2032_v20, %v2033_v46  ;;  %v982_v17 = vld [vmem:[#allocation2 + $0x84] sm:$0xf] }
  0xb9   : > { %v2731_v54 = vsel %vm2729_vm1, %v2698_v21, %v10326_v29  ;;  %1941 = vrot.lane.b32.xlu0 %v1840_v47, %s9615_s21  ;;  %v10423_v33 = vpop.permute.xlu1 %1416  ;;  %v2349_v29 = vshll.u32 %v10401_v0, 16  ;;  %v2766_v3 = vsel %vm2762_vm6, %v2733_v49, %v10287_v4  ;;  %v10446_v62 = vcombine.low %v920_v11, %v10426_v22  ;;  %v984_v0 = vld [vmem:[#allocation2 + $0x90] sm:$0xf] }
  0xba   : > { %v2764_v18 = vsel %vm2762_vm6, %v2731_v54, %v10273_v59  ;;  %1943 = vrot.lane.b32.xlu1 %v1852_v53, %s9615_s21  ;;  %v2354_v4 = vshrl.u32 %v10394_v39, 16  ;;  %v2358_v63 = vrot.slane %v2356_v50, 1  ;;  %v7827_v20 = vcombine.low %v1084_v13, %v10379_v52 }
  0xbb   : > { %v2438_v5 = vpop.permute.xlu0 %2437  ;;  %v2351_v10 = vrot.slane %v2349_v29, 1  ;;  %v668_v58 = vshrl.u32 %v10429_v57, 16  ;;  %v2799_v37 = vsel %vm2795_vm11, %v2766_v3, %v2440_v15  ;;  %v1355_v56 = vshll.u32 %v10446_v62, 16  ;;  %v10495_v3 = vld [vmem:[#allocation2 + $0x98] ss:$0 sps:$4 sm:$0x11]  }
  0xbc   : > { %v2797_v59 = vsel %vm2795_vm11, %v2764_v18, %v2438_v5  ;;  %v1360_v52 = vshll.u32 %v10448_v51, 16  ;;  %v2359_v15 = vor.u32 %v2358_v63, %v2354_v4  ;;  %v7733_v21 = vcombine.low %v957_v48, %v10426_v22  ;;  %v1021_v63 = vld [vmem:[#allocation2 + $0x90] sm:$0xe] }
  0xbd   : > { %2069 = vrot.lane.b32.xlu0 %v2031_v7, %s9613_s15  ;;  %v10451_v28 = vpop.permute.xlu1 %1418  ;;  %v2830_v26 = vsel %vm2828_vm4, %v2797_v59, %v10355_v25  ;;  %v10462_v25 = vld [vmem:[#allocation2 + $0x94] sm:$0xf]  ;;  %v671_v46 = vshll.u32 %v10429_v57, 16  ;;  %v2352_v54 = vsel %vm1219_vm10, %v2347_v16, %v2351_v10  ;;  %v1350_v53 = vrot.slane %v1348_v38, 1  ;;  %v454_v57 = vld [vmem:[%s9702_s10 + $0x64] sm:$0xf] }
  0xbe   : > { %8783 = vmatprep.mubr.msk.bf16.mxu0 %vm2881_vm2, %v2830_v26  ;;  %2071 = vrot.lane.b32.xlu1 %v2034_v9, %s9613_s15  ;;  %v1353_v50 = vshrl.u32 %v10446_v62, 16  ;;  %v2544_v11 = vrot.slane %v7827_v20, 1  ;;  %v1527_v7 = vrot.slane %v10448_v51, 1  ;;  %v10484_v29 = vcombine.low %v984_v0, %v10462_v25  ;;  %v414_v59 = vld [vmem:[#allocation2 + $0xa4] sm:$0x1] }
  0xbf   : > { %v2568_v47 = vpop.permute.xlu0 %2567  ;;  %v10487_v22 = vcombine.low %v982_v17, %v10468_v19  ;;  %v1346_v5 = vor.u32 %v10413_v43, %v1341_v27  ;;  %v1357_v13 = vrot.slane %v1355_v56, 1  ;;  %v1362_v16 = vrot.slane %v1360_v52, 1  ;;  %v10499_v26 = vld [vmem:[#allocation2 + $0x8c] ss:$0 sps:$4 sm:$0x11]  }
  0xc0   : > { %v2832_v32 = vsel %vm2828_vm4, %v2799_v37, %v2568_v47  ;;  %v2364_v9 = vsel %vm1219_vm10, %v2359_v15, %v2363_v55  ;;  %v1526_v51 = vrot.slane %v7733_v21, 1  ;;  %v670_v4 = vrot.slane %v668_v58, 7  ;;  %v361_v56 = vld [vmem:[#allocation2 + $0xa8] sm:$0x1]  ;;  %v1020_v55 = vld [vmem:[#allocation2 + $0x84] sm:$0xe] }
  0xc1   : > { %2181 = vrot.lane.b32.xlu0 %v10360_v45, %s9611_s13  ;;  %8784 = vmatmul.mubr.msk.bf16.vlgmr.msra.gmra.mrb[0].mxu0 %vm2881_vm2, %v2832_v32  ;;  %v10475_v49 = vpop.permute.xlu1 %1547  ;;  %v2545_v45 = vrot.slane %v10411_v12, 1  ;;  %v870_v12 = vld [vmem:[#allocation2 + $0x9c] sm:$0xf]  ;;  %v676_v31 = vshrl.u32 %v454_v57, 16  ;;  %v679_v27 = vshll.u32 %v454_v57, 16  ;;  %v1868_v20 = vshll.u32 %v10484_v29, 16 }
  0xc2   : > { %2183 = vrot.lane.b32.xlu1 %v10394_v39, %s9611_s13  ;;  %v2543_v39 = vsel %vm1492_vm9, %v10415_v44, %v2542_v2  ;;  %v1856_v10 = vshll.u32 %v10487_v22, 16  ;;  %v673_v38 = vor.u32 %v671_v46, %v670_v4  ;;  %v1351_v58 = vsel %vm1219_vm10, %v1346_v5, %v1350_v53  ;;  %v10520_v52 = vld [vmem:[%s9702_s10 + $0x68] sm:$0xf]  ;;  %v1047_v5 = vld [vmem:[#allocation2 + $0x90] sm:$0xf] }
  0xc3   : > { %v10479_v18 = vpop.permute.xlu0 %1545  ;;  %v674_v37 = vrot.slane %v670_v4, 4  ;;  %v10511_v47 = vrot.slane %v676_v31, 7  ;;  %v1358_v44 = vor.u32 %v1357_v13, %v1353_v50  ;;  %v1524_v2 = vrot.slane %v10435_v60, 1 }
  0xc4   : > { %v871_v0 = vsel %vm9721_vm7, %v673_v38, %v870_v12  ;;  %v415_v32 = vsel %vm9692_vm5, 0, %v414_v59  ;;  %v2603_v17 = vsel %vm2597_vm12, %v9815_v34, %v10423_v33  ;;  %v2546_v15 = vsel %vm1492_vm9, %v2544_v11, %v2545_v45  ;;  %v10533_v34 = vld [vmem:[#allocation2 + $0x94] sm:$0xf]  ;;  %v10535_v33 = vld [vmem:[#allocation2 + $0x98] ss:$0 sps:$4 sm:$0x11]  }
  0xc5   : > { %2453 = vrot.lane.b32.xlu0 %v2352_v54, %s9616_s22  ;;  %v10508_v48 = vpop.permute.xlu1 %1659  ;;  %v1873_v21 = vshll.u32 %v10495_v3, 16  ;;  %v681_v60 = vor.u32 %v679_v27, %v10511_v47  ;;  %872 = vst [vmem:[#allocation2 + $0x9c] sm:$0xf] %v871_v0  ;;  %416 = vst [vmem:[#allocation2 + $0xa4] sm:$0x1] %v415_v32  ;;  %v7781_v54 = vcombine.low %v1021_v63, %v10462_v25  ;;  %v1854_v53 = vshrl.u32 %v10487_v22, 16 }
  0xc6   : > { %2455 = vrot.lane.b32.xlu1 %v2364_v9, %s9616_s22  ;;  %v1858_v50 = vrot.slane %v1856_v10, 1  ;;  %v1861_v57 = vshll.u32 %v10499_v26, 16  ;;  %v2605_v11 = vsel %vm2597_vm12, %v9842_v61, %v10451_v28  ;;  %v1866_v45 = vshrl.u32 %v10484_v29, 16  ;;  %v922_v61 = vld [vmem:[#allocation2 + $0x90] sm:$0xf] }
  0xc7   : > { %v10503_v43 = vpop.permute.xlu0 %1657  ;;  %v1870_v25 = vrot.slane %v1868_v20, 1  ;;  %v682_v13 = vsel %vm9729_vm8, %v674_v37, %v681_v60  ;;  %v1363_v12 = vsel %vm1219_vm10, %v1358_v44, %v1362_v16  ;;  %v1528_v59 = vsel %vm1492_vm9, %v1526_v51, %v1527_v7  ;;  %v10551_v28 = vld [vmem:[#allocation2 + $0x94] sm:$0xf]  ;;  %v10557_v27 = vld [vmem:[#allocation2 + $0x90] sm:$0xe] }
  0xc8   : > { %v1525_v9 = vsel %vm1492_vm9, %v10438_v24, %v1524_v2  ;;  %v7780_v4 = vcombine.low %v1020_v55, %v10468_v19  ;;  %873 = vst.msk [vmem:[#allocation2 + $0xa0] sm:$0xf] %vm12552_vm0, %v682_v13  ;;  %v1875_v31 = vrot.slane %v1873_v21, 1  ;;  %v683_v16 = vrot.slane %v10511_v47, 4  ;;  %v417_v51 = vld [vmem:[#allocation2 + $0xb0] sm:$0x1] }
  0xc9   : > { %2581 = vrot.lane.b32.xlu0 %v2543_v39, %s9614_s20  ;;  %v456_v39 = vld [vmem:[%s9702_s10 + $0x6c] sm:$0xf]  ;;  %v362_v7 = vsel %vm9675_vm3, 0, %v361_v56  ;;  %v685_v24 = vshrl.u32 %v10520_v52, 16  ;;  %v2638_v19 = vsel %vm2630_vm13, %v2605_v11, %v10475_v49  ;;  %v1859_v10 = vor.u32 %v1858_v50, %v1854_v53  ;;  %v364_v37 = vld [vmem:[#allocation2 + $0xb4] sm:$0x1] }
  0xca   : > { %1432 = vrot.lane.b32.xlu1 %v1351_v58, %s9612_s14  ;;  %v1863_v38 = vrot.slane %v1861_v57, 1  ;;  %v10564_v58 = vrot.slane %v7781_v54, 1  ;;  %363 = vst [vmem:[#allocation2 + $0xa8] sm:$0x1] %v362_v7  ;;  %v2636_v47 = vsel %vm2630_vm13, %v2603_v17, %v10479_v18  ;;  %v1871_v44 = vor.u32 %v1870_v25, %v1866_v45 }
  0xcb   : > { %v10528_v46 = vpop.permute.xlu0 %1929  ;;  %v2039_v2 = vrot.slane %v10495_v3, 1  ;;  %v10571_v0 = vcombine.low %v1047_v5, %v10533_v34  ;;  %v2035_v49 = vrot.slane %v7780_v4, 1  ;;  %v2373_v56 = vshll.u32 %v10535_v33, 16 }
  0xcc   : > { %v10554_v63 = vpop.permute.xlu1 %1931  ;;  %v874_v32 = vld [vmem:[#allocation2 + $0xa4] sm:$0x1]  ;;  %v688_v55 = vshll.u32 %v10520_v52, 16  ;;  %v2036_v18 = vrot.slane %v10499_v26, 1  ;;  %v1049_v17 = vld [vmem:[#allocation2 + $0x9c] sm:$0xf]  ;;  %v10582_v54 = vcombine.low %v922_v61, %v10551_v28  ;;  %v1864_v57 = vsel %vm1219_vm10, %v1859_v10, %v1863_v38 }
  0xcd   : > { %2583 = vrot.lane.b32.xlu0 %v2546_v15, %s9614_s20  ;;  %v687_v15 = vrot.slane %v685_v24, 7  ;;  %v875_v60 = vsel %vm9675_vm3, %v683_v16, %v874_v32  ;;  %v693_v53 = vshrl.u32 %v456_v39, 16  ;;  %v7828_v5 = vcombine.low %v10557_v27, %v10533_v34  ;;  %v10587_v52 = vld [vmem:[#allocation2 + $0x98] ss:$0 sps:$4 sm:$0x11]  }
  0xce   : > { %1434 = vrot.lane.b32.xlu1 %v1363_v12, %s9612_s14  ;;  %876 = vst [vmem:[#allocation2 + $0xa4] sm:$0x1] %v875_v60  ;;  %v696_v11 = vshll.u32 %v456_v39, 16  ;;  %v418_v26 = vsel %vm9692_vm5, 0, %v417_v51  ;;  %v2368_v25 = vshll.u32 %v10571_v0, 16  ;;  %v2366_v13 = vshrl.u32 %v10571_v0, 16 }
  0xcf   : > { %v2058_v20 = vpop.permute.xlu0 %2057  ;;  %v10592_v45 = vld [vmem:[#allocation2 + $0xa0] sm:$0xf]  ;;  %v695_v12 = vrot.slane %v693_v53, 7  ;;  %419 = vst [vmem:[#allocation2 + $0xb0] sm:$0x1] %v418_v26  ;;  %v365_v34 = vsel %vm9675_vm3, 0, %v364_v37  ;;  %v2669_v39 = vsel %vm2663_vm14, %v2636_v47, %v10503_v43  ;;  %v1876_v37 = vsel %vm1219_vm10, %v1871_v44, %v1875_v31 }
  0xd0   : > { %v10576_v21 = vpop.permute.xlu1 %2059  ;;  %v10603_v4 = vrot.slane %v2373_v56, 1  ;;  %v691_v61 = vrot.slane %v687_v15, 4  ;;  %366 = vst [vmem:[#allocation2 + $0xb4] sm:$0x1] %v365_v34  ;;  %v1365_v27 = vshrl.u32 %v10582_v54, 16  ;;  %v1367_v7 = vshll.u32 %v10582_v54, 16 }
  0xd1   : > { %1561 = vrot.lane.b32.xlu0 %v1525_v9, %s9609_s11  ;;  %v10601_v9 = vcombine.low %v1049_v17, %v10592_v45  ;;  %v698_v24 = vor.u32 %v696_v11, %v695_v12  ;;  %v877_v51 = vld [vmem:[#allocation2 + $0xa8] sm:$0xf]  ;;  %v2702_v10 = vsel %vm2696_vm15, %v2669_v39, %v10528_v46  ;;  %v924_v32 = vld [vmem:[#allocation2 + $0x9c] sm:$0xf]  ;;  %v10614_v56 = vld [vmem:[#allocation2 + $0xa0] sm:$0xf]  ;;  %v2037_v17 = vsel %vm1492_vm9, %v2035_v49, %v2036_v18 }
  0xd2   : > { %1563 = vrot.lane.b32.xlu1 %v1528_v59, %s9609_s11  ;;  %v690_v59 = vor.u32 %v688_v55, %v687_v15  ;;  %v958_v43 = vld [vmem:[#allocation2 + $0x90] sm:$0xe]  ;;  %v2735_v47 = vsel %vm2729_vm1, %v2702_v10, %v2058_v20  ;;  %v2370_v15 = vrot.slane %v2368_v25, 1  ;;  %v1372_v55 = vshll.u32 %v10587_v52, 16  ;;  %v1086_v18 = vld [vmem:[#allocation2 + $0x9c] sm:$0xe] }
  0xd3   : > { %v2170_v50 = vpop.permute.xlu0 %2169  ;;  %v2380_v46 = vshll.u32 %v10601_v9, 16  ;;  %v699_v31 = vsel %vm9729_vm8, %v691_v61, %v698_v24  ;;  %v10632_v53 = vrot.slane %v1367_v7, 1  ;;  %v2040_v49 = vsel %vm1492_vm9, %v10564_v58, %v2039_v2  ;;  %v986_v25 = vld [vmem:[#allocation2 + $0x9c] sm:$0xf]  ;;  %v10653_v61 = vld [vmem:[#allocation2 + $0xa0] sm:$0xf] }
  0xd4   : > { %v2172_v16 = vpop.permute.xlu1 %2171  ;;  %v878_v20 = vsel %vm9721_vm7, %v690_v59, %v877_v51  ;;  %v2768_v44 = vsel %vm2762_vm6, %v2735_v47, %v2170_v50  ;;  %880 = vst.msk [vmem:[#allocation2 + $0xac] sm:$0xf] %vm12552_vm0, %v699_v31  ;;  %v2371_v59 = vor.u32 %v2370_v15, %v2366_v13  ;;  %v2378_v3 = vshrl.u32 %v10601_v9, 16  ;;  %v458_v10 = vld [vmem:[%s9702_s10 + $0x74] sm:$0xf] }
  0xd5   : > { %1673 = vrot.lane.b32.xlu0 %v10487_v22, %s9610_s12  ;;  %v2671_v22 = vsel %vm2663_vm14, %v2638_v19, %v10508_v48  ;;  %v10620_v48 = vrot.slane %v7828_v5, 1  ;;  %v700_v19 = vrot.slane %v695_v12, 4  ;;  %v10630_v60 = vld [vmem:[#allocation2 + $0xa4] ss:$0 sps:$4 sm:$0x11]   ;;  %v2382_v58 = vrot.slane %v2380_v46, 1 }
  0xd6   : > { %1675 = vrot.lane.b32.xlu1 %v10484_v29, %s9610_s12  ;;  %879 = vst [vmem:[#allocation2 + $0xa8] sm:$0xf] %v878_v20  ;;  %v10639_v5 = vld [vmem:[%s9702_s10 + $0x70] sm:$0xf]  ;;  %v2704_v11 = vsel %vm2696_vm15, %v2671_v22, %v10554_v63  ;;  %v7734_v63 = vcombine.low %v958_v43, %v10551_v28  ;;  %v2385_v2 = vshll.u32 %v10630_v60, 16  ;;  %v7829_v28 = vcombine.low %v1086_v18, %v10592_v45 }
  0xd7   : > { %v2442_v38 = vpop.permute.xlu0 %2441  ;;  %v2737_v12 = vsel %vm2729_vm1, %v2704_v11, %v10576_v21  ;;  %v881_v39 = vld [vmem:[#allocation2 + $0xb0] sm:$0x1]  ;;  %v10665_v24 = vld [vmem:[#allocation2 + $0xa4] ss:$0 sps:$4 sm:$0x11]   ;;  %v10671_v43 = vcombine.low %v986_v25, %v10653_v61  ;;  %v2548_v47 = vrot.slane %v10535_v33, 1  ;;  %v2383_v46 = vor.u32 %v2382_v58, %v2378_v3 }
  0xd8   : > { %v2444_v29 = vpop.permute.xlu1 %2443  ;;  %v2801_v50 = vsel %vm2795_vm11, %v2768_v44, %v2442_v38  ;;  %v882_v21 = vsel %vm9675_vm3, %v700_v19, %v881_v39  ;;  %v2770_v13 = vsel %vm2762_vm6, %v2737_v12, %v2172_v16  ;;  %v959_v22 = vld [vmem:[#allocation2 + $0x9c] sm:$0xe]  ;;  %v702_v16 = vshrl.u32 %v10639_v5, 16  ;;  %v10696_v25 = vld [vmem:[#allocation2 + $0xa4] ss:$0 sps:$4 sm:$0x11]  }
  0xd9   : > { %1945 = vrot.lane.b32.xlu0 %v1864_v57, %s9615_s21  ;;  %v10635_v57 = vcombine.low %v924_v32, %v10614_v56  ;;  %883 = vst [vmem:[#allocation2 + $0xb0] sm:$0x1] %v882_v21  ;;  %v2803_v38 = vsel %vm2795_vm11, %v2770_v13, %v2444_v29  ;;  %v1374_v32 = vrot.slane %v1372_v55, 1  ;;  %v1530_v15 = vrot.slane %v10587_v52, 1  ;;  %v884_v12 = vld [vmem:[#allocation2 + $0xb4] sm:$0xf] }
  0xda   : > { %1947 = vrot.lane.b32.xlu1 %v1876_v37, %s9615_s21  ;;  %v2387_v55 = vrot.slane %v2385_v2, 1  ;;  %v2376_v31 = vsel %vm1219_vm10, %v2371_v59, %v10603_v4  ;;  %v10683_v19 = vrot.slane %v7734_v63, 1  ;;  %v2550_v33 = vrot.slane %v7829_v28, 1 }
  0xdb   : > { %v2570_v26 = vpop.permute.xlu0 %2569  ;;  %v1379_v51 = vshll.u32 %v10635_v57, 16  ;;  %v1377_v44 = vshrl.u32 %v10635_v57, 16  ;;  %v710_v18 = vshrl.u32 %v458_v10, 16  ;;  %v1384_v4 = vshll.u32 %v10665_v24, 16  ;;  %v10705_v39 = vld [vmem:[#allocation2 + $0xac] sm:$0xf] }
  0xdc   : > { %v2834_v34 = vsel %vm2828_vm4, %v2801_v50, %v2570_v26  ;;  %v10662_v7 = vpop.permute.xlu1 %1420  ;;  %v1022_v50 = vld [vmem:[#allocation2 + $0x9c] sm:$0xe]  ;;  %v704_v26 = vrot.slane %v702_v16, 7  ;;  %v1370_v59 = vor.u32 %v10632_v53, %v1365_v27  ;;  %v2551_v58 = vrot.slane %v10630_v60, 1 }
  0xdd   : > { %2073 = vrot.lane.b32.xlu0 %v2037_v17, %s9613_s15  ;;  %8787 = vmatprep.mubr.msk.bf16.mxu0 %vm2881_vm2, %v2834_v34  ;;  %v1381_v29 = vrot.slane %v1379_v51, 1  ;;  %v7735_v17 = vcombine.low %v959_v22, %v10614_v56  ;;  %v420_v34 = vld [vmem:[#allocation2 + $0xbc] sm:$0x1]  ;;  %v2388_v56 = vsel %vm1219_vm10, %v2383_v46, %v2387_v55  ;;  %v988_v63 = vld [vmem:[#allocation2 + $0xa8] sm:$0xf]  ;;  %v10710_v21 = vrot.slane %v710_v18, 7 }
  0xde   : > { %2075 = vrot.lane.b32.xlu1 %v2040_v49, %s9613_s15  ;;  %v705_v49 = vshll.u32 %v10639_v5, 16  ;;  %v2549_v5 = vsel %vm1492_vm9, %v10620_v48, %v2548_v47  ;;  %v708_v2 = vrot.slane %v704_v26, 4  ;;  %v713_v13 = vshll.u32 %v458_v10, 16  ;;  %v10726_v47 = vld [vmem:[#allocation2 + $0xac] sm:$0xf] }
  0xdf   : > { %v2572_v37 = vpop.permute.xlu0 %2571  ;;  %v1532_v51 = vrot.slane %v7735_v17, 1  ;;  %v1878_v27 = vshrl.u32 %v10671_v43, 16  ;;  %v7782_v53 = vcombine.low %v1022_v50, %v10653_v61  ;;  %v1386_v22 = vrot.slane %v1384_v4, 1  ;;  %v367_v55 = vld [vmem:[#allocation2 + $0xc0] sm:$0x1] }
  0xe0   : > { %v2836_v45 = vsel %vm2828_vm4, %v2803_v38, %v2572_v37  ;;  %v10685_v20 = vpop.permute.xlu1 %1422  ;;  %v10720_v38 = vcombine.low %v988_v63, %v10705_v39  ;;  %v715_v37 = vor.u32 %v713_v13, %v10710_v21  ;;  %v1375_v10 = vsel %vm1219_vm10, %v1370_v59, %v1374_v32  ;;  %v1023_v50 = vld [vmem:[#allocation2 + $0xa8] sm:$0xe]  ;;  %v459_v18 = vld [vmem:[%s9702_s10 + $0x78] sm:$0xf]  ;;  %v10750_v4 = vld [vmem:[%s9702_s10 + $0x7c] sm:$0xf] }
  0xe1   : > { %2185 = vrot.lane.b32.xlu0 %v10571_v0, %s9611_s13  ;;  %8788 = vmatmul.mubr.msk.bf16.gmra.mrb[4].mxu0 %vm2881_vm2, %v2836_v45  ;;  %v1880_v0 = vshll.u32 %v10671_v43, 16  ;;  %v1382_v16 = vor.u32 %v1381_v29, %v1377_v44  ;;  %v1885_v61 = vshll.u32 %v10696_v25, 16  ;;  %v1051_v45 = vld [vmem:[#allocation2 + $0xa8] sm:$0xf]  ;;  %v421_v46 = vsel %vm9692_vm5, 0, %v420_v34 }
  0xe2   : > { %2187 = vrot.lane.b32.xlu1 %v10601_v9, %s9611_s13  ;;  %v707_v9 = vor.u32 %v705_v49, %v704_v26  ;;  %v2552_v17 = vsel %vm1492_vm9, %v2550_v33, %v2551_v58  ;;  %v1533_v32 = vrot.slane %v10665_v24, 1  ;;  %v716_v44 = vsel %vm9729_vm8, %v708_v2, %v715_v37  ;;  %422 = vst [vmem:[#allocation2 + $0xbc] sm:$0x1] %v421_v46  ;;  %v926_v24 = vld [vmem:[#allocation2 + $0xa8] sm:$0xf] }
  0xe3   : > { %v10689_v11 = vpop.permute.xlu0 %1549  ;;  %v1882_v60 = vrot.slane %v1880_v0, 1  ;;  %v10734_v0 = vld [vmem:[#allocation2 + $0xb0] ss:$0 sps:$4 sm:$0x11]   ;;  %887 = vst.msk [vmem:[#allocation2 + $0xb8] sm:$0xf] %vm12552_vm0, %v716_v44  ;;  %v10746_v33 = vcombine.low %v1051_v45, %v10726_v47  ;;  %v1531_v34 = vsel %vm1492_vm9, %v10683_v19, %v1530_v15  ;;  %v2607_v63 = vsel %vm2597_vm12, %v9943_v14, %v10662_v7 }
  0xe4   : > { %v10707_v3 = vpop.permute.xlu1 %1551  ;;  %v885_v48 = vsel %vm9721_vm7, %v707_v9, %v884_v12  ;;  %v1892_v26 = vshll.u32 %v10720_v38, 16  ;;  %v10743_v49 = vrot.slane %v7782_v53, 1  ;;  %v1387_v12 = vsel %vm1219_vm10, %v1382_v16, %v1386_v22  ;;  %v10767_v13 = vld [vmem:[#allocation2 + $0xac] sm:$0xf] }
  0xe5   : > { %2457 = vrot.lane.b32.xlu0 %v2376_v31, %s9616_s22  ;;  %886 = vst [vmem:[#allocation2 + $0xb4] sm:$0xf] %v885_v48  ;;  %v1887_v59 = vrot.slane %v1885_v61, 1  ;;  %v1534_v58 = vsel %vm1492_vm9, %v1532_v51, %v1533_v32  ;;  %v717_v2 = vrot.slane %v10710_v21, 4  ;;  %v368_v52 = vsel %vm9675_vm3, 0, %v367_v55 }
  0xe6   : > { %2459 = vrot.lane.b32.xlu1 %v2388_v56, %s9616_s22  ;;  %v1883_v56 = vor.u32 %v1882_v60, %v1878_v27  ;;  %v2609_v15 = vsel %vm2597_vm12, %v9964_v40, %v10685_v20  ;;  %v1897_v27 = vshll.u32 %v10734_v0, 16  ;;  %v7783_v14 = vcombine.low %v1023_v50, %v10705_v39  ;;  %369 = vst [vmem:[#allocation2 + $0xc0] sm:$0x1] %v368_v52  ;;  %v423_v51 = vld [vmem:[#allocation2 + $0xc8] sm:$0x1] }
  0xe7   : > { %v10712_v28 = vpop.permute.xlu0 %1661  ;;  %v2042_v7 = vrot.slane %v10696_v25, 1  ;;  %v2640_v21 = vsel %vm2630_vm13, %v2607_v63, %v10689_v11  ;;  %v1890_v53 = vshrl.u32 %v10720_v38, 16  ;;  %v1894_v48 = vrot.slane %v1892_v26, 1  ;;  %v10784_v20 = vld [vmem:[#allocation2 + $0xb0] ss:$0 sps:$4 sm:$0x11]  }
  0xe8   : > { %v10730_v31 = vpop.permute.xlu1 %1663  ;;  %v2392_v40 = vshll.u32 %v10746_v33, 16  ;;  %v1888_v39 = vsel %vm1219_vm10, %v1883_v56, %v1887_v59  ;;  %v10789_v60 = vcombine.low %v926_v24, %v10767_v13  ;;  %v719_v37 = vshrl.u32 %v459_v18, 16  ;;  %v1087_v63 = vld [vmem:[#allocation2 + $0xa8] sm:$0xe] }
  0xe9   : > { %2585 = vrot.lane.b32.xlu0 %v2549_v5, %s9614_s20  ;;  %v10758_v5 = vld [vmem:[#allocation2 + $0xb0] ss:$0 sps:$4 sm:$0x11]   ;;  %v888_v25 = vld [vmem:[#allocation2 + $0xbc] sm:$0x1]  ;;  %v727_v11 = vshrl.u32 %v10750_v4, 16  ;;  %v1895_v24 = vor.u32 %v1894_v48, %v1890_v53  ;;  %v2642_v53 = vsel %vm2630_vm13, %v2609_v15, %v10707_v3 }
  0xea   : > { %1436 = vrot.lane.b32.xlu1 %v1375_v10, %s9612_s14  ;;  %v10794_v16 = vld [vmem:[#allocation2 + $0xb8] sm:$0xf]  ;;  %v889_v61 = vsel %vm9675_vm3, %v717_v2, %v888_v25  ;;  %v2397_v45 = vshll.u32 %v10758_v5, 16  ;;  %v722_v46 = vshll.u32 %v459_v18, 16  ;;  %v424_v55 = vsel %vm9692_vm5, 0, %v423_v51 }
  0xeb   : > { %v10738_v29 = vpop.permute.xlu0 %1933  ;;  %v1899_v32 = vrot.slane %v1897_v27, 1  ;;  %v2044_v44 = vrot.slane %v7783_v14, 1  ;;  %v2045_v50 = vrot.slane %v10734_v0, 1  ;;  %890 = vst [vmem:[#allocation2 + $0xbc] sm:$0x1] %v889_v61  ;;  %v730_v26 = vshll.u32 %v10750_v4, 16 }
  0xec   : > { %v10763_v9 = vpop.permute.xlu1 %1935  ;;  %v1053_v22 = vld [vmem:[#allocation2 + $0xb4] sm:$0xf]  ;;  %425 = vst [vmem:[#allocation2 + $0xc8] sm:$0x1] %v424_v55  ;;  %v729_v18 = vrot.slane %v727_v11, 7  ;;  %v2390_v56 = vshrl.u32 %v10746_v33, 16 }
  0xed   : > { %2587 = vrot.lane.b32.xlu0 %v2552_v17, %s9614_s20  ;;  %v1389_v59 = vshrl.u32 %v10789_v60, 16  ;;  %v1391_v0 = vshll.u32 %v10789_v60, 16  ;;  %v1396_v4 = vshll.u32 %v10784_v20, 16  ;;  %v10813_v52 = vrot.slane %v2397_v45, 1  ;;  %v891_v51 = vld [vmem:[#allocation2 + $0xc0] sm:$0xf] }
  0xee   : > { %1438 = vrot.lane.b32.xlu1 %v1387_v12, %s9612_s14  ;;  %v10805_v12 = vcombine.low %v1053_v22, %v10794_v16  ;;  %v2043_v22 = vsel %vm1492_vm9, %v10743_v49, %v2042_v7  ;;  %v928_v25 = vld [vmem:[#allocation2 + $0xb4] sm:$0xf]  ;;  %v10823_v11 = vld [vmem:[#allocation2 + $0xa8] sm:$0xe]  ;;  %v734_v15 = vrot.slane %v729_v18, 4  ;;  %v1900_v7 = vsel %vm1219_vm10, %v1895_v24, %v1899_v32 }
  0xef   : > { %v10774_v19 = vpop.permute.xlu0 %2061  ;;  %v1393_v55 = vrot.slane %v1391_v0, 1 }
  0xf0   : > { %v10792_v10 = vpop.permute.xlu1 %2063  ;;  %v2404_v3 = vshll.u32 %v10805_v12, 16 }
  0xf1   : > { %1565 = vrot.lane.b32.xlu0 %v1531_v34, %s9609_s11  ;;  %v721_v34 = vrot.slane %v719_v37, 7  ;;  %v10821_v37 = vld [vmem:[#allocation2 + $0xb8] sm:$0xf] }
  0xf2   : > { %1567 = vrot.lane.b32.xlu1 %v1534_v58, %s9609_s11  ;;  %v2394_v58 = vrot.slane %v2392_v40, 1  ;;  %v732_v40 = vor.u32 %v730_v26, %v729_v18  ;;  %v370_v26 = vld [vmem:[#allocation2 + $0xcc] sm:$0x1]  ;;  %v10857_v24 = vcombine.low %v928_v25, %v10821_v37  ;;  %v2406_v0 = vrot.slane %v2404_v3, 1  ;;  %v991_v25 = vld [vmem:[#allocation2 + $0xb8] sm:$0xf] }
  0xf3   : > { %v2174_v17 = vpop.permute.xlu0 %2173  ;;  %v724_v27 = vor.u32 %v722_v46, %v721_v34  ;;  %v725_v14 = vrot.slane %v721_v34, 4  ;;  %v10842_v46 = vld [vmem:[#allocation2 + $0xbc] ss:$0 sps:$4 sm:$0x11]   ;;  %v1088_v34 = vld [vmem:[#allocation2 + $0xb4] sm:$0xe] }
  0xf4   : > { %v2176_v2 = vpop.permute.xlu1 %2175  ;;  %v895_v18 = vld [vmem:[#allocation2 + $0xc8] sm:$0x1] }
  0xf5   : > { %1677 = vrot.lane.b32.xlu0 %v10671_v43, %s9610_s12  ;;  %v2673_v43 = vsel %vm2663_vm14, %v2640_v21, %v10712_v28  ;;  %v892_v28 = vsel %vm9721_vm7, %v724_v27, %v891_v51  ;;  %v2046_v21 = vsel %vm1492_vm9, %v2044_v44, %v2045_v50  ;;  %v10849_v50 = vrot.slane %v1396_v4, 1  ;;  %v961_v4 = vld [vmem:[#allocation2 + $0xb4] sm:$0xe] }
  0xf6   : > { %v2706_v61 = vsel %vm2696_vm15, %v2673_v43, %v10738_v29  ;;  %1679 = vrot.lane.b32.xlu1 %v10720_v38, %s9610_s12  ;;  %v733_v29 = vsel %vm9729_vm8, %v725_v14, %v732_v40  ;;  %893 = vst [vmem:[#allocation2 + $0xc0] sm:$0xf] %v892_v28  ;;  %v2675_v38 = vsel %vm2663_vm14, %v2642_v53, %v10730_v31  ;;  %v2554_v31 = vrot.slane %v10758_v5, 1  ;;  %v990_v53 = vld [vmem:[#allocation2 + $0xb4] sm:$0xf] }
  0xf7   : > { %v2446_v48 = vpop.permute.xlu0 %2445  ;;  %v2739_v49 = vsel %vm2729_vm1, %v2706_v61, %v10774_v19  ;;  %v7830_v19 = vcombine.low %v1087_v63, %v10726_v47  ;;  %894 = vst.msk [vmem:[#allocation2 + $0xc4] sm:$0xf] %vm12552_vm0, %v733_v29  ;;  %v2402_v5 = vshrl.u32 %v10805_v12, 16  ;;  %v896_v63 = vsel %vm9675_vm3, %v734_v15, %v895_v18  ;;  %v10875_v40 = vld [vmem:[#allocation2 + $0xbc] ss:$0 sps:$4 sm:$0x11]  }
  0xf8   : > { %v2772_v45 = vsel %vm2762_vm6, %v2739_v49, %v2174_v17  ;;  %v2448_v35 = vpop.permute.xlu1 %2447  ;;  %v2395_v51 = vor.u32 %v2394_v58, %v2390_v56  ;;  %897 = vst [vmem:[#allocation2 + $0xc8] sm:$0x1] %v896_v63  ;;  %v371_v43 = vsel %vm9675_vm3, 0, %v370_v26  ;;  %v7737_v56 = vcombine.low %v961_v4, %v10821_v37  ;;  %v426_v61 = vld [vmem:[#allocation2 + $0xd4] sm:$0x1] }
  0xf9   : > { %1949 = vrot.lane.b32.xlu0 %v1888_v39, %s9615_s21  ;;  %v2708_v39 = vsel %vm2696_vm15, %v2675_v38, %v10763_v9  ;;  %v2805_v32 = vsel %vm2795_vm11, %v2772_v45, %v2446_v48  ;;  %v7736_v9 = vcombine.low %v10823_v11, %v10767_v13  ;;  %v2553_v13 = vrot.slane %v7830_v19, 1  ;;  %372 = vst [vmem:[#allocation2 + $0xcc] sm:$0x1] %v371_v43  ;;  %v10884_v49 = vld [vmem:[#allocation2 + $0xbc] ss:$0 sps:$4 sm:$0x11]  }
  0xfa   : > { %v2741_v17 = vsel %vm2729_vm1, %v2708_v39, %v10792_v10  ;;  %1951 = vrot.lane.b32.xlu1 %v1900_v7, %s9615_s21  ;;  %v2409_v10 = vshll.u32 %v10842_v46, 16  ;;  %v1536_v58 = vrot.slane %v10784_v20, 1  ;;  %v2407_v1 = vor.u32 %v2406_v0, %v2402_v5  ;;  %v1024_v38 = vld [vmem:[#allocation2 + $0xb4] sm:$0xe] }
  0xfb   : > { %v2574_v44 = vpop.permute.xlu0 %2573  ;;  %v2774_v27 = vsel %vm2762_vm6, %v2741_v17, %v2176_v2  ;;  %v7831_v2 = vcombine.low %v1088_v34, %v10794_v16  ;;  %v1403_v15 = vshll.u32 %v10857_v24, 16  ;;  %v1535_v28 = vrot.slane %v7736_v9, 1 }
  0xfc   : > { %v2838_v47 = vsel %vm2828_vm4, %v2805_v32, %v2574_v44  ;;  %v10868_v14 = vpop.permute.xlu1 %1424  ;;  %v2807_v48 = vsel %vm2795_vm11, %v2774_v27, %v2448_v35  ;;  %v2411_v3 = vrot.slane %v2409_v10, 1  ;;  %v2400_v16 = vsel %vm1219_vm10, %v2395_v51, %v10813_v52 }
  0xfd   : > { %2077 = vrot.lane.b32.xlu0 %v2043_v22, %s9613_s15  ;;  %8791 = vmatprep.mubr.msk.bf16.mxu0 %vm2881_vm2, %v2838_v47  ;;  %v992_v37 = vld [vmem:[#allocation2 + $0xc0] sm:$0xf]  ;;  %v10890_v29 = vcombine.low %v990_v53, %v991_v25  ;;  %v1401_v45 = vshrl.u32 %v10857_v24, 16  ;;  %v427_v35 = vsel %vm9692_vm5, 0, %v426_v61  ;;  %v1394_v19 = vor.u32 %v1393_v55, %v1389_v59 }
  0xfe   : > { %2079 = vrot.lane.b32.xlu1 %v2046_v21, %s9613_s15  ;;  %v993_v21 = vld [vmem:[#allocation2 + $0xc4] sm:$0xf]  ;;  %v2556_v39 = vrot.slane %v7831_v2, 1  ;;  %v1538_v52 = vrot.slane %v7737_v56, 1  ;;  %428 = vst [vmem:[#allocation2 + $0xd4] sm:$0x1] %v427_v35  ;;  %v2412_v32 = vsel %vm1219_vm10, %v2407_v1, %v2411_v3  ;;  %v2555_v47 = vsel %vm1492_vm9, %v2553_v13, %v2554_v31 }
  0xff   : > { %v2576_v22 = vpop.permute.xlu0 %2575  ;;  %v1405_v44 = vrot.slane %v1403_v15, 1  ;;  %v1408_v26 = vshll.u32 %v10875_v40, 16  ;;  %v10904_v17 = vcombine.low %v992_v37, %v993_v21  ;;  %v1904_v59 = vshll.u32 %v10890_v29, 16  ;;  %v1025_v55 = vld [vmem:[#allocation2 + $0xc0] sm:$0xe] }
 0x100   : > { %v2840_v11 = vsel %vm2828_vm4, %v2807_v48, %v2576_v22  ;;  %v10886_v7 = vpop.permute.xlu1 %1426  ;;  %v10911_v9 = vld [vmem:[#allocation2 + $0xc8] ss:$0 sps:$4 sm:$0x11]   ;;  %v1909_v18 = vshll.u32 %v10884_v49, 16  ;;  %v7784_v5 = vcombine.low %v1024_v38, %v991_v25  ;;  %v1055_v0 = vld [vmem:[#allocation2 + $0xc0] sm:$0xf]  ;;  %v1399_v10 = vsel %vm1219_vm10, %v1394_v19, %v10849_v50 }
 0x101   : > { %2189 = vrot.lane.b32.xlu0 %v10746_v33, %s9611_s13  ;;  %8792 = vmatmul.mubr.msk.bf16.gmra.mrb[8].mxu0 %vm2881_vm2, %v2840_v11  ;;  %v10917_v4 = vld [vmem:[#allocation2 + $0xc4] sm:$0xf]  ;;  %v1410_v31 = vrot.slane %v1408_v26, 1  ;;  %v1916_v63 = vshll.u32 %v10904_v17, 16  ;;  %v7785_v27 = vcombine.low %v1025_v55, %v993_v21  ;;  %v1539_v53 = vrot.slane %v10875_v40, 1 }
 0x102   : > { %2191 = vrot.lane.b32.xlu1 %v10805_v12, %s9611_s13  ;;  %v2557_v12 = vrot.slane %v10842_v46, 1  ;;  %v1406_v46 = vor.u32 %v1405_v44, %v1401_v45  ;;  %v1902_v43 = vshrl.u32 %v10890_v29, 16  ;;  %v1906_v48 = vrot.slane %v1904_v59, 1  ;;  %v1057_v21 = vld [vmem:[#allocation2 + $0xcc] sm:$0xf] }
 0x103   : > { %v10892_v33 = vpop.permute.xlu0 %1553  ;;  %v1921_v50 = vshll.u32 %v10911_v9, 16  ;;  %v2047_v25 = vrot.slane %v7784_v5, 1  ;;  %v2048_v11 = vrot.slane %v10884_v49, 1  ;;  %v10929_v2 = vcombine.low %v1055_v0, %v10917_v4  ;;  %v10940_v38 = vld [vmem:[#allocation2 + $0xd0] sm:$0xf] }
 0x104   : > { %v10906_v8 = vpop.permute.xlu1 %1555  ;;  %v2558_v13 = vsel %vm1492_vm9, %v2556_v39, %v2557_v12  ;;  %v1914_v56 = vshrl.u32 %v10904_v17, 16  ;;  %v1911_v61 = vrot.slane %v1909_v18, 1  ;;  %v1411_v1 = vsel %vm1219_vm10, %v1406_v46, %v1410_v31  ;;  %v10946_v44 = vld [vmem:[#allocation2 + $0xc8] ss:$0 sps:$4 sm:$0x11]  }
 0x105   : > { %2461 = vrot.lane.b32.xlu0 %v2400_v16, %s9616_s22  ;;  %v1918_v40 = vrot.slane %v1916_v63, 1  ;;  %v10935_v3 = vrot.slane %v7785_v27, 1  ;;  %vm3196_vm3 = vcmask 1040384   ;;  %v1537_v49 = vsel %vm1492_vm9, %v1535_v28, %v1536_v58  ;;  %v10964_v18 = vld [vmem:[#allocation2 + $0xd4] ss:$0 sps:$4 sm:$0x11]  }
 0x106   : > { %2463 = vrot.lane.b32.xlu1 %v2412_v32, %s9616_s22  ;;  %v1923_v37 = vrot.slane %v1921_v50, 1  ;;  %v2416_v45 = vshll.u32 %v10929_v2, 16  ;;  %v1540_v35 = vsel %vm1492_vm9, %v1538_v52, %v1539_v53  ;;  %v1907_v39 = vor.u32 %v1906_v48, %v1902_v43  ;;  %v3204_v46 = vld [vmem:[#allocation3 + $0x18] sm:$0x1] }
 0x107   : > { %v1666_v34 = vpop.permute.xlu0 %1665  ;;  %v10950_v20 = vcombine.low %v1057_v21, %v10940_v38  ;;  %v2611_v58 = vsel %vm2597_vm12, %v10061_v42, %v10868_v14  ;;  %v1919_v28 = vor.u32 %v1918_v40, %v1914_v56  ;;  %v2613_v12 = vsel %vm2597_vm12, %v10088_v6, %v10886_v7  ;;  %v9323_v6 = vld [vmem:[%s12544_s4 + $0x140] sm:$0xff]  }
 0x108   : > { %v10921_v51 = vpop.permute.xlu1 %1667  ;;  %v2644_v52 = vsel %vm2630_vm13, %v2611_v58, %v10892_v33  ;;  %v2414_v42 = vshrl.u32 %v10929_v2, 16  ;;  %v2051_v5 = vrot.slane %v10911_v9, 1  ;;  %v2421_v0 = vshll.u32 %v10946_v44, 16  ;;  %8815 = vmatprep.subr.bf16.mxu0 %v9323_v6  ;;  %v9324_v56 = vld [vmem:[%s12544_s4 + $0x100] sm:$0xff]   ;;  %v3259_v58 = vld [vmem:[#allocation3 + $0x20] sm:$0x1] }
 0x109   : > { %2589 = vrot.lane.b32.xlu0 %v2555_v47, %s9614_s20  ;;  %v1912_v47 = vsel %vm1219_vm10, %v1907_v39, %v1911_v61  ;;  %v2677_v59 = vsel %vm2663_vm14, %v2644_v52, %v1666_v34  ;;  %v2428_v33 = vshll.u32 %v10950_v20, 16  ;;  %v1924_v34 = vsel %vm1219_vm10, %v1919_v28, %v1923_v37  ;;  %8816 = vmatpush3.bf16.msra.mxu0 %v9323_v6  ;;  %v9328_v28 = vld [vmem:[%s12544_s4 + $0x150] sm:$0xff]  }
 0x10a   : > { %1440 = vrot.lane.b32.xlu1 %v1399_v10, %s9612_s14  ;;  %v1089_v10 = vld [vmem:[#allocation2 + $0xc0] sm:$0xe]  ;;  %vm12561_vm5 = vsmask.f32 256  ;;  %v2646_v31 = vsel %vm2630_vm13, %v2613_v12, %v10906_v8  ;;  %v2426_v50 = vshrl.u32 %v10950_v20, 16  ;;  %v2052_v40 = vsel %vm1492_vm9, %v10935_v3, %v2051_v5  ;;  %8352 = vmatprep.subr.bf16.mxu1 %v9324_v56 }
 0x10b   : > { %v1938_v22 = vpop.permute.xlu0 %1937  ;;  %vm10982_vm7 = vmand %vm3196_vm3, %vm12561_vm5  ;;  %v2679_v53 = vsel %vm2663_vm14, %v2646_v31, %v10921_v51  ;;  %v9325_v51 = vld [vmem:[%s12544_s4 + $0x148] sm:$0xff]   ;;  %vm12564_vm5 = vsmask.f32 7938  ;;  %v3201_v3 = vld [vmem:[#allocation3 + $0xc] sm:$0x1]  ;;  %v2563_v6 = vrot.slane %v10964_v18, 1 }
 0x10c   : > { %v1940_v15 = vpop.permute.xlu1 %1939  ;;  %v2710_v14 = vsel %vm2696_vm15, %v2677_v59, %v1938_v22  ;;  %v3205_v9 = vsel %vm10982_vm7, 0, %v3204_v46  ;;  %vm11006_vm0 = vmand %vm3196_vm3, %vm12564_vm5  ;;  %8817 = vmatprep.subr.bf16.mxu0 %v9325_v51  ;;  %v3256_v12 = vld [vmem:[#allocation3 + $0x14] sm:$0x1]  ;;  %v9340_v31 = vld [vmem:[%s12544_s4 + $0x170] sm:$0xff]  }
 0x10d   : > { %2591 = vrot.lane.b32.xlu0 %v2558_v13, %s9614_s20  ;;  %v2418_v13 = vrot.slane %v2416_v45, 1  ;;  %3206 = vst [vmem:[#allocation3 + $0x18] sm:$0x1] %v3205_v9  ;;  %v2712_v22 = vsel %vm2696_vm15, %v2679_v53, %v1940_v15  ;;  %v2433_v15 = vshll.u32 %v10964_v18, 16  ;;  %v7832_v45 = vcombine.low %v1089_v10, %v10917_v4  ;;  %8818 = vmatpush3.bf16.msra.mxu0 %v9325_v51  ;;  %v3210_v51 = vld [vmem:[#allocation3 + $0x30] sm:$0x1] }
 0x10e   : > { %1442 = vrot.lane.b32.xlu1 %v1411_v1, %s9612_s14  ;;  %8819 = vmatprep.subr.bf16.mxu0 %v9328_v28 }
 0x10f   : > { %v2066_v16 = vpop.permute.xlu0 %2065  ;;  %v2419_v21 = vor.u32 %v2418_v13, %v2414_v42  ;;  %v2435_v52 = vrot.slane %v2433_v15, 1  ;;  %v2559_v42 = vrot.slane %v7832_v45, 1  ;;  %v3211_v15 = vsel %vm10982_vm7, 0, %v3210_v51 }
 0x110   : > { %v2068_v19 = vpop.permute.xlu1 %2067  ;;  %v2743_v7 = vsel %vm2729_vm1, %v2710_v14, %v2066_v16  ;;  %v2560_v14 = vrot.slane %v10946_v44, 1  ;;  %3212 = vst [vmem:[#allocation3 + $0x30] sm:$0x1] %v3211_v15 }
 0x111   : > { %1569 = vrot.lane.b32.xlu0 %v1537_v49, %s9609_s11  ;;  %v2745_v1 = vsel %vm2729_vm1, %v2712_v22, %v2068_v19  ;;  %v2423_v49 = vrot.slane %v2421_v0, 1  ;;  %8820 = vmatpush3.bf16.msra.mxu0 %v9328_v28  ;;  %v9337_v0 = vld [vmem:[%s12544_s4 + $0x168] sm:$0xff]   ;;  %v3207_v28 = vld [vmem:[#allocation3 + $0x24] sm:$0x1] }
 0x112   : > { %1571 = vrot.lane.b32.xlu1 %v1540_v35, %s9609_s11 }
 0x113   : > { %v2178_v32 = vpop.permute.xlu0 %2177 }
 0x114   : > { %v2180_v26 = vpop.permute.xlu1 %2179  ;;  %v2776_v63 = vsel %vm2762_vm6, %v2743_v7, %v2178_v32  ;;  %v3202_v32 = vsel %vm10982_vm7, 0, %v3201_v3  ;;  %v9326_v3 = vld [vmem:[%s12544_s4 + $0xc0] sm:$0xff]  }
 0x115   : > { %1681 = vrot.lane.b32.xlu0 %v10890_v29, %s9610_s12  ;;  %v2049_v29 = vsel %vm1492_vm9, %v2047_v25, %v2048_v11  ;;  %v2430_v25 = vrot.slane %v2428_v33, 1  ;;  %v1090_v11 = vld [vmem:[#allocation2 + $0xcc] sm:$0xe]  ;;  %v2778_v16 = vsel %vm2762_vm6, %v2745_v1, %v2180_v26  ;;  %3203 = vst [vmem:[#allocation3 + $0xc] sm:$0x1] %v3202_v32 }
 0x116   : > { %1683 = vrot.lane.b32.xlu1 %v10904_v17, %s9610_s12  ;;  %v7833_v26 = vcombine.low %v1090_v11, %v10940_v38  ;;  %v9331_v38 = vld [vmem:[%s12544_s4 + $0x158] sm:$0xff]  }
 0x117   : > { %v2450_v55 = vpop.permute.xlu0 %2449  ;;  %v2431_v4 = vor.u32 %v2430_v25, %v2426_v50  ;;  %8821 = vmatprep.subr.bf16.mxu0 %v9331_v38 }
 0x118   : > { %v2452_v27 = vpop.permute.xlu1 %2451  ;;  %v2809_v43 = vsel %vm2795_vm11, %v2776_v63, %v2450_v55  ;;  %v2424_v55 = vsel %vm1219_vm10, %v2419_v21, %v2423_v49  ;;  %v2562_v44 = vrot.slane %v7833_v26, 1  ;;  %8822 = vmatpush3.bf16.msra.mxu0 %v9331_v38  ;;  %v3265_v26 = vld [vmem:[#allocation3 + $0x38] sm:$0x1] }
 0x119   : > { %1953 = vrot.lane.b32.xlu0 %v1912_v47, %s9615_s21  ;;  %v2811_v35 = vsel %vm2795_vm11, %v2778_v16, %v2452_v27  ;;  %v3260_v47 = vsel %vm11006_vm0, 0, %v3259_v58  ;;  %v2436_v33 = vsel %vm1219_vm10, %v2431_v4, %v2435_v52  ;;  %v9343_v27 = vld [vmem:[%s12544_s4 + $0x178] sm:$0xff]   ;;  %v9327_v58 = vld [vmem:[%s12544_s4 + $0x108] sm:$0xff]   ;;  %v3208_v52 = vsel %vm10982_vm7, 0, %v3207_v28  ;;  %v9332_v38 = vld [vmem:[%s12544_s4 + $0xd0] sm:$0xff]  }
 0x11a   : > { %1955 = vrot.lane.b32.xlu1 %v1924_v34, %s9615_s21  ;;  %3261 = vst [vmem:[#allocation3 + $0x20] sm:$0x1] %v3260_v47  ;;  %v2561_v34 = vsel %vm1492_vm9, %v2559_v42, %v2560_v14  ;;  %v2564_v10 = vsel %vm1492_vm9, %v2562_v44, %v2563_v6  ;;  %3209 = vst [vmem:[#allocation3 + $0x24] sm:$0x1] %v3208_v52  ;;  %v3266_v47 = vsel %vm11006_vm0, 0, %v3265_v26  ;;  %v9333_v44 = vld [vmem:[%s12544_s4 + $0x118] sm:$0xff]  }
 0x11b   : > { %v2578_v48 = vpop.permute.xlu0 %2577  ;;  %3267 = vst [vmem:[#allocation3 + $0x38] sm:$0x1] %v3266_v47 }
 0x11c   : > { %v2842_v8 = vsel %vm2828_vm4, %v2809_v43, %v2578_v48  ;;  %v11017_v37 = vpop.permute.xlu1 %1428 }
 0x11d   : > { %2081 = vrot.lane.b32.xlu0 %v2049_v29, %s9613_s15  ;;  %8795 = vmatprep.mubr.msk.bf16.mxu0 %vm2881_vm2, %v2842_v8  ;;  %v2615_v43 = vsel %vm2597_vm12, %v10168_v30, %v11017_v37 }
 0x11e   : > { %2083 = vrot.lane.b32.xlu1 %v2052_v40, %s9613_s15 }
 0x11f   : > { %v2580_v19 = vpop.permute.xlu0 %2579 }
 0x120   : > { %v2844_v39 = vsel %vm2828_vm4, %v2811_v35, %v2580_v19  ;;  %v1431_v59 = vpop.permute.xlu1 %1430 }
 0x121   : > { %2193 = vrot.lane.b32.xlu0 %v10929_v2, %s9611_s13  ;;  %8796 = vmatmul.mubr.msk.bf16.gmra.mrb[12].mxu0 %vm2881_vm2, %v2844_v39  ;;  %v3257_v2 = vsel %vm11006_vm0, 0, %v3256_v12  ;;  %v2617_v8 = vsel %vm2597_vm12, %v10198_v36, %v1431_v59  ;;  %v3262_v12 = vld [vmem:[#allocation3 + $0x2c] sm:$0x1] }
 0x122   : > { %3258 = vst [vmem:[#allocation3 + $0x14] sm:$0x1] %v3257_v2  ;;  %2195 = vrot.lane.b32.xlu1 %v10950_v20, %s9611_s13  ;;  %v9334_v20 = vld [vmem:[%s12544_s4 + $0x160] sm:$0xff]   ;;  %v3263_v42 = vsel %vm11006_vm0, 0, %v3262_v12  ;;  %v9330_v2 = vld [vmem:[%s12544_s4 + $0x110] sm:$0xff]  }
 0x123   : > { %v1558_v29 = vpop.permute.xlu0 %1557  ;;  %8823 = vmatprep.subr.bf16.mxu0 %v9334_v20  ;;  %3264 = vst [vmem:[#allocation3 + $0x2c] sm:$0x1] %v3263_v42 }
 0x124   : > { %v1560_v7 = vpop.permute.xlu1 %1559  ;;  %8824 = vmatpush3.bf16.msra.mxu0 %v9334_v20  ;;  %v2648_v48 = vsel %vm2630_vm13, %v2615_v43, %v1558_v29  ;;  %v9344_v43 = vld [vmem:[%s12544_s4 + $0xf0] sm:$0xff]  }
 0x125   : > { %2465 = vrot.lane.b32.xlu0 %v2424_v55, %s9616_s22  ;;  %8825 = vmatprep.subr.bf16.mxu0 %v9337_v0  ;;  %v2650_v1 = vsel %vm2630_vm13, %v2617_v8, %v1560_v7  ;;  %v9329_v55 = vld [vmem:[%s12544_s4 + $0xc8] sm:$0xff]   ;;  %v9335_v7 = vld [vmem:[%s12544_s4 + $0xd8] sm:$0xff]  }
 0x126   : > { %2467 = vrot.lane.b32.xlu1 %v2436_v33, %s9616_s22 }
 0x127   : > { %v1670_v5 = vpop.permute.xlu0 %1669 }
 0x128   : > { %v1672_v18 = vpop.permute.xlu1 %1671  ;;  %8826 = vmatpush3.bf16.msra.mxu0 %v9337_v0  ;;  %v2681_v50 = vsel %vm2663_vm14, %v2648_v48, %v1670_v5  ;;  %v9336_v5 = vld [vmem:[%s12544_s4 + $0x120] sm:$0xff]  }
 0x129   : > { %2593 = vrot.lane.b32.xlu0 %v2561_v34, %s9614_s20  ;;  %8827 = vmatprep.subr.bf16.mxu0 %v9340_v31  ;;  %v2683_v49 = vsel %vm2663_vm14, %v2650_v1, %v1672_v18  ;;  %v9338_v0 = vld [vmem:[%s12544_s4 + $0xe0] sm:$0xff]   ;;  %v9339_v18 = vld [vmem:[%s12544_s4 + $0x128] sm:$0xff]  }
 0x12a   : > { %2595 = vrot.lane.b32.xlu1 %v2564_v10, %s9614_s20 }
 0x12b   : > { %v1942_v46 = vpop.permute.xlu0 %1941 }
 0x12c   : > { %v1944_v63 = vpop.permute.xlu1 %1943  ;;  %8828 = vmatpush3.bf16.msra.mxu0 %v9340_v31  ;;  %v2714_v11 = vsel %vm2696_vm15, %v2681_v50, %v1942_v46  ;;  %v9341_v31 = vld [vmem:[%s12544_s4 + $0xe8] sm:$0xff]   ;;  %v9348_v50 = vld [vmem:[%s12544_s4 + $0x138] sm:$0xff]  }
 0x12d   : > { %8829 = vmatprep.subr.bf16.mxu0 %v9343_v27  ;;  %v2716_v37 = vsel %vm2696_vm15, %v2683_v49, %v1944_v63 }
 0x12f   : > { %v2070_v13 = vpop.permute.xlu0 %2069 }
 0x130   : > { %v2072_v9 = vpop.permute.xlu1 %2071  ;;  %8830 = vmatpush3.bf16.msra.mxu0 %v9343_v27  ;;  %v2747_v56 = vsel %vm2729_vm1, %v2714_v11, %v2070_v13  ;;  %v9342_v27 = vld [vmem:[%s12544_s4 + $0x130] sm:$0xff]   ;;  %v3216_v11 = vld [vmem:[#allocation3 + $0x48] sm:$0x1] }
 0x131   : > { %v2749_v45 = vsel %vm2729_vm1, %v2716_v37, %v2072_v9 }
 0x133   : > { %v2182_v53 = vpop.permute.xlu0 %2181 }
 0x134   : > { %v2184_v22 = vpop.permute.xlu1 %2183  ;;  %v2780_v40 = vsel %vm2762_vm6, %v2747_v56, %v2182_v53 }
 0x135   : > { %v2782_v35 = vsel %vm2762_vm6, %v2749_v45, %v2184_v22 }
 0x137   : > { %v2454_v25 = vpop.permute.xlu0 %2453 }
 0x138   : > { %v2456_v30 = vpop.permute.xlu1 %2455  ;;  %v2813_v36 = vsel %vm2795_vm11, %v2780_v40, %v2454_v25  ;;  %v3217_v40 = vsel %vm10982_vm7, 0, %v3216_v11  ;;  %v3277_v11 = vld [vmem:[#allocation3 + $0x68] sm:$0x1] }
 0x139   : > { %v2815_v39 = vsel %vm2795_vm11, %v2782_v35, %v2456_v30  ;;  %3218 = vst [vmem:[#allocation3 + $0x48] sm:$0x1] %v3217_v40 }
 0x13b   : > { %v2582_v16 = vpop.permute.xlu0 %2581 }
 0x13c   : > { %v2846_v21 = vsel %vm2828_vm4, %v2813_v36, %v2582_v16  ;;  %v1433_v19 = vpop.permute.xlu1 %1432 }
 0x13d   : > { %8799 = vmatprep.mubr.msk.bf16.mxu1 %vm2881_vm2, %v2846_v21  ;;  %v2619_v13 = vsel %vm2597_vm12, %v10368_v23, %v1433_v19 }
 0x13f   : > { %v2584_v32 = vpop.permute.xlu0 %2583 }
 0x140   : > { %v2848_v4 = vsel %vm2828_vm4, %v2815_v39, %v2584_v32  ;;  %v1435_v59 = vpop.permute.xlu1 %1434 }
 0x141   : > { %8800 = vmatmul.mubr.msk.bf16.vlgmr.msra.gmra.mrb[0].mxu1 %vm2881_vm2, %v2848_v4  ;;  %v2621_v48 = vsel %vm2597_vm12, %v10446_v62, %v1435_v59  ;;  %v9351_v62 = vld [vmem:[%s12544_s4 + $0xf8] sm:$0xff]  }
 0x142   : > { %8353 = vmatpush3.bf16.msra.mxu1 %v9326_v3  ;;  %v3213_v3 = vld [vmem:[#allocation3 + $0x3c] sm:$0x1]  ;;  %v3268_v4 = vld [vmem:[#allocation3 + $0x44] sm:$0x1] }
 0x143   : > { %v1562_v14 = vpop.permute.xlu0 %1561  ;;  %8354 = vmatprep.subr.bf16.mxu1 %v9327_v58  ;;  %v3214_v32 = vsel %vm10982_vm7, 0, %v3213_v3  ;;  %v3271_v58 = vld [vmem:[#allocation3 + $0x50] sm:$0x1]  ;;  %v3269_v26 = vsel %vm11006_vm0, 0, %v3268_v4  ;;  %v11201_v3 = vld [vmem:[%s12543_s3] ss:$0 sm:$0xff] }
 0x144   : > { %v1564_v29 = vpop.permute.xlu1 %1563  ;;  %v2652_v9 = vsel %vm2630_vm13, %v2619_v13, %v1562_v14  ;;  %3215 = vst [vmem:[#allocation3 + $0x3c] sm:$0x1] %v3214_v32  ;;  %v3272_v28 = vsel %vm11006_vm0, 0, %v3271_v58  ;;  %3270 = vst [vmem:[#allocation3 + $0x44] sm:$0x1] %v3269_v26 }
 0x145   : > { %v2654_v56 = vsel %vm2630_vm13, %v2621_v48, %v1564_v29  ;;  %3273 = vst [vmem:[#allocation3 + $0x50] sm:$0x1] %v3272_v28 }
 0x146   : > { %8355 = vmatpush3.bf16.msra.mxu1 %v9329_v55 }
 0x147   : > { %v1674_v33 = vpop.permute.xlu0 %1673  ;;  %8356 = vmatprep.subr.bf16.mxu1 %v9330_v2 }
 0x148   : > { %v1676_v6 = vpop.permute.xlu1 %1675  ;;  %v2685_v22 = vsel %vm2663_vm14, %v2652_v9, %v1674_v33 }
 0x149   : > { %v2687_v30 = vsel %vm2663_vm14, %v2654_v56, %v1676_v6  ;;  %v3278_v56 = vsel %vm11006_vm0, 0, %v3277_v11 }
 0x14a   : > { %8357 = vmatpush3.bf16.msra.mxu1 %v9332_v38  ;;  %3279 = vst [vmem:[#allocation3 + $0x68] sm:$0x1] %v3278_v56 }
 0x14b   : > { %v1946_v34 = vpop.permute.xlu0 %1945  ;;  %8358 = vmatprep.subr.bf16.mxu1 %v9333_v44 }
 0x14c   : > { %v1948_v20 = vpop.permute.xlu1 %1947  ;;  %v2718_v23 = vsel %vm2696_vm15, %v2685_v22, %v1946_v34 }
 0x14d   : > { %v2720_v36 = vsel %vm2696_vm15, %v2687_v30, %v1948_v20 }
 0x14e   : > { %8359 = vmatpush3.bf16.msra.mxu1 %v9335_v7 }
 0x14f   : > { %v2074_v10 = vpop.permute.xlu0 %2073  ;;  %8360 = vmatprep.subr.bf16.mxu1 %v9336_v5 }
 0x150   : > { %v2076_v46 = vpop.permute.xlu1 %2075  ;;  %v2751_v25 = vsel %vm2729_vm1, %v2718_v23, %v2074_v10  ;;  %v3222_v10 = vld [vmem:[#allocation3 + $0x60] sm:$0x1] }
 0x151   : > { %v2753_v37 = vsel %vm2729_vm1, %v2720_v36, %v2076_v46 }
 0x152   : > { %8361 = vmatpush3.bf16.msra.mxu1 %v9338_v0 }
 0x153   : > { %v2186_v63 = vpop.permute.xlu0 %2185  ;;  %8362 = vmatprep.subr.bf16.mxu1 %v9339_v18 }
 0x154   : > { %v2188_v53 = vpop.permute.xlu1 %2187  ;;  %v2784_v51 = vsel %vm2762_vm6, %v2751_v25, %v2186_v63 }
 0x155   : > { %v2786_v21 = vsel %vm2762_vm6, %v2753_v37, %v2188_v53 }
 0x156   : > { %8363 = vmatpush3.bf16.msra.mxu1 %v9341_v31 }
 0x157   : > { %v2458_v8 = vpop.permute.xlu0 %2457  ;;  %8364 = vmatprep.subr.bf16.mxu1 %v9342_v27 }
 0x158   : > { %v2460_v1 = vpop.permute.xlu1 %2459  ;;  %v2817_v15 = vsel %vm2795_vm11, %v2784_v51, %v2458_v8  ;;  %v3274_v51 = vld [vmem:[#allocation3 + $0x5c] sm:$0x1] }
 0x159   : > { %v2819_v35 = vsel %vm2795_vm11, %v2786_v21, %v2460_v1 }
 0x15a   : > { %8365 = vmatpush3.bf16.msra.mxu1 %v9344_v43 }
 0x15b   : > { %v2586_v49 = vpop.permute.xlu0 %2585  ;;  %8366 = vmatprep.subr.bf16.mxu1 %v9348_v50  ;;  %v3219_v50 = vld [vmem:[#allocation3 + $0x54] sm:$0x1] }
 0x15c   : > { %v2850_v16 = vsel %vm2828_vm4, %v2817_v15, %v2586_v49  ;;  %v1437_v45 = vpop.permute.xlu1 %1436  ;;  %v3220_v25 = vsel %vm10982_vm7, 0, %v3219_v50 }
 0x15d   : > { %8803 = vmatprep.mubr.msk.bf16.mxu1 %vm2881_vm2, %v2850_v16  ;;  %v2623_v33 = vsel %vm2597_vm12, %v10582_v54, %v1437_v45  ;;  %v3223_v54 = vsel %vm10982_vm7, 0, %v3222_v10  ;;  %3221 = vst [vmem:[#allocation3 + $0x54] sm:$0x1] %v3220_v25  ;;  %v11196_v45 = vld [vmem:[%s12542_s2] ss:$0 sm:$0xff] }
 0x15e   : > { %8367 = vmatpush3.bf16.msra.mxu1 %v9351_v62  ;;  %3224 = vst [vmem:[#allocation3 + $0x60] sm:$0x1] %v3223_v54  ;;  %v3275_v62 = vsel %vm11006_vm0, 0, %v3274_v51  ;;  %v3726_v51 = vld [vmem:[#allocation3 + $0xc] sm:$0xf] }
 0x15f   : > { %v2588_v19 = vpop.permute.xlu0 %2587  ;;  %3276 = vst [vmem:[#allocation3 + $0x5c] sm:$0x1] %v3275_v62 }
 0x160   : > { %v2852_v39 = vsel %vm2828_vm4, %v2819_v35, %v2588_v19  ;;  %v1439_v52 = vpop.permute.xlu1 %1438 }
 0x161   : > { %8804 = vmatmul.mubr.msk.bf16.gmra.mrb[4].mxu1 %vm2881_vm2, %v2852_v39  ;;  %v2625_v7 = vsel %vm2597_vm12, %v10635_v57, %v1439_v52 }
 0x163   : > { %v1566_v47 = vpop.permute.xlu0 %1565 }
 0x164   : > { %v1568_v12 = vpop.permute.xlu1 %1567  ;;  %v2656_v44 = vsel %vm2630_vm13, %v2623_v33, %v1566_v47 }
 0x165   : > { %v2658_v18 = vsel %vm2630_vm13, %v2625_v7, %v1568_v12  ;;  %v3228_v7 = vld [vmem:[#allocation3 + $0x78] sm:$0x1] }
 0x166   : > { %v3229_v10 = vsel %vm10982_vm7, 0, %v3228_v7 }
 0x167   : > { %v1678_v59 = vpop.permute.xlu0 %1677  ;;  %3230 = vst [vmem:[#allocation3 + $0x78] sm:$0x1] %v3229_v10 }
 0x168   : > { %v1680_v55 = vpop.permute.xlu1 %1679  ;;  %v2689_v34 = vsel %vm2663_vm14, %v2656_v44, %v1678_v59 }
 0x169   : > { %v2691_v63 = vsel %vm2663_vm14, %v2658_v18, %v1680_v55 }
 0x16b   : > { %v1950_v42 = vpop.permute.xlu0 %1949 }
 0x16c   : > { %v1952_v14 = vpop.permute.xlu1 %1951  ;;  %v2722_v20 = vsel %vm2696_vm15, %v2689_v34, %v1950_v42 }
 0x16d   : > { %v2724_v13 = vsel %vm2696_vm15, %v2691_v63, %v1952_v14 }
 0x16f   : > { %v2078_v2 = vpop.permute.xlu0 %2077 }
 0x170   : > { %v2080_v29 = vpop.permute.xlu1 %2079  ;;  %v2755_v0 = vsel %vm2729_vm1, %v2722_v20, %v2078_v2 }
 0x171   : > { %v2757_v53 = vsel %vm2729_vm1, %v2724_v13, %v2080_v29 }
 0x173   : > { %v2190_v38 = vpop.permute.xlu0 %2189 }
 0x174   : > { %v2192_v6 = vpop.permute.xlu1 %2191  ;;  %v2788_v46 = vsel %vm2762_vm6, %v2755_v0, %v2190_v38 }
 0x175   : > { %v2790_v43 = vsel %vm2762_vm6, %v2757_v53, %v2192_v6 }
 0x177   : > { %v2462_v5 = vpop.permute.xlu0 %2461 }
 0x178   : > { %v2464_v31 = vpop.permute.xlu1 %2463  ;;  %v2821_v57 = vsel %vm2795_vm11, %v2788_v46, %v2462_v5 }
 0x179   : > { %v2823_v22 = vsel %vm2795_vm11, %v2790_v43, %v2464_v31 }
 0x17b   : > { %v2590_v27 = vpop.permute.xlu0 %2589 }
 0x17c   : > { %v2854_v9 = vsel %vm2828_vm4, %v2821_v57, %v2590_v27  ;;  %v1441_v48 = vpop.permute.xlu1 %1440 }
 0x17d   : > { %8807 = vmatprep.mubr.msk.bf16.mxu1 %vm2881_vm2, %v2854_v9  ;;  %v2627_v39 = vsel %vm2597_vm12, %v10789_v60, %v1441_v48 }
 0x17f   : > { %v2592_v8 = vpop.permute.xlu0 %2591 }
 0x180   : > { %v2856_v23 = vsel %vm2828_vm4, %v2823_v22, %v2592_v8  ;;  %v1443_v1 = vpop.permute.xlu1 %1442  ;;  %v3733_v22 = vld [vmem:[#allocation3 + $0x18] sm:$0xf] }
 0x181   : > { %8808 = vmatmul.mubr.msk.bf16.gmra.mrb[8].mxu1 %vm2881_vm2, %v2856_v23  ;;  %v2629_v32 = vsel %vm2597_vm12, %v10857_v24, %v1443_v1 }
 0x183   : > { %v1570_v40 = vpop.permute.xlu0 %1569 }
 0x184   : > { %v1572_v30 = vpop.permute.xlu1 %1571  ;;  %v2660_v4 = vsel %vm2630_vm13, %v2627_v39, %v1570_v40  ;;  %v3225_v40 = vld [vmem:[#allocation3 + $0x6c] sm:$0x1] }
 0x185   : > { %v2662_v14 = vsel %vm2630_vm13, %v2629_v32, %v1572_v30  ;;  %vm3724_vm13 = vcmask 1043456   ;;  %v3280_v32 = vld [vmem:[#allocation3 + $0x74] sm:$0x1] }
 0x187   : > { %v1682_v15 = vpop.permute.xlu0 %1681 }
 0x188   : > { %v1684_v49 = vpop.permute.xlu1 %1683  ;;  %v2693_v12 = vsel %vm2663_vm14, %v2660_v4, %v1682_v15 }
 0x189   : > { %v2695_v38 = vsel %vm2663_vm14, %v2662_v14, %v1684_v49  ;;  %vm12567_vm14 = vmmov %vm12564_vm5 }
 0x18b   : > { %v1954_v36 = vpop.permute.xlu0 %1953 }
 0x18c   : > { %v1956_v16 = vpop.permute.xlu1 %1955  ;;  %v2726_v24 = vsel %vm2696_vm15, %v2693_v12, %v1954_v36 }
 0x18d   : > { %v2728_v18 = vsel %vm2696_vm15, %v2695_v38, %v1956_v16  ;;  %vm11234_vm15 = vmand %vm3724_vm13, %vm12567_vm14  ;;  %v3226_v16 = vsel %vm10982_vm7, 0, %v3225_v40 }
 0x18e   : > { %3227 = vst [vmem:[#allocation3 + $0x6c] sm:$0x1] %v3226_v16 }
 0x18f   : > { %v2082_v37 = vpop.permute.xlu0 %2081 }
 0x190   : > { %v2084_v21 = vpop.permute.xlu1 %2083  ;;  %v2759_v33 = vsel %vm2729_vm1, %v2726_v24, %v2082_v37  ;;  %v3283_v37 = vld [vmem:[#allocation3 + $0x80] sm:$0x1] }
 0x191   : > { %v2761_v57 = vsel %vm2729_vm1, %v2728_v18, %v2084_v21  ;;  %v3284_v39 = vsel %vm11006_vm0, 0, %v3283_v37 }
 0x192   : > { %3285 = vst [vmem:[#allocation3 + $0x80] sm:$0x1] %v3284_v39 }
 0x193   : > { %v2194_v35 = vpop.permute.xlu0 %2193 }
 0x194   : > { %v8785_v19 = vpop.f32.mrb[0].mxu0  ;;  %v2196_v52 = vpop.permute.xlu1 %2195  ;;  %v2792_v34 = vsel %vm2762_vm6, %v2759_v33, %v2194_v35 }
 0x195   : > { %v3088_v58 = vmul.f32 %v8785_v19, %v11196_v45  ;;  %v2952_v28 = vpop.f32.mrb[1].mxu0  ;;  %v2794_v53 = vsel %vm2762_vm6, %v2761_v57, %v2196_v52 }
 0x196   : > { %v3086_v26 = vmul.f32 %v11196_v45, %v2952_v28  ;;  %v8786_v47 = vpop.f32.mrb[2].mxu0  ;;  %v3737_v28 = vld [vmem:[#allocation3 + $0x20] sm:$0x1] }
 0x197   : > { %v3127_v59 = vadd.f32 %v11201_v3, %v3088_v58  ;;  %v3089_v55 = vmul.f32 %v8786_v47, %v11196_v45  ;;  %v2955_v42 = vpop.f32.mrb[3].mxu0  ;;  %v2466_v60 = vpop.permute.xlu0 %2465 }
 0x198   : > { %v3125_v2 = vadd.f32 %v11201_v3, %v3086_v26  ;;  %v3087_v29 = vmul.f32 %v11196_v45, %v2955_v42  ;;  %v2468_v20 = vpop.permute.xlu1 %2467  ;;  %v2825_v54 = vsel %vm2795_vm11, %v2792_v34, %v2466_v60  ;;  %v3281_v26 = vsel %vm11006_vm0, 0, %v3280_v32  ;;  %v3730_v42 = vld [vmem:[#allocation3 + $0x14] sm:$0x1] }
 0x199   : > { %v3159_v44 = vmax.f32 %v3127_v59, 0.0  ;;  %v3128_v6 = vadd.f32 %v11201_v3, %v3089_v55  ;;  %v2827_v50 = vsel %vm2795_vm11, %v2794_v53, %v2468_v20  ;;  %3282 = vst [vmem:[#allocation3 + $0x74] sm:$0x1] %v3281_v26 }
 0x19a   : > { %v3157_v5 = vmax.f32 %v3125_v2, 0.0  ;;  %v3126_v0 = vadd.f32 %v11201_v3, %v3087_v29 }
 0x19b   : > { %v8271_v46 = vpack.c.bf16 %v3159_v44, %v3159_v44  ;;  %v3160_v31 = vmax.f32 %v3128_v6, 0.0  ;;  %v2594_v63 = vpop.permute.xlu0 %2593 }
 0x19c   : > { %v8269_v27 = vpack.c.bf16 %v3157_v5, %v3157_v5  ;;  %v3158_v13 = vmax.f32 %v3126_v0, 0.0  ;;  %v2858_v9 = vsel %vm2828_vm4, %v2825_v54, %v2594_v63  ;;  %v2596_v25 = vpop.permute.xlu1 %2595 }
 0x19d   : > { %v3421_v43 = vshrl.u32 %v8271_v46, 16  ;;  %v8272_v48 = vpack.c.bf16 %v3160_v31, %v3160_v31  ;;  %8811 = vmatprep.mubr.msk.bf16.mxu1 %vm2881_vm2, %v2858_v9  ;;  %v3424_v56 = vshll.u32 %v8271_v46, 16  ;;  %v2860_v62 = vsel %vm2828_vm4, %v2827_v50, %v2596_v25 }
 0x19e   : > { %v3404_v8 = vshrl.u32 %v8269_v27, 16  ;;  %v8270_v23 = vpack.c.bf16 %v3158_v13, %v3158_v13  ;;  %v3407_v49 = vshll.u32 %v8269_v27, 16  ;;  %8812 = vmatmul.mubr.msk.bf16.gmra.mrb[12].mxu1 %vm2881_vm2, %v2860_v62  ;;  %vm12577_vm2 = vcmask 1041408  }
 0x19f   : > { %v3423_v11 = vrot.slane %v3421_v43, 7  ;;  %v3429_v1 = vshrl.u32 %v8272_v48, 16  ;;  %v3432_v19 = vshll.u32 %v8272_v48, 16  ;;  %vm12632_vm4 = vcmask 27648  }
 0x1a0   : > { %v3406_v15 = vrot.slane %v3404_v8, 7  ;;  %v3412_v36 = vshrl.u32 %v8270_v23, 16  ;;  %v3415_v52 = vshll.u32 %v8270_v23, 16  ;;  %vm12636_vm11 = vmmov %vm12632_vm4 }
 0x1a1   : > { %v3426_v21 = vor.u32 %v3424_v56, %v3423_v11  ;;  %v3431_v35 = vrot.slane %v3429_v1, 7  ;;  %v3427_v47 = vrot.slane %v3423_v11, 4  ;;  %vm12638_vm1 = vmmov %vm12632_vm4 }
 0x1a2   : > { %v3409_v58 = vor.u32 %v3407_v49, %v3406_v15  ;;  %v3414_v4 = vrot.slane %v3412_v36, 7  ;;  %v3410_v60 = vrot.slane %v3406_v15, 4  ;;  %vm12639_vm6 = vmmov %vm12638_vm1 }
 0x1a3   : > { %v3734_v12 = vsel %vm11234_vm15, %v3426_v21, %v3733_v22  ;;  %v3434_v59 = vor.u32 %v3432_v19, %v3431_v35  ;;  %v3436_v55 = vrot.slane %v3431_v35, 4  ;;  %vm12640_vm3 = vmmov %vm12638_vm1 }
 0x1a4   : > { %3735 = vst [vmem:[#allocation3 + $0x18] sm:$0xf] %v3734_v12  ;;  %v3727_v14 = vsel %vm11234_vm15, %v3409_v58, %v3726_v51  ;;  %v3417_v24 = vor.u32 %v3415_v52, %v3414_v4  ;;  %v3419_v2 = vrot.slane %v3414_v4, 4  ;;  %v3234_v52 = vld [vmem:[#allocation3 + $0x90] sm:$0x1]  ;;  %vm12642_vm5 = vmmov %vm12638_vm1 }
 0x1a5   : > { %3728 = vst [vmem:[#allocation3 + $0xc] sm:$0xf] %v3727_v14  ;;  %v3435_v29 = vsel %vm9729_vm8, %v3427_v47, %v3434_v59  ;;  %v3738_v38 = vsel %vm10982_vm7, %v3436_v55, %v3737_v28  ;;  %v3235_v59 = vsel %vm10982_vm7, 0, %v3234_v52  ;;  %vm12643_vm13 = vmmov %vm12638_vm1 }
 0x1a6   : > { %3736 = vst [vmem:[#allocation3 + $0x1c] sm:$0xf] %v3435_v29  ;;  %3739 = vst [vmem:[#allocation3 + $0x20] sm:$0x1] %v3738_v38  ;;  %v3418_v33 = vsel %vm9729_vm8, %v3410_v60, %v3417_v24  ;;  %v3731_v44 = vsel %vm10982_vm7, %v3419_v2, %v3730_v42  ;;  %v3747_v29 = vld [vmem:[#allocation3 + $0x30] sm:$0xf] }
 0x1a7   : > { %3729 = vst [vmem:[#allocation3 + $0x10] sm:$0xf] %v3418_v33  ;;  %3732 = vst [vmem:[#allocation3 + $0x14] sm:$0x1] %v3731_v44 }
 0x1a8   : > { %3236 = vst [vmem:[#allocation3 + $0x90] sm:$0x1] %v3235_v59  ;;  %vm12644_vm14 = vmmov %vm12638_vm1 }
 0x1ab   : > { %v4463_v6 = vld [vmem:[#allocation3 + $0x18] sm:$0xe] }
 0x1ac   : > { %v4416_v7 = vld [vmem:[#allocation3 + $0x18] sm:$0xf]  ;;  %v4414_v34 = vld [vmem:[#allocation3 + $0xc] sm:$0xf] }
 0x1ad   : > { %v4417_v5 = vld [vmem:[#allocation3 + $0x1c] sm:$0xf]  ;;  %v4462_v0 = vld [vmem:[#allocation3 + $0xc] sm:$0xe] }
 0x1ae   : > { %v4415_v20 = vld [vmem:[#allocation3 + $0x10] sm:$0xf]  ;;  %v7968_v10 = vcombine.low %v4463_v6, %v4417_v5  ;;  %v11257_v18 = vcombine.low %v4416_v7, %v4417_v5  ;;  %v9346_v31 = vld [vmem:[#allocation3 + $0x14] ss:$0 sps:$4 sm:$0x11]  }
 0x1af   : > { %v7935_v46 = vcombine.low %v4414_v34, %v4415_v20  ;;  %v7967_v54 = vcombine.low %v4462_v0, %v4415_v20  ;;  %v9349_v63 = vld [vmem:[#allocation3 + $0x20] ss:$0 sps:$4 sm:$0x11]   ;;  %v4879_v9 = vrot.slane %v9346_v31, 1  ;;  %v4630_v48 = vshll.u32 %v9346_v31, 16 }
 0x1b0   : > { %v4881_v57 = vrot.slane %v7968_v10, 1  ;;  %v4637_v27 = vshll.u32 %v11257_v18, 16  ;;  %v4882_v53 = vrot.slane %v9349_v63, 1  ;;  %v4635_v50 = vshrl.u32 %v11257_v18, 16  ;;  %v3740_v34 = vld [vmem:[#allocation3 + $0x24] sm:$0xf] }
 0x1b1   : > { %v4878_v13 = vrot.slane %v7967_v54, 1  ;;  %v4625_v43 = vshll.u32 %v7935_v46, 16  ;;  %v4623_v11 = vshrl.u32 %v7935_v46, 16  ;;  %v4642_v51 = vshll.u32 %v9349_v63, 16  ;;  %v3231_v20 = vld [vmem:[#allocation3 + $0x84] sm:$0x1] }
 0x1b2   : > { %v4639_v22 = vrot.slane %v4637_v27, 1  ;;  %v4883_v25 = vsel %vm1492_vm9, %v4881_v57, %v4882_v53  ;;  %v4632_v36 = vrot.slane %v4630_v48, 1  ;;  %v3841_v0 = vld [vmem:[#allocation3 + $0x10] sm:$0xf]  ;;  %v3751_v54 = vld [vmem:[#allocation3 + $0x38] sm:$0x1] }
 0x1b3   : > { %v4880_v8 = vsel %vm1492_vm9, %v4878_v13, %v4879_v9  ;;  %v4627_v56 = vrot.slane %v4625_v43, 1  ;;  %v4644_v58 = vrot.slane %v4642_v51, 1  ;;  %v9426_v10 = vld [vmem:[#allocation3 + $0x14] ss:$0 sps:$4 sm:$0x11]   ;;  %v3232_v57 = vsel %vm10982_vm7, 0, %v3231_v20 }
 0x1b4   : > { %v8789_v23 = vpop.f32.mrb[4].mxu0  ;;  %8831 = vmatprep.mubr.bf16.mxu0 %v4880_v8  ;;  %v4640_v16 = vor.u32 %v4639_v22, %v4635_v50  ;;  %v3289_v27 = vld [vmem:[#allocation3 + $0x98] sm:$0x1]  ;;  %v3744_v43 = vld [vmem:[#allocation3 + $0x2c] sm:$0x1] }
 0x1b5   : > { %v3092_v1 = vmul.f32 %v8789_v23, %v11196_v45  ;;  %v2968_v62 = vpop.f32.mrb[5].mxu0  ;;  %8832 = vmatmul.mubr.bf16.vlgmr.msra.gmra.mrb[16].mxu0 %v4883_v25  ;;  %v4628_v49 = vor.u32 %v4627_v56, %v4623_v11  ;;  %3233 = vst [vmem:[#allocation3 + $0x84] sm:$0x1] %v3232_v57  ;;  %v3290_v48 = vsel %vm11006_vm0, 0, %v3289_v27  ;;  %v3286_v22 = vld [vmem:[#allocation3 + $0x8c] sm:$0x1] }
 0x1b6   : > { %v3090_v40 = vmul.f32 %v11196_v45, %v2968_v62  ;;  %v8790_v15 = vpop.f32.mrb[6].mxu0  ;;  %v4645_v12 = vsel %vm1219_vm10, %v4640_v16, %v4644_v58  ;;  %v9431_v8 = vld [vmem:[#allocation3 + $0x20] ss:$0 sps:$4 sm:$0x11]   ;;  %v3843_v50 = vld [vmem:[#allocation3 + $0x1c] sm:$0xf] }
 0x1b7   : > { %v3131_v37 = vadd.f32 %v11201_v3, %v3092_v1  ;;  %v3093_v21 = vmul.f32 %v8790_v15, %v11196_v45  ;;  %v2971_v35 = vpop.f32.mrb[7].mxu0  ;;  %v4633_v32 = vsel %vm1219_vm10, %v4628_v49, %v4632_v36  ;;  %3291 = vst [vmem:[#allocation3 + $0x98] sm:$0x1] %v3290_v48  ;;  %v3287_v56 = vsel %vm11006_vm0, 0, %v3286_v22  ;;  %v3887_v51 = vld [vmem:[#allocation3 + $0xc] sm:$0xe] }
 0x1b8   : > { %v3129_v19 = vadd.f32 %v11201_v3, %v3090_v40  ;;  %v3091_v39 = vmul.f32 %v11196_v45, %v2971_v35  ;;  %5167 = vmatprep.mubr.bf16.mxu1 %v4633_v32  ;;  %3288 = vst [vmem:[#allocation3 + $0x8c] sm:$0x1] %v3287_v56  ;;  %v9434_v49 = vld [vmem:[#allocation3 + $0x20] ss:$0 sps:$4 sm:$0x11]   ;;  %v6389_v59 = vrot.slane %v9431_v8, 1 }
 0x1b9   : > { %v3163_v28 = vmax.f32 %v3131_v37, 0.0  ;;  %v3132_v4 = vadd.f32 %v11201_v3, %v3093_v21  ;;  %5168 = vmatmul.mubr.bf16.vlgmr.msra.gmra.mrb[16].mxu1 %v7935_v46  ;;  %v7920_v21 = vcombine.low %v3887_v51, %v3841_v0  ;;  %v3888_v32 = vld [vmem:[#allocation3 + $0x18] sm:$0xe] }
 0x1ba   : > { %v3161_v26 = vmax.f32 %v3129_v19, 0.0  ;;  %v3130_v47 = vadd.f32 %v11201_v3, %v3091_v39  ;;  %5175 = vmatprep.mubr.bf16.mxu1 %v4645_v12  ;;  %v4306_v39 = vrot.slane %v9426_v10, 1  ;;  %v7921_v52 = vcombine.low %v3888_v32, %v3843_v50 }
 0x1bb   : > { %v8275_v55 = vpack.c.bf16 %v3163_v28, %v3163_v28  ;;  %v3164_v42 = vmax.f32 %v3132_v4, 0.0  ;;  %v4305_v4 = vrot.slane %v7920_v21, 1 }
 0x1bc   : > { %v8273_v60 = vpack.c.bf16 %v3161_v26, %v3161_v26  ;;  %v3162_v14 = vmax.f32 %v3130_v47, 0.0  ;;  %v5972_v26 = vld [vmem:[#allocation3 + $0x18] sm:$0xe]  ;;  %v4309_v47 = vrot.slane %v9434_v49, 1 }
 0x1bd   : > { %v3455_v24 = vshrl.u32 %v8275_v55, 16  ;;  %v8276_v2 = vpack.c.bf16 %v3164_v42, %v3164_v42  ;;  %v3458_v6 = vshll.u32 %v8275_v55, 16  ;;  %v11295_v55 = vsel %vm1492_vm9, %v4305_v4, %v4306_v39  ;;  %v3240_v39 = vld [vmem:[#allocation3 + $0xa8] sm:$0x1] }
 0x1be   : > { %v3438_v38 = vshrl.u32 %v8273_v60, 16  ;;  %v8274_v33 = vpack.c.bf16 %v3162_v14, %v3162_v14  ;;  %v3441_v7 = vshll.u32 %v8273_v60, 16  ;;  %v4308_v42 = vrot.slane %v7921_v52, 1 }
 0x1bf   : > { %v3457_v44 = vrot.slane %v3455_v24, 7  ;;  %v3463_v5 = vshrl.u32 %v8276_v2, 16  ;;  %v3466_v31 = vshll.u32 %v8276_v2, 16  ;;  %v3241_v4 = vsel %vm10982_vm7, 0, %v3240_v39 }
 0x1c0   : > { %v3440_v46 = vrot.slane %v3438_v38, 7  ;;  %v3446_v63 = vshrl.u32 %v8274_v33, 16  ;;  %v3449_v53 = vshll.u32 %v8274_v33, 16  ;;  %v11298_v14 = vsel %vm1492_vm9, %v4308_v42, %v4309_v47  ;;  %3242 = vst [vmem:[#allocation3 + $0xa8] sm:$0x1] %v3241_v4  ;;  %v9385_v4 = vld [vmem:[%s12544_s4 + $0x1c0] sm:$0xff]  }
 0x1c1   : > { %v3460_v13 = vor.u32 %v3458_v6, %v3457_v44  ;;  %v3465_v9 = vrot.slane %v3463_v5, 7  ;;  %v3461_v23 = vrot.slane %v3457_v44, 4  ;;  %5176 = vmatmul.mubr.bf16.gmra.mrb[20].mxu1 %v11257_v18  ;;  %v5925_v18 = vld [vmem:[#allocation3 + $0x1c] sm:$0xf]  ;;  %8624 = vmatprep.subr.bf16.mxu1 %v9385_v4 }
 0x1c2   : > { %v3443_v25 = vor.u32 %v3441_v7, %v3440_v46  ;;  %v3448_v11 = vrot.slane %v3446_v63, 7  ;;  %v3444_v62 = vrot.slane %v3440_v46, 4  ;;  %v8111_v12 = vcombine.low %v5972_v26, %v5925_v18 }
 0x1c3   : > { %v3748_v1 = vsel %vm11234_vm15, %v3460_v13, %v3747_v29  ;;  %v3468_v40 = vor.u32 %v3466_v31, %v3465_v9  ;;  %v3470_v15 = vrot.slane %v3465_v9, 4 }
 0x1c4   : > { %3749 = vst [vmem:[#allocation3 + $0x30] sm:$0xf] %v3748_v1  ;;  %v3741_v36 = vsel %vm11234_vm15, %v3443_v25, %v3740_v34  ;;  %v3451_v16 = vor.u32 %v3449_v53, %v3448_v11  ;;  %v3453_v37 = vrot.slane %v3448_v11, 4  ;;  %v6388_v60 = vrot.slane %v8111_v12, 1 }
 0x1c5   : > { %3742 = vst [vmem:[#allocation3 + $0x24] sm:$0xf] %v3741_v36  ;;  %v3469_v35 = vsel %vm9729_vm8, %v3461_v23, %v3468_v40  ;;  %v3752_v19 = vsel %vm10982_vm7, %v3470_v15, %v3751_v54 }
 0x1c6   : > { %3750 = vst [vmem:[#allocation3 + $0x34] sm:$0xf] %v3469_v35  ;;  %3753 = vst [vmem:[#allocation3 + $0x38] sm:$0x1] %v3752_v19  ;;  %v3452_v58 = vsel %vm9729_vm8, %v3444_v62, %v3451_v16  ;;  %v3745_v28 = vsel %vm10982_vm7, %v3453_v37, %v3744_v43  ;;  %v11301_v24 = vsel %vm1492_vm9, %v6388_v60, %v6389_v59  ;;  %v3761_v60 = vld [vmem:[#allocation3 + $0x48] sm:$0xf] }
 0x1c7   : > { %3743 = vst [vmem:[#allocation3 + $0x28] sm:$0xf] %v3452_v58  ;;  %3746 = vst [vmem:[#allocation3 + $0x2c] sm:$0x1] %v3745_v28 }
 0x1c8   : > { %12570 = vst [vmem:[#allocation4_spill] sm:$0xff] %v11301_v24 }
 0x1cb   : > { %v4420_v2 = vld [vmem:[#allocation3 + $0x30] sm:$0xf] }
 0x1cc   : > { %v4465_v29 = vld [vmem:[#allocation3 + $0x30] sm:$0xe]  ;;  %v4418_v38 = vld [vmem:[#allocation3 + $0x24] sm:$0xf] }
 0x1cd   : > { %v4421_v33 = vld [vmem:[#allocation3 + $0x34] sm:$0xf]  ;;  %v4464_v6 = vld [vmem:[#allocation3 + $0x24] sm:$0xe]  ;;  %v3890_v39 = vld [vmem:[#allocation3 + $0x30] sm:$0xe] }
 0x1ce   : > { %v4419_v44 = vld [vmem:[#allocation3 + $0x28] sm:$0xf]  ;;  %v11303_v7 = vcombine.low %v4420_v2, %v4421_v33  ;;  %v7970_v34 = vcombine.low %v4465_v29, %v4421_v33  ;;  %v9354_v20 = vld [vmem:[#allocation3 + $0x2c] ss:$0 sps:$4 sm:$0x11]  }
 0x1cf   : > { %v7937_v5 = vcombine.low %v4418_v38, %v4419_v44  ;;  %v7969_v0 = vcombine.low %v4464_v6, %v4419_v44  ;;  %v9357_v10 = vld [vmem:[#allocation3 + $0x38] ss:$0 sps:$4 sm:$0x11]   ;;  %v4885_v63 = vrot.slane %v9354_v20, 1  ;;  %v4654_v13 = vshll.u32 %v9354_v20, 16 }
 0x1d0   : > { %v4887_v46 = vrot.slane %v7970_v34, 1  ;;  %v4661_v31 = vshll.u32 %v11303_v7, 16  ;;  %v4888_v57 = vrot.slane %v9357_v10, 1  ;;  %v4659_v43 = vshrl.u32 %v11303_v7, 16  ;;  %v3754_v44 = vld [vmem:[#allocation3 + $0x3c] sm:$0xf] }
 0x1d1   : > { %v4884_v54 = vrot.slane %v7969_v0, 1  ;;  %v4649_v27 = vshll.u32 %v7937_v5, 16  ;;  %v4647_v8 = vshrl.u32 %v7937_v5, 16  ;;  %v4666_v23 = vshll.u32 %v9357_v10, 16  ;;  %v3237_v34 = vld [vmem:[#allocation3 + $0x9c] sm:$0x1] }
 0x1d2   : > { %v4663_v9 = vrot.slane %v4661_v31, 1  ;;  %v4889_v22 = vsel %vm1492_vm9, %v4887_v46, %v4888_v57  ;;  %v4656_v62 = vrot.slane %v4654_v13, 1  ;;  %v3765_v0 = vld [vmem:[#allocation3 + $0x50] sm:$0x1]  ;;  %v3238_v46 = vsel %vm10982_vm7, 0, %v3237_v34 }
 0x1d3   : > { %v4886_v53 = vsel %vm1492_vm9, %v4884_v54, %v4885_v63  ;;  %v4651_v50 = vrot.slane %v4649_v27, 1  ;;  %v4668_v21 = vrot.slane %v4666_v23, 1  ;;  %v3295_v31 = vld [vmem:[#allocation3 + $0xb0] sm:$0x1]  ;;  %v3758_v27 = vld [vmem:[#allocation3 + $0x44] sm:$0x1] }
 0x1d4   : > { %v8793_v48 = vpop.f32.mrb[8].mxu0  ;;  %8835 = vmatprep.mubr.bf16.mxu0 %v4886_v53  ;;  %v4664_v40 = vor.u32 %v4663_v9, %v4659_v43  ;;  %3239 = vst [vmem:[#allocation3 + $0x9c] sm:$0x1] %v3238_v46  ;;  %v3296_v13 = vsel %vm11006_vm0, 0, %v3295_v31  ;;  %v3292_v9 = vld [vmem:[#allocation3 + $0xa4] sm:$0x1] }
 0x1d5   : > { %v3096_v25 = vmul.f32 %v8793_v48, %v11196_v45  ;;  %v2984_v11 = vpop.f32.mrb[9].mxu0  ;;  %8836 = vmatmul.mubr.bf16.gmra.mrb[20].mxu0 %v4889_v22  ;;  %v4652_v1 = vor.u32 %v4651_v50, %v4647_v8  ;;  %3297 = vst [vmem:[#allocation3 + $0xb0] sm:$0x1] %v3296_v13  ;;  %v3293_v22 = vsel %vm11006_vm0, 0, %v3292_v9  ;;  %v3845_v8 = vld [vmem:[#allocation3 + $0x28] sm:$0xf] }
 0x1d6   : > { %v3094_v56 = vmul.f32 %v11196_v45, %v2984_v11  ;;  %v8794_v51 = vpop.f32.mrb[10].mxu0  ;;  %v4669_v28 = vsel %vm1219_vm10, %v4664_v40, %v4668_v21  ;;  %3294 = vst [vmem:[#allocation3 + $0xa4] sm:$0x1] %v3293_v22  ;;  %v5927_v40 = vld [vmem:[#allocation3 + $0x28] sm:$0xf]  ;;  %v9392_v34 = vld [vmem:[%s12544_s4 + $0x188] sm:$0xff]  }
 0x1d7   : > { %v3135_v15 = vadd.f32 %v11201_v3, %v3096_v25  ;;  %v3097_v49 = vmul.f32 %v8794_v51, %v11196_v45  ;;  %v2987_v36 = vpop.f32.mrb[11].mxu0  ;;  %v4657_v18 = vsel %vm1219_vm10, %v4652_v1, %v4656_v62 }
 0x1d8   : > { %v3133_v16 = vadd.f32 %v11201_v3, %v3094_v56  ;;  %v3095_v37 = vmul.f32 %v11196_v45, %v2987_v36  ;;  %5183 = vmatprep.mubr.bf16.mxu1 %v4657_v18  ;;  %v9440_v56 = vld [vmem:[#allocation3 + $0x2c] ss:$0 sps:$4 sm:$0x11]   ;;  %v3889_v18 = vld [vmem:[#allocation3 + $0x24] sm:$0xe] }
 0x1d9   : > { %v3167_v35 = vmax.f32 %v3135_v15, 0.0  ;;  %v3136_v19 = vadd.f32 %v11201_v3, %v3097_v49  ;;  %5184 = vmatmul.mubr.bf16.gmra.mrb[24].mxu1 %v7937_v5  ;;  %v3847_v15 = vld [vmem:[#allocation3 + $0x34] sm:$0xf] }
 0x1da   : > { %v3165_v32 = vmax.f32 %v3133_v16, 0.0  ;;  %v3134_v58 = vadd.f32 %v11201_v3, %v3095_v37  ;;  %5191 = vmatprep.mubr.bf16.mxu1 %v4669_v28  ;;  %v9437_v16 = vld [vmem:[#allocation3 + $0x2c] ss:$0 sps:$4 sm:$0x11]  }
 0x1db   : > { %v8279_v52 = vpack.c.bf16 %v3167_v35, %v3167_v35  ;;  %v3168_v26 = vmax.f32 %v3136_v19, 0.0  ;;  %v9444_v37 = vld [vmem:[#allocation3 + $0x38] ss:$0 sps:$4 sm:$0x11]   ;;  %v7922_v19 = vcombine.low %v3889_v18, %v3845_v8  ;;  %v9384_v28 = vld [vmem:[%s12544_s4] sm:$0xff]  }
 0x1dc   : > { %v8277_v47 = vpack.c.bf16 %v3165_v32, %v3165_v32  ;;  %v3166_v12 = vmax.f32 %v3134_v58, 0.0  ;;  %v5973_v32 = vld [vmem:[#allocation3 + $0x24] sm:$0xe]  ;;  %v9383_v58 = vld [vmem:[%s12544_s4 + $0x40] sm:$0xff]  }
 0x1dd   : > { %v3489_v59 = vshrl.u32 %v8279_v52, 16  ;;  %v8280_v42 = vpack.c.bf16 %v3168_v26, %v3168_v26  ;;  %v3492_v33 = vshll.u32 %v8279_v52, 16  ;;  %v7923_v52 = vcombine.low %v3890_v39, %v3847_v15  ;;  %v9386_v26 = vld [vmem:[%s12544_s4 + $0x180] sm:$0xff]   ;;  %8488 = vmatprep.subr.bf16.mxu0 %v9383_v58 }
 0x1de   : > { %v3472_v2 = vshrl.u32 %v8277_v47, 16  ;;  %v8278_v29 = vpack.c.bf16 %v3166_v12, %v3166_v12  ;;  %v3475_v20 = vshll.u32 %v8277_v47, 16  ;;  %v9387_v47 = vld [vmem:[%s12544_s4 + $0x48] sm:$0xff]   ;;  %v4311_v12 = vrot.slane %v7922_v19, 1  ;;  %8489 = vmatpush3.bf16.msra.mxu0 %v9384_v28  ;;  %8625 = vmatpush3.bf16.msra.mxu1 %v9386_v26 }
 0x1df   : > { %v3491_v38 = vrot.slane %v3489_v59, 7  ;;  %v3497_v6 = vshrl.u32 %v8280_v42, 16  ;;  %v3500_v57 = vshll.u32 %v8280_v42, 16  ;;  %v4312_v59 = vrot.slane %v9440_v56, 1  ;;  %8490 = vmatprep.subr.bf16.mxu0 %v9387_v47 }
 0x1e0   : > { %v3474_v5 = vrot.slane %v3472_v2, 7  ;;  %v3480_v10 = vshrl.u32 %v8278_v29, 16  ;;  %v3483_v48 = vshll.u32 %v8278_v29, 16  ;;  %v8112_v42 = vcombine.low %v5973_v32, %v5927_v40  ;;  %v9388_v2 = vld [vmem:[%s12544_s4 + $0x8] sm:$0xff]  }
 0x1e1   : > { %v3494_v54 = vor.u32 %v3492_v33, %v3491_v38  ;;  %v3499_v63 = vrot.slane %v3497_v6, 7  ;;  %5192 = vmatmul.mubr.bf16.gmra.mrb[28].mxu1 %v11303_v7  ;;  %v3495_v50 = vrot.slane %v3491_v38, 4  ;;  %v9391_v29 = vld [vmem:[%s12544_s4 + $0x1c8] sm:$0xff]   ;;  %v11362_v38 = vsel %vm1492_vm9, %v4311_v12, %v4312_v59  ;;  %v9389_v6 = vld [vmem:[%s12544_s4 + $0x50] sm:$0xff]   ;;  %v3246_v59 = vld [vmem:[#allocation3 + $0xc0] sm:$0x1] }
 0x1e2   : > { %v3477_v53 = vor.u32 %v3475_v20, %v3474_v5  ;;  %v3482_v43 = vrot.slane %v3480_v10, 7  ;;  %v3478_v51 = vrot.slane %v3474_v5, 4  ;;  %v4315_v33 = vrot.slane %v9444_v37, 1  ;;  %v9390_v10 = vld [vmem:[%s12544_s4 + $0x10] sm:$0xff]   ;;  %8626 = vmatprep.subr.bf16.mxu1 %v9391_v29  ;;  %8491 = vmatpush3.bf16.msra.mxu0 %v9388_v2 }
 0x1e3   : > { %v3762_v23 = vsel %vm11234_vm15, %v3494_v54, %v3761_v60  ;;  %v3502_v25 = vor.u32 %v3500_v57, %v3499_v63  ;;  %v3504_v11 = vrot.slane %v3499_v63, 4  ;;  %v4314_v60 = vrot.slane %v7923_v52, 1  ;;  %8627 = vmatpush3.bf16.msra.mxu1 %v9392_v34  ;;  %8492 = vmatprep.subr.bf16.mxu0 %v9389_v6  ;;  %v5929_v6 = vld [vmem:[#allocation3 + $0x34] sm:$0xf] }
 0x1e4   : > { %3763 = vst [vmem:[#allocation3 + $0x48] sm:$0xf] %v3762_v23  ;;  %v3755_v1 = vsel %vm11234_vm15, %v3477_v53, %v3754_v44  ;;  %v3485_v62 = vor.u32 %v3483_v48, %v3482_v43  ;;  %v3487_v7 = vrot.slane %v3482_v43, 4  ;;  %v6391_v44 = vrot.slane %v8112_v42, 1 }
 0x1e5   : > { %3756 = vst [vmem:[#allocation3 + $0x3c] sm:$0xf] %v3755_v1  ;;  %v3503_v49 = vsel %vm9729_vm8, %v3495_v50, %v3502_v25  ;;  %v3766_v36 = vsel %vm10982_vm7, %v3504_v11, %v3765_v0  ;;  %v6392_v5 = vrot.slane %v9437_v16, 1  ;;  %v11374_v46 = vsel %vm1492_vm9, %v4314_v60, %v4315_v33 }
 0x1e6   : > { %3764 = vst [vmem:[#allocation3 + $0x4c] sm:$0xf] %v3503_v49  ;;  %3767 = vst [vmem:[#allocation3 + $0x50] sm:$0x1] %v3766_v36  ;;  %v3486_v21 = vsel %vm9729_vm8, %v3478_v51, %v3485_v62  ;;  %v3759_v35 = vsel %vm10982_vm7, %v3487_v7, %v3758_v27  ;;  %8493 = vmatpush3.bf16.msra.mxu0 %v9390_v10  ;;  %v3247_v2 = vsel %vm10982_vm7, 0, %v3246_v59  ;;  %v9394_v59 = vld [vmem:[%s12544_s4 + $0x18] sm:$0xff]  }
 0x1e7   : > { %3757 = vst [vmem:[#allocation3 + $0x40] sm:$0xf] %v3486_v21  ;;  %3760 = vst [vmem:[#allocation3 + $0x44] sm:$0x1] %v3759_v35  ;;  %v11377_v63 = vsel %vm1492_vm9, %v6391_v44, %v6392_v5 }
 0x1e8   : > { %12571 = vst [vmem:[#allocation5_spill] sm:$0xff] %v11377_v63  ;;  %3248 = vst [vmem:[#allocation3 + $0xc0] sm:$0x1] %v3247_v2  ;;  %v11397_v10 = vld [vmem:[#allocation3 + $0x38] ss:$0 sps:$4 sm:$0x11]  }
 0x1eb   : > { %v4424_v20 = vld [vmem:[#allocation3 + $0x48] sm:$0xf] }
 0x1ec   : > { %v4467_v0 = vld [vmem:[#allocation3 + $0x48] sm:$0xe]  ;;  %v4422_v31 = vld [vmem:[#allocation3 + $0x3c] sm:$0xf] }
 0x1ed   : > { %v4425_v54 = vld [vmem:[#allocation3 + $0x4c] sm:$0xf]  ;;  %v4466_v27 = vld [vmem:[#allocation3 + $0x3c] sm:$0xe] }
 0x1ee   : > { %v4423_v57 = vld [vmem:[#allocation3 + $0x40] sm:$0xf]  ;;  %v11379_v13 = vcombine.low %v4424_v20, %v4425_v54  ;;  %v7972_v9 = vcombine.low %v4467_v0, %v4425_v54  ;;  %v9360_v43 = vld [vmem:[#allocation3 + $0x44] ss:$0 sps:$4 sm:$0x11]  }
 0x1ef   : > { %v7939_v53 = vcombine.low %v4422_v31, %v4423_v57  ;;  %v7971_v48 = vcombine.low %v4466_v27, %v4423_v57  ;;  %v9363_v22 = vld [vmem:[#allocation3 + $0x50] ss:$0 sps:$4 sm:$0x11]   ;;  %v4891_v25 = vrot.slane %v9360_v43, 1  ;;  %v4678_v51 = vshll.u32 %v9360_v43, 16 }
 0x1f0   : > { %v4893_v8 = vrot.slane %v7972_v9, 1  ;;  %v4685_v50 = vshll.u32 %v11379_v13, 16  ;;  %v4894_v11 = vrot.slane %v9363_v22, 1  ;;  %v4683_v7 = vshrl.u32 %v11379_v13, 16  ;;  %v3243_v0 = vld [vmem:[#allocation3 + $0xb4] sm:$0x1] }
 0x1f1   : > { %v4890_v23 = vrot.slane %v7971_v48, 1  ;;  %v4673_v56 = vshll.u32 %v7939_v53, 16  ;;  %v4671_v49 = vshrl.u32 %v7939_v53, 16  ;;  %v4690_v16 = vshll.u32 %v9363_v22, 16  ;;  %v5974_v31 = vld [vmem:[#allocation3 + $0x30] sm:$0xe] }
 0x1f2   : > { %v4687_v1 = vrot.slane %v4685_v50, 1  ;;  %v4895_v15 = vsel %vm1492_vm9, %v4893_v8, %v4894_v11  ;;  %v4680_v39 = vrot.slane %v4678_v51, 1  ;;  %v3244_v27 = vsel %vm10982_vm7, 0, %v3243_v0  ;;  %v3298_v8 = vld [vmem:[#allocation3 + $0xbc] sm:$0x1] }
 0x1f3   : > { %v4892_v62 = vsel %vm1492_vm9, %v4890_v23, %v4891_v25  ;;  %v4675_v36 = vrot.slane %v4673_v56, 1  ;;  %v4692_v12 = vrot.slane %v4690_v16, 1  ;;  %v8113_v9 = vcombine.low %v5974_v31, %v5929_v6  ;;  %3245 = vst [vmem:[#allocation3 + $0xb4] sm:$0x1] %v3244_v27  ;;  %v3768_v25 = vld [vmem:[#allocation3 + $0x54] sm:$0xf] }
 0x1f4   : > { %v8797_v40 = vpop.f32.mrb[12].mxu0  ;;  %8839 = vmatprep.mubr.bf16.mxu0 %v4892_v62  ;;  %v4688_v32 = vor.u32 %v4687_v1, %v4683_v7  ;;  %v3299_v56 = vsel %vm11006_vm0, 0, %v3298_v8  ;;  %v3779_v62 = vld [vmem:[#allocation3 + $0x68] sm:$0x1]  ;;  %v3892_v0 = vld [vmem:[#allocation3 + $0x48] sm:$0xe] }
 0x1f5   : > { %v3100_v37 = vmul.f32 %v8797_v40, %v11196_v45  ;;  %v3000_v18 = vpop.f32.mrb[13].mxu0  ;;  %8840 = vmatmul.mubr.bf16.gmra.mrb[24].mxu0 %v4895_v15  ;;  %v4676_v19 = vor.u32 %v4675_v36, %v4671_v49  ;;  %3300 = vst [vmem:[#allocation3 + $0xbc] sm:$0x1] %v3299_v56  ;;  %v3772_v36 = vld [vmem:[#allocation3 + $0x5c] sm:$0x1]  ;;  %v6394_v16 = vrot.slane %v8113_v9, 1 }
 0x1f6   : > { %v3098_v21 = vmul.f32 %v11196_v45, %v3000_v18  ;;  %v8798_v35 = vpop.f32.mrb[14].mxu0  ;;  %v4693_v44 = vsel %vm1219_vm10, %v4688_v32, %v4692_v12  ;;  %v9404_v31 = vld [vmem:[%s12544_s4 + $0x190] sm:$0xff]   ;;  %v9405_v27 = vld [vmem:[%s12544_s4 + $0x68] sm:$0xff]  }
 0x1f7   : > { %v3139_v58 = vadd.f32 %v11201_v3, %v3100_v37  ;;  %v3101_v28 = vmul.f32 %v8798_v35, %v11196_v45  ;;  %v3003_v4 = vpop.f32.mrb[15].mxu0  ;;  %v4681_v47 = vsel %vm1219_vm10, %v4676_v19, %v4680_v39  ;;  %v3849_v35 = vld [vmem:[#allocation3 + $0x40] sm:$0xf]  ;;  %v6395_v19 = vrot.slane %v11397_v10, 1  ;;  %v9403_v10 = vld [vmem:[%s12544_s4 + $0x1d0] sm:$0xff]   ;;  %v9406_v8 = vld [vmem:[%s12544_s4 + $0x28] sm:$0xff]  }
 0x1f8   : > { %v3137_v52 = vadd.f32 %v11201_v3, %v3098_v21  ;;  %v3099_v26 = vmul.f32 %v11196_v45, %v3003_v4  ;;  %5199 = vmatprep.mubr.bf16.mxu1 %v4681_v47  ;;  %v9393_v4 = vld [vmem:[%s12544_s4 + $0x58] sm:$0xff]   ;;  %8628 = vmatprep.subr.bf16.mxu1 %v9403_v10 }
 0x1f9   : > { %v3171_v42 = vmax.f32 %v3139_v58, 0.0  ;;  %v3140_v60 = vadd.f32 %v11201_v3, %v3101_v28  ;;  %5200 = vmatmul.mubr.bf16.gmra.mrb[32].mxu1 %v7939_v53  ;;  %v3775_v53 = vld [vmem:[#allocation3 + $0x60] sm:$0xf]  ;;  %8494 = vmatprep.subr.bf16.mxu0 %v9393_v4 }
 0x1fa   : > { %v3169_v29 = vmax.f32 %v3137_v52, 0.0  ;;  %v3138_v33 = vadd.f32 %v11201_v3, %v3099_v26  ;;  %5207 = vmatprep.mubr.bf16.mxu1 %v4693_v44  ;;  %v3301_v3 = vld [vmem:[#allocation3 + $0xc8] sm:$0x1]  ;;  %v9449_v52 = vld [vmem:[#allocation3 + $0x44] ss:$0 sps:$4 sm:$0x11]   ;;  %8495 = vmatpush3.bf16.msra.mxu0 %v9394_v59 }
 0x1fb   : > { %v8283_v45 = vpack.c.bf16 %v3171_v42, %v3171_v42  ;;  %v3172_v34 = vmax.f32 %v3140_v60, 0.0  ;;  %v3302_v22 = vsel %vm11006_vm0, 0, %v3301_v3  ;;  %v3851_v42 = vld [vmem:[#allocation3 + $0x4c] sm:$0xf]  ;;  %v3891_v44 = vld [vmem:[#allocation3 + $0x3c] sm:$0xe]  ;;  %8629 = vmatpush3.bf16.msra.mxu1 %v9404_v31 }
 0x1fc   : > { %v8281_v5 = vpack.c.bf16 %v3169_v29, %v3169_v29  ;;  %v3170_v20 = vmax.f32 %v3138_v33, 0.0  ;;  %3303 = vst [vmem:[#allocation3 + $0xc8] sm:$0x1] %v3302_v22  ;;  %v5931_v29 = vld [vmem:[#allocation3 + $0x40] sm:$0xf]  ;;  %v4318_v9 = vrot.slane %v9449_v52, 1 }
 0x1fd   : > { %v3523_v54 = vshrl.u32 %v8283_v45, 16  ;;  %v8284_v57 = vpack.c.bf16 %v3172_v34, %v3172_v34  ;;  %v3526_v23 = vshll.u32 %v8283_v45, 16  ;;  %v9453_v33 = vld [vmem:[#allocation3 + $0x50] ss:$0 sps:$4 sm:$0x11]   ;;  %v9401_v34 = vld [vmem:[%s12544_s4 + $0x60] sm:$0xff]  }
 0x1fe   : > { %v3506_v43 = vshrl.u32 %v8281_v5, 16  ;;  %v8282_v48 = vpack.c.bf16 %v3170_v20, %v3170_v20  ;;  %v3509_v1 = vshll.u32 %v8281_v5, 16  ;;  %v9402_v5 = vld [vmem:[%s12544_s4 + $0x20] sm:$0xff]   ;;  %v7924_v20 = vcombine.low %v3891_v44, %v3849_v35  ;;  %8496 = vmatprep.subr.bf16.mxu0 %v9401_v34  ;;  %v5975_v22 = vld [vmem:[#allocation3 + $0x3c] sm:$0xe]  ;;  %v9410_v59 = vld [vmem:[%s12544_s4 + $0x198] sm:$0xff]  }
 0x1ff   : > { %v3525_v50 = vrot.slane %v3523_v54, 7  ;;  %v3531_v11 = vshrl.u32 %v8284_v57, 16  ;;  %v3534_v49 = vshll.u32 %v8284_v57, 16  ;;  %v9446_v54 = vld [vmem:[#allocation3 + $0x44] ss:$0 sps:$4 sm:$0x11]   ;;  %v7925_v57 = vcombine.low %v3892_v0, %v3851_v42  ;;  %8497 = vmatpush3.bf16.msra.mxu0 %v9402_v5 }
 0x200   : > { %v3508_v51 = vrot.slane %v3506_v43, 7  ;;  %v3514_v7 = vshrl.u32 %v8282_v48, 16  ;;  %v3517_v21 = vshll.u32 %v8282_v48, 16  ;;  %v4317_v3 = vrot.slane %v7924_v20, 1  ;;  %8498 = vmatprep.subr.bf16.mxu0 %v9405_v27  ;;  %v3253_v52 = vld [vmem:[#allocation3 + $0x8] sm:$0x1] }
 0x201   : > { %v3528_v40 = vor.u32 %v3526_v23, %v3525_v50  ;;  %v3533_v15 = vrot.slane %v3531_v11, 7  ;;  %5208 = vmatmul.mubr.bf16.gmra.mrb[36].mxu1 %v11379_v13  ;;  %v3529_v39 = vrot.slane %v3525_v50, 4  ;;  %v4320_v43 = vrot.slane %v7925_v57, 1  ;;  %v9407_v11 = vld [vmem:[%s12544_s4 + $0x70] sm:$0xff]   ;;  %v9414_v44 = vld [vmem:[%s12544_s4 + $0x78] sm:$0xff]  }
 0x202   : > { %v3511_v37 = vor.u32 %v3509_v1, %v3508_v51  ;;  %v3516_v18 = vrot.slane %v3514_v7, 7  ;;  %v3512_v26 = vrot.slane %v3508_v51, 4  ;;  %v4321_v48 = vrot.slane %v9453_v33, 1  ;;  %v9408_v7 = vld [vmem:[%s12544_s4 + $0x30] sm:$0xff]   ;;  %v9418_v10 = vld [vmem:[%s12544_s4 + $0x38] sm:$0xff]  }
 0x203   : > { %v3776_v32 = vsel %vm11234_vm15, %v3528_v40, %v3775_v53  ;;  %v3536_v58 = vor.u32 %v3534_v49, %v3533_v15  ;;  %v3538_v28 = vrot.slane %v3533_v15, 4  ;;  %v11441_v53 = vsel %vm1492_vm9, %v6394_v16, %v6395_v19  ;;  %v3198_v40 = vld [vmem:[#allocation3] sm:$0x1]  ;;  %8499 = vmatpush3.bf16.msra.mxu0 %v9406_v8  ;;  %v11486_v31 = vld [vmem:[%s12542_s2] ss:$0 sm:$0xff] }
 0x204   : > { %3777 = vst [vmem:[#allocation3 + $0x60] sm:$0xf] %v3776_v32  ;;  %v3769_v47 = vsel %vm11234_vm15, %v3511_v37, %v3768_v25  ;;  %v3519_v13 = vor.u32 %v3517_v21, %v3516_v18  ;;  %v3521_v12 = vrot.slane %v3516_v18, 4  ;;  %12572 = vst [vmem:[#allocation6_spill] sm:$0xff] %v11441_v53  ;;  %v11447_v50 = vsel %vm1492_vm9, %v4317_v3, %v4318_v9 }
 0x205   : > { %3770 = vst [vmem:[#allocation3 + $0x54] sm:$0xf] %v3769_v47  ;;  %v3537_v60 = vsel %vm9729_vm8, %v3529_v39, %v3536_v58  ;;  %v3780_v2 = vsel %vm10982_vm7, %v3538_v28, %v3779_v62  ;;  %v8114_v23 = vcombine.low %v5975_v22, %v5931_v29  ;;  %v11453_v56 = vsel %vm1492_vm9, %v4320_v43, %v4321_v48  ;;  %v11493_v22 = vld [vmem:[%s12543_s3] ss:$0 sm:$0xff] }
 0x206   : > { %3778 = vst [vmem:[#allocation3 + $0x64] sm:$0xf] %v3537_v60  ;;  %3781 = vst [vmem:[#allocation3 + $0x68] sm:$0x1] %v3780_v2  ;;  %v3520_v6 = vsel %vm9729_vm8, %v3512_v26, %v3519_v13  ;;  %v3773_v45 = vsel %vm10982_vm7, %v3521_v12, %v3772_v36  ;;  %v6398_v51 = vrot.slane %v9446_v54, 1  ;;  %v3199_v49 = vsel %vm10982_vm7, 0, %v3198_v40  ;;  %8500 = vmatprep.subr.bf16.mxu0 %v9407_v11 }
 0x207   : > { %3771 = vst [vmem:[#allocation3 + $0x58] sm:$0xf] %v3520_v6  ;;  %3774 = vst [vmem:[#allocation3 + $0x5c] sm:$0x1] %v3773_v45  ;;  %v6397_v36 = vrot.slane %v8114_v23, 1  ;;  %v9409_v12 = vld [vmem:[%s12544_s4 + $0x1d8] sm:$0xff]   ;;  %8501 = vmatpush3.bf16.msra.mxu0 %v9408_v7 }
 0x208   : > { %3200 = vst [vmem:[#allocation3] sm:$0x1] %v3199_v49  ;;  %8630 = vmatprep.subr.bf16.mxu1 %v9409_v12  ;;  %v3254_v6 = vsel %vm11006_vm0, 0, %v3253_v52  ;;  %8502 = vmatprep.subr.bf16.mxu0 %v9414_v44  ;;  %v9419_v7 = vld [vmem:[%s12544_s4 + $0x1e0] sm:$0xff]   ;;  %v9428_v44 = vld [vmem:[%s12544_s4 + $0x1f0] sm:$0xff]  }
 0x209   : > { %v11463_v58 = vsel %vm1492_vm9, %v6397_v36, %v6398_v51  ;;  %8631 = vmatpush3.bf16.msra.mxu1 %v9410_v59  ;;  %3255 = vst [vmem:[#allocation3 + $0x8] sm:$0x1] %v3254_v6  ;;  %v9420_v49 = vld [vmem:[%s12544_s4 + $0x1a0] sm:$0xff]   ;;  %v9429_v6 = vld [vmem:[%s12544_s4 + $0x1b0] sm:$0xff]  }
 0x20a   : > { %12573 = vst [vmem:[#allocation7_spill] sm:$0xff] %v11463_v58  ;;  %v9423_v36 = vld [vmem:[%s12544_s4 + $0x80] sm:$0xff]   ;;  %8632 = vmatprep.subr.bf16.mxu1 %v9419_v7 }
 0x20b   : > { %v4428_v25 = vld [vmem:[#allocation3 + $0x60] sm:$0xf]  ;;  %8503 = vmatpush3.bf16.msra.mxu0 %v9418_v10 }
 0x20c   : > { %v4426_v1 = vld [vmem:[#allocation3 + $0x54] sm:$0xf]  ;;  %v4469_v62 = vld [vmem:[#allocation3 + $0x60] sm:$0xe]  ;;  %8863 = vmatprep.subr.bf16.mxu0 %v9423_v36 }
 0x20d   : > { %v4429_v15 = vld [vmem:[#allocation3 + $0x64] sm:$0xf]  ;;  %v4468_v37 = vld [vmem:[#allocation3 + $0x54] sm:$0xe]  ;;  %8633 = vmatpush3.bf16.msra.mxu1 %v9420_v49 }
 0x20e   : > { %v4427_v16 = vld [vmem:[#allocation3 + $0x58] sm:$0xf]  ;;  %v11460_v18 = vcombine.low %v4428_v25, %v4429_v15  ;;  %v7974_v21 = vcombine.low %v4469_v62, %v4429_v15  ;;  %v9366_v19 = vld [vmem:[#allocation3 + $0x5c] ss:$0 sps:$4 sm:$0x11]   ;;  %v9435_v49 = vld [vmem:[%s12544_s4 + $0x1b8] sm:$0xff]  }
 0x20f   : > { %v7941_v35 = vcombine.low %v4426_v1, %v4427_v16  ;;  %v7973_v39 = vcombine.low %v4468_v37, %v4427_v16  ;;  %v9369_v32 = vld [vmem:[#allocation3 + $0x68] ss:$0 sps:$4 sm:$0x11]   ;;  %v4897_v47 = vrot.slane %v9366_v19, 1  ;;  %v4702_v60 = vshll.u32 %v9366_v19, 16 }
 0x210   : > { %v4899_v28 = vrot.slane %v7974_v21, 1  ;;  %v4709_v4 = vshll.u32 %v11460_v18, 16  ;;  %v4900_v13 = vrot.slane %v9369_v32, 1  ;;  %v4707_v33 = vshrl.u32 %v11460_v18, 16  ;;  %v3855_v36 = vld [vmem:[#allocation3 + $0x64] sm:$0xf] }
 0x211   : > { %v4896_v26 = vrot.slane %v7973_v39, 1  ;;  %v4697_v42 = vshll.u32 %v7941_v35, 16  ;;  %v4695_v5 = vshrl.u32 %v7941_v35, 16  ;;  %v4714_v0 = vshll.u32 %v9369_v32, 16 }
 0x212   : > { %v4711_v2 = vrot.slane %v4709_v4, 1  ;;  %v4901_v34 = vsel %vm1492_vm9, %v4899_v28, %v4900_v13  ;;  %v4704_v43 = vrot.slane %v4702_v60, 1  ;;  %v9458_v7 = vld [vmem:[#allocation3 + $0x5c] ss:$0 sps:$4 sm:$0x11]  }
 0x213   : > { %v4898_v29 = vsel %vm1492_vm9, %v4896_v26, %v4897_v47  ;;  %v4699_v20 = vrot.slane %v4697_v42, 1  ;;  %v4716_v62 = vrot.slane %v4714_v0, 1  ;;  %v9424_v26 = vld [vmem:[%s12544_s4 + $0x1e8] sm:$0xff]   ;;  %v3789_v47 = vld [vmem:[#allocation3 + $0x78] sm:$0xf] }
 0x214   : > { %v8801_v45 = vpop.f32.mrb[0].mxu1  ;;  %8843 = vmatprep.mubr.bf16.mxu0 %v4898_v29  ;;  %v4712_v48 = vor.u32 %v4711_v2, %v4707_v33  ;;  %8634 = vmatprep.subr.bf16.mxu1 %v9424_v26  ;;  %v3793_v0 = vld [vmem:[#allocation3 + $0x80] sm:$0x1] }
 0x215   : > { %v3104_v54 = vmul.f32 %v11486_v31, %v8801_v45  ;;  %v3016_v57 = vpop.f32.mrb[1].mxu1  ;;  %8844 = vmatmul.mubr.bf16.gmra.mrb[28].mxu0 %v4901_v34  ;;  %v4700_v9 = vor.u32 %v4699_v20, %v4695_v5  ;;  %v3782_v34 = vld [vmem:[#allocation3 + $0x6c] sm:$0xf] }
 0x216   : > { %v3102_v27 = vmul.f32 %v11486_v31, %v3016_v57  ;;  %v8802_v3 = vpop.f32.mrb[2].mxu1  ;;  %v4717_v21 = vsel %vm1219_vm10, %v4712_v48, %v4716_v62 }
 0x217   : > { %v3143_v8 = vadd.f32 %v11493_v22, %v3104_v54  ;;  %v3105_v23 = vmul.f32 %v11486_v31, %v8802_v3  ;;  %v3019_v25 = vpop.f32.mrb[3].mxu1  ;;  %v4705_v1 = vsel %vm1219_vm10, %v4700_v9, %v4704_v43  ;;  %v5933_v3 = vld [vmem:[#allocation3 + $0x4c] sm:$0xf] }
 0x218   : > { %v3141_v11 = vadd.f32 %v11493_v22, %v3102_v27  ;;  %v3103_v51 = vmul.f32 %v11486_v31, %v3019_v25  ;;  %5215 = vmatprep.mubr.bf16.mxu1 %v4705_v1  ;;  %v3786_v27 = vld [vmem:[#allocation3 + $0x74] sm:$0x1]  ;;  %v5976_v25 = vld [vmem:[#allocation3 + $0x48] sm:$0xe] }
 0x219   : > { %v3175_v40 = vmax.f32 %v3143_v8, 0.0  ;;  %v3144_v15 = vadd.f32 %v11493_v22, %v3105_v23  ;;  %5216 = vmatmul.mubr.bf16.gmra.mrb[40].mxu1 %v7941_v35  ;;  %v9427_v35 = vld [vmem:[%s12544_s4 + $0x1a8] sm:$0xff]   ;;  %v3853_v23 = vld [vmem:[#allocation3 + $0x58] sm:$0xf] }
 0x21a   : > { %v3173_v16 = vmax.f32 %v3141_v11, 0.0  ;;  %v3142_v37 = vadd.f32 %v11493_v22, %v3103_v51  ;;  %5223 = vmatprep.mubr.bf16.mxu1 %v4717_v21  ;;  %8635 = vmatpush3.bf16.msra.mxu1 %v9427_v35 }
 0x21b   : > { %v8287_v19 = vpack.c.bf16 %v3175_v40, %v3175_v40  ;;  %v3176_v39 = vmax.f32 %v3144_v15, 0.0  ;;  %8636 = vmatprep.subr.bf16.mxu1 %v9428_v44 }
 0x21c   : > { %v8285_v32 = vpack.c.bf16 %v3173_v16, %v3173_v16  ;;  %v3174_v28 = vmax.f32 %v3142_v37, 0.0  ;;  %v8115_v16 = vcombine.low %v5976_v25, %v5933_v3 }
 0x21d   : > { %v3557_v4 = vshrl.u32 %v8287_v19, 16  ;;  %v8288_v52 = vpack.c.bf16 %v3176_v39, %v3176_v39  ;;  %v3560_v42 = vshll.u32 %v8287_v19, 16  ;;  %v9462_v19 = vld [vmem:[#allocation3 + $0x68] ss:$0 sps:$4 sm:$0x11]  }
 0x21e   : > { %v3540_v13 = vshrl.u32 %v8285_v32, 16  ;;  %v8286_v12 = vpack.c.bf16 %v3174_v28, %v3174_v28  ;;  %v3543_v29 = vshll.u32 %v8285_v32, 16  ;;  %8637 = vmatpush3.bf16.msra.mxu1 %v9429_v6  ;;  %v3893_v39 = vld [vmem:[#allocation3 + $0x54] sm:$0xe]  ;;  %v6400_v35 = vrot.slane %v8115_v16, 1 }
 0x21f   : > { %v3559_v59 = vrot.slane %v3557_v4, 7  ;;  %v3565_v60 = vshrl.u32 %v8288_v52, 16  ;;  %v3568_v20 = vshll.u32 %v8288_v52, 16  ;;  %v9451_v32 = vld [vmem:[#allocation3 + $0x50] ss:$0 sps:$4 sm:$0x11]   ;;  %v7926_v28 = vcombine.low %v3893_v39, %v3853_v23 }
 0x220   : > { %v3542_v2 = vrot.slane %v3540_v13, 7  ;;  %v3548_v33 = vshrl.u32 %v8286_v12, 16  ;;  %v3551_v57 = vshll.u32 %v8286_v12, 16  ;;  %v3894_v4 = vld [vmem:[#allocation3 + $0x60] sm:$0xe]  ;;  %v4324_v52 = vrot.slane %v9458_v7, 1 }
 0x221   : > { %v3562_v45 = vor.u32 %v3560_v42, %v3559_v59  ;;  %v3567_v5 = vrot.slane %v3565_v60, 7  ;;  %5224 = vmatmul.mubr.bf16.gmra.mrb[44].mxu1 %v11460_v18  ;;  %v3563_v9 = vrot.slane %v3559_v59, 4  ;;  %v9432_v18 = vld [vmem:[%s12544_s4 + $0x1f8] sm:$0xff]   ;;  %v7927_v26 = vcombine.low %v3894_v4, %v3855_v36 }
 0x222   : > { %v3545_v10 = vor.u32 %v3543_v29, %v3542_v2  ;;  %v3550_v54 = vrot.slane %v3548_v33, 7  ;;  %v3546_v11 = vrot.slane %v3542_v2, 4  ;;  %8638 = vmatprep.subr.bf16.mxu1 %v9432_v18  ;;  %v4327_v12 = vrot.slane %v9462_v19, 1 }
 0x223   : > { %v3790_v43 = vsel %vm11234_vm15, %v3562_v45, %v3789_v47  ;;  %v3570_v48 = vor.u32 %v3568_v20, %v3567_v5  ;;  %v3572_v8 = vrot.slane %v3567_v5, 4  ;;  %8639 = vmatpush3.bf16.msra.mxu1 %v9435_v49  ;;  %v4323_v47 = vrot.slane %v7926_v28, 1 }
 0x224   : > { %3791 = vst [vmem:[#allocation3 + $0x78] sm:$0xf] %v3790_v43  ;;  %v3783_v51 = vsel %vm11234_vm15, %v3545_v10, %v3782_v34  ;;  %v3553_v1 = vor.u32 %v3551_v57, %v3550_v54  ;;  %v3555_v62 = vrot.slane %v3550_v54, 4  ;;  %v4326_v13 = vrot.slane %v7927_v26, 1 }
 0x225   : > { %3784 = vst [vmem:[#allocation3 + $0x6c] sm:$0xf] %v3783_v51  ;;  %v3571_v40 = vsel %vm9729_vm8, %v3563_v9, %v3570_v48  ;;  %v3794_v15 = vsel %vm10982_vm7, %v3572_v8, %v3793_v0  ;;  %v6401_v59 = vrot.slane %v9451_v32, 1  ;;  %v11544_v2 = vsel %vm1492_vm9, %v4323_v47, %v4324_v52 }
 0x226   : > { %3792 = vst [vmem:[#allocation3 + $0x7c] sm:$0xf] %v3571_v40  ;;  %3795 = vst [vmem:[#allocation3 + $0x80] sm:$0x1] %v3794_v15  ;;  %v3554_v37 = vsel %vm9729_vm8, %v3546_v11, %v3553_v1  ;;  %v3787_v21 = vsel %vm10982_vm7, %v3555_v62, %v3786_v27  ;;  %v11547_v29 = vsel %vm1492_vm9, %v4326_v13, %v4327_v12 }
 0x227   : > { %3785 = vst [vmem:[#allocation3 + $0x70] sm:$0xf] %v3554_v37  ;;  %3788 = vst [vmem:[#allocation3 + $0x74] sm:$0x1] %v3787_v21  ;;  %v11550_v6 = vsel %vm1492_vm9, %v6400_v35, %v6401_v59 }
 0x228   : > { %12574 = vst [vmem:[#allocation8_spill] sm:$0xff] %v11550_v6 }
 0x22b   : > { %v4432_v42 = vld [vmem:[#allocation3 + $0x78] sm:$0xf] }
 0x22c   : > { %v4471_v60 = vld [vmem:[#allocation3 + $0x78] sm:$0xe]  ;;  %v4430_v33 = vld [vmem:[#allocation3 + $0x6c] sm:$0xf] }
 0x22d   : > { %v4433_v44 = vld [vmem:[#allocation3 + $0x7c] sm:$0xf]  ;;  %v4470_v34 = vld [vmem:[#allocation3 + $0x6c] sm:$0xe] }
 0x22e   : > { %v4431_v45 = vld [vmem:[#allocation3 + $0x70] sm:$0xf]  ;;  %v11552_v5 = vcombine.low %v4432_v42, %v4433_v44  ;;  %v7976_v20 = vcombine.low %v4471_v60, %v4433_v44  ;;  %v9372_v10 = vld [vmem:[#allocation3 + $0x74] ss:$0 sps:$4 sm:$0x11]  }
 0x22f   : > { %v7943_v0 = vcombine.low %v4430_v33, %v4431_v45  ;;  %v7975_v54 = vcombine.low %v4470_v34, %v4431_v45  ;;  %v9375_v57 = vld [vmem:[#allocation3 + $0x80] ss:$0 sps:$4 sm:$0x11]   ;;  %v4903_v43 = vrot.slane %v9372_v10, 1  ;;  %v4726_v23 = vshll.u32 %v9372_v10, 16 }
 0x230   : > { %v4905_v27 = vrot.slane %v7976_v20, 1  ;;  %v4733_v3 = vshll.u32 %v11552_v5, 16  ;;  %v4906_v48 = vrot.slane %v9375_v57, 1  ;;  %v4731_v51 = vshrl.u32 %v11552_v5, 16  ;;  %v5935_v60 = vld [vmem:[#allocation3 + $0x58] sm:$0xf] }
 0x231   : > { %v4902_v9 = vrot.slane %v7975_v54, 1  ;;  %v4721_v8 = vshll.u32 %v7943_v0, 16  ;;  %v4719_v18 = vshrl.u32 %v7943_v0, 16  ;;  %v4738_v40 = vshll.u32 %v9375_v57, 16  ;;  %v5977_v20 = vld [vmem:[#allocation3 + $0x54] sm:$0xe] }
 0x232   : > { %v4735_v25 = vrot.slane %v4733_v3, 1  ;;  %v4907_v62 = vsel %vm1492_vm9, %v4905_v27, %v4906_v48  ;;  %v4728_v21 = vrot.slane %v4726_v23, 1  ;;  %v5937_v57 = vld [vmem:[#allocation3 + $0x64] sm:$0xf]  ;;  %v8116_v27 = vcombine.low %v5977_v20, %v5935_v60  ;;  %v3803_v3 = vld [vmem:[#allocation3 + $0x90] sm:$0xf] }
 0x233   : > { %v4904_v11 = vsel %vm1492_vm9, %v4902_v9, %v4903_v43  ;;  %v4723_v7 = vrot.slane %v4721_v8, 1  ;;  %v4740_v35 = vrot.slane %v4738_v40, 1  ;;  %v9455_v48 = vld [vmem:[#allocation3 + $0x5c] ss:$0 sps:$4 sm:$0x11]  }
 0x234   : > { %v8805_v1 = vpop.f32.mrb[4].mxu1  ;;  %8847 = vmatprep.mubr.bf16.mxu0 %v4904_v11  ;;  %v4736_v19 = vor.u32 %v4735_v25, %v4731_v51  ;;  %v5978_v11 = vld [vmem:[#allocation3 + $0x60] sm:$0xe]  ;;  %v3859_v60 = vld [vmem:[#allocation3 + $0x7c] sm:$0xf] }
 0x235   : > { %v3108_v15 = vmul.f32 %v11486_v31, %v8805_v1  ;;  %v3032_v49 = vpop.f32.mrb[5].mxu1  ;;  %8848 = vmatmul.mubr.bf16.gmra.mrb[32].mxu0 %v4907_v62  ;;  %v4724_v37 = vor.u32 %v4723_v7, %v4719_v18  ;;  %v3807_v62 = vld [vmem:[#allocation3 + $0x98] sm:$0x1]  ;;  %v8117_v7 = vcombine.low %v5978_v11, %v5937_v57 }
 0x236   : > { %v3106_v36 = vmul.f32 %v11486_v31, %v3032_v49  ;;  %v8806_v16 = vpop.f32.mrb[6].mxu1  ;;  %v4741_v42 = vsel %vm1219_vm10, %v4736_v19, %v4740_v35 }
 0x237   : > { %v3147_v39 = vadd.f32 %v11493_v22, %v3108_v15  ;;  %v3109_v32 = vmul.f32 %v11486_v31, %v8806_v16  ;;  %v3035_v28 = vpop.f32.mrb[7].mxu1  ;;  %v4729_v26 = vsel %vm1219_vm10, %v4724_v37, %v4728_v21  ;;  %v3857_v16 = vld [vmem:[#allocation3 + $0x70] sm:$0xf]  ;;  %v6403_v37 = vrot.slane %v8116_v27, 1 }
 0x238   : > { %v3145_v4 = vadd.f32 %v11493_v22, %v3106_v36  ;;  %v3107_v52 = vmul.f32 %v11486_v31, %v3035_v28  ;;  %5231 = vmatprep.mubr.bf16.mxu1 %v4729_v26  ;;  %v3800_v36 = vld [vmem:[#allocation3 + $0x8c] sm:$0x1]  ;;  %v6404_v28 = vrot.slane %v9455_v48, 1  ;;  %v6406_v48 = vrot.slane %v8117_v7, 1 }
 0x239   : > { %v3179_v47 = vmax.f32 %v3147_v39, 0.0  ;;  %v3148_v13 = vadd.f32 %v11493_v22, %v3109_v32  ;;  %5232 = vmatmul.mubr.bf16.gmra.mrb[48].mxu1 %v7943_v0  ;;  %v3796_v0 = vld [vmem:[#allocation3 + $0x84] sm:$0xf]  ;;  %v9467_v32 = vld [vmem:[#allocation3 + $0x74] ss:$0 sps:$4 sm:$0x11]  }
 0x23a   : > { %v3177_v12 = vmax.f32 %v3145_v4, 0.0  ;;  %v3146_v59 = vadd.f32 %v11493_v22, %v3107_v52  ;;  %5239 = vmatprep.mubr.bf16.mxu1 %v4741_v42  ;;  %v4330_v57 = vrot.slane %v9467_v32, 1 }
 0x23b   : > { %v8291_v33 = vpack.c.bf16 %v3179_v47, %v3179_v47  ;;  %v3180_v44 = vmax.f32 %v3148_v13, 0.0  ;;  %v9471_v47 = vld [vmem:[#allocation3 + $0x80] ss:$0 sps:$4 sm:$0x11]  }
 0x23c   : > { %v8289_v45 = vpack.c.bf16 %v3177_v12, %v3177_v12  ;;  %v3178_v34 = vmax.f32 %v3146_v59, 0.0 }
 0x23d   : > { %v3591_v10 = vshrl.u32 %v8291_v33, 16  ;;  %v8292_v54 = vpack.c.bf16 %v3180_v44, %v3180_v44  ;;  %v3594_v23 = vshll.u32 %v8291_v33, 16  ;;  %v9460_v44 = vld [vmem:[#allocation3 + $0x68] ss:$0 sps:$4 sm:$0x11]  }
 0x23e   : > { %v3574_v9 = vshrl.u32 %v8289_v45, 16  ;;  %v8290_v43 = vpack.c.bf16 %v3178_v34, %v3178_v34  ;;  %v3577_v1 = vshll.u32 %v8289_v45, 16  ;;  %v3895_v45 = vld [vmem:[#allocation3 + $0x6c] sm:$0xe] }
 0x23f   : > { %v3593_v8 = vrot.slane %v3591_v10, 7  ;;  %v3599_v25 = vshrl.u32 %v8292_v54, 16  ;;  %v3602_v49 = vshll.u32 %v8292_v54, 16  ;;  %v7928_v10 = vcombine.low %v3895_v45, %v3857_v16  ;;  %v3896_v54 = vld [vmem:[#allocation3 + $0x78] sm:$0xe] }
 0x240   : > { %v3576_v51 = vrot.slane %v3574_v9, 7  ;;  %v3582_v18 = vshrl.u32 %v8290_v43, 16  ;;  %v3585_v39 = vshll.u32 %v8290_v43, 16  ;;  %v7929_v27 = vcombine.low %v3896_v54, %v3859_v60 }
 0x241   : > { %v3596_v40 = vor.u32 %v3594_v23, %v3593_v8  ;;  %v3601_v15 = vrot.slane %v3599_v25, 7  ;;  %5240 = vmatmul.mubr.bf16.gmra.mrb[52].mxu1 %v11552_v5  ;;  %v3597_v4 = vrot.slane %v3593_v8, 4  ;;  %v4329_v9 = vrot.slane %v7928_v10, 1 }
 0x242   : > { %v3579_v21 = vor.u32 %v3577_v1, %v3576_v51  ;;  %v3584_v19 = vrot.slane %v3582_v18, 7  ;;  %v3580_v13 = vrot.slane %v3576_v51, 4  ;;  %v11582_v43 = vsel %vm1492_vm9, %v6403_v37, %v6404_v28 }
 0x243   : > { %v3804_v52 = vsel %vm11234_vm15, %v3596_v40, %v3803_v3  ;;  %v3604_v26 = vor.u32 %v3602_v49, %v3601_v15  ;;  %v3606_v35 = vrot.slane %v3601_v15, 4  ;;  %v4333_v3 = vrot.slane %v9471_v47, 1  ;;  %12575 = vst [vmem:[#allocation9_spill] sm:$0xff] %v11582_v43 }
 0x244   : > { %3805 = vst [vmem:[#allocation3 + $0x90] sm:$0xf] %v3804_v52  ;;  %v3797_v12 = vsel %vm11234_vm15, %v3579_v21, %v3796_v0  ;;  %v3587_v59 = vor.u32 %v3585_v39, %v3584_v19  ;;  %v3589_v42 = vrot.slane %v3584_v19, 4  ;;  %v4332_v8 = vrot.slane %v7929_v27, 1 }
 0x245   : > { %3798 = vst [vmem:[#allocation3 + $0x84] sm:$0xf] %v3797_v12  ;;  %v3605_v5 = vsel %vm9729_vm8, %v3597_v4, %v3604_v26  ;;  %v3808_v33 = vsel %vm10982_vm7, %v3606_v35, %v3807_v62  ;;  %v6407_v23 = vrot.slane %v9460_v44, 1  ;;  %v11585_v0 = vsel %vm1492_vm9, %v4329_v9, %v4330_v57 }
 0x246   : > { %3806 = vst [vmem:[#allocation3 + $0x94] sm:$0xf] %v3605_v5  ;;  %3809 = vst [vmem:[#allocation3 + $0x98] sm:$0x1] %v3808_v33  ;;  %v3588_v34 = vsel %vm9729_vm8, %v3580_v13, %v3587_v59  ;;  %v3801_v20 = vsel %vm10982_vm7, %v3589_v42, %v3800_v36  ;;  %v11588_v25 = vsel %vm1492_vm9, %v4332_v8, %v4333_v3 }
 0x247   : > { %3799 = vst [vmem:[#allocation3 + $0x88] sm:$0xf] %v3588_v34  ;;  %3802 = vst [vmem:[#allocation3 + $0x8c] sm:$0x1] %v3801_v20  ;;  %v11591_v11 = vsel %vm1492_vm9, %v6406_v48, %v6407_v23 }
 0x248   : > { %12576 = vst [vmem:[#allocation10_spill] sm:$0xff] %v11591_v11 }
 0x24b   : > { %v4436_v51 = vld [vmem:[#allocation3 + $0x90] sm:$0xf] }
 0x24c   : > { %v4473_v1 = vld [vmem:[#allocation3 + $0x90] sm:$0xe]  ;;  %v4434_v62 = vld [vmem:[#allocation3 + $0x84] sm:$0xf] }
 0x24d   : > { %v4437_v18 = vld [vmem:[#allocation3 + $0x94] sm:$0xf]  ;;  %v4472_v15 = vld [vmem:[#allocation3 + $0x84] sm:$0xe] }
 0x24e   : > { %v4435_v40 = vld [vmem:[#allocation3 + $0x88] sm:$0xf]  ;;  %v11593_v49 = vcombine.low %v4436_v51, %v4437_v18  ;;  %v7978_v7 = vcombine.low %v4473_v1, %v4437_v18  ;;  %v9378_v16 = vld [vmem:[#allocation3 + $0x8c] ss:$0 sps:$4 sm:$0x11]  }
 0x24f   : > { %v7945_v36 = vcombine.low %v4434_v62, %v4435_v40  ;;  %v7977_v37 = vcombine.low %v4472_v15, %v4435_v40  ;;  %v9381_v21 = vld [vmem:[#allocation3 + $0x98] ss:$0 sps:$4 sm:$0x11]   ;;  %v4909_v28 = vrot.slane %v9378_v16, 1  ;;  %v4750_v26 = vshll.u32 %v9378_v16, 16 }
 0x250   : > { %v4911_v19 = vrot.slane %v7978_v7, 1  ;;  %v4757_v39 = vshll.u32 %v11593_v49, 16  ;;  %v4912_v4 = vrot.slane %v9381_v21, 1  ;;  %v4755_v13 = vshrl.u32 %v11593_v49, 16  ;;  %v11609_v16 = vld [vmem:[#allocation3 + $0x70] sm:$0xf] }
 0x251   : > { %v4908_v32 = vrot.slane %v7977_v37, 1  ;;  %v4745_v52 = vshll.u32 %v7945_v36, 16  ;;  %v4743_v42 = vshrl.u32 %v7945_v36, 16  ;;  %v4762_v5 = vshll.u32 %v9381_v21, 16 }
 0x252   : > { %v4759_v35 = vrot.slane %v4757_v39, 1  ;;  %v4913_v59 = vsel %vm1492_vm9, %v4911_v19, %v4912_v4  ;;  %v4752_v10 = vrot.slane %v4750_v26, 1  ;;  %v11611_v19 = vld [vmem:[#allocation3 + $0x74] ss:$0 sps:$4 sm:$0x11]  }
 0x253   : > { %v4910_v47 = vsel %vm1492_vm9, %v4908_v32, %v4909_v28  ;;  %v4747_v60 = vrot.slane %v4745_v52, 1  ;;  %v4764_v23 = vrot.slane %v4762_v5, 1  ;;  %v5979_v28 = vld [vmem:[#allocation3 + $0x6c] sm:$0xe]  ;;  %v3817_v4 = vld [vmem:[#allocation3 + $0xa8] sm:$0xf] }
 0x254   : > { %v8809_v12 = vpop.f32.mrb[8].mxu1  ;;  %8851 = vmatprep.mubr.bf16.mxu0 %v4910_v47  ;;  %v4760_v54 = vor.u32 %v4759_v35, %v4755_v13  ;;  %v11613_v35 = vld [vmem:[#allocation3 + $0x7c] sm:$0xf]  ;;  %v3821_v5 = vld [vmem:[#allocation3 + $0xb0] sm:$0x1] }
 0x255   : > { %v3112_v33 = vmul.f32 %v11486_v31, %v8809_v12  ;;  %v3048_v44 = vpop.f32.mrb[9].mxu1  ;;  %8852 = vmatmul.mubr.bf16.gmra.mrb[36].mxu0 %v4913_v59  ;;  %v4748_v20 = vor.u32 %v4747_v60, %v4743_v42  ;;  %v3810_v12 = vld [vmem:[#allocation3 + $0x9c] sm:$0xf] }
 0x256   : > { %v3110_v45 = vmul.f32 %v11486_v31, %v3048_v44  ;;  %v8810_v34 = vpop.f32.mrb[10].mxu1  ;;  %v4765_v40 = vsel %vm1219_vm10, %v4760_v54, %v4764_v23  ;;  %v9469_v44 = vld [vmem:[#allocation3 + $0x80] ss:$0 sps:$4 sm:$0x11]  }
 0x257   : > { %v3151_v57 = vadd.f32 %v11493_v22, %v3112_v33  ;;  %v3113_v27 = vmul.f32 %v11486_v31, %v8810_v34  ;;  %v3051_v3 = vpop.f32.mrb[11].mxu1  ;;  %v4753_v8 = vsel %vm1219_vm10, %v4748_v20, %v4752_v10  ;;  %v5980_v34 = vld [vmem:[#allocation3 + $0x78] sm:$0xe] }
 0x258   : > { %v3149_v9 = vadd.f32 %v11493_v22, %v3110_v45  ;;  %v3111_v48 = vmul.f32 %v11486_v31, %v3051_v3  ;;  %5247 = vmatprep.mubr.bf16.mxu1 %v4753_v8  ;;  %v6410_v45 = vrot.slane %v11611_v19, 1  ;;  %v3861_v3 = vld [vmem:[#allocation3 + $0x88] sm:$0xf] }
 0x259   : > { %v3183_v51 = vmax.f32 %v3151_v57, 0.0  ;;  %v3152_v1 = vadd.f32 %v11493_v22, %v3113_v27  ;;  %5248 = vmatmul.mubr.bf16.gmra.mrb[56].mxu1 %v7945_v36  ;;  %v8118_v36 = vcombine.low %v5979_v28, %v11609_v16  ;;  %v3814_v57 = vld [vmem:[#allocation3 + $0xa4] sm:$0x1]  ;;  %v11620_v27 = vld [vmem:[%s12547_s7] sm:$0x3] }
 0x25a   : > { %v3181_v62 = vmax.f32 %v3149_v9, 0.0  ;;  %v3150_v18 = vadd.f32 %v11493_v22, %v3111_v48  ;;  %5255 = vmatprep.mubr.bf16.mxu1 %v4765_v40  ;;  %v8119_v9 = vcombine.low %v5980_v34, %v11613_v35  ;;  %9161 = vmatprep.subr.msk.bf16.mxu1 %vm12577_vm2, %v11620_v27 }
 0x25b   : > { %v8295_v15 = vpack.c.bf16 %v3183_v51, %v3183_v51  ;;  %v3184_v7 = vmax.f32 %v3152_v1, 0.0  ;;  %v9476_v51 = vld [vmem:[#allocation3 + $0x8c] ss:$0 sps:$4 sm:$0x11]   ;;  %v6409_v1 = vrot.slane %v8118_v36, 1 }
 0x25c   : > { %v8293_v37 = vpack.c.bf16 %v3181_v62, %v3181_v62  ;;  %v3182_v21 = vmax.f32 %v3150_v18, 0.0 }
 0x25d   : > { %v3625_v39 = vshrl.u32 %v8295_v15, 16  ;;  %v8296_v32 = vpack.c.bf16 %v3184_v7, %v3184_v7  ;;  %v3628_v13 = vshll.u32 %v8295_v15, 16  ;;  %v9480_v7 = vld [vmem:[#allocation3 + $0x98] ss:$0 sps:$4 sm:$0x11]  }
 0x25e   : > { %v3608_v52 = vshrl.u32 %v8293_v37, 16  ;;  %v8294_v26 = vpack.c.bf16 %v3182_v21, %v3182_v21  ;;  %v3611_v60 = vshll.u32 %v8293_v37, 16 }
 0x25f   : > { %v3627_v47 = vrot.slane %v3625_v39, 7  ;;  %v3633_v59 = vshrl.u32 %v8296_v32, 16  ;;  %v3636_v54 = vshll.u32 %v8296_v32, 16  ;;  %v3897_v32 = vld [vmem:[#allocation3 + $0x84] sm:$0xe] }
 0x260   : > { %v3610_v42 = vrot.slane %v3608_v52, 7  ;;  %v3616_v33 = vshrl.u32 %v8294_v26, 16  ;;  %v3619_v23 = vshll.u32 %v8294_v26, 16 }
 0x261   : > { %v3630_v20 = vor.u32 %v3628_v13, %v3627_v47  ;;  %v3635_v10 = vrot.slane %v3633_v59, 7  ;;  %5256 = vmatmul.mubr.bf16.gmra.mrb[60].mxu1 %v11593_v49  ;;  %v3631_v62 = vrot.slane %v3627_v47, 4  ;;  %v3863_v49 = vld [vmem:[#allocation3 + $0x94] sm:$0xf]  ;;  %v3898_v47 = vld [vmem:[#allocation3 + $0x90] sm:$0xe] }
 0x262   : > { %v3613_v48 = vor.u32 %v3611_v60, %v3610_v42  ;;  %v3618_v8 = vrot.slane %v3616_v33, 7  ;;  %v3614_v37 = vrot.slane %v3610_v42, 4  ;;  %v6413_v13 = vrot.slane %v9469_v44, 1 }
 0x263   : > { %v3818_v18 = vsel %vm11234_vm15, %v3630_v20, %v3817_v4  ;;  %v3638_v40 = vor.u32 %v3636_v54, %v3635_v10  ;;  %v3640_v15 = vrot.slane %v3635_v10, 4  ;;  %v7930_v4 = vcombine.low %v3897_v32, %v3861_v3 }
 0x264   : > { %3819 = vst [vmem:[#allocation3 + $0xa8] sm:$0xf] %v3818_v18  ;;  %v3811_v21 = vsel %vm11234_vm15, %v3613_v48, %v3810_v12  ;;  %v3621_v19 = vor.u32 %v3619_v23, %v3618_v8  ;;  %v3623_v39 = vrot.slane %v3618_v8, 4  ;;  %v4336_v59 = vrot.slane %v9476_v51, 1 }
 0x265   : > { %3812 = vst [vmem:[#allocation3 + $0x9c] sm:$0xf] %v3811_v21  ;;  %v3639_v28 = vsel %vm9729_vm8, %v3631_v62, %v3638_v40  ;;  %v3822_v52 = vsel %vm10982_vm7, %v3640_v15, %v3821_v5  ;;  %v4335_v12 = vrot.slane %v7930_v4, 1  ;;  %v7931_v42 = vcombine.low %v3898_v47, %v3863_v49 }
 0x266   : > { %3820 = vst [vmem:[#allocation3 + $0xac] sm:$0xf] %v3639_v28  ;;  %3823 = vst [vmem:[#allocation3 + $0xb0] sm:$0x1] %v3822_v52  ;;  %v3622_v26 = vsel %vm9729_vm8, %v3614_v37, %v3621_v19  ;;  %v3815_v36 = vsel %vm10982_vm7, %v3623_v39, %v3814_v57  ;;  %v4339_v60 = vrot.slane %v9480_v7, 1  ;;  %v11639_v33 = vsel %vm1492_vm9, %v6409_v1, %v6410_v45 }
 0x267   : > { %3813 = vst [vmem:[#allocation3 + $0xa0] sm:$0xf] %v3622_v26  ;;  %3816 = vst [vmem:[#allocation3 + $0xa4] sm:$0x1] %v3815_v36  ;;  %v6412_v5 = vrot.slane %v8119_v9, 1  ;;  %v11642_v34 = vsel %vm1492_vm9, %v4335_v12, %v4336_v59  ;;  %v4338_v20 = vrot.slane %v7931_v42, 1 }
 0x268   : > { %12578 = vst [vmem:[#allocation11_spill] sm:$0xff] %v11639_v33 }
 0x269   : > { %v11645_v10 = vsel %vm1492_vm9, %v6412_v5, %v6413_v13  ;;  %v11648_v54 = vsel %vm1492_vm9, %v4338_v20, %v4339_v60 }
 0x26a   : > { %12579 = vst [vmem:[#allocation12_spill] sm:$0xff] %v11645_v10  ;;  %12580 = vst [vmem:[#allocation13_spill] sm:$0xff] %v11648_v54 }
 0x26b   : > { %v4440_v44 = vld [vmem:[#allocation3 + $0xa8] sm:$0xf] }
 0x26c   : > { %v4475_v57 = vld [vmem:[#allocation3 + $0xa8] sm:$0xe]  ;;  %v4438_v3 = vld [vmem:[#allocation3 + $0x9c] sm:$0xf] }
 0x26d   : > { %v4441_v48 = vld [vmem:[#allocation3 + $0xac] sm:$0xf]  ;;  %v4474_v23 = vld [vmem:[#allocation3 + $0x9c] sm:$0xe] }
 0x26e   : > { %v4439_v8 = vld [vmem:[#allocation3 + $0xa0] sm:$0xf]  ;;  %v11650_v51 = vcombine.low %v4440_v44, %v4441_v48  ;;  %v7980_v45 = vcombine.low %v4475_v57, %v4441_v48  ;;  %v9396_v1 = vld [vmem:[#allocation3 + $0xa4] ss:$0 sps:$4 sm:$0x11]  }
 0x26f   : > { %v7947_v9 = vcombine.low %v4438_v3, %v4439_v8  ;;  %v7979_v62 = vcombine.low %v4474_v23, %v4439_v8  ;;  %v9399_v18 = vld [vmem:[#allocation3 + $0xb0] ss:$0 sps:$4 sm:$0x11]   ;;  %v4915_v37 = vrot.slane %v9396_v1, 1  ;;  %v4774_v39 = vshll.u32 %v9396_v1, 16 }
 0x270   : > { %v4917_v40 = vrot.slane %v7980_v45, 1  ;;  %v4781_v15 = vshll.u32 %v11650_v51, 16  ;;  %v4918_v21 = vrot.slane %v9399_v18, 1  ;;  %v4779_v4 = vshrl.u32 %v11650_v51, 16 }
 0x271   : > { %v4914_v7 = vrot.slane %v7979_v62, 1  ;;  %v4769_v19 = vshll.u32 %v7947_v9, 16  ;;  %v8813_v32 = vpop.f32.mrb[12].mxu1  ;;  %v4767_v52 = vshrl.u32 %v7947_v9, 16  ;;  %v4786_v12 = vshll.u32 %v9399_v18, 16 }
 0x272   : > { %v4783_v49 = vrot.slane %v4781_v15, 1  ;;  %v3116_v26 = vmul.f32 %v11486_v31, %v8813_v32  ;;  %v3064_v36 = vpop.f32.mrb[13].mxu1  ;;  %v4919_v47 = vsel %vm1492_vm9, %v4917_v40, %v4918_v21  ;;  %v4776_v60 = vrot.slane %v4774_v39, 1  ;;  %v3838_v18 = vld [vmem:[#allocation3] sm:$0xf] }
 0x273   : > { %v4916_v28 = vsel %vm1492_vm9, %v4914_v7, %v4915_v37  ;;  %v4771_v13 = vrot.slane %v4769_v19, 1  ;;  %v3114_v59 = vmul.f32 %v11486_v31, %v3064_v36  ;;  %v8814_v42 = vpop.f32.mrb[14].mxu1  ;;  %v4788_v62 = vrot.slane %v4786_v12, 1  ;;  %v3839_v40 = vld [vmem:[#allocation3 + $0x4] sm:$0xf] }
 0x274   : > { %8855 = vmatprep.mubr.bf16.mxu0 %v4916_v28  ;;  %v3155_v5 = vadd.f32 %v11493_v22, %v3116_v26  ;;  %v3117_v20 = vmul.f32 %v11486_v31, %v8814_v42  ;;  %v3067_v44 = vpop.f32.mrb[15].mxu1  ;;  %v4784_v3 = vor.u32 %v4783_v49, %v4779_v4  ;;  %v5924_v4 = vld [vmem:[#allocation3 + $0x18] sm:$0xf]  ;;  %v3831_v26 = vld [vmem:[#allocation3 + $0xc0] sm:$0xf] }
 0x275   : > { %8856 = vmatmul.mubr.bf16.gmra.mrb[40].mxu0 %v4919_v47  ;;  %v4772_v57 = vor.u32 %v4771_v13, %v4767_v52  ;;  %v3153_v48 = vadd.f32 %v11493_v22, %v3114_v59  ;;  %v3115_v8 = vmul.f32 %v11486_v31, %v3067_v44  ;;  %v11666_v31 = vcombine.low %v3838_v18, %v3839_v40  ;;  %v3840_v52 = vld [vmem:[#allocation3 + $0xc] sm:$0xf]  ;;  %v9557_v13 = vld [vmem:[#allocation3 + $0x1c] sm:$0xf]  ;;  %v11670_v12 = vld [vmem:[#allocation3 + $0x88] sm:$0xf] }
 0x276   : > { %v3187_v23 = vmax.f32 %v3155_v5, 0.0  ;;  %v3156_v45 = vadd.f32 %v11493_v22, %v3117_v20  ;;  %v4789_v19 = vsel %vm1219_vm10, %v4784_v3, %v4788_v62  ;;  %v9558_v20 = vld [vmem:[#allocation3 + $0x10] sm:$0xf] }
 0x277   : > { %v4777_v1 = vsel %vm1219_vm10, %v4772_v57, %v4776_v60  ;;  %v3185_v15 = vmax.f32 %v3153_v48, 0.0  ;;  %v3154_v7 = vadd.f32 %v11493_v22, %v3115_v8  ;;  %v11668_v22 = vcombine.low %v5924_v4, %v9557_v13  ;;  %v3824_v60 = vld [vmem:[#allocation3 + $0xb4] sm:$0xf]  ;;  %v3835_v48 = vld [vmem:[#allocation3 + $0xc8] sm:$0x1] }
 0x278   : > { %5263 = vmatprep.mubr.bf16.mxu1 %v4777_v1  ;;  %v8299_v37 = vpack.c.bf16 %v3187_v23, %v3187_v23  ;;  %v3188_v21 = vmax.f32 %v3156_v45, 0.0  ;;  %v11674_v44 = vcombine.low %v3840_v52, %v9558_v20  ;;  %v4049_v23 = vshll.u32 %v11666_v31, 16  ;;  %v11677_v45 = vld [vmem:[#allocation3 + $0x94] sm:$0xf]  ;;  %v5981_v1 = vld [vmem:[#allocation3 + $0x84] sm:$0xe] }
 0x279   : > { %5264 = vmatmul.mubr.bf16.gmra.mrb[64].mxu1 %v7947_v9  ;;  %v8297_v39 = vpack.c.bf16 %v3185_v15, %v3185_v15  ;;  %v3186_v49 = vmax.f32 %v3154_v7, 0.0  ;;  %v11672_v9 = vld [vmem:[#allocation3 + $0x8c] ss:$0 sps:$4 sm:$0x11]   ;;  %v3828_v15 = vld [vmem:[#allocation3 + $0xbc] sm:$0x1] }
 0x27a   : > { %5271 = vmatprep.mubr.bf16.mxu1 %v4789_v19  ;;  %v3659_v32 = vshrl.u32 %v8299_v37, 16  ;;  %v8300_v28 = vpack.c.bf16 %v3188_v21, %v3188_v21  ;;  %v3662_v42 = vshll.u32 %v8299_v37, 16  ;;  %v9422_v7 = vld [vmem:[#allocation3 + $0x8] ss:$0 sps:$4 sm:$0x11]   ;;  %v8120_v21 = vcombine.low %v5981_v1, %v11670_v12 }
 0x27b   : > { %v3642_v36 = vshrl.u32 %v8297_v39, 16  ;;  %v8298_v47 = vpack.c.bf16 %v3186_v49, %v3186_v49  ;;  %v3645_v3 = vshll.u32 %v8297_v39, 16  ;;  %v11679_v37 = vld [vmem:[#allocation3 + $0x98] ss:$0 sps:$4 sm:$0x11]   ;;  %v6416_v52 = vrot.slane %v11672_v9, 1 }
 0x27c   : > { %v3661_v59 = vrot.slane %v3659_v32, 7  ;;  %v3667_v5 = vshrl.u32 %v8300_v28, 16  ;;  %v3670_v40 = vshll.u32 %v8300_v28, 16  ;;  %v11682_v39 = vld [vmem:[#allocation3 + $0xa0] sm:$0xf] }
 0x27d   : > { %v3644_v57 = vrot.slane %v3642_v36, 7  ;;  %v3650_v8 = vshrl.u32 %v8298_v47, 16  ;;  %v3653_v32 = vshll.u32 %v8298_v47, 16  ;;  %v5982_v4 = vld [vmem:[#allocation3 + $0x90] sm:$0xe] }
 0x27e   : > { %v3664_v62 = vor.u32 %v3662_v42, %v3661_v59  ;;  %v3669_v18 = vrot.slane %v3667_v5, 7  ;;  %v3665_v36 = vrot.slane %v3661_v59, 4  ;;  %v11688_v5 = vld [vmem:[#allocation3 + $0xa4] ss:$0 sps:$4 sm:$0x11]  }
 0x27f   : > { %v3647_v19 = vor.u32 %v3645_v3, %v3644_v57  ;;  %v3652_v49 = vrot.slane %v3650_v8, 7  ;;  %v3648_v20 = vrot.slane %v3644_v57, 4  ;;  %v11692_v1 = vld [vmem:[#allocation3 + $0xb0] ss:$0 sps:$4 sm:$0x11]   ;;  %v8121_v57 = vcombine.low %v5982_v4, %v11677_v45 }
 0x280   : > { %v3832_v13 = vsel %vm11234_vm15, %v3664_v62, %v3831_v26  ;;  %v3672_v42 = vor.u32 %v3670_v40, %v3669_v18  ;;  %v3674_v28 = vrot.slane %v3669_v18, 4  ;;  %v11698_v62 = vld [vmem:[#allocation3 + $0xac] sm:$0xf]  ;;  %v6415_v18 = vrot.slane %v8120_v21, 1 }
 0x281   : > { %5272 = vmatmul.mubr.bf16.gmra.mrb[68].mxu1 %v11650_v51  ;;  %3833 = vst [vmem:[#allocation3 + $0xc0] sm:$0xf] %v3832_v13  ;;  %v3825_v47 = vsel %vm11234_vm15, %v3647_v19, %v3824_v60  ;;  %v3655_v3 = vor.u32 %v3653_v32, %v3652_v49  ;;  %v3657_v8 = vrot.slane %v3652_v49, 4  ;;  %v3899_v51 = vld [vmem:[#allocation3 + $0x9c] sm:$0xe]  ;;  %v4061_v40 = vshll.u32 %v11674_v44, 16  ;;  %vm12645_vm15 = vmmov %vm12638_vm1 }
 0x282   : > { %3826 = vst [vmem:[#allocation3 + $0xb4] sm:$0xf] %v3825_v47  ;;  %v3673_v59 = vsel %vm9729_vm8, %v3665_v36, %v3672_v42  ;;  %v3836_v26 = vsel %vm10982_vm7, %v3674_v28, %v3835_v48  ;;  %v7932_v19 = vcombine.low %v3899_v51, %v11682_v39  ;;  %v4047_v48 = vshrl.u32 %v11666_v31, 16  ;;  %v3900_v32 = vld [vmem:[#allocation3 + $0xa8] sm:$0xe] }
 0x283   : > { %3834 = vst [vmem:[#allocation3 + $0xc4] sm:$0xf] %v3673_v59  ;;  %3837 = vst [vmem:[#allocation3 + $0xc8] sm:$0x1] %v3836_v26  ;;  %v3656_v30 = vsel %vm9729_vm8, %v3648_v20, %v3655_v3  ;;  %v3829_v60 = vsel %vm10982_vm7, %v3657_v8, %v3828_v15  ;;  %v4054_v49 = vshll.u32 %v9422_v7, 16  ;;  %v4342_v21 = vrot.slane %v11688_v5, 1 }
 0x284   : > { %3827 = vst [vmem:[#allocation3 + $0xb8] sm:$0xf] %v3656_v30  ;;  %3830 = vst [vmem:[#allocation3 + $0xbc] sm:$0x1] %v3829_v60  ;;  %v6419_v4 = vrot.slane %v11679_v37, 1  ;;  %v4051_v36 = vrot.slane %v4049_v23, 1  ;;  %v7933_v13 = vcombine.low %v3900_v32, %v11698_v62  ;;  %v11715_v20 = vsel %vm1492_vm9, %v6415_v18, %v6416_v52 }
 0x285   : > { %v4341_v41 = vrot.slane %v7932_v19, 1  ;;  %v4345_v15 = vrot.slane %v11692_v1, 1  ;;  %12581 = vst [vmem:[#allocation14_spill] sm:$0xff] %v11715_v20  ;;  %v6418_v47 = vrot.slane %v8121_v57, 1  ;;  %v11717_v7 = vrot.slane %v4061_v40, 1  ;;  %vm12633_vm8 = vmmov %vm12632_vm4 }
 0x286   : > { %v9559_v3 = vld [vmem:[#allocation3 + $0x14] ss:$0 sps:$4 sm:$0x11]   ;;  %v11719_v59 = vld [vmem:[#allocation3 + $0xa0] sm:$0xf]  ;;  %v4344_v26 = vrot.slane %v7933_v13, 1  ;;  %v4052_v32 = vor.u32 %v4051_v36, %v4047_v48 }
 0x287   : > { %v4066_v8 = vshll.u32 %v9559_v3, 16  ;;  %v11722_v23 = vsel %vm1492_vm9, %v4341_v41, %v4342_v21  ;;  %v4056_v51 = vrot.slane %v4054_v49, 1  ;;  %v3842_v30 = vld [vmem:[#allocation3 + $0x18] sm:$0xf]  ;;  %v11727_v19 = vsel %vm1492_vm9, %v6418_v47, %v6419_v4  ;;  %v5983_v52 = vld [vmem:[#allocation3 + $0x9c] sm:$0xe] }
 0x288   : > { %12582 = vst [vmem:[#allocation15_spill] sm:$0xff] %v11722_v23  ;;  %v11724_v60 = vld [vmem:[#allocation3 + $0xa4] ss:$0 sps:$4 sm:$0x11]   ;;  %12583 = vst [vmem:[#allocation16_spill] sm:$0xff] %v11727_v19  ;;  %v11730_v3 = vsel %vm1492_vm9, %v4344_v26, %v4345_v15  ;;  %v8122_v21 = vcombine.low %v5983_v52, %v11719_v59  ;;  %v6135_v4 = vshll.u32 %v11668_v22, 16 }
 0x289   : > { %v4442_v18 = vld [vmem:[#allocation3 + $0xb4] sm:$0xf]  ;;  %v4444_v57 = vld [vmem:[#allocation3 + $0xc0] sm:$0xf]  ;;  %12584 = vst [vmem:[#allocation17_spill] sm:$0xff] %v11730_v3  ;;  %v11738_v15 = vrot.slane %v4066_v8, 1 }
 0x28a   : > { %v4477_v40 = vld [vmem:[#allocation3 + $0xc0] sm:$0xe]  ;;  %v4476_v28 = vld [vmem:[#allocation3 + $0xb4] sm:$0xe]  ;;  %v4445_v42 = vld [vmem:[#allocation3 + $0xc4] sm:$0xf] }
 0x28b   : > { %v4443_v49 = vld [vmem:[#allocation3 + $0xb8] sm:$0xf]  ;;  %v11733_v13 = vcombine.low %v4444_v57, %v4445_v42  ;;  %v7982_v20 = vcombine.low %v4477_v40, %v4445_v42  ;;  %v9560_v47 = vld [vmem:[#allocation3 + $0x1c] sm:$0xf]  ;;  %v4057_v42 = vsel %vm1219_vm10, %v4052_v32, %v4056_v51  ;;  %v6422_v40 = vrot.slane %v11724_v60, 1  ;;  %v9565_v3 = vld [vmem:[%s12544_s4 + $0x80] sm:$0xff]  }
 0x28c   : > { %v8368_v41 = vpop.f32.mrb[16].mxu1  ;;  %v11736_v19 = vcombine.low %v3842_v30, %v9560_v47  ;;  %v7949_v33 = vcombine.low %v4442_v18, %v4443_v49  ;;  %v9412_v48 = vld [vmem:[#allocation3 + $0xbc] ss:$0 sps:$4 sm:$0x11]   ;;  %v7981_v36 = vcombine.low %v4476_v28, %v4443_v49  ;;  %v6421_v18 = vrot.slane %v8122_v21, 1 }
 0x28d   : > { %v8369_v10 = vpop.f32.mrb[17].mxu1  ;;  %v9561_v26 = vld [vmem:[#allocation3 + $0x20] ss:$0 sps:$4 sm:$0x11]   ;;  %v4923_v57 = vrot.slane %v7982_v20, 1  ;;  %v4921_v47 = vrot.slane %v9412_v48, 1 }
 0x28e   : > { %v6140_v11 = vshll.u32 %v9561_v26, 16  ;;  %v11740_v43 = vadd.f32 %v8369_v10, %v8368_v41  ;;  %v8371_v52 = vpop.f32.mrb[18].mxu1  ;;  %v9416_v6 = vld [vmem:[#allocation3 + $0xc8] ss:$0 sps:$4 sm:$0x11]   ;;  %v4920_v30 = vrot.slane %v7981_v36, 1 }
 0x28f   : > { %v8372_v58 = vpop.f32.mrb[19].mxu1  ;;  %v4793_v53 = vshll.u32 %v7949_v33, 16  ;;  %v4924_v28 = vrot.slane %v9416_v6, 1  ;;  %v4798_v8 = vshll.u32 %v9412_v48, 16  ;;  %v4805_v49 = vshll.u32 %v11733_v13, 16 }
 0x290   : > { %12585 = vst [vmem:[#allocation18_spill] sm:$0xff] %v11740_v43  ;;  %v11744_v63 = vadd.f32 %v8372_v58, %v8371_v52  ;;  %v4922_v10 = vsel %vm1492_vm9, %v4920_v30, %v4921_v47  ;;  %v4791_v41 = vshrl.u32 %v7949_v33, 16  ;;  %v4810_v20 = vshll.u32 %v9416_v6, 16  ;;  %v11751_v48 = vld [vmem:[#allocation3 + $0xac] sm:$0xf] }
 0x291   : > { %v4795_v26 = vrot.slane %v4793_v53, 1  ;;  %8859 = vmatprep.mubr.bf16.mxu0 %v4922_v10  ;;  %v4925_v51 = vsel %vm1492_vm9, %v4923_v57, %v4924_v28  ;;  %v4803_v32 = vshrl.u32 %v11733_v13, 16  ;;  %v4807_v36 = vrot.slane %v4805_v49, 1  ;;  %v5984_v49 = vld [vmem:[#allocation3 + $0xa8] sm:$0xe] }
 0x292   : > { %12586 = vst [vmem:[#allocation19_spill] sm:$0xff] %v11744_v63  ;;  %v4073_v43 = vshll.u32 %v11736_v19, 16  ;;  %8860 = vmatmul.mubr.bf16.gmra.mrb[44].mxu0 %v4925_v51  ;;  %v4800_v21 = vrot.slane %v4798_v8, 1  ;;  %v6137_v52 = vrot.slane %v6135_v4, 1  ;;  %v6142_v30 = vrot.slane %v6140_v11, 1 }
 0x293   : > { %v4796_v58 = vor.u32 %v4795_v26, %v4791_v41  ;;  %v4808_v24 = vor.u32 %v4807_v36, %v4803_v32  ;;  %5633 = vmatprep.mubr.bf16.mxu0 %v4057_v42  ;;  %v4071_v53 = vshrl.u32 %v11736_v19, 16  ;;  %v11755_v6 = vsel %vm1492_vm9, %v6421_v18, %v6422_v40  ;;  %v11760_v41 = vld [vmem:[#allocation3 + $0x20] ss:$0 sps:$4 sm:$0x11]   ;;  %v5926_v11 = vld [vmem:[#allocation3 + $0x24] sm:$0xf] }
 0x294   : > { %v8374_v63 = vpop.f32.mrb[20].mxu1  ;;  %12587 = vst [vmem:[#allocation20_spill] sm:$0xff] %v11755_v6  ;;  %v4812_v28 = vrot.slane %v4810_v20, 1  ;;  %v4075_v8 = vrot.slane %v4073_v43, 1  ;;  %v8123_v26 = vcombine.low %v5984_v49, %v11751_v48  ;;  %v12589_v51 = vshrl.u32 %v11674_v44, 16  ;;  %v9438_v43 = vld [vmem:[%s12544_s4 + $0x88] sm:$0xff]  }
 0x295   : > { %v8375_v57 = vpop.f32.mrb[21].mxu1  ;;  %v4801_v47 = vsel %vm1219_vm10, %v4796_v58, %v4800_v21  ;;  %v11773_v36 = vld [vmem:[#allocation3 + $0xb0] ss:$0 sps:$4 sm:$0x11]   ;;  %v11775_v58 = vld [vmem:[#allocation3 + $0xb8] sm:$0xf] }
 0x296   : > { %v11758_v10 = vadd.f32 %v8375_v57, %v8374_v63  ;;  %5279 = vmatprep.mubr.bf16.mxu1 %v4801_v47  ;;  %v8377_v4 = vpop.f32.mrb[22].mxu1  ;;  %v4813_v18 = vsel %vm1219_vm10, %v4808_v24, %v4812_v28  ;;  %v4064_v20 = vor.u32 %v11717_v7, %v12589_v51  ;;  %v9563_v63 = vld [vmem:[#allocation3 + $0x28] sm:$0xf]  ;;  %v12591_v24 = vshrl.u32 %v11668_v22, 16  ;;  %v11785_v47 = vld [vmem:[#allocation3 + $0xb8] sm:$0xf] }
 0x297   : > { %5280 = vmatmul.mubr.bf16.gmra.mrb[72].mxu1 %v7949_v33  ;;  %v8378_v40 = vpop.f32.mrb[23].mxu1  ;;  %v11768_v32 = vcombine.low %v5926_v11, %v9563_v63  ;;  %v11781_v57 = vld [vmem:[#allocation3 + $0xbc] ss:$0 sps:$4 sm:$0x11]   ;;  %v11787_v28 = vld [vmem:[#allocation3 + $0xc4] sm:$0xf] }
 0x298   : > { %12588 = vst [vmem:[#allocation21_spill] sm:$0xff] %v11758_v10  ;;  %v11777_v21 = vadd.f32 %v8378_v40, %v8377_v4  ;;  %5287 = vmatprep.mubr.bf16.mxu1 %v4813_v18  ;;  %v6138_v33 = vor.u32 %v6137_v52, %v12591_v24  ;;  %v11783_v7 = vld [vmem:[#allocation3 + $0xbc] ss:$0 sps:$4 sm:$0x11]   ;;  %v3901_v49 = vld [vmem:[#allocation3 + $0xb4] sm:$0xe]  ;;  %v4069_v52 = vsel %vm1219_vm10, %v4064_v20, %v11738_v15 }
 0x299   : > { %v3844_v11 = vld [vmem:[#allocation3 + $0x24] sm:$0xf]  ;;  %v5928_v51 = vld [vmem:[#allocation3 + $0x30] sm:$0xf]  ;;  %v7934_v4 = vcombine.low %v3901_v49, %v11775_v58  ;;  %v6424_v40 = vrot.slane %v8123_v26, 1  ;;  %v6147_v18 = vshll.u32 %v11768_v32, 16 }
 0x29a   : > { %12590 = vst [vmem:[#allocation22_spill] sm:$0xff] %v11777_v21  ;;  %v11789_v63 = vld [vmem:[#allocation3 + $0xc8] ss:$0 sps:$4 sm:$0x11]   ;;  %5634 = vmatmul.mubr.bf16.vlgmr.msra.gmra.mrb[48].mxu0 %v11666_v31  ;;  %v6425_v6 = vrot.slane %v11773_v36, 1  ;;  %v6143_v31 = vsel %vm1219_vm10, %v6138_v33, %v6142_v30  ;;  %v4348_v15 = vrot.slane %v11783_v7, 1 }
 0x29b   : > { %v9564_v24 = vld [vmem:[#allocation3 + $0x28] sm:$0xf]  ;;  %v5985_v21 = vld [vmem:[#allocation3 + $0xb4] sm:$0xe]  ;;  %v5986_v10 = vld [vmem:[#allocation3 + $0xc0] sm:$0xe]  ;;  %8864 = vmatpush3.bf16.msra.mxu0 %v9565_v3  ;;  %5641 = vmatprep.mubr.bf16.mxu0 %v4069_v52 }
 0x29c   : > { %v11796_v42 = vcombine.low %v3844_v11, %v9564_v24  ;;  %v3249_v26 = vld [vmem:[#allocation3 + $0xcc] sm:$0x1]  ;;  %v3304_v49 = vld [vmem:[#allocation3 + $0xd4] sm:$0x1]  ;;  %v8124_v20 = vcombine.low %v5985_v21, %v11785_v47  ;;  %v8125_v11 = vcombine.low %v5986_v10, %v11787_v28  ;;  %v4076_v24 = vor.u32 %v4075_v8, %v4071_v53  ;;  %8865 = vmatprep.subr.bf16.mxu0 %v9438_v43  ;;  %v9447_v3 = vld [vmem:[%s12544_s4 + $0x90] sm:$0xff]  }
 0x29d   : > { %v9566_v23 = vld [vmem:[#allocation3 + $0x34] sm:$0xf]  ;;  %v3250_v30 = vsel %vm10982_vm7, 0, %v3249_v26  ;;  %v3305_v33 = vsel %vm11006_vm0, 0, %v3304_v49  ;;  %v4347_v21 = vrot.slane %v7934_v4, 1  ;;  %v11816_v10 = vsel %vm1492_vm9, %v6424_v40, %v6425_v6  ;;  %v9456_v49 = vld [vmem:[%s12544_s4 + $0x98] sm:$0xff]   ;;  %vm12595_vm0 = vmmov %vm12577_vm2 }
 0x29e   : > { %v11806_v54 = vcombine.low %v5928_v51, %v9566_v23  ;;  %3251 = vst [vmem:[#allocation3 + $0xcc] sm:$0x1] %v3250_v30  ;;  %3306 = vst [vmem:[#allocation3 + $0xd4] sm:$0x1] %v3305_v33  ;;  %v6427_v53 = vrot.slane %v8124_v20, 1  ;;  %v6428_v23 = vrot.slane %v11781_v57, 1 }
 0x29f   : > { %5288 = vmatmul.mubr.bf16.gmra.mrb[76].mxu1 %v11733_v13  ;;  %v6149_v8 = vrot.slane %v6147_v18, 1  ;;  %v4085_v51 = vshll.u32 %v11796_v42, 16  ;;  %v6430_v52 = vrot.slane %v8125_v11, 1  ;;  %v6431_v17 = vrot.slane %v11789_v63, 1  ;;  %8866 = vmatpush3.bf16.msra.mxu0 %v9438_v43  ;;  %v9568_v30 = vld [vmem:[#allocation3 + $0x34] sm:$0xf]  ;;  %vm12641_vm7 = vmmov %vm12638_vm1 }
 0x2a0   : > { %6677 = vmatprep.mubr.bf16.mxu1 %v6143_v31  ;;  %v11823_v61 = vsel %vm1492_vm9, %v4347_v21, %v4348_v15  ;;  %v11826_v4 = vsel %vm1492_vm9, %v6427_v53, %v6428_v23  ;;  %v12593_v6 = vshll.u32 %v11760_v41, 16  ;;  %v6145_v26 = vshrl.u32 %v11768_v32, 16  ;;  %v9567_v13 = vld [vmem:[#allocation3 + $0x2c] ss:$0 sps:$4 sm:$0x11]   ;;  %8867 = vmatprep.subr.bf16.mxu0 %v9447_v3  ;;  %vm12646_vm2 = vmmov %vm12638_vm1 }
 0x2a1   : > { %12592 = vst [vmem:[#allocation23_spill] sm:$0xff] %v11826_v4  ;;  %v6152_v18 = vshll.u32 %v9567_v13, 16  ;;  %v11835_v43 = vsel %vm1492_vm9, %v6430_v52, %v6431_v17  ;;  %v6159_v31 = vshll.u32 %v11806_v54, 16  ;;  %v3846_v15 = vld [vmem:[#allocation3 + $0x30] sm:$0xf]  ;;  %v4087_v11 = vrot.slane %v4085_v51, 1 }
 0x2a2   : > { %v4080_v40 = vrot.slane %v12593_v6, 1  ;;  %12594 = vst [vmem:[#allocation24_spill] sm:$0xff] %v11835_v43  ;;  %5642 = vmatmul.mubr.bf16.gmra.mrb[52].mxu0 %v11674_v44  ;;  %v6150_v20 = vor.u32 %v6149_v8, %v6145_v26  ;;  %v11840_v33 = vcombine.low %v3846_v15, %v9568_v30  ;;  %v4083_v53 = vshrl.u32 %v11796_v42, 16  ;;  %v9569_v23 = vld [vmem:[#allocation3 + $0x2c] ss:$0 sps:$4 sm:$0x11]  }
 0x2a3   : > { %8868 = vmatpush3.bf16.msra.mxu0 %v9447_v3  ;;  %v6154_v21 = vrot.slane %v6152_v18, 1  ;;  %v4090_v52 = vshll.u32 %v9569_v23, 16  ;;  %v9465_v17 = vld [vmem:[%s12544_s4 + $0xa0] sm:$0xff]   ;;  %v6161_v44 = vrot.slane %v6159_v31, 1  ;;  %v5930_v6 = vld [vmem:[#allocation3 + $0x3c] sm:$0xf] }
 0x2a4   : > { %v4081_v41 = vsel %vm1219_vm10, %v4076_v24, %v4080_v40  ;;  %8869 = vmatprep.subr.bf16.mxu0 %v9456_v49  ;;  %v7161_v24 = vsel %vm12595_vm0, %v11620_v27, 0  ;;  %v4088_v3 = vor.u32 %v4087_v11, %v4083_v53  ;;  %v4097_v51 = vshll.u32 %v11840_v33, 16  ;;  %v9570_v40 = vld [vmem:[#allocation3 + $0x40] sm:$0xf]  ;;  %v9474_v27 = vld [vmem:[%s12544_s4 + $0xa8] sm:$0xff]   ;;  %vm12647_vm0 = vmmov %vm12638_vm1 }
 0x2a5   : > { %5649 = vmatprep.mubr.bf16.mxu0 %v4081_v41  ;;  %v6155_v8 = vsel %vm1219_vm10, %v6150_v20, %v6154_v21  ;;  %v11851_v26 = vcombine.low %v5930_v6, %v9570_v40  ;;  %v6157_v13 = vshrl.u32 %v11806_v54, 16  ;;  %v9571_v18 = vld [vmem:[#allocation3 + $0x38] ss:$0 sps:$4 sm:$0x11]   ;;  %v4092_v31 = vrot.slane %v4090_v52, 1 }
 0x2a6   : > { %v6164_v15 = vshll.u32 %v9571_v18, 16  ;;  %v3848_v41 = vld [vmem:[#allocation3 + $0x3c] sm:$0xf]  ;;  %v4099_v11 = vrot.slane %v4097_v51, 1  ;;  %v9572_v21 = vld [vmem:[#allocation3 + $0x40] sm:$0xf] }
 0x2a7   : > { %6678 = vmatmul.mubr.bf16.vlgmr.msra.gmra.mrb[80].mxu1 %v11668_v22  ;;  %8870 = vmatpush3.bf16.msra.mxu0 %v9456_v49  ;;  %v6162_v22 = vor.u32 %v6161_v44, %v6157_v13  ;;  %v4093_v20 = vsel %vm1219_vm10, %v4088_v3, %v4092_v31  ;;  %v6171_v30 = vshll.u32 %v11851_v26, 16  ;;  %v11860_v53 = vcombine.low %v3848_v41, %v9572_v21  ;;  %v5932_v40 = vld [vmem:[#allocation3 + $0x48] sm:$0xf]  ;;  %v9574_v31 = vld [vmem:[#allocation3 + $0x4c] sm:$0xf] }
 0x2a8   : > { %6685 = vmatprep.mubr.bf16.mxu1 %v6155_v8  ;;  %8871 = vmatprep.subr.bf16.mxu0 %v9465_v17  ;;  %v6166_v23 = vrot.slane %v6164_v15, 1  ;;  %v4095_v6 = vshrl.u32 %v11840_v33, 16  ;;  %v11871_v41 = vcombine.low %v5932_v40, %v9574_v31  ;;  %v9577_v31 = vld [vmem:[#allocation3 + $0x44] ss:$0 sps:$4 sm:$0x11]  }
 0x2a9   : > { %8960 = vmatpush3.bf16.msra.mxu1 %v7161_v24  ;;  %v9573_v24 = vld [vmem:[#allocation3 + $0x38] ss:$0 sps:$4 sm:$0x11]   ;;  %v6173_v18 = vrot.slane %v6171_v30, 1  ;;  %v4109_v15 = vshll.u32 %v11860_v53, 16 }
 0x2aa   : > { %5650 = vmatmul.mubr.bf16.gmra.mrb[56].mxu0 %v11736_v19  ;;  %v4102_v44 = vshll.u32 %v9573_v24, 16  ;;  %v9483_v19 = vld [vmem:[%s12544_s4 + $0xb0] sm:$0xff]   ;;  %v6167_v51 = vsel %vm1219_vm10, %v6162_v22, %v6166_v23  ;;  %v3850_v23 = vld [vmem:[#allocation3 + $0x48] sm:$0xf] }
 0x2ab   : > { %5657 = vmatprep.mubr.bf16.mxu0 %v4093_v20  ;;  %8872 = vmatpush3.bf16.msra.mxu0 %v9465_v17  ;;  %v4100_v17 = vor.u32 %v4099_v11, %v4095_v6  ;;  %v9576_v11 = vld [vmem:[#allocation3 + $0x4c] sm:$0xf]  ;;  %v9579_v43 = vld [vmem:[#allocation3 + $0x50] ss:$0 sps:$4 sm:$0x11]  }
 0x2ac   : > { %v8380_v49 = vpop.f32.mrb[24].mxu1  ;;  %8873 = vmatprep.subr.bf16.mxu0 %v9474_v27  ;;  %v4104_v21 = vrot.slane %v4102_v44, 1  ;;  %v11879_v30 = vcombine.low %v3850_v23, %v9576_v11  ;;  %v6183_v44 = vshll.u32 %v11871_v41, 16  ;;  %v9578_v11 = vld [vmem:[#allocation3 + $0x58] sm:$0xf]  ;;  %v6188_v4 = vshll.u32 %v9579_v43, 16 }
 0x2ad   : > { %v8381_v52 = vpop.f32.mrb[25].mxu1 }
 0x2ae   : > { %v11866_v8 = vadd.f32 %v8381_v52, %v8380_v49  ;;  %v8383_v3 = vpop.f32.mrb[26].mxu1  ;;  %v6169_v49 = vshrl.u32 %v11851_v26, 16  ;;  %v9575_v52 = vld [vmem:[#allocation3 + $0x44] ss:$0 sps:$4 sm:$0x11]   ;;  %v4105_v6 = vsel %vm1219_vm10, %v4100_v17, %v4104_v21  ;;  %v6185_v23 = vrot.slane %v6183_v44, 1 }
 0x2af   : > { %6686 = vmatmul.mubr.bf16.gmra.mrb[84].mxu1 %v11768_v32  ;;  %v8384_v13 = vpop.f32.mrb[27].mxu1  ;;  %8874 = vmatpush3.bf16.msra.mxu0 %v9474_v27  ;;  %v6176_v22 = vshll.u32 %v9575_v52, 16  ;;  %v9492_v32 = vld [vmem:[%s12544_s4 + $0xb8] sm:$0xff]   ;;  %v4111_v27 = vrot.slane %v4109_v15, 1  ;;  %v4114_v52 = vshll.u32 %v9577_v31, 16  ;;  %v4121_v15 = vshll.u32 %v11879_v30, 16 }
 0x2b0   : > { %v11873_v20 = vadd.f32 %v8384_v13, %v8383_v3  ;;  %6693 = vmatprep.mubr.bf16.mxu1 %v6167_v51  ;;  %8875 = vmatprep.subr.bf16.mxu0 %v9483_v19  ;;  %v6174_v24 = vor.u32 %v6173_v18, %v6169_v49  ;;  %v4107_v13 = vshrl.u32 %v11860_v53, 16  ;;  %v5934_v21 = vld [vmem:[#allocation3 + $0x54] sm:$0xf]  ;;  %v6190_v43 = vrot.slane %v6188_v4, 1 }
 0x2b1   : > { %v6178_v40 = vrot.slane %v6176_v22, 1 }
 0x2b2   : > { %5658 = vmatmul.mubr.bf16.gmra.mrb[60].mxu0 %v11796_v42  ;;  %v11888_v42 = vld [vmem:[%s12544_s4 + $0x200] sm:$0xff]   ;;  %v4112_v22 = vor.u32 %v4111_v27, %v4107_v13 }
 0x2b3   : > { %5665 = vmatprep.mubr.bf16.mxu0 %v4105_v6  ;;  %8876 = vmatpush3.bf16.msra.mxu0 %v9483_v19  ;;  %v6179_v49 = vsel %vm1219_vm10, %v6174_v24, %v6178_v40  ;;  %v11895_v6 = vcombine.low %v5934_v21, %v9578_v11  ;;  %v9580_v40 = vld [vmem:[#allocation3 + $0x58] sm:$0xf] }
 0x2b4   : > { %v8386_v3 = vpop.f32.mrb[28].mxu1  ;;  %8877 = vmatprep.subr.bf16.mxu0 %v9492_v32 }
 0x2b5   : > { %v8387_v51 = vpop.f32.mrb[29].mxu1  ;;  %v6195_v44 = vshll.u32 %v11895_v6, 16  ;;  %v6193_v11 = vshrl.u32 %v11895_v6, 16 }
 0x2b6   : > { %v11890_v17 = vadd.f32 %v8387_v51, %v8386_v3  ;;  %v8389_v18 = vpop.f32.mrb[30].mxu1  ;;  %v4116_v3 = vrot.slane %v4114_v52, 1  ;;  %v6181_v51 = vshrl.u32 %v11871_v41, 16  ;;  %v9581_v52 = vld [vmem:[#allocation3 + $0x50] ss:$0 sps:$4 sm:$0x11]  }
 0x2b7   : > { %6694 = vmatmul.mubr.bf16.gmra.mrb[88].mxu1 %v11806_v54  ;;  %v8390_v19 = vpop.f32.mrb[31].mxu1  ;;  %8878 = vmatpush3.bf16.msra.mxu0 %v9492_v32  ;;  %v4123_v54 = vrot.slane %v4121_v15, 1  ;;  %v4119_v32 = vshrl.u32 %v11879_v30, 16  ;;  %v6197_v15 = vrot.slane %v6195_v44, 1  ;;  %v9584_v44 = vld [vmem:[#allocation3 + $0x64] sm:$0xf] }
 0x2b8   : > { %12596 = vst [vmem:[#allocation25_spill] sm:$0xff] %v11890_v17  ;;  %v11897_v31 = vadd.f32 %v8390_v19, %v8389_v18  ;;  %6701 = vmatprep.mubr.bf16.mxu1 %v6179_v49  ;;  %8911 = vmatprep.subr.bf16.mxu0 %v11888_v42  ;;  %v3852_v17 = vld [vmem:[#allocation3 + $0x54] sm:$0xf]  ;;  %v4117_v24 = vsel %vm1219_vm10, %v4112_v22, %v4116_v3  ;;  %v4126_v18 = vshll.u32 %v9581_v52, 16  ;;  %v5936_v19 = vld [vmem:[#allocation3 + $0x60] sm:$0xf] }
 0x2b9   : > { %v6186_v27 = vor.u32 %v6185_v23, %v6181_v51  ;;  %v11904_v13 = vcombine.low %v3852_v17, %v9580_v40  ;;  %v4124_v21 = vor.u32 %v4123_v54, %v4119_v32  ;;  %v9582_v22 = vld [vmem:[#allocation3 + $0x64] sm:$0xf]  ;;  %v9583_v3 = vld [vmem:[#allocation3 + $0x5c] ss:$0 sps:$4 sm:$0x11]  }
 0x2ba   : > { %5666 = vmatmul.mubr.bf16.gmra.mrb[64].mxu0 %v11840_v33  ;;  %v11910_v23 = vcombine.low %v5936_v19, %v9582_v22  ;;  %v4128_v17 = vrot.slane %v4126_v18, 1  ;;  %v6200_v51 = vshll.u32 %v9583_v3, 16  ;;  %v3854_v54 = vld [vmem:[#allocation3 + $0x60] sm:$0xf]  ;;  %v5938_v19 = vld [vmem:[#allocation3 + $0x6c] sm:$0xf] }
 0x2bb   : > { %5673 = vmatprep.mubr.bf16.mxu0 %v4117_v24  ;;  %v6191_v33 = vsel %vm1219_vm10, %v6186_v27, %v6190_v43  ;;  %v4133_v49 = vshll.u32 %v11904_v13, 16  ;;  %v11916_v40 = vcombine.low %v3854_v54, %v9584_v44  ;;  %v4131_v52 = vshrl.u32 %v11904_v13, 16  ;;  %v9585_v18 = vld [vmem:[#allocation3 + $0x5c] ss:$0 sps:$4 sm:$0x11]  }
 0x2bc   : > { %v4129_v4 = vsel %vm1219_vm10, %v4124_v21, %v4128_v17  ;;  %v6207_v27 = vshll.u32 %v11910_v23, 16  ;;  %v6202_v32 = vrot.slane %v6200_v51, 1  ;;  %v4138_v43 = vshll.u32 %v9585_v18, 16  ;;  %v9588_v18 = vld [vmem:[#allocation3 + $0x68] ss:$0 sps:$4 sm:$0x11]  }
 0x2bd   : > { %v4135_v24 = vrot.slane %v4133_v49, 1  ;;  %v4145_v49 = vshll.u32 %v11916_v40, 16  ;;  %v6205_v17 = vshrl.u32 %v11910_v23, 16 }
 0x2be   : > { %v4140_v22 = vrot.slane %v4138_v43, 1  ;;  %v4150_v43 = vshll.u32 %v9588_v18, 16 }
 0x2bf   : > { %6702 = vmatmul.mubr.bf16.gmra.mrb[92].mxu1 %v11851_v26  ;;  %v6198_v26 = vor.u32 %v6197_v15, %v6193_v11  ;;  %v4136_v21 = vor.u32 %v4135_v24, %v4131_v52  ;;  %v6209_v15 = vrot.slane %v6207_v27, 1  ;;  %v9586_v11 = vld [vmem:[#allocation3 + $0x68] ss:$0 sps:$4 sm:$0x11]   ;;  %v4147_v54 = vrot.slane %v4145_v49, 1 }
 0x2c0   : > { %6709 = vmatprep.mubr.bf16.mxu1 %v6191_v33  ;;  %v11920_v33 = vcombine.low %v5938_v19, %v11609_v16  ;;  %v6212_v3 = vshll.u32 %v9586_v11, 16  ;;  %v4143_v52 = vshrl.u32 %v11916_v40, 16 }
 0x2c1   : > { %v4141_v16 = vsel %vm1219_vm10, %v4136_v21, %v4140_v22 }
 0x2c2   : > { %5674 = vmatmul.mubr.bf16.gmra.mrb[68].mxu0 %v11860_v53  ;;  %v6203_v53 = vsel %vm1219_vm10, %v6198_v26, %v6202_v32  ;;  %v6219_v51 = vshll.u32 %v11920_v33, 16  ;;  %v9587_v26 = vld [vmem:[#allocation3 + $0x70] sm:$0xf]  ;;  %v6214_v32 = vrot.slane %v6212_v3, 1  ;;  %v4148_v49 = vor.u32 %v4147_v54, %v4143_v52 }
 0x2c3   : > { %5681 = vmatprep.mubr.bf16.mxu0 %v4129_v4  ;;  %v3856_v4 = vld [vmem:[#allocation3 + $0x6c] sm:$0xf] }
 0x2c4   : > { %v11929_v24 = vcombine.low %v3856_v4, %v9587_v26  ;;  %v6221_v11 = vrot.slane %v6219_v51, 1  ;;  %v6217_v4 = vshrl.u32 %v11920_v33, 16  ;;  %v4152_v51 = vrot.slane %v4150_v43, 1 }
 0x2c6   : > { %v4157_v22 = vshll.u32 %v11929_v24, 16 }
 0x2c7   : > { %6710 = vmatmul.mubr.bf16.gmra.mrb[96].mxu1 %v11871_v41  ;;  %v6210_v41 = vor.u32 %v6209_v15, %v6205_v17 }
 0x2c8   : > { %6717 = vmatprep.mubr.bf16.mxu1 %v6203_v53 }
 0x2c9   : > { %v6215_v15 = vsel %vm1219_vm10, %v6210_v41, %v6214_v32  ;;  %v4159_v41 = vrot.slane %v4157_v22, 1  ;;  %v9590_v32 = vld [vmem:[#allocation3 + $0x7c] sm:$0xf] }
 0x2ca   : > { %5682 = vmatmul.mubr.bf16.gmra.mrb[72].mxu0 %v11879_v30  ;;  %v5940_v30 = vld [vmem:[#allocation3 + $0x78] sm:$0xf] }
 0x2cb   : > { %5689 = vmatprep.mubr.bf16.mxu0 %v4141_v16  ;;  %v11938_v17 = vcombine.low %v5940_v30, %v11613_v35  ;;  %v9589_v16 = vld [vmem:[#allocation3 + $0x74] ss:$0 sps:$4 sm:$0x11]   ;;  %v4155_v30 = vshrl.u32 %v11929_v24, 16 }
 0x2cc   : > { %v8392_v27 = vpop.f32.mrb[32].mxu1  ;;  %v6224_v26 = vshll.u32 %v9589_v16, 16 }
 0x2cd   : > { %v8393_v44 = vpop.f32.mrb[33].mxu1  ;;  %v6231_v54 = vshll.u32 %v11938_v17, 16 }
 0x2ce   : > { %v11932_v19 = vadd.f32 %v8393_v44, %v8392_v27  ;;  %v8395_v53 = vpop.f32.mrb[34].mxu1  ;;  %v6222_v27 = vor.u32 %v6221_v11, %v6217_v4  ;;  %v3858_v44 = vld [vmem:[#allocation3 + $0x78] sm:$0xf]  ;;  %v6226_v18 = vrot.slane %v6224_v26, 1  ;;  %v4160_v4 = vor.u32 %v4159_v41, %v4155_v30 }
 0x2cf   : > { %6718 = vmatmul.mubr.bf16.gmra.mrb[100].mxu1 %v11895_v6  ;;  %v8396_v21 = vpop.f32.mrb[35].mxu1  ;;  %v4153_v6 = vsel %vm1219_vm10, %v4148_v49, %v4152_v51  ;;  %v11946_v35 = vcombine.low %v3858_v44, %v9590_v32  ;;  %v5942_v49 = vld [vmem:[#allocation3 + $0x84] sm:$0xf]  ;;  %v6233_v16 = vrot.slane %v6231_v54, 1  ;;  %v6229_v32 = vshrl.u32 %v11938_v17, 16 }
 0x2d0   : > { %v11940_v3 = vadd.f32 %v8396_v21, %v8395_v53  ;;  %6725 = vmatprep.mubr.bf16.mxu1 %v6215_v15  ;;  %v9591_v21 = vld [vmem:[#allocation3 + $0x74] ss:$0 sps:$4 sm:$0x11]   ;;  %v11955_v26 = vcombine.low %v5942_v49, %v11670_v12 }
 0x2d1   : > { %v4162_v43 = vshll.u32 %v9591_v21, 16  ;;  %v4169_v51 = vshll.u32 %v11946_v35, 16  ;;  %v6234_v41 = vor.u32 %v6233_v16, %v6229_v32 }
 0x2d2   : > { %5690 = vmatmul.mubr.bf16.gmra.mrb[76].mxu0 %v11904_v13  ;;  %v6227_v13 = vsel %vm1219_vm10, %v6222_v27, %v6226_v18  ;;  %v3860_v27 = vld [vmem:[#allocation3 + $0x84] sm:$0xf]  ;;  %v9593_v18 = vld [vmem:[#allocation3 + $0x88] sm:$0xf]  ;;  %v6243_v12 = vshll.u32 %v11955_v26, 16 }
 0x2d3   : > { %5697 = vmatprep.mubr.bf16.mxu0 %v4153_v6  ;;  %v4164_v6 = vrot.slane %v4162_v43, 1  ;;  %v11960_v21 = vcombine.low %v3860_v27, %v9593_v18  ;;  %v4171_v54 = vrot.slane %v4169_v51, 1  ;;  %v4167_v43 = vshrl.u32 %v11946_v35, 16 }
 0x2d4   : > { %v8398_v52 = vpop.f32.mrb[36].mxu1  ;;  %v6245_v27 = vrot.slane %v6243_v12, 1  ;;  %v6241_v51 = vshrl.u32 %v11955_v26, 16  ;;  %v9596_v12 = vld [vmem:[#allocation3 + $0x8c] ss:$0 sps:$4 sm:$0x11]  }
 0x2d5   : > { %v8399_v53 = vpop.f32.mrb[37].mxu1  ;;  %v4181_v49 = vshll.u32 %v11960_v21, 16 }
 0x2d6   : > { %v11949_v11 = vadd.f32 %v8399_v53, %v8398_v52  ;;  %v8401_v15 = vpop.f32.mrb[38].mxu1  ;;  %v9592_v52 = vld [vmem:[#allocation3 + $0x80] ss:$0 sps:$4 sm:$0x11]  }
 0x2d7   : > { %6726 = vmatmul.mubr.bf16.gmra.mrb[104].mxu1 %v11910_v23  ;;  %v8402_v22 = vpop.f32.mrb[39].mxu1  ;;  %v6236_v53 = vshll.u32 %v9592_v52, 16  ;;  %v4165_v23 = vsel %vm1219_vm10, %v4160_v4, %v4164_v6  ;;  %v6248_v6 = vshll.u32 %v11672_v9, 16  ;;  %v4183_v32 = vrot.slane %v4181_v49, 1  ;;  %v5946_v9 = vld [vmem:[#allocation3 + $0x9c] sm:$0xf] }
 0x2d8   : > { %v11957_v44 = vadd.f32 %v8402_v22, %v8401_v15  ;;  %6733 = vmatprep.mubr.bf16.mxu1 %v6227_v13  ;;  %v9594_v15 = vld [vmem:[#allocation3 + $0x80] ss:$0 sps:$4 sm:$0x11]   ;;  %v5944_v22 = vld [vmem:[#allocation3 + $0x90] sm:$0xf] }
 0x2d9   : > { %v6238_v30 = vrot.slane %v6236_v53, 1  ;;  %v4174_v13 = vshll.u32 %v9594_v15, 16  ;;  %v11970_v4 = vcombine.low %v5944_v22, %v11677_v45  ;;  %v3862_v53 = vld [vmem:[#allocation3 + $0x90] sm:$0xf]  ;;  %v4179_v45 = vshrl.u32 %v11960_v21, 16 }
 0x2da   : > { %5698 = vmatmul.mubr.bf16.gmra.mrb[80].mxu0 %v11916_v40  ;;  %v4172_v40 = vor.u32 %v4171_v54, %v4167_v43  ;;  %v6250_v43 = vrot.slane %v6248_v6, 1  ;;  %v11984_v22 = vcombine.low %v5946_v9, %v11719_v59 }
 0x2db   : > { %5705 = vmatprep.mubr.bf16.mxu0 %v4165_v23  ;;  %v6239_v52 = vsel %vm1219_vm10, %v6234_v41, %v6238_v30  ;;  %v4176_v16 = vrot.slane %v4174_v13, 1  ;;  %v6255_v23 = vshll.u32 %v11970_v4, 16  ;;  %v9595_v41 = vld [vmem:[#allocation3 + $0x94] sm:$0xf]  ;;  %v4186_v30 = vshll.u32 %v9596_v12, 16 }
 0x2dc   : > { %v11977_v54 = vcombine.low %v3862_v53, %v9595_v41  ;;  %v4184_v15 = vor.u32 %v4183_v32, %v4179_v45  ;;  %v6267_v32 = vshll.u32 %v11984_v22, 16  ;;  %v9597_v41 = vld [vmem:[#allocation3 + $0x98] ss:$0 sps:$4 sm:$0x11]   ;;  %v5948_v45 = vld [vmem:[#allocation3 + $0xa8] sm:$0xf] }
 0x2dd   : > { %v4177_v18 = vsel %vm1219_vm10, %v4172_v40, %v4176_v16  ;;  %v6257_v13 = vrot.slane %v6255_v23, 1  ;;  %v6253_v40 = vshrl.u32 %v11970_v4, 16 }
 0x2de   : > { %v4193_v49 = vshll.u32 %v11977_v54, 16  ;;  %v4191_v23 = vshrl.u32 %v11977_v54, 16  ;;  %v6269_v9 = vrot.slane %v6267_v32, 1 }
 0x2df   : > { %6734 = vmatmul.mubr.bf16.gmra.mrb[108].mxu1 %v11920_v33  ;;  %v6246_v33 = vor.u32 %v6245_v27, %v6241_v51  ;;  %v6260_v27 = vshll.u32 %v11679_v37, 16  ;;  %v3864_v51 = vld [vmem:[#allocation3 + $0x9c] sm:$0xf]  ;;  %v4198_v37 = vshll.u32 %v9597_v41, 16 }
 0x2e0   : > { %6741 = vmatprep.mubr.bf16.mxu1 %v6239_v52  ;;  %v4188_v52 = vrot.slane %v4186_v30, 1  ;;  %v4195_v6 = vrot.slane %v4193_v49, 1  ;;  %v11992_v53 = vcombine.low %v3864_v51, %v11682_v39 }
 0x2e1   : > { %v4200_v49 = vrot.slane %v4198_v37, 1 }
 0x2e2   : > { %5706 = vmatmul.mubr.bf16.gmra.mrb[84].mxu0 %v11929_v24  ;;  %v6251_v24 = vsel %vm1219_vm10, %v6246_v33, %v6250_v43  ;;  %v4189_v16 = vsel %vm1219_vm10, %v4184_v15, %v4188_v52  ;;  %v6262_v33 = vrot.slane %v6260_v27, 1  ;;  %v4196_v15 = vor.u32 %v4195_v6, %v4191_v23  ;;  %v3866_v27 = vld [vmem:[#allocation3 + $0xa8] sm:$0xf] }
 0x2e3   : > { %5713 = vmatprep.mubr.bf16.mxu0 %v4177_v18  ;;  %v6265_v52 = vshrl.u32 %v11984_v22, 16 }
 0x2e7   : > { %6742 = vmatmul.mubr.bf16.gmra.mrb[112].mxu1 %v11938_v17  ;;  %v6258_v17 = vor.u32 %v6257_v13, %v6253_v40  ;;  %v6272_v40 = vshll.u32 %v11724_v60, 16  ;;  %v4210_v60 = vshll.u32 %v11688_v5, 16 }
 0x2e8   : > { %6749 = vmatprep.mubr.bf16.mxu1 %v6251_v24  ;;  %v4205_v24 = vshll.u32 %v11992_v53, 16 }
 0x2e9   : > { %v6263_v39 = vsel %vm1219_vm10, %v6258_v17, %v6262_v33  ;;  %v12011_v17 = vcombine.low %v3866_v27, %v11698_v62 }
 0x2ea   : > { %5714 = vmatmul.mubr.bf16.gmra.mrb[88].mxu0 %v11946_v35  ;;  %v11998_v35 = vcombine.low %v5948_v45, %v11751_v48  ;;  %v4207_v51 = vrot.slane %v4205_v24, 1 }
 0x2eb   : > { %5721 = vmatprep.mubr.bf16.mxu0 %v4189_v16  ;;  %v6270_v16 = vor.u32 %v6269_v9, %v6265_v52  ;;  %v4212_v9 = vrot.slane %v4210_v60, 1  ;;  %v4215_v27 = vshrl.u32 %v12011_v17, 16  ;;  %v5954_v60 = vld [vmem:[#allocation3 + $0xcc] sm:$0xf] }
 0x2ec   : > { %v8404_v59 = vpop.f32.mrb[40].mxu1  ;;  %v6279_v48 = vshll.u32 %v11998_v35, 16  ;;  %v6277_v5 = vshrl.u32 %v11998_v35, 16 }
 0x2ed   : > { %v8405_v18 = vpop.f32.mrb[41].mxu1 }
 0x2ee   : > { %v11995_v12 = vadd.f32 %v8405_v18, %v8404_v59  ;;  %v8407_v30 = vpop.f32.mrb[42].mxu1  ;;  %v6274_v59 = vrot.slane %v6272_v40, 1  ;;  %v4203_v18 = vshrl.u32 %v11992_v53, 16  ;;  %v6281_v41 = vrot.slane %v6279_v48, 1 }
 0x2ef   : > { %6750 = vmatmul.mubr.bf16.gmra.mrb[116].mxu1 %v11955_v26  ;;  %v8408_v43 = vpop.f32.mrb[43].mxu1  ;;  %v4201_v26 = vsel %vm1219_vm10, %v4196_v15, %v4200_v49  ;;  %v6284_v15 = vshll.u32 %v11773_v36, 16  ;;  %v3868_v49 = vld [vmem:[#allocation3 + $0xb4] sm:$0xf] }
 0x2f0   : > { %v12003_v13 = vadd.f32 %v8408_v43, %v8407_v30  ;;  %6757 = vmatprep.mubr.bf16.mxu1 %v6263_v39  ;;  %v6275_v45 = vsel %vm1219_vm10, %v6270_v16, %v6274_v59  ;;  %v4208_v62 = vor.u32 %v4207_v51, %v4203_v18  ;;  %v4217_v30 = vshll.u32 %v12011_v17, 16  ;;  %v5952_v16 = vld [vmem:[#allocation3 + $0xc0] sm:$0xf] }
 0x2f1   : > { %v6282_v24 = vor.u32 %v6281_v41, %v6277_v5  ;;  %v6286_v48 = vrot.slane %v6284_v15, 1  ;;  %v6296_v18 = vshll.u32 %v11781_v57, 16  ;;  %v6308_v15 = vshll.u32 %v11789_v63, 16 }
 0x2f2   : > { %5722 = vmatmul.mubr.bf16.gmra.mrb[92].mxu0 %v11960_v21  ;;  %v5950_v21 = vld [vmem:[#allocation3 + $0xb4] sm:$0xf]  ;;  %v4219_v52 = vrot.slane %v4217_v30, 1  ;;  %v3886_v30 = vld [vmem:[#allocation3] sm:$0xe] }
 0x2f3   : > { %5729 = vmatprep.mubr.bf16.mxu0 %v4201_v26  ;;  %v12021_v43 = vcombine.low %v5950_v21, %v11785_v47  ;;  %v12031_v47 = vcombine.low %v3868_v49, %v11775_v58  ;;  %v4222_v26 = vshll.u32 %v11692_v1, 16  ;;  %v6287_v36 = vsel %vm1219_vm10, %v6282_v24, %v6286_v48  ;;  %v9598_v49 = vld [vmem:[#allocation3 + $0x4] sm:$0xf] }
 0x2f4   : > { %v8410_v6 = vpop.f32.mrb[44].mxu1 }
 0x2f5   : > { %v8411_v32 = vpop.f32.mrb[45].mxu1  ;;  %v6291_v40 = vshll.u32 %v12021_v43, 16  ;;  %v4224_v58 = vrot.slane %v4222_v26, 1  ;;  %v6289_v59 = vshrl.u32 %v12021_v43, 16 }
 0x2f6   : > { %v12015_v33 = vadd.f32 %v8411_v32, %v8410_v6  ;;  %v8413_v23 = vpop.f32.mrb[46].mxu1  ;;  %v4229_v6 = vshll.u32 %v12031_v47, 16  ;;  %v8093_v32 = vcombine.low %v5952_v16, %v11787_v28  ;;  %v4227_v28 = vshrl.u32 %v12031_v47, 16  ;;  %v9599_v26 = vld [vmem:[#allocation3 + $0x8] ss:$0 sps:$4 sm:$0x11]  }
 0x2f7   : > { %6758 = vmatmul.mubr.bf16.gmra.mrb[120].mxu1 %v11970_v4  ;;  %v8414_v37 = vpop.f32.mrb[47].mxu1  ;;  %v4213_v4 = vsel %vm1219_vm10, %v4208_v62, %v4212_v9  ;;  %v6293_v51 = vrot.slane %v6291_v40, 1 }
 0x2f8   : > { %v12023_v39 = vadd.f32 %v8414_v37, %v8413_v23  ;;  %6765 = vmatprep.mubr.bf16.mxu1 %v6275_v45  ;;  %v12041_v23 = vld [vmem:[#allocation3 + $0xd0] sm:$0xf]  ;;  %v4231_v41 = vrot.slane %v4229_v6, 1  ;;  %v6303_v21 = vshll.u32 %v8093_v32, 16  ;;  %v6298_v37 = vrot.slane %v6296_v18, 1 }
 0x2f9   : > { %v4234_v45 = vshll.u32 %v11783_v7, 16  ;;  %v8094_v62 = vcombine.low %v5954_v60, %v12041_v23  ;;  %v6301_v24 = vshrl.u32 %v8093_v32, 16 }
 0x2fa   : > { %5730 = vmatmul.mubr.bf16.gmra.mrb[96].mxu0 %v11977_v54  ;;  %v4220_v54 = vor.u32 %v4219_v52, %v4215_v27  ;;  %v4232_v5 = vor.u32 %v4231_v41, %v4227_v28  ;;  %v12051_v52 = vld [vmem:[#allocation3 + $0xd4] ss:$0 sps:$4 sm:$0x11]   ;;  %v6310_v27 = vrot.slane %v6308_v15, 1  ;;  %v9534_v15 = vld [vmem:[%s9702_s10 + $0x20] sm:$0xff]  }
 0x2fb   : > { %5737 = vmatprep.mubr.bf16.mxu0 %v4213_v4  ;;  %v4236_v9 = vrot.slane %v4234_v45, 1  ;;  %v7919_v4 = vcombine.low %v3886_v30, %v9598_v49  ;;  %v6315_v40 = vshll.u32 %v8094_v62, 16  ;;  %v6313_v63 = vshrl.u32 %v8094_v62, 16 }
 0x2fc   : > { %v4225_v1 = vsel %vm1219_vm10, %v4220_v54, %v4224_v58  ;;  %v6320_v6 = vshll.u32 %v12051_v52, 16 }
 0x2fd   : > { %v4237_v7 = vsel %vm1219_vm10, %v4232_v5, %v4236_v9  ;;  %v4302_v54 = vrot.slane %v7919_v4, 1  ;;  %v9503_v5 = vld [vmem:[%s12544_s4 + $0x208] sm:$0xff]  }
 0x2fe   : > { %v6322_v41 = vrot.slane %v6320_v6, 1  ;;  %v9546_v6 = vld [vmem:[%s9702_s10 + $0x50] sm:$0xff]  }
 0x2ff   : > { %6766 = vmatmul.mubr.bf16.gmra.mrb[124].mxu1 %v11984_v22  ;;  %v6294_v22 = vor.u32 %v6293_v51, %v6289_v59  ;;  %v6317_v51 = vrot.slane %v6315_v40, 1 }
 0x300   : > { %6773 = vmatprep.mubr.bf16.mxu1 %v6287_v36  ;;  %v4303_v36 = vrot.slane %v9599_v26, 1 }
 0x301   : > { %v6299_v57 = vsel %vm1219_vm10, %v6294_v22, %v6298_v37  ;;  %v6318_v22 = vor.u32 %v6317_v51, %v6313_v63  ;;  %v9543_v63 = vld [vmem:[%s9702_s10 + $0x48] sm:$0xff]   ;;  %v12597_v51 = vld [vmem:[#allocation13_spill] sm:$0xff] }
 0x302   : > { %5738 = vmatmul.mubr.bf16.gmra.mrb[100].mxu0 %v11992_v53  ;;  %v6305_v53 = vrot.slane %v6303_v21, 1 }
 0x303   : > { %5745 = vmatprep.mubr.bf16.mxu0 %v4225_v1  ;;  %v4304_v1 = vsel %vm1492_vm9, %v4302_v54, %v4303_v36  ;;  %v6323_v28 = vsel %vm1219_vm10, %v6318_v22, %v6322_v41 }
 0x304   : > { %v6306_v48 = vor.u32 %v6305_v53, %v6301_v24  ;;  %v9518_v24 = vld [vmem:[%s12544_s4 + $0x230] sm:$0xff]  }
 0x306   : > { %v6311_v18 = vsel %vm1219_vm10, %v6306_v48, %v6310_v27  ;;  %vm12635_vm10 = vmmov %vm12632_vm4 }
 0x307   : > { %6774 = vmatmul.mubr.bf16.gmra.mrb[128].mxu1 %v11998_v35 }
 0x308   : > { %6781 = vmatprep.mubr.bf16.mxu1 %v6299_v57 }
 0x30a   : > { %5746 = vmatmul.mubr.bf16.gmra.mrb[104].mxu0 %v12011_v17 }
 0x30b   : > { %5753 = vmatprep.mubr.bf16.mxu0 %v4237_v7  ;;  %v9535_v7 = vld [vmem:[%s9702_s10 + $0x28] sm:$0xff]  }
 0x30c   : > { %v8416_v35 = vpop.f32.mrb[48].mxu1 }
 0x30d   : > { %v8417_v16 = vpop.f32.mrb[49].mxu1 }
 0x30e   : > { %v12056_v58 = vadd.f32 %v8417_v16, %v8416_v35  ;;  %v8419_v59 = vpop.f32.mrb[50].mxu1  ;;  %v9538_v35 = vld [vmem:[%s9702_s10 + $0x30] sm:$0xff]  }
 0x30f   : > { %6782 = vmatmul.mubr.bf16.gmra.mrb[132].mxu1 %v12021_v43  ;;  %v8420_v17 = vpop.f32.mrb[51].mxu1 }
 0x310   : > { %v12060_v60 = vadd.f32 %v8420_v17, %v8419_v59  ;;  %6789 = vmatprep.mubr.bf16.mxu1 %v6311_v18  ;;  %v12599_v59 = vld [vmem:[#allocation17_spill] sm:$0xff]  ;;  %v9550_v18 = vld [vmem:[%s9702_s10 + $0x60] sm:$0xff]  }
 0x312   : > { %5754 = vmatmul.mubr.bf16.gmra.mrb[108].mxu0 %v12031_v47  ;;  %v9526_v47 = vld [vmem:[%s9702_s10] sm:$0xff]  }
 0x313   : > { %8879 = vmatprep.mubr.bf16.mxu0 %v4304_v1 }
 0x314   : > { %v8422_v21 = vpop.f32.mrb[52].mxu1 }
 0x315   : > { %v8423_v37 = vpop.f32.mrb[53].mxu1 }
 0x316   : > { %v12065_v45 = vadd.f32 %v8423_v37, %v8422_v21  ;;  %v8425_v43 = vpop.f32.mrb[54].mxu1  ;;  %v9551_v37 = vld [vmem:[%s9702_s10 + $0x68] sm:$0xff]  }
 0x317   : > { %6790 = vmatmul.mubr.bf16.gmra.mrb[136].mxu1 %v8093_v32  ;;  %v8426_v30 = vpop.f32.mrb[55].mxu1  ;;  %v9506_v32 = vld [vmem:[%s12544_s4 + $0x210] sm:$0xff]  }
 0x318   : > { %v12067_v57 = vadd.f32 %v8426_v30, %v8425_v43  ;;  %6797 = vmatprep.mubr.bf16.mxu1 %v6323_v28  ;;  %v12600_v28 = vld [vmem:[#allocation4_spill] sm:$0xff] }
 0x319   : > { %v9553_v30 = vld [vmem:[%s9702_s10 + $0x70] sm:$0xff]  }
 0x31a   : > { %8880 = vmatmul.mubr.bf16.vlgmr.msra.gmra.mrb[16].mxu0 %v11295_v55  ;;  %v9509_v55 = vld [vmem:[%s12544_s4 + $0x218] sm:$0xff]  }
 0x31b   : > { %8912 = vmatpush3.bf16.msra.mxu0 %v11888_v42  ;;  %8883 = vmatprep.mubr.bf16.mxu0 %v11298_v14  ;;  %v9527_v42 = vld [vmem:[%s9702_s10 + $0x8] sm:$0xff]   ;;  %v9530_v14 = vld [vmem:[%s9702_s10 + $0x10] sm:$0xff]  }
 0x31c   : > { %8913 = vmatprep.subr.bf16.mxu0 %v9503_v5 }
 0x31f   : > { %6798 = vmatmul.mubr.bf16.gmra.mrb[140].mxu1 %v8094_v62  ;;  %8914 = vmatpush3.bf16.msra.mxu0 %v9503_v5  ;;  %v9512_v62 = vld [vmem:[%s12544_s4 + $0x220] sm:$0xff]  }
 0x320   : > { %8961 = vmatprep.mubr.msk.bf16.mxu1 %vm2597_vm12, %v9526_v47  ;;  %8915 = vmatprep.subr.bf16.mxu0 %v9506_v32 }
 0x322   : > { %8884 = vmatmul.mubr.bf16.gmra.mrb[20].mxu0 %v11362_v38  ;;  %v9515_v38 = vld [vmem:[%s12544_s4 + $0x228] sm:$0xff]  }
 0x323   : > { %8887 = vmatprep.mubr.bf16.mxu0 %v11374_v46  ;;  %8916 = vmatpush3.bf16.msra.mxu0 %v9506_v32  ;;  %v9531_v46 = vld [vmem:[%s9702_s10 + $0x18] sm:$0xff]  }
 0x324   : > { %8917 = vmatprep.subr.bf16.mxu0 %v9509_v55 }
 0x327   : > { %8962 = vmatmul.mubr.msk.bf16.vlgmr.msra.gmra.mrb[144].mxu1 %vm2597_vm12, %v9527_v42  ;;  %8918 = vmatpush3.bf16.msra.mxu0 %v9509_v55 }
 0x328   : > { %8965 = vmatprep.mubr.msk.bf16.mxu1 %vm2597_vm12, %v9530_v14  ;;  %8919 = vmatprep.subr.bf16.mxu0 %v9512_v62  ;;  %v12601_v14 = vld [vmem:[#allocation5_spill] sm:$0xff] }
 0x32a   : > { %8888 = vmatmul.mubr.bf16.gmra.mrb[24].mxu0 %v11447_v50 }
 0x32b   : > { %8891 = vmatprep.mubr.bf16.mxu0 %v11453_v56  ;;  %8920 = vmatpush3.bf16.msra.mxu0 %v9512_v62  ;;  %v9521_v56 = vld [vmem:[%s12544_s4 + $0x238] sm:$0xff]  }
 0x32c   : > { %v8428_v53 = vpop.f32.mrb[56].mxu1  ;;  %8921 = vmatprep.subr.bf16.mxu0 %v9515_v38  ;;  %v9554_v62 = vld [vmem:[%s9702_s10 + $0x78] sm:$0xff]  }
 0x32d   : > { %v8429_v9 = vpop.f32.mrb[57].mxu1 }
 0x32e   : > { %v12102_v49 = vadd.f32 %v8429_v9, %v8428_v53  ;;  %v8431_v4 = vpop.f32.mrb[58].mxu1  ;;  %v12605_v9 = vld [vmem:[#allocation9_spill] sm:$0xff] }
 0x32f   : > { %v8432_v40 = vpop.f32.mrb[59].mxu1  ;;  %8966 = vmatmul.mubr.msk.bf16.gmra.mrb[148].mxu1 %vm2597_vm12, %v9531_v46  ;;  %8922 = vmatpush3.bf16.msra.mxu0 %v9515_v38  ;;  %v12603_v38 = vld [vmem:[#allocation7_spill] sm:$0xff]  ;;  %v12604_v46 = vld [vmem:[#allocation8_spill] sm:$0xff] }
 0x330   : > { %v12105_v50 = vadd.f32 %v8432_v40, %v8431_v4  ;;  %8969 = vmatprep.mubr.msk.bf16.mxu1 %vm2597_vm12, %v9534_v15  ;;  %8923 = vmatprep.subr.bf16.mxu0 %v9518_v24  ;;  %v12606_v40 = vld [vmem:[#allocation10_spill] sm:$0xff] }
 0x332   : > { %8892 = vmatmul.mubr.bf16.gmra.mrb[28].mxu0 %v11544_v2  ;;  %v9539_v2 = vld [vmem:[%s9702_s10 + $0x38] sm:$0xff]  }
 0x333   : > { %8895 = vmatprep.mubr.bf16.mxu0 %v11547_v29  ;;  %8924 = vmatpush3.bf16.msra.mxu0 %v9518_v24  ;;  %v9542_v29 = vld [vmem:[%s9702_s10 + $0x40] sm:$0xff]  }
 0x334   : > { %v8434_v48 = vpop.f32.mrb[60].mxu1  ;;  %8925 = vmatprep.subr.bf16.mxu0 %v9521_v56 }
 0x335   : > { %v8435_v27 = vpop.f32.mrb[61].mxu1 }
 0x336   : > { %v12115_v26 = vadd.f32 %v8435_v27, %v8434_v48  ;;  %v8437_v36 = vpop.f32.mrb[62].mxu1 }
 0x337   : > { %v8438_v16 = vpop.f32.mrb[63].mxu1  ;;  %8970 = vmatmul.mubr.msk.bf16.gmra.mrb[152].mxu1 %vm2597_vm12, %v9535_v7  ;;  %8926 = vmatpush3.bf16.msra.mxu0 %v9521_v56 }
 0x338   : > { %v12118_v54 = vadd.f32 %v8438_v16, %v8437_v36  ;;  %8973 = vmatprep.mubr.msk.bf16.mxu1 %vm2597_vm12, %v9538_v35 }
 0x33a   : > { %8896 = vmatmul.mubr.bf16.gmra.mrb[32].mxu0 %v11585_v0  ;;  %v12598_v0 = vld [vmem:[#allocation15_spill] sm:$0xff] }
 0x33b   : > { %8899 = vmatprep.mubr.bf16.mxu0 %v11588_v25  ;;  %v9547_v25 = vld [vmem:[%s9702_s10 + $0x58] sm:$0xff]  }
 0x33f   : > { %8974 = vmatmul.mubr.msk.bf16.gmra.mrb[156].mxu1 %vm2597_vm12, %v9539_v2  ;;  %v12607_v2 = vld [vmem:[#allocation18_spill] sm:$0xff] }
 0x340   : > { %8977 = vmatprep.mubr.msk.bf16.mxu1 %vm2597_vm12, %v9542_v29 }
 0x342   : > { %8900 = vmatmul.mubr.bf16.gmra.mrb[36].mxu0 %v11642_v34 }
 0x343   : > { %8903 = vmatprep.mubr.bf16.mxu0 %v12597_v51 }
 0x347   : > { %8978 = vmatmul.mubr.msk.bf16.gmra.mrb[160].mxu1 %vm2597_vm12, %v9543_v63 }
 0x348   : > { %8981 = vmatprep.mubr.msk.bf16.mxu1 %vm2597_vm12, %v9546_v6 }
 0x34a   : > { %8904 = vmatmul.mubr.bf16.gmra.mrb[40].mxu0 %v12598_v0  ;;  %v12608_v0 = vld [vmem:[#allocation11_spill] sm:$0xff] }
 0x34b   : > { %8907 = vmatprep.mubr.bf16.mxu0 %v12599_v59 }
 0x34c   : > { %v8440_v17 = vpop.f32.mrb[64].mxu1 }
 0x34d   : > { %v8441_v1 = vpop.f32.mrb[65].mxu1 }
 0x34e   : > { %v12137_v22 = vadd.f32 %v8441_v1, %v8440_v17  ;;  %v8443_v34 = vpop.f32.mrb[66].mxu1  ;;  %v12610_v1 = vld [vmem:[#allocation12_spill] sm:$0xff] }
 0x34f   : > { %v8444_v41 = vpop.f32.mrb[67].mxu1  ;;  %8982 = vmatmul.mubr.msk.bf16.gmra.mrb[164].mxu1 %vm2597_vm12, %v9547_v25  ;;  %v12609_v25 = vld [vmem:[#allocation19_spill] sm:$0xff] }
 0x350   : > { %v12140_v21 = vadd.f32 %v8444_v41, %v8443_v34  ;;  %8985 = vmatprep.mubr.msk.bf16.mxu1 %vm2597_vm12, %v9550_v18 }
 0x352   : > { %8908 = vmatmul.mubr.bf16.gmra.mrb[44].mxu0 %v11823_v61  ;;  %v12602_v61 = vld [vmem:[#allocation6_spill] sm:$0xff] }
 0x353   : > { %8927 = vmatprep.mubr.bf16.mxu0 %v12600_v28 }
 0x354   : > { %v8446_v43 = vpop.f32.mrb[68].mxu1 }
 0x355   : > { %v8447_v5 = vpop.f32.mrb[69].mxu1 }
 0x356   : > { %v12147_v47 = vadd.f32 %v8447_v5, %v8446_v43  ;;  %v8449_v32 = vpop.f32.mrb[70].mxu1 }
 0x357   : > { %v8450_v55 = vpop.f32.mrb[71].mxu1  ;;  %8986 = vmatmul.mubr.msk.bf16.gmra.mrb[168].mxu1 %vm2597_vm12, %v9551_v37 }
 0x358   : > { %v12150_v42 = vadd.f32 %v8450_v55, %v8449_v32  ;;  %8989 = vmatprep.mubr.msk.bf16.mxu1 %vm2597_vm12, %v9553_v30  ;;  %v12611_v32 = vld [vmem:[#allocation21_spill] sm:$0xff] }
 0x35a   : > { %8928 = vmatmul.mubr.bf16.vlgmr.msra.gmra.mrb[16].mxu0 %v12601_v14 }
 0x35b   : > { %8931 = vmatprep.mubr.bf16.mxu0 %v12602_v61 }
 0x35f   : > { %8990 = vmatmul.mubr.msk.bf16.gmra.mrb[172].mxu1 %vm2597_vm12, %v9554_v62  ;;  %vm12637_vm12 = vmmov %vm12632_vm4 }
 0x362   : > { %8932 = vmatmul.mubr.bf16.gmra.mrb[20].mxu0 %v12603_v38  ;;  %v12612_v38 = vld [vmem:[#allocation14_spill] sm:$0xff] }
 0x363   : > { %8935 = vmatprep.mubr.bf16.mxu0 %v12604_v46  ;;  %v12613_v46 = vld [vmem:[#allocation22_spill] sm:$0xff] }
 0x36a   : > { %v8452_v53 = vpop.f32.mrb[72].mxu1  ;;  %8936 = vmatmul.mubr.bf16.gmra.mrb[24].mxu0 %v12605_v9 }
 0x36b   : > { %v8453_v15 = vpop.f32.mrb[73].mxu1  ;;  %8939 = vmatprep.mubr.bf16.mxu0 %v12606_v40 }
 0x36c   : > { %v12160_v24 = vadd.f32 %v8453_v15, %v8452_v53  ;;  %v8455_v4 = vpop.f32.mrb[74].mxu1 }
 0x36d   : > { %v8456_v56 = vpop.f32.mrb[75].mxu1  ;;  %v8504_v48 = vpop.f32.mrb[48].mxu0 }
 0x36e   : > { %v12163_v7 = vadd.f32 %v8456_v56, %v8455_v4  ;;  %v8505_v35 = vpop.f32.mrb[49].mxu0  ;;  %v12614_v4 = vld [vmem:[#allocation16_spill] sm:$0xff] }
 0x36f   : > { %v8506_v27 = vadd.f32 %v8505_v35, %v8504_v48  ;;  %v8507_v36 = vpop.f32.mrb[50].mxu0 }
 0x370   : > { %v8508_v16 = vpop.f32.mrb[51].mxu0 }
 0x371   : > { %v9002_v29 = vadd.f32 %v8506_v27, %v12607_v2  ;;  %v8509_v63 = vadd.f32 %v8508_v16, %v8507_v36 }
 0x372   : > { %v8458_v51 = vpop.f32.mrb[76].mxu1  ;;  %8940 = vmatmul.mubr.bf16.gmra.mrb[28].mxu0 %v12608_v0 }
 0x373   : > { %v8459_v6 = vpop.f32.mrb[77].mxu1  ;;  %v9008_v59 = vadd.f32 %v8509_v63, %v12609_v25  ;;  %8943 = vmatprep.mubr.bf16.mxu0 %v12610_v1 }
 0x374   : > { %v12168_v17 = vadd.f32 %v8459_v6, %v8458_v51  ;;  %v8461_v18 = vpop.f32.mrb[78].mxu1 }
 0x375   : > { %v8462_v34 = vpop.f32.mrb[79].mxu1  ;;  %v8510_v37 = vpop.f32.mrb[52].mxu0 }
 0x376   : > { %v12171_v41 = vadd.f32 %v8462_v34, %v8461_v18  ;;  %v8511_v28 = vpop.f32.mrb[53].mxu0  ;;  %v12615_v18 = vld [vmem:[#allocation20_spill] sm:$0xff] }
 0x377   : > { %v8512_v43 = vadd.f32 %v8511_v28, %v8510_v37  ;;  %v8513_v30 = vpop.f32.mrb[54].mxu0  ;;  %v5987_v28 = vld [vmem:[#allocation3 + $0xcc] sm:$0xe] }
 0x378   : > { %v8514_v5 = vpop.f32.mrb[55].mxu0 }
 0x379   : > { %v8999_v55 = vadd.f32 %v8512_v43, %v12611_v32  ;;  %v8515_v14 = vadd.f32 %v8514_v5, %v8513_v30 }
 0x37a   : > { %v8640_v62 = vpop.f32.mrb[80].mxu1  ;;  %8944 = vmatmul.mubr.bf16.gmra.mrb[32].mxu0 %v12612_v38  ;;  %v12616_v38 = vld [vmem:[#allocation25_spill] sm:$0xff] }
 0x37b   : > { %v8641_v61 = vpop.f32.mrb[81].mxu1  ;;  %v9005_v53 = vadd.f32 %v8515_v14, %v12613_v46  ;;  %8947 = vmatprep.mubr.bf16.mxu0 %v12614_v4  ;;  %v8126_v14 = vcombine.low %v5987_v28, %v12041_v23 }
 0x37c   : > { %v8642_v15 = vadd.f32 %v8641_v61, %v8640_v62  ;;  %v8643_v9 = vpop.f32.mrb[82].mxu1 }
 0x37d   : > { %v8644_v40 = vpop.f32.mrb[83].mxu1  ;;  %v8516_v48 = vpop.f32.mrb[56].mxu0 }
 0x37e   : > { %v8645_v56 = vadd.f32 %v8644_v40, %v8643_v9  ;;  %v12177_v35 = vadd.f32 %v9002_v29, %v8642_v15  ;;  %v8517_v27 = vpop.f32.mrb[57].mxu0 }
 0x37f   : > { %v8518_v36 = vadd.f32 %v8517_v27, %v8516_v48  ;;  %v8519_v16 = vpop.f32.mrb[58].mxu0  ;;  %v6433_v48 = vrot.slane %v8126_v14, 1  ;;  %v6434_v27 = vrot.slane %v12051_v52, 1 }
 0x380   : > { %v12179_v2 = vadd.f32 %v9008_v59, %v8645_v56  ;;  %v8520_v63 = vpop.f32.mrb[59].mxu0  ;;  %v12618_v56 = vld [vmem:[#allocation24_spill] sm:$0xff] }
 0x381   : > { %v9014_v51 = vadd.f32 %v8518_v36, %v11866_v8  ;;  %v8521_v6 = vadd.f32 %v8520_v63, %v8519_v16 }
 0x382   : > { %v8646_v0 = vpop.f32.mrb[84].mxu1  ;;  %8948 = vmatmul.mubr.bf16.gmra.mrb[36].mxu0 %v12615_v18 }
 0x383   : > { %v8647_v25 = vpop.f32.mrb[85].mxu1  ;;  %v9020_v1 = vadd.f32 %v8521_v6, %v11873_v20  ;;  %8951 = vmatprep.mubr.bf16.mxu0 %v11816_v10  ;;  %v12617_v10 = vld [vmem:[#allocation23_spill] sm:$0xff] }
 0x384   : > { %v8648_v34 = vadd.f32 %v8647_v25, %v8646_v0  ;;  %v8649_v37 = vpop.f32.mrb[86].mxu1  ;;  %v6435_v25 = vsel %vm1492_vm9, %v6433_v48, %v6434_v27  ;;  %vm12634_vm9 = vmmov %vm12632_vm4 }
 0x385   : > { %v8650_v29 = vpop.f32.mrb[87].mxu1  ;;  %v8522_v30 = vpop.f32.mrb[60].mxu0 }
 0x386   : > { %v8651_v43 = vadd.f32 %v8650_v29, %v8649_v37  ;;  %v12185_v59 = vadd.f32 %v8999_v55, %v8648_v34  ;;  %v8523_v5 = vpop.f32.mrb[61].mxu0 }
 0x387   : > { %v8524_v32 = vadd.f32 %v8523_v5, %v8522_v30  ;;  %v8525_v8 = vpop.f32.mrb[62].mxu0 }
 0x388   : > { %v12188_v62 = vadd.f32 %v9005_v53, %v8651_v43  ;;  %v8526_v61 = vpop.f32.mrb[63].mxu0 }
 0x389   : > { %v9011_v20 = vadd.f32 %v8524_v32, %v12616_v38  ;;  %v8527_v46 = vadd.f32 %v8526_v61, %v8525_v8 }
 0x38a   : > { %v8652_v15 = vpop.f32.mrb[88].mxu1  ;;  %8952 = vmatmul.mubr.bf16.gmra.mrb[40].mxu0 %v12617_v10 }
 0x38b   : > { %v8653_v9 = vpop.f32.mrb[89].mxu1  ;;  %v9017_v4 = vadd.f32 %v8527_v46, %v11897_v31  ;;  %8955 = vmatprep.mubr.bf16.mxu0 %v12618_v56 }
 0x38c   : > { %v8654_v40 = vadd.f32 %v8653_v9, %v8652_v15  ;;  %v8655_v55 = vpop.f32.mrb[90].mxu1 }
 0x38d   : > { %v8656_v23 = vpop.f32.mrb[91].mxu1  ;;  %v8528_v36 = vpop.f32.mrb[64].mxu0 }
 0x38e   : > { %v8657_v53 = vadd.f32 %v8656_v23, %v8655_v55  ;;  %v12195_v16 = vadd.f32 %v9014_v51, %v8654_v40  ;;  %v8529_v63 = vpop.f32.mrb[65].mxu0 }
 0x38f   : > { %v8530_v6 = vadd.f32 %v8529_v63, %v8528_v36  ;;  %v8531_v0 = vpop.f32.mrb[66].mxu0 }
 0x390   : > { %v12198_v18 = vadd.f32 %v9020_v1, %v8657_v53  ;;  %v8532_v31 = vpop.f32.mrb[67].mxu0 }
 0x391   : > { %v9026_v34 = vadd.f32 %v8530_v6, %v11932_v19  ;;  %v8533_v37 = vadd.f32 %v8532_v31, %v8531_v0 }
 0x392   : > { %v8658_v29 = vpop.f32.mrb[92].mxu1  ;;  %8956 = vmatmul.mubr.bf16.gmra.mrb[44].mxu0 %v6435_v25 }
 0x393   : > { %v8659_v28 = vpop.f32.mrb[93].mxu1  ;;  %v9032_v52 = vadd.f32 %v8533_v37, %v11940_v3 }
 0x394   : > { %v8660_v43 = vadd.f32 %v8659_v28, %v8658_v29  ;;  %v8661_v30 = vpop.f32.mrb[94].mxu1 }
 0x395   : > { %v8662_v51 = vpop.f32.mrb[95].mxu1  ;;  %v8534_v32 = vpop.f32.mrb[68].mxu0 }
 0x396   : > { %v8663_v5 = vadd.f32 %v8662_v51, %v8661_v30  ;;  %v12202_v8 = vadd.f32 %v9011_v20, %v8660_v43  ;;  %v8535_v14 = vpop.f32.mrb[69].mxu0 }
 0x397   : > { %v8536_v61 = vadd.f32 %v8535_v14, %v8534_v32  ;;  %v8537_v1 = vpop.f32.mrb[70].mxu0 }
 0x398   : > { %v12204_v38 = vadd.f32 %v9017_v4, %v8663_v5  ;;  %v8538_v46 = vpop.f32.mrb[71].mxu0 }
 0x399   : > { %v9023_v19 = vadd.f32 %v8536_v61, %v11949_v11  ;;  %v8539_v15 = vadd.f32 %v8538_v46, %v8537_v1 }
 0x39a   : > { %v8664_v9 = vpop.f32.mrb[96].mxu1 }
 0x39b   : > { %v8665_v10 = vpop.f32.mrb[97].mxu1  ;;  %v9029_v3 = vadd.f32 %v8539_v15, %v11957_v44 }
 0x39c   : > { %v8666_v40 = vadd.f32 %v8665_v10, %v8664_v9  ;;  %v8667_v55 = vpop.f32.mrb[98].mxu1 }
 0x39d   : > { %v8668_v56 = vpop.f32.mrb[99].mxu1  ;;  %v8540_v27 = vpop.f32.mrb[72].mxu0 }
 0x39e   : > { %v8669_v48 = vadd.f32 %v8668_v56, %v8667_v55  ;;  %v12208_v20 = vadd.f32 %v9026_v34, %v8666_v40  ;;  %v8541_v23 = vpop.f32.mrb[73].mxu0 }
 0x39f   : > { %v8542_v53 = vadd.f32 %v8541_v23, %v8540_v27  ;;  %v8543_v36 = vpop.f32.mrb[74].mxu0 }
 0x3a0   : > { %v12210_v4 = vadd.f32 %v9032_v52, %v8669_v48  ;;  %v8544_v63 = vpop.f32.mrb[75].mxu0 }
 0x3a1   : > { %v9038_v11 = vadd.f32 %v8542_v53, %v11995_v12  ;;  %v8545_v6 = vadd.f32 %v8544_v63, %v8543_v36 }
 0x3a2   : > { %v8670_v0 = vpop.f32.mrb[100].mxu1 }
 0x3a3   : > { %v8671_v25 = vpop.f32.mrb[101].mxu1  ;;  %v9044_v44 = vadd.f32 %v8545_v6, %v12003_v13 }
 0x3a4   : > { %v8672_v31 = vadd.f32 %v8671_v25, %v8670_v0  ;;  %v8673_v37 = vpop.f32.mrb[102].mxu1 }
 0x3a5   : > { %v8674_v29 = vpop.f32.mrb[103].mxu1  ;;  %v8546_v43 = vpop.f32.mrb[76].mxu0 }
 0x3a6   : > { %v8675_v28 = vadd.f32 %v8674_v29, %v8673_v37  ;;  %v12214_v34 = vadd.f32 %v9023_v19, %v8672_v31  ;;  %v8547_v30 = vpop.f32.mrb[77].mxu0 }
 0x3a7   : > { %v8548_v51 = vadd.f32 %v8547_v30, %v8546_v43  ;;  %v8549_v5 = vpop.f32.mrb[78].mxu0 }
 0x3a8   : > { %v12216_v52 = vadd.f32 %v9029_v3, %v8675_v28  ;;  %v8550_v32 = vpop.f32.mrb[79].mxu0 }
 0x3a9   : > { %v9035_v12 = vadd.f32 %v8548_v51, %v12015_v33  ;;  %v8551_v14 = vadd.f32 %v8550_v32, %v8549_v5 }
 0x3aa   : > { %v8676_v61 = vpop.f32.mrb[104].mxu1 }
 0x3ab   : > { %v8677_v1 = vpop.f32.mrb[105].mxu1  ;;  %v9041_v13 = vadd.f32 %v8551_v14, %v12023_v39 }
 0x3ac   : > { %v8678_v46 = vadd.f32 %v8677_v1, %v8676_v61  ;;  %v8679_v15 = vpop.f32.mrb[106].mxu1 }
 0x3ad   : > { %v8680_v9 = vpop.f32.mrb[107].mxu1  ;;  %v8552_v40 = vpop.f32.mrb[80].mxu0 }
 0x3ae   : > { %v8681_v10 = vadd.f32 %v8680_v9, %v8679_v15  ;;  %v12220_v19 = vadd.f32 %v9038_v11, %v8678_v46  ;;  %v8553_v55 = vpop.f32.mrb[81].mxu0 }
 0x3af   : > { %v8554_v56 = vadd.f32 %v8553_v55, %v8552_v40  ;;  %v8555_v48 = vpop.f32.mrb[82].mxu0 }
 0x3b0   : > { %v12222_v3 = vadd.f32 %v9044_v44, %v8681_v10  ;;  %v8556_v27 = vpop.f32.mrb[83].mxu0 }
 0x3b1   : > { %v9050_v33 = vadd.f32 %v8554_v56, %v12056_v58  ;;  %v8557_v23 = vadd.f32 %v8556_v27, %v8555_v48 }
 0x3b2   : > { %v8682_v53 = vpop.f32.mrb[108].mxu1 }
 0x3b3   : > { %v8683_v36 = vpop.f32.mrb[109].mxu1  ;;  %v9056_v39 = vadd.f32 %v8557_v23, %v12060_v60 }
 0x3b4   : > { %v8684_v63 = vadd.f32 %v8683_v36, %v8682_v53  ;;  %v8685_v6 = vpop.f32.mrb[110].mxu1 }
 0x3b5   : > { %v8686_v0 = vpop.f32.mrb[111].mxu1  ;;  %v8558_v31 = vpop.f32.mrb[84].mxu0 }
 0x3b6   : > { %v8687_v25 = vadd.f32 %v8686_v0, %v8685_v6  ;;  %v12226_v11 = vadd.f32 %v9035_v12, %v8684_v63  ;;  %v8559_v37 = vpop.f32.mrb[85].mxu0 }
 0x3b7   : > { %v8560_v29 = vadd.f32 %v8559_v37, %v8558_v31  ;;  %v8561_v28 = vpop.f32.mrb[86].mxu0 }
 0x3b8   : > { %v12228_v44 = vadd.f32 %v9041_v13, %v8687_v25  ;;  %v8562_v43 = vpop.f32.mrb[87].mxu0 }
 0x3b9   : > { %v9047_v58 = vadd.f32 %v8560_v29, %v12065_v45  ;;  %v8563_v30 = vadd.f32 %v8562_v43, %v8561_v28 }
 0x3ba   : > { %v8688_v51 = vpop.f32.mrb[112].mxu1 }
 0x3bb   : > { %v8689_v5 = vpop.f32.mrb[113].mxu1  ;;  %v9053_v60 = vadd.f32 %v8563_v30, %v12067_v57 }
 0x3bc   : > { %v8690_v32 = vadd.f32 %v8689_v5, %v8688_v51  ;;  %v8691_v14 = vpop.f32.mrb[114].mxu1 }
 0x3bd   : > { %v8692_v61 = vpop.f32.mrb[115].mxu1  ;;  %v8564_v46 = vpop.f32.mrb[88].mxu0 }
 0x3be   : > { %v8693_v1 = vadd.f32 %v8692_v61, %v8691_v14  ;;  %v12232_v12 = vadd.f32 %v9050_v33, %v8690_v32  ;;  %v8565_v15 = vpop.f32.mrb[89].mxu0 }
 0x3bf   : > { %v8566_v9 = vadd.f32 %v8565_v15, %v8564_v46  ;;  %v8567_v10 = vpop.f32.mrb[90].mxu0 }
 0x3c0   : > { %v12234_v13 = vadd.f32 %v9056_v39, %v8693_v1  ;;  %v8568_v40 = vpop.f32.mrb[91].mxu0 }
 0x3c1   : > { %v9062_v45 = vadd.f32 %v8566_v9, %v12102_v49  ;;  %v8569_v55 = vadd.f32 %v8568_v40, %v8567_v10 }
 0x3c2   : > { %v8694_v56 = vpop.f32.mrb[116].mxu1 }
 0x3c3   : > { %v8695_v48 = vpop.f32.mrb[117].mxu1  ;;  %v9068_v57 = vadd.f32 %v8569_v55, %v12105_v50 }
 0x3c4   : > { %v8696_v27 = vadd.f32 %v8695_v48, %v8694_v56  ;;  %v8697_v23 = vpop.f32.mrb[118].mxu1 }
 0x3c5   : > { %v8698_v53 = vpop.f32.mrb[119].mxu1  ;;  %v8570_v63 = vpop.f32.mrb[92].mxu0 }
 0x3c6   : > { %v8699_v36 = vadd.f32 %v8698_v53, %v8697_v23  ;;  %v12238_v33 = vadd.f32 %v9047_v58, %v8696_v27  ;;  %v8571_v6 = vpop.f32.mrb[93].mxu0 }
 0x3c7   : > { %v8572_v0 = vadd.f32 %v8571_v6, %v8570_v63  ;;  %v8573_v25 = vpop.f32.mrb[94].mxu0 }
 0x3c8   : > { %v12240_v39 = vadd.f32 %v9053_v60, %v8699_v36  ;;  %v8574_v31 = vpop.f32.mrb[95].mxu0 }
 0x3c9   : > { %v9059_v49 = vadd.f32 %v8572_v0, %v12115_v26  ;;  %v8575_v37 = vadd.f32 %v8574_v31, %v8573_v25 }
 0x3ca   : > { %v8700_v29 = vpop.f32.mrb[120].mxu1 }
 0x3cb   : > { %v8701_v28 = vpop.f32.mrb[121].mxu1  ;;  %v9065_v50 = vadd.f32 %v8575_v37, %v12118_v54 }
 0x3cc   : > { %v8702_v43 = vadd.f32 %v8701_v28, %v8700_v29  ;;  %v8703_v30 = vpop.f32.mrb[122].mxu1 }
 0x3cd   : > { %v8704_v51 = vpop.f32.mrb[123].mxu1  ;;  %v8576_v32 = vpop.f32.mrb[96].mxu0 }
 0x3ce   : > { %v8705_v5 = vadd.f32 %v8704_v51, %v8703_v30  ;;  %v12244_v58 = vadd.f32 %v9062_v45, %v8702_v43  ;;  %v8577_v14 = vpop.f32.mrb[97].mxu0 }
 0x3cf   : > { %v8578_v61 = vadd.f32 %v8577_v14, %v8576_v32  ;;  %v8579_v1 = vpop.f32.mrb[98].mxu0 }
 0x3d0   : > { %v12246_v60 = vadd.f32 %v9068_v57, %v8705_v5  ;;  %v8580_v46 = vpop.f32.mrb[99].mxu0 }
 0x3d1   : > { %v9074_v26 = vadd.f32 %v8578_v61, %v12137_v22  ;;  %v8581_v15 = vadd.f32 %v8580_v46, %v8579_v1 }
 0x3d2   : > { %v8706_v9 = vpop.f32.mrb[124].mxu1 }
 0x3d3   : > { %v8707_v10 = vpop.f32.mrb[125].mxu1  ;;  %v9080_v54 = vadd.f32 %v8581_v15, %v12140_v21 }
 0x3d4   : > { %v8708_v40 = vadd.f32 %v8707_v10, %v8706_v9  ;;  %v8709_v55 = vpop.f32.mrb[126].mxu1 }
 0x3d5   : > { %v8710_v56 = vpop.f32.mrb[127].mxu1  ;;  %v8582_v27 = vpop.f32.mrb[100].mxu0 }
 0x3d6   : > { %v8711_v48 = vadd.f32 %v8710_v56, %v8709_v55  ;;  %v12250_v45 = vadd.f32 %v9059_v49, %v8708_v40  ;;  %v8583_v23 = vpop.f32.mrb[101].mxu0 }
 0x3d7   : > { %v8584_v53 = vadd.f32 %v8583_v23, %v8582_v27  ;;  %v8585_v36 = vpop.f32.mrb[102].mxu0 }
 0x3d8   : > { %v12252_v57 = vadd.f32 %v9065_v50, %v8711_v48  ;;  %v8586_v63 = vpop.f32.mrb[103].mxu0 }
 0x3d9   : > { %v9071_v22 = vadd.f32 %v8584_v53, %v12147_v47  ;;  %v8587_v6 = vadd.f32 %v8586_v63, %v8585_v36 }
 0x3da   : > { %v8712_v0 = vpop.f32.mrb[128].mxu1 }
 0x3db   : > { %v8713_v25 = vpop.f32.mrb[129].mxu1  ;;  %v9077_v21 = vadd.f32 %v8587_v6, %v12150_v42 }
 0x3dc   : > { %v8714_v31 = vadd.f32 %v8713_v25, %v8712_v0  ;;  %v8715_v37 = vpop.f32.mrb[130].mxu1 }
 0x3dd   : > { %v8716_v29 = vpop.f32.mrb[131].mxu1  ;;  %v8588_v43 = vpop.f32.mrb[104].mxu0 }
 0x3de   : > { %v8717_v28 = vadd.f32 %v8716_v29, %v8715_v37  ;;  %v12256_v49 = vadd.f32 %v9074_v26, %v8714_v31  ;;  %v8589_v30 = vpop.f32.mrb[105].mxu0 }
 0x3df   : > { %v8590_v51 = vadd.f32 %v8589_v30, %v8588_v43  ;;  %v8591_v5 = vpop.f32.mrb[106].mxu0 }
 0x3e0   : > { %12619 = vst [vmem:[#allocation13_spill] sm:$0xff] %v12256_v49  ;;  %v12258_v50 = vadd.f32 %v9080_v54, %v8717_v28  ;;  %v8592_v32 = vpop.f32.mrb[107].mxu0 }
 0x3e1   : > { %v9086_v47 = vadd.f32 %v8590_v51, %v12160_v24  ;;  %v8593_v14 = vadd.f32 %v8592_v32, %v8591_v5 }
 0x3e2   : > { %12620 = vst [vmem:[#allocation15_spill] sm:$0xff] %v12258_v50  ;;  %v8718_v61 = vpop.f32.mrb[132].mxu1 }
 0x3e3   : > { %v8719_v1 = vpop.f32.mrb[133].mxu1  ;;  %v9092_v42 = vadd.f32 %v8593_v14, %v12163_v7 }
 0x3e4   : > { %v8720_v46 = vadd.f32 %v8719_v1, %v8718_v61  ;;  %v8721_v15 = vpop.f32.mrb[134].mxu1 }
 0x3e5   : > { %v8722_v9 = vpop.f32.mrb[135].mxu1  ;;  %v8594_v40 = vpop.f32.mrb[108].mxu0 }
 0x3e6   : > { %v8723_v10 = vadd.f32 %v8722_v9, %v8721_v15  ;;  %v12262_v26 = vadd.f32 %v9071_v22, %v8720_v46  ;;  %v8595_v55 = vpop.f32.mrb[109].mxu0 }
 0x3e7   : > { %v8596_v56 = vadd.f32 %v8595_v55, %v8594_v40  ;;  %v8597_v48 = vpop.f32.mrb[110].mxu0 }
 0x3e8   : > { %v12264_v54 = vadd.f32 %v9077_v21, %v8723_v10  ;;  %v8598_v27 = vpop.f32.mrb[111].mxu0 }
 0x3e9   : > { %v9083_v24 = vadd.f32 %v8596_v56, %v12168_v17  ;;  %v8599_v23 = vadd.f32 %v8598_v27, %v8597_v48 }
 0x3ea   : > { %12621 = vst [vmem:[#allocation17_spill] sm:$0xff] %v12264_v54  ;;  %v8724_v53 = vpop.f32.mrb[136].mxu1 }
 0x3eb   : > { %v8725_v36 = vpop.f32.mrb[137].mxu1  ;;  %v9089_v7 = vadd.f32 %v8599_v23, %v12171_v41 }
 0x3ec   : > { %v8726_v63 = vadd.f32 %v8725_v36, %v8724_v53  ;;  %v8727_v6 = vpop.f32.mrb[138].mxu1 }
 0x3ed   : > { %v8728_v0 = vpop.f32.mrb[139].mxu1 }
 0x3ee   : > { %v8729_v25 = vadd.f32 %v8728_v0, %v8727_v6  ;;  %v12268_v31 = vadd.f32 %v9086_v47, %v8726_v63 }
 0x3f0   : > { %12622 = vst [vmem:[#allocation4_spill] sm:$0xff] %v12268_v31  ;;  %v12270_v22 = vadd.f32 %v9092_v42, %v8729_v25  ;;  %v12334_v31 = vld [vmem:[%s12546_s6] ss:$0 sm:$0xff] }
 0x3f2   : > { %12623 = vst [vmem:[#allocation5_spill] sm:$0xff] %v12270_v22  ;;  %v8730_v37 = vpop.f32.mrb[140].mxu1 }
 0x3f3   : > { %v8731_v29 = vpop.f32.mrb[141].mxu1 }
 0x3f4   : > { %v8732_v21 = vadd.f32 %v8731_v29, %v8730_v37  ;;  %v8733_v28 = vpop.f32.mrb[142].mxu1 }
 0x3f5   : > { %v8734_v43 = vpop.f32.mrb[143].mxu1 }
 0x3f6   : > { %v8735_v30 = vadd.f32 %v8734_v43, %v8733_v28  ;;  %v12272_v17 = vadd.f32 %v9083_v24, %v8732_v21  ;;  %v12327_v28 = vld [vmem:[%s12545_s5] ss:$0 sm:$0xff] }
 0x3f8   : > { %12624 = vst [vmem:[#allocation6_spill] sm:$0xff] %v12272_v17  ;;  %v12274_v51 = vadd.f32 %v9089_v7, %v8735_v30 }
 0x3fa   : > { %12625 = vst [vmem:[#allocation7_spill] sm:$0xff] %v12274_v51  ;;  %v8963_v5 = vpop.f32.mrb[144].mxu1 }
 0x3fb   : > { %v7197_v41 = vpop.f32.mrb[145].mxu1 }
 0x3fc   : > { %v8964_v32 = vpop.f32.mrb[146].mxu1 }
 0x3fd   : > { %v7200_v14 = vpop.f32.mrb[147].mxu1 }
 0x402   : > { %v12276_v61 = vpop.f32.mrb[148].mxu1 }
 0x403   : > { %v12278_v47 = vpop.f32.mrb[149].mxu1 }
 0x404   : > { %v12280_v1 = vpop.f32.mrb[150].mxu1 }
 0x405   : > { %v12282_v42 = vpop.f32.mrb[151].mxu1 }
 0x40a   : > { %v12284_v46 = vpop.f32.mrb[152].mxu1 }
 0x40b   : > { %v12286_v15 = vpop.f32.mrb[153].mxu1 }
 0x40c   : > { %v12288_v9 = vpop.f32.mrb[154].mxu1 }
 0x40d   : > { %v12290_v10 = vpop.f32.mrb[155].mxu1 }
 0x412   : > { %v12292_v40 = vpop.f32.mrb[156].mxu1 }
 0x413   : > { %v12294_v55 = vpop.f32.mrb[157].mxu1 }
 0x414   : > { %v12296_v56 = vpop.f32.mrb[158].mxu1 }
 0x415   : > { %v12298_v48 = vpop.f32.mrb[159].mxu1 }
 0x41a   : > { %v12300_v27 = vpop.f32.mrb[160].mxu1 }
 0x41b   : > { %v12302_v24 = vpop.f32.mrb[161].mxu1 }
 0x41c   : > { %v12304_v23 = vpop.f32.mrb[162].mxu1 }
 0x41d   : > { %v12306_v53 = vpop.f32.mrb[163].mxu1 }
 0x422   : > { %v12308_v36 = vpop.f32.mrb[164].mxu1 }
 0x423   : > { %v12310_v7 = vpop.f32.mrb[165].mxu1 }
 0x424   : > { %v12312_v63 = vpop.f32.mrb[166].mxu1 }
 0x425   : > { %v12314_v6 = vpop.f32.mrb[167].mxu1 }
 0x42a   : > { %v12316_v0 = vpop.f32.mrb[168].mxu1 }
 0x42b   : > { %12626 = vst [vmem:[#allocation8_spill] sm:$0xff] %v12316_v0  ;;  %v12318_v25 = vpop.f32.mrb[169].mxu1 }
 0x42c   : > { %12627 = vst [vmem:[#allocation9_spill] sm:$0xff] %v12318_v25  ;;  %v12320_v37 = vpop.f32.mrb[170].mxu1 }
 0x42d   : > { %12628 = vst [vmem:[#allocation10_spill] sm:$0xff] %v12320_v37  ;;  %v12322_v29 = vpop.f32.mrb[171].mxu1  ;;  %v8929_v21 = vpop.f32.mrb[16].mxu0 }
 0x42e   : > { %12629 = vst [vmem:[#allocation18_spill] sm:$0xff] %v12322_v29  ;;  %v9001_v43 = vadd.f32 %v12185_v59, %v8929_v21  ;;  %v6840_v30 = vpop.f32.mrb[17].mxu0 }
 0x42f   : > { %v9004_v22 = vadd.f32 %v12177_v35, %v6840_v30  ;;  %v8930_v51 = vpop.f32.mrb[18].mxu0 }
 0x430   : > { %v7333_v17 = vmul.f32 %v9001_v43, %v12327_v28  ;;  %v9007_v29 = vadd.f32 %v12188_v62, %v8930_v51  ;;  %v6843_v37 = vpop.f32.mrb[19].mxu0 }
 0x431   : > { %v7331_v25 = vmul.f32 %v9004_v22, %v12327_v28  ;;  %v9010_v0 = vadd.f32 %v12179_v2, %v6843_v37 }
 0x432   : > { %v12340_v50 = vpop.f32.mrb[172].mxu1  ;;  %v7334_v59 = vmul.f32 %v9007_v29, %v12327_v28  ;;  %v7372_v35 = vadd.f32 %v12334_v31, %v7333_v17 }
 0x433   : > { %12630 = vst [vmem:[#allocation11_spill] sm:$0xff] %v12340_v50  ;;  %v12344_v21 = vpop.f32.mrb[173].mxu1  ;;  %v7332_v30 = vmul.f32 %v9010_v0, %v12327_v28  ;;  %v7370_v43 = vadd.f32 %v12334_v31, %v7331_v25 }
 0x434   : > { %12631 = vst [vmem:[#allocation19_spill] sm:$0xff] %v12344_v21  ;;  %v12348_v54 = vpop.f32.mrb[174].mxu1  ;;  %v7404_v62 = vadd.f32 %v8963_v5, %v7372_v35  ;;  %v7373_v22 = vadd.f32 %v12334_v31, %v7334_v59 }
 0x435   : > { %v12351_v51 = vpop.f32.mrb[175].mxu1  ;;  %v7402_v2 = vadd.f32 %v7370_v43, %v7197_v41  ;;  %v7371_v37 = vadd.f32 %v12334_v31, %v7332_v30  ;;  %v8933_v29 = vpop.f32.mrb[20].mxu0 }
 0x436   : > { %v7436_v50 = vmax.f32 %v7404_v62, 0.0  ;;  %v7405_v49 = vadd.f32 %v8964_v32, %v7373_v22  ;;  %v9013_v17 = vadd.f32 %v12202_v8, %v8933_v29  ;;  %v6856_v21 = vpop.f32.mrb[21].mxu0 }
 0x437   : > { %v7434_v5 = vmax.f32 %v7402_v2, 0.0  ;;  %v7403_v0 = vadd.f32 %v7371_v37, %v7200_v14  ;;  %v9016_v41 = vadd.f32 %v12195_v16, %v6856_v21  ;;  %v8934_v25 = vpop.f32.mrb[22].mxu0 }
 0x438   : > { %v8303_v59 = vpack.c.bf16 %v7436_v50, %v7436_v50  ;;  %v7437_v35 = vmax.f32 %v7405_v49, 0.0  ;;  %v7337_v32 = vmul.f32 %v9013_v17, %v12327_v28  ;;  %v9019_v8 = vadd.f32 %v12204_v38, %v8934_v25  ;;  %v6859_v30 = vpop.f32.mrb[23].mxu0 }
 0x439   : > { %v8301_v43 = vpack.c.bf16 %v7434_v5, %v7434_v5  ;;  %v7435_v62 = vmax.f32 %v7403_v0, 0.0  ;;  %v7335_v22 = vmul.f32 %v9016_v41, %v12327_v28  ;;  %v9022_v2 = vadd.f32 %v12198_v18, %v6859_v30 }
 0x43a   : > { %7596 = vst.msk [vmem:[%s12360_s25 + $0x8] sm:$0xf] %vm12632_vm4, %v8303_v59  ;;  %v8304_v14 = vpack.c.bf16 %v7437_v35, %v7437_v35  ;;  %v7338_v16 = vmul.f32 %v9019_v8, %v12327_v28  ;;  %v7376_v49 = vadd.f32 %v12334_v31, %v7337_v32  ;;  %vm12648_vm4 = vmmov %vm12647_vm0 }
 0x43b   : > { %7594 = vst.msk [vmem:[%s12360_s25] sm:$0xf] %vm12633_vm8, %v8301_v43  ;;  %v8302_v50 = vpack.c.bf16 %v7435_v62, %v7435_v62  ;;  %v7336_v38 = vmul.f32 %v9022_v2, %v12327_v28  ;;  %v7374_v21 = vadd.f32 %v12334_v31, %v7335_v22  ;;  %vm12649_vm8 = vmmov %vm12647_vm0 }
 0x43c   : > { %7597 = vst.msk [vmem:[%s12360_s25 + $0xc] sm:$0xf] %vm12634_vm9, %v8304_v14  ;;  %v7408_v37 = vadd.f32 %v12276_v61, %v7376_v49  ;;  %v7377_v18 = vadd.f32 %v12334_v31, %v7338_v16  ;;  %vm12650_vm9 = vmmov %vm12647_vm0 }
 0x43d   : > { %7595 = vst.msk [vmem:[%s12360_s25 + $0x4] sm:$0xf] %vm12635_vm10, %v8302_v50  ;;  %v7406_v29 = vadd.f32 %v7374_v21, %v12278_v47  ;;  %v7375_v17 = vadd.f32 %v12334_v31, %v7336_v38  ;;  %v8937_v5 = vpop.f32.mrb[24].mxu0  ;;  %vm12651_vm10 = vmmov %vm12647_vm0 }
 0x43e   : > { %v7440_v0 = vmax.f32 %v7408_v37, 0.0  ;;  %v7409_v41 = vadd.f32 %v12280_v1, %v7377_v18  ;;  %v9025_v25 = vadd.f32 %v12214_v34, %v8937_v5  ;;  %v6872_v59 = vpop.f32.mrb[25].mxu0 }
 0x43f   : > { %v7438_v35 = vmax.f32 %v7406_v29, 0.0  ;;  %v7407_v32 = vadd.f32 %v7375_v17, %v12282_v42  ;;  %v9028_v61 = vadd.f32 %v12208_v20, %v6872_v59  ;;  %v8938_v8 = vpop.f32.mrb[26].mxu0 }
 0x440   : > { %v8307_v30 = vpack.c.bf16 %v7440_v0, %v7440_v0  ;;  %v7441_v43 = vmax.f32 %v7409_v41, 0.0  ;;  %v7341_v47 = vmul.f32 %v9025_v25, %v12327_v28  ;;  %v9031_v62 = vadd.f32 %v12216_v52, %v8938_v8  ;;  %v6875_v22 = vpop.f32.mrb[27].mxu0 }
 0x441   : > { %v8305_v1 = vpack.c.bf16 %v7438_v35, %v7438_v35  ;;  %v7439_v2 = vmax.f32 %v7407_v32, 0.0  ;;  %v7339_v34 = vmul.f32 %v9028_v61, %v12327_v28  ;;  %v9034_v14 = vadd.f32 %v12210_v4, %v6875_v22 }
 0x442   : > { %7600 = vst.msk [vmem:[%s12360_s25 + $0x18] sm:$0xf] %vm12636_vm11, %v8307_v30  ;;  %v8308_v42 = vpack.c.bf16 %v7441_v43, %v7441_v43  ;;  %v7342_v20 = vmul.f32 %v9031_v62, %v12327_v28  ;;  %v7380_v16 = vadd.f32 %v12334_v31, %v7341_v47  ;;  %vm12655_vm11 = vmmov %vm12647_vm0 }
 0x443   : > { %7598 = vst.msk [vmem:[%s12360_s25 + $0x10] sm:$0xf] %vm12637_vm12, %v8305_v1  ;;  %v8306_v49 = vpack.c.bf16 %v7439_v2, %v7439_v2  ;;  %v7340_v52 = vmul.f32 %v9034_v14, %v12327_v28  ;;  %v7378_v50 = vadd.f32 %v12334_v31, %v7339_v34  ;;  %vm12656_vm12 = vmmov %vm12647_vm0 }
 0x444   : > { %7601 = vst.msk [vmem:[%s12360_s25 + $0x1c] sm:$0xf] %vm12638_vm1, %v8308_v42  ;;  %v7412_v38 = vadd.f32 %v12284_v46, %v7380_v16  ;;  %v7381_v4 = vadd.f32 %v12334_v31, %v7342_v20  ;;  %vm12657_vm1 = vmmov %vm12647_vm0 }
 0x445   : > { %7599 = vst.msk [vmem:[%s12360_s25 + $0x14] sm:$0xf] %vm12639_vm6, %v8306_v49  ;;  %v7410_v21 = vadd.f32 %v7378_v50, %v12286_v15  ;;  %v7379_v37 = vadd.f32 %v12334_v31, %v7340_v52  ;;  %v8941_v18 = vpop.f32.mrb[28].mxu0  ;;  %vm12659_vm6 = vmmov %vm12647_vm0 }
 0x446   : > { %v7444_v29 = vmax.f32 %v7412_v38, 0.0  ;;  %v7413_v17 = vadd.f32 %v12288_v9, %v7381_v4  ;;  %v9037_v5 = vadd.f32 %v12226_v11, %v8941_v18  ;;  %v6888_v0 = vpop.f32.mrb[29].mxu0 }
 0x447   : > { %v7442_v41 = vmax.f32 %v7410_v21, 0.0  ;;  %v7411_v25 = vadd.f32 %v7379_v37, %v12290_v10  ;;  %v9040_v46 = vadd.f32 %v12220_v19, %v6888_v0  ;;  %v8942_v59 = vpop.f32.mrb[30].mxu0 }
 0x448   : > { %v8311_v35 = vpack.c.bf16 %v7444_v29, %v7444_v29  ;;  %v7445_v32 = vmax.f32 %v7413_v17, 0.0  ;;  %v7345_v15 = vmul.f32 %v9037_v5, %v12327_v28  ;;  %v9043_v61 = vadd.f32 %v12228_v44, %v8942_v59  ;;  %v6891_v8 = vpop.f32.mrb[31].mxu0 }
 0x449   : > { %v8309_v9 = vpack.c.bf16 %v7442_v41, %v7442_v41  ;;  %v7443_v30 = vmax.f32 %v7411_v25, 0.0  ;;  %v7343_v11 = vmul.f32 %v9040_v46, %v12327_v28  ;;  %v9046_v43 = vadd.f32 %v12222_v3, %v6891_v8 }
 0x44a   : > { %7604 = vst.msk [vmem:[%s12360_s25 + $0x28] sm:$0xf] %vm12640_vm3, %v8311_v35  ;;  %v8312_v10 = vpack.c.bf16 %v7445_v32, %v7445_v32  ;;  %v7346_v19 = vmul.f32 %v9043_v61, %v12327_v28  ;;  %v7384_v47 = vadd.f32 %v12334_v31, %v7345_v15  ;;  %vm12667_vm3 = vmmov %vm12647_vm0 }
 0x44b   : > { %7602 = vst.msk [vmem:[%s12360_s25 + $0x20] sm:$0xf] %vm12641_vm7, %v8309_v9  ;;  %v8310_v62 = vpack.c.bf16 %v7443_v30, %v7443_v30  ;;  %v7344_v44 = vmul.f32 %v9046_v43, %v12327_v28  ;;  %v7382_v22 = vadd.f32 %v12334_v31, %v7343_v11  ;;  %vm12668_vm7 = vmmov %vm12647_vm0 }
 0x44c   : > { %7605 = vst.msk [vmem:[%s12360_s25 + $0x2c] sm:$0xf] %vm12642_vm5, %v8312_v10  ;;  %v7416_v1 = vadd.f32 %v12292_v40, %v7384_v47  ;;  %v7385_v3 = vadd.f32 %v12334_v31, %v7346_v19  ;;  %vm12669_vm5 = vmmov %vm12647_vm0 }
 0x44d   : > { %7603 = vst.msk [vmem:[%s12360_s25 + $0x24] sm:$0xf] %vm12643_vm13, %v8310_v62  ;;  %v7414_v2 = vadd.f32 %v7382_v22, %v12294_v55  ;;  %v7383_v34 = vadd.f32 %v12334_v31, %v7344_v44  ;;  %v8945_v14 = vpop.f32.mrb[32].mxu0  ;;  %vm12671_vm13 = vmmov %vm12647_vm0 }
 0x44e   : > { %v7448_v42 = vmax.f32 %v7416_v1, 0.0  ;;  %v7417_v20 = vadd.f32 %v12296_v56, %v7385_v3  ;;  %v9049_v16 = vadd.f32 %v12238_v33, %v8945_v14  ;;  %v6904_v49 = vpop.f32.mrb[33].mxu0 }
 0x44f   : > { %v7446_v52 = vmax.f32 %v7414_v2, 0.0  ;;  %v7415_v50 = vadd.f32 %v7383_v34, %v12298_v48  ;;  %v9052_v40 = vadd.f32 %v12232_v12, %v6904_v49  ;;  %v8946_v38 = vpop.f32.mrb[34].mxu0 }
 0x450   : > { %v8315_v4 = vpack.c.bf16 %v7448_v42, %v7448_v42  ;;  %v7449_v21 = vmax.f32 %v7417_v20, 0.0  ;;  %v7349_v55 = vmul.f32 %v9049_v16, %v12327_v28  ;;  %v9055_v37 = vadd.f32 %v12240_v39, %v8946_v38  ;;  %v6907_v18 = vpop.f32.mrb[35].mxu0 }
 0x451   : > { %v8313_v56 = vpack.c.bf16 %v7446_v52, %v7446_v52  ;;  %v7447_v29 = vmax.f32 %v7415_v50, 0.0  ;;  %v7347_v33 = vmul.f32 %v9052_v40, %v12327_v28  ;;  %v9058_v17 = vadd.f32 %v12234_v13, %v6907_v18 }
 0x452   : > { %7608 = vst.msk [vmem:[%s12360_s25 + $0x38] sm:$0xf] %vm12644_vm14, %v8315_v4  ;;  %v8316_v48 = vpack.c.bf16 %v7449_v21, %v7449_v21  ;;  %v7350_v12 = vmul.f32 %v9055_v37, %v12327_v28  ;;  %v7388_v5 = vadd.f32 %v12334_v31, %v7349_v55  ;;  %v12653_v37 = vld [vmem:[#allocation17_spill] sm:$0xff]  ;;  %vm12673_vm14 = vmmov %vm12647_vm0 }
 0x453   : > { %7606 = vst.msk [vmem:[%s12360_s25 + $0x30] sm:$0xf] %vm12645_vm15, %v8313_v56  ;;  %v8314_v0 = vpack.c.bf16 %v7447_v29, %v7447_v29  ;;  %v7348_v39 = vmul.f32 %v9058_v17, %v12327_v28  ;;  %v7386_v41 = vadd.f32 %v12334_v31, %v7347_v33  ;;  %v12654_v33 = vld [vmem:[#allocation15_spill] sm:$0xff]  ;;  %vm12674_vm15 = vmmov %vm12647_vm0 }
 0x454   : > { %7609 = vst.msk [vmem:[%s12360_s25 + $0x3c] sm:$0xf] %vm12646_vm2, %v8316_v48  ;;  %v7420_v25 = vadd.f32 %v12300_v27, %v7388_v5  ;;  %v7389_v13 = vadd.f32 %v12334_v31, %v7350_v12  ;;  %vm12675_vm2 = vmmov %vm12647_vm0 }
 0x455   : > { %7607 = vst.msk [vmem:[%s12360_s25 + $0x34] sm:$0xf] %vm12647_vm0, %v8314_v0  ;;  %v7418_v46 = vadd.f32 %v7386_v41, %v12302_v24  ;;  %v7387_v59 = vadd.f32 %v12334_v31, %v7348_v39  ;;  %v8949_v35 = vpop.f32.mrb[36].mxu0  ;;  %v12658_v41 = vld [vmem:[#allocation8_spill] sm:$0xff] }
 0x456   : > { %v7452_v32 = vmax.f32 %v7420_v25, 0.0  ;;  %v7421_v15 = vadd.f32 %v12304_v23, %v7389_v13  ;;  %v9061_v61 = vadd.f32 %v12250_v45, %v8949_v35  ;;  %v6920_v8 = vpop.f32.mrb[37].mxu0 }
 0x457   : > { %v7450_v9 = vmax.f32 %v7418_v46, 0.0  ;;  %v7419_v30 = vadd.f32 %v7387_v59, %v12306_v53  ;;  %v9064_v27 = vadd.f32 %v12244_v58, %v6920_v8  ;;  %v8950_v11 = vpop.f32.mrb[38].mxu0  ;;  %v12660_v46 = vld [vmem:[#allocation9_spill] sm:$0xff] }
 0x458   : > { %v8319_v43 = vpack.c.bf16 %v7452_v32, %v7452_v32  ;;  %v7453_v10 = vmax.f32 %v7421_v15, 0.0  ;;  %v7353_v24 = vmul.f32 %v9061_v61, %v12327_v28  ;;  %v9067_v19 = vadd.f32 %v12252_v57, %v8950_v11  ;;  %v6923_v47 = vpop.f32.mrb[39].mxu0  ;;  %v12661_v61 = vld [vmem:[#allocation10_spill] sm:$0xff] }
 0x459   : > { %v8317_v23 = vpack.c.bf16 %v7450_v9, %v7450_v9  ;;  %v7451_v62 = vmax.f32 %v7419_v30, 0.0  ;;  %v7351_v45 = vmul.f32 %v9064_v27, %v12327_v28  ;;  %v9070_v44 = vadd.f32 %v12246_v60, %v6923_v47  ;;  %v12662_v9 = vld [vmem:[#allocation6_spill] sm:$0xff] }
 0x45a   : > { %7612 = vst.msk [vmem:[%s12360_s25 + $0x48] sm:$0xf] %vm12648_vm4, %v8319_v43  ;;  %v8320_v53 = vpack.c.bf16 %v7453_v10, %v7453_v10  ;;  %v7354_v58 = vmul.f32 %v9067_v19, %v12327_v28  ;;  %v7392_v22 = vadd.f32 %v12334_v31, %v7353_v24  ;;  %v12663_v43 = vld [vmem:[#allocation18_spill] sm:$0xff]  ;;  %v12664_v24 = vld [vmem:[#allocation4_spill] sm:$0xff] }
 0x45b   : > { %7610 = vst.msk [vmem:[%s12360_s25 + $0x40] sm:$0xf] %vm12649_vm8, %v8317_v23  ;;  %v8318_v1 = vpack.c.bf16 %v7451_v62, %v7451_v62  ;;  %v7352_v57 = vmul.f32 %v9070_v44, %v12327_v28  ;;  %v7390_v3 = vadd.f32 %v12334_v31, %v7351_v45  ;;  %v12665_v44 = vld [vmem:[#allocation7_spill] sm:$0xff] }
 0x45c   : > { %7613 = vst.msk [vmem:[%s12360_s25 + $0x4c] sm:$0xf] %vm12650_vm9, %v8320_v53  ;;  %v7424_v2 = vadd.f32 %v12308_v36, %v7392_v22  ;;  %v7393_v60 = vadd.f32 %v12334_v31, %v7354_v58  ;;  %v12652_v36 = vld [vmem:[#allocation13_spill] sm:$0xff] }
 0x45d   : > { %7611 = vst.msk [vmem:[%s12360_s25 + $0x44] sm:$0xf] %vm12651_vm10, %v8318_v1  ;;  %v7422_v34 = vadd.f32 %v7390_v3, %v12310_v7  ;;  %v7391_v14 = vadd.f32 %v12334_v31, %v7352_v57  ;;  %v8953_v42 = vpop.f32.mrb[40].mxu0  ;;  %v12666_v3 = vld [vmem:[#allocation5_spill] sm:$0xff] }
 0x45e   : > { %v7456_v20 = vmax.f32 %v7424_v2, 0.0  ;;  %v7425_v16 = vadd.f32 %v12312_v63, %v7393_v60  ;;  %v9073_v49 = vadd.f32 %v12262_v26, %v8953_v42  ;;  %v6936_v52 = vpop.f32.mrb[41].mxu0 }
 0x45f   : > { %v7454_v50 = vmax.f32 %v7422_v34, 0.0  ;;  %v7423_v40 = vadd.f32 %v7391_v14, %v12314_v6  ;;  %v9076_v38 = vadd.f32 %v12652_v36, %v6936_v52  ;;  %v8954_v4 = vpop.f32.mrb[42].mxu0 }
 0x460   : > { %v8323_v21 = vpack.c.bf16 %v7456_v20, %v7456_v20  ;;  %v7457_v55 = vmax.f32 %v7425_v16, 0.0  ;;  %v7357_v7 = vmul.f32 %v9073_v49, %v12327_v28  ;;  %v9079_v18 = vadd.f32 %v12653_v37, %v8954_v4  ;;  %v6939_v56 = vpop.f32.mrb[43].mxu0  ;;  %v12670_v49 = vld [vmem:[#allocation11_spill] sm:$0xff] }
 0x461   : > { %v8321_v63 = vpack.c.bf16 %v7454_v50, %v7454_v50  ;;  %v7455_v29 = vmax.f32 %v7423_v40, 0.0  ;;  %v7355_v26 = vmul.f32 %v9076_v38, %v12327_v28  ;;  %v9082_v17 = vadd.f32 %v12654_v33, %v6939_v56  ;;  %v12672_v40 = vld [vmem:[#allocation19_spill] sm:$0xff] }
 0x462   : > { %7616 = vst.msk [vmem:[%s12360_s25 + $0x58] sm:$0xf] %vm12655_vm11, %v8323_v21  ;;  %v8324_v6 = vpack.c.bf16 %v7457_v55, %v7457_v55  ;;  %v7358_v48 = vmul.f32 %v9079_v18, %v12327_v28  ;;  %v7396_v12 = vadd.f32 %v12334_v31, %v7357_v7 }
 0x463   : > { %7614 = vst.msk [vmem:[%s12360_s25 + $0x50] sm:$0xf] %vm12656_vm12, %v8321_v63  ;;  %v8322_v5 = vpack.c.bf16 %v7455_v29, %v7455_v29  ;;  %v7356_v0 = vmul.f32 %v9082_v17, %v12327_v28  ;;  %v7394_v39 = vadd.f32 %v12334_v31, %v7355_v26 }
 0x464   : > { %7617 = vst.msk [vmem:[%s12360_s25 + $0x5c] sm:$0xf] %vm12657_vm1, %v8324_v6  ;;  %v7428_v25 = vadd.f32 %v12658_v41, %v7396_v12  ;;  %v7397_v13 = vadd.f32 %v12334_v31, %v7358_v48 }
 0x465   : > { %7615 = vst.msk [vmem:[%s12360_s25 + $0x54] sm:$0xf] %vm12659_vm6, %v8322_v5  ;;  %v7426_v59 = vadd.f32 %v7394_v39, %v12660_v46  ;;  %v7395_v35 = vadd.f32 %v12334_v31, %v7356_v0  ;;  %v8957_v32 = vpop.f32.mrb[44].mxu0 }
 0x466   : > { %v7460_v15 = vmax.f32 %v7428_v25, 0.0  ;;  %v7429_v8 = vadd.f32 %v12661_v61, %v7397_v13  ;;  %v9085_v30 = vadd.f32 %v12662_v9, %v8957_v32  ;;  %v6952_v27 = vpop.f32.mrb[45].mxu0 }
 0x467   : > { %v7458_v11 = vmax.f32 %v7426_v59, 0.0  ;;  %v7427_v10 = vadd.f32 %v7395_v35, %v12663_v43  ;;  %v9088_v19 = vadd.f32 %v12664_v24, %v6952_v27  ;;  %v8958_v47 = vpop.f32.mrb[46].mxu0 }
 0x468   : > { %v8327_v23 = vpack.c.bf16 %v7460_v15, %v7460_v15  ;;  %v7461_v62 = vmax.f32 %v7429_v8, 0.0  ;;  %v7361_v45 = vmul.f32 %v9085_v30, %v12327_v28  ;;  %v9091_v53 = vadd.f32 %v12665_v44, %v8958_v47  ;;  %v6955_v58 = vpop.f32.mrb[47].mxu0 }
 0x469   : > { %v8325_v22 = vpack.c.bf16 %v7458_v11, %v7458_v11  ;;  %v7459_v1 = vmax.f32 %v7427_v10, 0.0  ;;  %v7359_v57 = vmul.f32 %v9088_v19, %v12327_v28  ;;  %v9094_v2 = vadd.f32 %v12666_v3, %v6955_v58 }
 0x46a   : > { %7620 = vst.msk [vmem:[%s12360_s25 + $0x68] sm:$0xf] %vm12667_vm3, %v8327_v23  ;;  %v8328_v60 = vpack.c.bf16 %v7461_v62, %v7461_v62  ;;  %v7362_v34 = vmul.f32 %v9091_v53, %v12327_v28  ;;  %v7400_v14 = vadd.f32 %v12334_v31, %v7361_v45 }
 0x46b   : > { %7618 = vst.msk [vmem:[%s12360_s25 + $0x60] sm:$0xf] %vm12668_vm7, %v8325_v22  ;;  %v8326_v42 = vpack.c.bf16 %v7459_v1, %v7459_v1  ;;  %v7360_v20 = vmul.f32 %v9094_v2, %v12327_v28  ;;  %v7398_v16 = vadd.f32 %v12334_v31, %v7359_v57 }
 0x46c   : > { %7621 = vst.msk [vmem:[%s12360_s25 + $0x6c] sm:$0xf] %vm12669_vm5, %v8328_v60  ;;  %v7432_v52 = vadd.f32 %v12670_v49, %v7400_v14  ;;  %v7401_v50 = vadd.f32 %v12334_v31, %v7362_v34 }
 0x46d   : > { %7619 = vst.msk [vmem:[%s12360_s25 + $0x64] sm:$0xf] %vm12671_vm13, %v8326_v42  ;;  %v7430_v36 = vadd.f32 %v7398_v16, %v12672_v40  ;;  %v7399_v38 = vadd.f32 %v12334_v31, %v7360_v20 }
 0x46e   : > { %v7464_v4 = vmax.f32 %v7432_v52, 0.0  ;;  %v7433_v28 = vadd.f32 %v12348_v54, %v7401_v50 }
 0x46f   : > { %v7462_v21 = vmax.f32 %v7430_v36, 0.0  ;;  %v7431_v55 = vadd.f32 %v7399_v38, %v12351_v51 }
 0x470   : > { %v8331_v7 = vpack.c.bf16 %v7464_v4, %v7464_v4  ;;  %v7465_v37 = vmax.f32 %v7433_v28, 0.0 }
 0x471   : > { %v8329_v18 = vpack.c.bf16 %v7462_v21, %v7462_v21  ;;  %v7463_v56 = vmax.f32 %v7431_v55, 0.0 }
 0x472   : > { %7624 = vst.msk [vmem:[%s12360_s25 + $0x78] sm:$0xf] %vm12673_vm14, %v8331_v7  ;;  %v8332_v63 = vpack.c.bf16 %v7465_v37, %v7465_v37 }
 0x473   : > { %7622 = vst.msk [vmem:[%s12360_s25 + $0x70] sm:$0xf] %vm12674_vm15, %v8329_v18  ;;  %v8330_v29 = vpack.c.bf16 %v7463_v56, %v7463_v56 }
 0x474   : > { %7625 = vst.msk [vmem:[%s12360_s25 + $0x7c] sm:$0xf] %vm12675_vm2, %v8332_v63 }
 0x475   : > { %7623 = vst.msk [vmem:[%s12360_s25 + $0x74] sm:$0xf] %vm12647_vm0, %v8330_v29 }
 0x476 PF: > { %s18_s27 = sadd.s32 1, %s9606_s27  }
 0x477   : > { %p15_p4 = scmp.ge.s32.totalorder %s18_s27, 4  }
 0x479   :  { %17 = sbr.rel (!%p15_p4) target bundleno = 1 (0x1), region = 90 }

</bundles_post_ra>
